<compile_context>
chip_gen: v7x
topology: tpu7x:2x2x1
jax: 0.10.0
libtpu: 0.0.40
codegen_flags: <defaults>
</compile_context>

<pallas_src>
import functools

import numpy as np

import jax
import jax.numpy as jnp
from jax import lax
from jax.experimental import pallas as pl
from jax.experimental.pallas import tpu as pltpu


# ---------------------------------------------------------------------------
# Pallas kernel: row-band transposed-conv matmul + scale/shift + activation
# ---------------------------------------------------------------------------
def _band_conv_kernel(*refs, k, ho, activation, apply_scale):
    if apply_scale:
        x_ref, w_ref, scale_ref, shift_ref, o_ref = refs
    else:
        x_ref, w_ref, shift_ref, o_ref = refs
        scale_ref = None

    nb = o_ref.shape[0]          # sample block
    wic = x_ref.shape[2]         # Wi * Cin  (W-flattened input lanes)
    woc = o_ref.shape[2]         # Wo * Cout (W-flattened output lanes)

    acc = jnp.zeros((nb * ho, woc), jnp.float32)
    for t in range(k):           # static unrolled loop over kernel rows (k <= 5)
        slab = x_ref[:, t:t + ho, :]                      # [nb, Ho, Wi*Cin] bf16
        acc = acc + jnp.dot(slab.reshape(nb * ho, wic), w_ref[t],
                            preferred_element_type=jnp.float32)

    y = acc
    if apply_scale:
        y = y * scale_ref[...]   # folded BatchNorm scale (per output column), f32
    y = y + shift_ref[...]       # folded conv bias + BatchNorm shift, f32
    if activation == "relu":
        y = jnp.maximum(y, 0.0)
    elif activation == "sigmoid":
        y = jax.nn.sigmoid(y)

    o_ref[...] = y.reshape(nb, ho, woc).astype(o_ref.dtype)


def _pick_block(n):
    # >=2 grid steps (v7x has 2 TensorCores), ideally ~4 steps to amortize per-step overhead.
    for nb in (4, 2, 1):
        if n % nb == 0 and n // nb >= 2:
            return nb
    return n


def band_conv(x, w_band, scale, shift, activation, out_dtype):
    """x: [N, Hp, Wi*Cin] (H already dilated+padded), w_band: [k, Wi*Cin, Wo*Cout]."""
    n, hp, wic = x.shape
    k, wic2, woc = w_band.shape
    assert wic == wic2
    ho = hp - k + 1
    nb = _pick_block(n)
    apply_scale = scale is not None

    kernel = functools.partial(_band_conv_kernel, k=k, ho=ho,
                               activation=activation, apply_scale=apply_scale)

    in_specs = [
        pl.BlockSpec((nb, hp, wic), lambda i: (i, 0, 0)),   # activation block (VMEM resident)
        pl.BlockSpec((k, wic, woc), lambda i: (0, 0, 0)),   # full band weights, resident
    ]
    args = [x.astype(jnp.bfloat16), w_band]
    if apply_scale:
        in_specs.append(pl.BlockSpec((1, woc), lambda i: (0, 0)))
        args.append(scale)
    in_specs.append(pl.BlockSpec((1, woc), lambda i: (0, 0)))
    args.append(shift)

    return pl.pallas_call(
        kernel,
        out_shape=jax.ShapeDtypeStruct((n, ho, woc), out_dtype),
        grid_spec=pltpu.PrefetchScalarGridSpec(
            num_scalar_prefetch=0,
            grid=(n // nb,),
            in_specs=in_specs,
            out_specs=pl.BlockSpec((nb, ho, woc), lambda i: (i, 0, 0)),
        ),
        compiler_params=pltpu.CompilerParams(dimension_semantics=("parallel",)),
    )(*args)


# ---------------------------------------------------------------------------
# Host-side (numpy) weight preparation: fold conv geometry / bias / BN
# ---------------------------------------------------------------------------
def _tconv_out(i, k, s, pad, op):
    return (i - 1) * s - 2 * pad + k + op


def _band_matrices(w_t, s, pad, wi, wo):
    """Per-kernel-row band matrices [k, Wi*Cin, Wo*Cout] for a ConvTranspose2d.

    W-direction taps, stride (zero-dilation) and padding are folded in; the matrices are
    indexed by the slab offset ky' into the H-dilated/H-padded input (kernel row k-1-ky').
    """
    cin, cout, k, _ = w_t.shape
    band = np.zeros((k, wi * cin, wo * cout), np.float32)
    for t in range(k):
        ki = k - 1 - t
        for win in range(wi):
            for wout in range(wo):
                kj = wout + pad - win * s
                if 0 <= kj < k:
                    band[t,
                         win * cin:(win + 1) * cin,
                         wout * cout:(wout + 1) * cout] = w_t[:, :, ki, kj]
    return band


def _dense_lin_conv(lin_w, lin_b, w_t, b_c, s, pad, op, hi, wi):
    """Compose Linear + UnFlatten(hi,wi) + ConvTranspose2d into one dense matmul."""
    cin, cout, k, _ = w_t.shape
    ho = _tconv_out(hi, k, s, pad, op)
    wo = _tconv_out(wi, k, s, pad, op)
    d = np.zeros((cin * hi * wi, ho * wo * cout), np.float32)   # rows in NCHW (ci, hi, wi) order
    for ci in range(cin):
        for hh in range(hi):
            for ww in range(wi):
                r = (ci * hi + hh) * wi + ww
                for ki in range(k):
                    oh = hh * s - pad + ki
                    if not (0 <= oh < ho):
                        continue
                    for kj in range(k):
                        ow = ww * s - pad + kj
                        if not (0 <= ow < wo):
                            continue
                        c0 = (oh * wo + ow) * cout
                        d[r, c0:c0 + cout] = w_t[ci, :, ki, kj]
    a = lin_w @ d                                               # [latent, Ho*Wo*Cout]
    bias_full = lin_b @ d + np.tile(b_c, ho * wo)               # [Ho*Wo*Cout]
    return a, bias_full, ho, wo


def _np_bn(bn):
    if bn is None:
        return None
    return tuple(np.asarray(v, np.float32) for v in bn)


def _fold_bn(bias_full, bn, reps):
    """Fold conv bias + eval-mode BatchNorm into per-output-column scale/shift."""
    if bn is None:
        return None, bias_full.astype(np.float32)
    gamma, beta, mean, var = bn
    sc = gamma / np.sqrt(var + 1e-5)                            # BatchNorm2d eps
    scale_full = np.tile(sc, reps)
    shift_full = bias_full * scale_full + np.tile(beta - mean * sc, reps)
    return scale_full.astype(np.float32), shift_full.astype(np.float32)


def prepare_params(params):
    """Build kernel-ready (bf16 band weights, f32 scale/shift) structures, once, on host."""
    convs = params["convs"]
    lin_w = np.asarray(params["lin_w"], np.float32)
    lin_b = np.asarray(params["lin_b"], np.float32)

    layers = []

    # Layer 0: Linear + UnFlatten(4) + ConvTranspose2d#1 (+BN+ReLU), fused dense matmul.
    p = convs[0]
    w_t = np.asarray(p["w"], np.float32)
    cin1, cout = w_t.shape[0], w_t.shape[1]
    assert lin_w.shape[1] == cin1 * 16, "Linear output must match UnFlatten(4) shape"
    a, bias_full, ho, wo = _dense_lin_conv(lin_w, lin_b, w_t,
                                           np.asarray(p["b"], np.float32),
                                           p["stride"], p["pad"], p["out_pad"], 4, 4)
    scale_full, shift_full = _fold_bn(bias_full, _np_bn(p["bn"]), ho * wo)
    layers.append(dict(
        w=jnp.asarray(a[None], jnp.bfloat16),                   # [1, latent, Ho*Wo*Cout]
        scale=None if scale_full is None else jnp.asarray(scale_full[None], jnp.float32),
        shift=jnp.asarray(shift_full[None], jnp.float32),
        act="relu", out_dtype=jnp.bfloat16,
        pad_cfg=None, post_shape=(ho, wo * cout)))
    hi, wi, cin = ho, wo, cout

    # Remaining ConvTranspose2d layers as band-matmul kernels.
    for idx in range(1, len(convs)):
        p = convs[idx]
        w_t = np.asarray(p["w"], np.float32)                    # [Cin, Cout, k, k]
        cin_l, cout, k, _ = w_t.shape
        assert cin_l == cin
        s, pad, op = p["stride"], p["pad"], p["out_pad"]
        assert k - 1 - pad >= 0, "layer config with pad > k-1 is not supported"
        ho = _tconv_out(hi, k, s, pad, op)
        wo = _tconv_out(wi, k, s, pad, op)
        band = _band_matrices(w_t, s, pad, wi, wo)              # [k, Wi*Cin, Wo*Cout]
        bias_full = np.tile(np.asarray(p["b"], np.float32), wo)
        scale_full, shift_full = _fold_bn(bias_full, _np_bn(p["bn"]), wo)
        last = idx == len(convs) - 1
        ph = k - 1 - pad                                        # H edge padding
        layers.append(dict(
            w=jnp.asarray(band, jnp.bfloat16),
            scale=None if scale_full is None else jnp.asarray(scale_full[None], jnp.float32),
            shift=jnp.asarray(shift_full[None], jnp.float32),
            act="sigmoid" if p["bn"] is None else "relu",
            out_dtype=jnp.float32 if last else jnp.bfloat16,
            pad_cfg=(ph, ph + op, s - 1),                       # (lo, hi, interior) for lax.pad
            post_shape=None))
        hi, wi, cin = ho, wo, cout

    return dict(layers=layers, out_hw=(hi, wi))


# ---------------------------------------------------------------------------
# EmissionDecoder forward
# ---------------------------------------------------------------------------
def emission_decoder_forward(prep, zts, batch_size, dim):
    b, t, latent = zts.shape
    n = b * t
    x = zts.reshape(n, 1, latent).astype(jnp.bfloat16)          # [N, Hp=1, Wi*Cin=latent]
    for layer in prep["layers"]:
        if layer["pad_cfg"] is not None:
            lo, hi_pad, interior = layer["pad_cfg"]             # H zero-dilation + H padding
            x = lax.pad(x, jnp.array(0, x.dtype),
                        ((0, 0, 0), (lo, hi_pad, interior), (0, 0, 0)))
        x = band_conv(x, layer["w"], layer["scale"], layer["shift"],
                      layer["act"], layer["out_dtype"])
        if layer["post_shape"] is not None:                     # only after the fused layer 0
            x = x.reshape(n, *layer["post_shape"])
    # x: [N, dim, dim] f32 (last layer Cout == 1, so Wo*Cout == dim)
    return x.reshape(batch_size, n // batch_size, dim, dim)


# ---------------------------------------------------------------------------
# Deterministic parameter init (synthetic weights; shapes follow __init__)
# ---------------------------------------------------------------------------
def init_params(key, latent_dim, num_filters):
    conv_dim = num_filters * 4 ** 3
    ks = jax.random.split(key, 16)

    def w_init(k, shape, scale=0.1):
        return (scale * jax.random.normal(k, shape)).astype(jnp.float32)

    def bn_init(k, c):
        k1, k2, k3 = jax.random.split(k, 3)
        gamma = (1.0 + 0.1 * jax.random.normal(k1, (c,))).astype(jnp.float32)
        beta = (0.05 * jax.random.normal(k2, (c,))).astype(jnp.float32)
        mean = (0.05 * jax.random.normal(k3, (c,))).astype(jnp.float32)
        var = jnp.ones((c,), jnp.float32)
        return (gamma, beta, mean, var)

    params = {
        "lin_w": w_init(ks[0], (latent_dim, conv_dim)),
        "lin_b": w_init(ks[1], (conv_dim,), 0.05),
    }

    c0 = conv_dim // 16
    cfg = [  # (Cin, Cout, k, stride, pad, out_pad, has_bn)
        (c0, num_filters * 4, 4, 1, 0, 0, True),
        (num_filters * 4, num_filters * 2, 5, 2, 1, 0, True),
        (num_filters * 2, num_filters, 5, 2, 1, 1, True),
        (num_filters, 1, 5, 1, 2, 0, False),
    ]
    convs = []
    ki = 2
    for (cin, cout, k, s, p, op, has_bn) in cfg:
        convs.append({
            "w": w_init(ks[ki], (cin, cout, k, k)),      # ConvTranspose2d layout [Cin,Cout,k,k]
            "b": w_init(ks[ki + 1], (cout,), 0.05),
            "k": k, "stride": s, "pad": p, "out_pad": op,
            "bn": bn_init(ks[ki + 2], cout) if has_bn else None,
        })
        ki += 3
    params["convs"] = convs
    return params


# ---------------------------------------------------------------------------
# Pure-numpy reference (PyTorch semantics, f32) for validation
# ---------------------------------------------------------------------------
def _np_reference(params, zts, batch_size, dim):
    z = np.asarray(zts, np.float32).reshape(-1, zts.shape[-1])
    h = z @ np.asarray(params["lin_w"], np.float32) + np.asarray(params["lin_b"], np.float32)
    n = h.shape[0]
    c0 = h.shape[1] // 16
    x = h.reshape(n, c0, 4, 4).transpose(0, 2, 3, 1)            # NCHW -> NHWC
    for p in params["convs"]:
        w_t = np.asarray(p["w"], np.float32)
        b = np.asarray(p["b"], np.float32)
        k, s, pad, op = p["k"], p["stride"], p["pad"], p["out_pad"]
        _, hi, wi, _ = x.shape
        cout = w_t.shape[1]
        ho = (hi - 1) * s - 2 * pad + k + op
        wo = (wi - 1) * s - 2 * pad + k + op
        pre = np.zeros((n, ho + 2 * pad, wo + 2 * pad, cout), np.float32)
        for ki in range(k):
            for kj in range(k):
                contrib = np.einsum("nhwc,cd->nhwd", x, w_t[:, :, ki, kj])
                pre[:, ki:ki + (hi - 1) * s + 1:s, kj:kj + (wi - 1) * s + 1:s, :] += contrib
        y = pre[:, pad:pad + ho, pad:pad + wo, :] + b
        if p["bn"] is not None:
            gamma, beta, mean, var = (np.asarray(v, np.float32) for v in p["bn"])
            y = gamma * (y - mean) / np.sqrt(var + 1e-5) + beta
            y = np.maximum(y, 0.0)
        else:
            y = 1.0 / (1.0 + np.exp(-y))
        x = y
    return x[..., 0].reshape(batch_size, n // batch_size, dim, dim)


if __name__ == "__main__":
    batch_size, generation_len = 2, 8
    dim, num_filters, num_channels, latent_dim = 32, 8, 1, 32

    key = jax.random.PRNGKey(0)
    pkey, zkey = jax.random.split(key)
    params = init_params(pkey, latent_dim, num_filters)
    prep = prepare_params(params)

    # zts: [BatchSize, GenerationLen, LatentDim]
    zts = jax.random.normal(zkey, (batch_size, generation_len, latent_dim), jnp.float32)

    fwd = jax.jit(lambda z: emission_decoder_forward(prep, z, batch_size, dim))
    out = jax.block_until_ready(fwd(zts))

    assert out.shape == (batch_size, generation_len, dim, dim), out.shape
    assert bool(jnp.all(jnp.isfinite(out)))
    assert bool(jnp.all((out >= 0.0) & (out <= 1.0)))           # sigmoid output range

    # Validate against a pure-numpy f32 reference (bf16 kernel path => loose tolerance).
    ref = _np_reference(params, zts, batch_size, dim)
    max_err = float(np.max(np.abs(np.asarray(out, np.float32) - ref)))
    assert max_err < 5e-2, f"max abs error vs reference: {max_err}"

    print("KERNEL_OK")
</pallas_src>

<mosaic_0001>
module attributes {stable_mosaic.version = 11 : i64} {
  func.func @_band_conv_kernel(%arg0: i32, %arg1: memref<4x1x32xbf16, #tpu.memory_space<vmem>>, %arg2: memref<1x32x1568xbf16, #tpu.memory_space<vmem>>, %arg3: memref<1x1568xf32, #tpu.memory_space<vmem>>, %arg4: memref<1x1568xf32, #tpu.memory_space<vmem>>, %arg5: memref<4x1x1568xbf16, #tpu.memory_space<vmem>>) attributes {dimension_semantics = [#tpu.dimension_semantics<parallel>], iteration_bounds = array<i64: 4>, scalar_prefetch = 0 : i64, scratch_operands = 0 : i64, tpu.core_type = #tpu.core_type<tc>, window_params = [{transform_indices = @transform_0, window_bounds = array<i64: 4, 1, 32>}, {pipeline_mode = #tpu.pipeline_mode<synchronous>, transform_indices = @transform_1, window_bounds = array<i64: 1, 32, 1568>}, {pipeline_mode = #tpu.pipeline_mode<synchronous>, transform_indices = @transform_2, window_bounds = array<i64: 1, 1568>}, {pipeline_mode = #tpu.pipeline_mode<synchronous>, transform_indices = @transform_3, window_bounds = array<i64: 1, 1568>}, {transform_indices = @transform_4, window_bounds = array<i64: 4, 1, 1568>}]} {
    %cst = arith.constant 0.000000e+00 : f32
    %0 = vector.broadcast %cst : f32 to vector<4x1568xf32>
    %c0 = arith.constant 0 : index
    %c0_0 = arith.constant 0 : index
    %c0_1 = arith.constant 0 : index
    %1 = vector.load %arg1[%c0, %c0_0, %c0_1] : memref<4x1x32xbf16, #tpu.memory_space<vmem>>, vector<4x1x32xbf16>
    %2 = vector.shape_cast %1 : vector<4x1x32xbf16> to vector<4x32xbf16>
    %c0_2 = arith.constant 0 : index
    %c0_3 = arith.constant 0 : index
    %c0_4 = arith.constant 0 : index
    %3 = vector.load %arg2[%c0_2, %c0_3, %c0_4] : memref<1x32x1568xbf16, #tpu.memory_space<vmem>>, vector<1x32x1568xbf16>
    %4 = vector.shape_cast %3 : vector<1x32x1568xbf16> to vector<32x1568xbf16>
    %cst_5 = arith.constant dense<0.000000e+00> : vector<4x1568xf32>
    %5 = tpu.matmul %2, %4, %cst_5 {dimension_numbers = #tpu.dot_dimension_numbers<[1], [0], [0], [1], [0, 0, 1, 1], [], []>} : vector<4x32xbf16>, vector<32x1568xbf16>, vector<4x1568xf32> -> vector<4x1568xf32>
    %6 = arith.addf %0, %5 : vector<4x1568xf32>
    %c0_6 = arith.constant 0 : index
    %c0_7 = arith.constant 0 : index
    %7 = vector.load %arg3[%c0_6, %c0_7] : memref<1x1568xf32, #tpu.memory_space<vmem>>, vector<1x1568xf32>
    %8 = vector.broadcast %7 : vector<1x1568xf32> to vector<4x1568xf32>
    %9 = arith.mulf %6, %8 : vector<4x1568xf32>
    %c0_8 = arith.constant 0 : index
    %c0_9 = arith.constant 0 : index
    %10 = vector.load %arg4[%c0_8, %c0_9] : memref<1x1568xf32, #tpu.memory_space<vmem>>, vector<1x1568xf32>
    %11 = vector.broadcast %10 : vector<1x1568xf32> to vector<4x1568xf32>
    %12 = arith.addf %9, %11 : vector<4x1568xf32>
    %cst_10 = arith.constant 0.000000e+00 : f32
    %13 = vector.broadcast %cst_10 : f32 to vector<4x1568xf32>
    %14 = arith.maximumf %12, %13 : vector<4x1568xf32>
    %15 = vector.shape_cast %14 : vector<4x1568xf32> to vector<4x1x1568xf32>
    %16 = arith.truncf %15 : vector<4x1x1568xf32> to vector<4x1x1568xbf16>
    %c0_11 = arith.constant 0 : index
    %c0_12 = arith.constant 0 : index
    %c0_13 = arith.constant 0 : index
    %17 = vector.load %arg5[%c0_11, %c0_12, %c0_13] : memref<4x1x1568xbf16, #tpu.memory_space<vmem>>, vector<4x1x1568xbf16>
    tpu.vector_store %arg5[%c0_11, %c0_12, %c0_13], %16 {strides = array<i32>} : memref<4x1x1568xbf16, #tpu.memory_space<vmem>>, vector<4x1x1568xbf16>,
    return
  }
  func.func @transform_0(%arg0: i32) -> (i32, i32, i32) {
    %c0_i32 = arith.constant 0 : i32
    %c0_i32_0 = arith.constant 0 : i32
    %c0_i32_1 = arith.constant 0 : i32
    return %arg0, %c0_i32, %c0_i32_0 : i32, i32, i32
  }
  func.func @transform_1(%arg0: i32) -> (i32, i32, i32) {
    %c0_i32 = arith.constant 0 : i32
    %c0_i32_0 = arith.constant 0 : i32
    %c0_i32_1 = arith.constant 0 : i32
    %c0_i32_2 = arith.constant 0 : i32
    return %c0_i32, %c0_i32_0, %c0_i32_1 : i32, i32, i32
  }
  func.func @transform_2(%arg0: i32) -> (i32, i32) {
    %c0_i32 = arith.constant 0 : i32
    %c0_i32_0 = arith.constant 0 : i32
    %c0_i32_1 = arith.constant 0 : i32
    return %c0_i32, %c0_i32_0 : i32, i32
  }
  func.func @transform_3(%arg0: i32) -> (i32, i32) {
    %c0_i32 = arith.constant 0 : i32
    %c0_i32_0 = arith.constant 0 : i32
    %c0_i32_1 = arith.constant 0 : i32
    return %c0_i32, %c0_i32_0 : i32, i32
  }
  func.func @transform_4(%arg0: i32) -> (i32, i32, i32) {
    %c0_i32 = arith.constant 0 : i32
    %c0_i32_0 = arith.constant 0 : i32
    %c0_i32_1 = arith.constant 0 : i32
    return %arg0, %c0_i32, %c0_i32_0 : i32, i32, i32
  }
}

module attributes {stable_mosaic.version = 11 : i64} {
  func.func @_band_conv_kernel(%arg0: i32, %arg1: memref<4x19x224xbf16, #tpu.memory_space<vmem>>, %arg2: memref<5x224x240xbf16, #tpu.memory_space<vmem>>, %arg3: memref<1x240xf32, #tpu.memory_space<vmem>>, %arg4: memref<1x240xf32, #tpu.memory_space<vmem>>, %arg5: memref<4x15x240xbf16, #tpu.memory_space<vmem>>) attributes {dimension_semantics = [#tpu.dimension_semantics<parallel>], iteration_bounds = array<i64: 4>, scalar_prefetch = 0 : i64, scratch_operands = 0 : i64, tpu.core_type = #tpu.core_type<tc>, window_params = [{transform_indices = @transform_0, window_bounds = array<i64: 4, 19, 224>}, {pipeline_mode = #tpu.pipeline_mode<synchronous>, transform_indices = @transform_1, window_bounds = array<i64: 5, 224, 240>}, {pipeline_mode = #tpu.pipeline_mode<synchronous>, transform_indices = @transform_2, window_bounds = array<i64: 1, 240>}, {pipeline_mode = #tpu.pipeline_mode<synchronous>, transform_indices = @transform_3, window_bounds = array<i64: 1, 240>}, {transform_indices = @transform_4, window_bounds = array<i64: 4, 15, 240>}]} {
    %cst = arith.constant 0.000000e+00 : f32
    %0 = vector.broadcast %cst : f32 to vector<60x240xf32>
    %c0 = arith.constant 0 : index
    %c0_0 = arith.constant 0 : index
    %c0_1 = arith.constant 0 : index
    %1 = vector.load %arg1[%c0, %c0_0, %c0_1] : memref<4x19x224xbf16, #tpu.memory_space<vmem>>, vector<4x15x224xbf16>
    %2 = vector.shape_cast %1 : vector<4x15x224xbf16> to vector<60x224xbf16>
    %c0_2 = arith.constant 0 : index
    %c0_3 = arith.constant 0 : index
    %c0_4 = arith.constant 0 : index
    %3 = vector.load %arg2[%c0_2, %c0_3, %c0_4] : memref<5x224x240xbf16, #tpu.memory_space<vmem>>, vector<1x224x240xbf16>
    %4 = vector.shape_cast %3 : vector<1x224x240xbf16> to vector<224x240xbf16>
    %cst_5 = arith.constant dense<0.000000e+00> : vector<60x240xf32>
    %5 = tpu.matmul %2, %4, %cst_5 {dimension_numbers = #tpu.dot_dimension_numbers<[1], [0], [0], [1], [0, 0, 1, 1], [], []>} : vector<60x224xbf16>, vector<224x240xbf16>, vector<60x240xf32> -> vector<60x240xf32>
    %6 = arith.addf %0, %5 : vector<60x240xf32>
    %c0_6 = arith.constant 0 : index
    %c1 = arith.constant 1 : index
    %c0_7 = arith.constant 0 : index
    %7 = vector.load %arg1[%c0_6, %c1, %c0_7] : memref<4x19x224xbf16, #tpu.memory_space<vmem>>, vector<4x15x224xbf16>
    %8 = vector.shape_cast %7 : vector<4x15x224xbf16> to vector<60x224xbf16>
    %c1_8 = arith.constant 1 : index
    %c0_9 = arith.constant 0 : index
    %c0_10 = arith.constant 0 : index
    %9 = vector.load %arg2[%c1_8, %c0_9, %c0_10] : memref<5x224x240xbf16, #tpu.memory_space<vmem>>, vector<1x224x240xbf16>
    %10 = vector.shape_cast %9 : vector<1x224x240xbf16> to vector<224x240xbf16>
    %cst_11 = arith.constant dense<0.000000e+00> : vector<60x240xf32>
    %11 = tpu.matmul %8, %10, %cst_11 {dimension_numbers = #tpu.dot_dimension_numbers<[1], [0], [0], [1], [0, 0, 1, 1], [], []>} : vector<60x224xbf16>, vector<224x240xbf16>, vector<60x240xf32> -> vector<60x240xf32>
    %12 = arith.addf %6, %11 : vector<60x240xf32>
    %c0_12 = arith.constant 0 : index
    %c2 = arith.constant 2 : index
    %c0_13 = arith.constant 0 : index
    %13 = vector.load %arg1[%c0_12, %c2, %c0_13] : memref<4x19x224xbf16, #tpu.memory_space<vmem>>, vector<4x15x224xbf16>
    %14 = vector.shape_cast %13 : vector<4x15x224xbf16> to vector<60x224xbf16>
    %c2_14 = arith.constant 2 : index
    %c0_15 = arith.constant 0 : index
    %c0_16 = arith.constant 0 : index
    %15 = vector.load %arg2[%c2_14, %c0_15, %c0_16] : memref<5x224x240xbf16, #tpu.memory_space<vmem>>, vector<1x224x240xbf16>
    %16 = vector.shape_cast %15 : vector<1x224x240xbf16> to vector<224x240xbf16>
    %cst_17 = arith.constant dense<0.000000e+00> : vector<60x240xf32>
    %17 = tpu.matmul %14, %16, %cst_17 {dimension_numbers = #tpu.dot_dimension_numbers<[1], [0], [0], [1], [0, 0, 1, 1], [], []>} : vector<60x224xbf16>, vector<224x240xbf16>, vector<60x240xf32> -> vector<60x240xf32>
    %18 = arith.addf %12, %17 : vector<60x240xf32>
    %c0_18 = arith.constant 0 : index
    %c3 = arith.constant 3 : index
    %c0_19 = arith.constant 0 : index
    %19 = vector.load %arg1[%c0_18, %c3, %c0_19] : memref<4x19x224xbf16, #tpu.memory_space<vmem>>, vector<4x15x224xbf16>
    %20 = vector.shape_cast %19 : vector<4x15x224xbf16> to vector<60x224xbf16>
    %c3_20 = arith.constant 3 : index
    %c0_21 = arith.constant 0 : index
    %c0_22 = arith.constant 0 : index
    %21 = vector.load %arg2[%c3_20, %c0_21, %c0_22] : memref<5x224x240xbf16, #tpu.memory_space<vmem>>, vector<1x224x240xbf16>
    %22 = vector.shape_cast %21 : vector<1x224x240xbf16> to vector<224x240xbf16>
    %cst_23 = arith.constant dense<0.000000e+00> : vector<60x240xf32>
    %23 = tpu.matmul %20, %22, %cst_23 {dimension_numbers = #tpu.dot_dimension_numbers<[1], [0], [0], [1], [0, 0, 1, 1], [], []>} : vector<60x224xbf16>, vector<224x240xbf16>, vector<60x240xf32> -> vector<60x240xf32>
    %24 = arith.addf %18, %23 : vector<60x240xf32>
    %c0_24 = arith.constant 0 : index
    %c4 = arith.constant 4 : index
    %c0_25 = arith.constant 0 : index
    %25 = vector.load %arg1[%c0_24, %c4, %c0_25] : memref<4x19x224xbf16, #tpu.memory_space<vmem>>, vector<4x15x224xbf16>
    %26 = vector.shape_cast %25 : vector<4x15x224xbf16> to vector<60x224xbf16>
    %c4_26 = arith.constant 4 : index
    %c0_27 = arith.constant 0 : index
    %c0_28 = arith.constant 0 : index
    %27 = vector.load %arg2[%c4_26, %c0_27, %c0_28] : memref<5x224x240xbf16, #tpu.memory_space<vmem>>, vector<1x224x240xbf16>
    %28 = vector.shape_cast %27 : vector<1x224x240xbf16> to vector<224x240xbf16>
    %cst_29 = arith.constant dense<0.000000e+00> : vector<60x240xf32>
    %29 = tpu.matmul %26, %28, %cst_29 {dimension_numbers = #tpu.dot_dimension_numbers<[1], [0], [0], [1], [0, 0, 1, 1], [], []>} : vector<60x224xbf16>, vector<224x240xbf16>, vector<60x240xf32> -> vector<60x240xf32>
    %30 = arith.addf %24, %29 : vector<60x240xf32>
    %c0_30 = arith.constant 0 : index
    %c0_31 = arith.constant 0 : index
    %31 = vector.load %arg3[%c0_30, %c0_31] : memref<1x240xf32, #tpu.memory_space<vmem>>, vector<1x240xf32>
    %32 = vector.broadcast %31 : vector<1x240xf32> to vector<60x240xf32>
    %33 = arith.mulf %30, %32 : vector<60x240xf32>
    %c0_32 = arith.constant 0 : index
    %c0_33 = arith.constant 0 : index
    %34 = vector.load %arg4[%c0_32, %c0_33] : memref<1x240xf32, #tpu.memory_space<vmem>>, vector<1x240xf32>
    %35 = vector.broadcast %34 : vector<1x240xf32> to vector<60x240xf32>
    %36 = arith.addf %33, %35 : vector<60x240xf32>
    %cst_34 = arith.constant 0.000000e+00 : f32
    %37 = vector.broadcast %cst_34 : f32 to vector<60x240xf32>
    %38 = arith.maximumf %36, %37 : vector<60x240xf32>
    %39 = vector.shape_cast %38 : vector<60x240xf32> to vector<4x15x240xf32>
    %40 = arith.truncf %39 : vector<4x15x240xf32> to vector<4x15x240xbf16>
    %c0_35 = arith.constant 0 : index
    %c0_36 = arith.constant 0 : index
    %c0_37 = arith.constant 0 : index
    %41 = vector.load %arg5[%c0_35, %c0_36, %c0_37] : memref<4x15x240xbf16, #tpu.memory_space<vmem>>, vector<4x15x240xbf16>
    tpu.vector_store %arg5[%c0_35, %c0_36, %c0_37], %40 {strides = array<i32>} : memref<4x15x240xbf16, #tpu.memory_space<vmem>>, vector<4x15x240xbf16>,
    return
  }
  func.func @transform_0(%arg0: i32) -> (i32, i32, i32) {
    %c0_i32 = arith.constant 0 : i32
    %c0_i32_0 = arith.constant 0 : i32
    %c0_i32_1 = arith.constant 0 : i32
    return %arg0, %c0_i32, %c0_i32_0 : i32, i32, i32
  }
  func.func @transform_1(%arg0: i32) -> (i32, i32, i32) {
    %c0_i32 = arith.constant 0 : i32
    %c0_i32_0 = arith.constant 0 : i32
    %c0_i32_1 = arith.constant 0 : i32
    %c0_i32_2 = arith.constant 0 : i32
    return %c0_i32, %c0_i32_0, %c0_i32_1 : i32, i32, i32
  }
  func.func @transform_2(%arg0: i32) -> (i32, i32) {
    %c0_i32 = arith.constant 0 : i32
    %c0_i32_0 = arith.constant 0 : i32
    %c0_i32_1 = arith.constant 0 : i32
    return %c0_i32, %c0_i32_0 : i32, i32
  }
  func.func @transform_3(%arg0: i32) -> (i32, i32) {
    %c0_i32 = arith.constant 0 : i32
    %c0_i32_0 = arith.constant 0 : i32
    %c0_i32_1 = arith.constant 0 : i32
    return %c0_i32, %c0_i32_0 : i32, i32
  }
  func.func @transform_4(%arg0: i32) -> (i32, i32, i32) {
    %c0_i32 = arith.constant 0 : i32
    %c0_i32_0 = arith.constant 0 : i32
    %c0_i32_1 = arith.constant 0 : i32
    return %arg0, %c0_i32, %c0_i32_0 : i32, i32, i32
  }
}

module attributes {stable_mosaic.version = 11 : i64} {
  func.func @_band_conv_kernel(%arg0: i32, %arg1: memref<4x36x240xbf16, #tpu.memory_space<vmem>>, %arg2: memref<5x240x256xbf16, #tpu.memory_space<vmem>>, %arg3: memref<1x256xf32, #tpu.memory_space<vmem>>, %arg4: memref<1x256xf32, #tpu.memory_space<vmem>>, %arg5: memref<4x32x256xbf16, #tpu.memory_space<vmem>>) attributes {dimension_semantics = [#tpu.dimension_semantics<parallel>], iteration_bounds = array<i64: 4>, scalar_prefetch = 0 : i64, scratch_operands = 0 : i64, tpu.core_type = #tpu.core_type<tc>, window_params = [{transform_indices = @transform_0, window_bounds = array<i64: 4, 36, 240>}, {pipeline_mode = #tpu.pipeline_mode<synchronous>, transform_indices = @transform_1, window_bounds = array<i64: 5, 240, 256>}, {pipeline_mode = #tpu.pipeline_mode<synchronous>, transform_indices = @transform_2, window_bounds = array<i64: 1, 256>}, {pipeline_mode = #tpu.pipeline_mode<synchronous>, transform_indices = @transform_3, window_bounds = array<i64: 1, 256>}, {transform_indices = @transform_4, window_bounds = array<i64: 4, 32, 256>}]} {
    %cst = arith.constant 0.000000e+00 : f32
    %0 = vector.broadcast %cst : f32 to vector<128x256xf32>
    %c0 = arith.constant 0 : index
    %c0_0 = arith.constant 0 : index
    %c0_1 = arith.constant 0 : index
    %1 = vector.load %arg1[%c0, %c0_0, %c0_1] : memref<4x36x240xbf16, #tpu.memory_space<vmem>>, vector<4x32x240xbf16>
    %2 = vector.shape_cast %1 : vector<4x32x240xbf16> to vector<128x240xbf16>
    %c0_2 = arith.constant 0 : index
    %c0_3 = arith.constant 0 : index
    %c0_4 = arith.constant 0 : index
    %3 = vector.load %arg2[%c0_2, %c0_3, %c0_4] : memref<5x240x256xbf16, #tpu.memory_space<vmem>>, vector<1x240x256xbf16>
    %4 = vector.shape_cast %3 : vector<1x240x256xbf16> to vector<240x256xbf16>
    %cst_5 = arith.constant dense<0.000000e+00> : vector<128x256xf32>
    %5 = tpu.matmul %2, %4, %cst_5 {dimension_numbers = #tpu.dot_dimension_numbers<[1], [0], [0], [1], [0, 0, 1, 1], [], []>} : vector<128x240xbf16>, vector<240x256xbf16>, vector<128x256xf32> -> vector<128x256xf32>
    %6 = arith.addf %0, %5 : vector<128x256xf32>
    %c0_6 = arith.constant 0 : index
    %c1 = arith.constant 1 : index
    %c0_7 = arith.constant 0 : index
    %7 = vector.load %arg1[%c0_6, %c1, %c0_7] : memref<4x36x240xbf16, #tpu.memory_space<vmem>>, vector<4x32x240xbf16>
    %8 = vector.shape_cast %7 : vector<4x32x240xbf16> to vector<128x240xbf16>
    %c1_8 = arith.constant 1 : index
    %c0_9 = arith.constant 0 : index
    %c0_10 = arith.constant 0 : index
    %9 = vector.load %arg2[%c1_8, %c0_9, %c0_10] : memref<5x240x256xbf16, #tpu.memory_space<vmem>>, vector<1x240x256xbf16>
    %10 = vector.shape_cast %9 : vector<1x240x256xbf16> to vector<240x256xbf16>
    %cst_11 = arith.constant dense<0.000000e+00> : vector<128x256xf32>
    %11 = tpu.matmul %8, %10, %cst_11 {dimension_numbers = #tpu.dot_dimension_numbers<[1], [0], [0], [1], [0, 0, 1, 1], [], []>} : vector<128x240xbf16>, vector<240x256xbf16>, vector<128x256xf32> -> vector<128x256xf32>
    %12 = arith.addf %6, %11 : vector<128x256xf32>
    %c0_12 = arith.constant 0 : index
    %c2 = arith.constant 2 : index
    %c0_13 = arith.constant 0 : index
    %13 = vector.load %arg1[%c0_12, %c2, %c0_13] : memref<4x36x240xbf16, #tpu.memory_space<vmem>>, vector<4x32x240xbf16>
    %14 = vector.shape_cast %13 : vector<4x32x240xbf16> to vector<128x240xbf16>
    %c2_14 = arith.constant 2 : index
    %c0_15 = arith.constant 0 : index
    %c0_16 = arith.constant 0 : index
    %15 = vector.load %arg2[%c2_14, %c0_15, %c0_16] : memref<5x240x256xbf16, #tpu.memory_space<vmem>>, vector<1x240x256xbf16>
    %16 = vector.shape_cast %15 : vector<1x240x256xbf16> to vector<240x256xbf16>
    %cst_17 = arith.constant dense<0.000000e+00> : vector<128x256xf32>
    %17 = tpu.matmul %14, %16, %cst_17 {dimension_numbers = #tpu.dot_dimension_numbers<[1], [0], [0], [1], [0, 0, 1, 1], [], []>} : vector<128x240xbf16>, vector<240x256xbf16>, vector<128x256xf32> -> vector<128x256xf32>
    %18 = arith.addf %12, %17 : vector<128x256xf32>
    %c0_18 = arith.constant 0 : index
    %c3 = arith.constant 3 : index
    %c0_19 = arith.constant 0 : index
    %19 = vector.load %arg1[%c0_18, %c3, %c0_19] : memref<4x36x240xbf16, #tpu.memory_space<vmem>>, vector<4x32x240xbf16>
    %20 = vector.shape_cast %19 : vector<4x32x240xbf16> to vector<128x240xbf16>
    %c3_20 = arith.constant 3 : index
    %c0_21 = arith.constant 0 : index
    %c0_22 = arith.constant 0 : index
    %21 = vector.load %arg2[%c3_20, %c0_21, %c0_22] : memref<5x240x256xbf16, #tpu.memory_space<vmem>>, vector<1x240x256xbf16>
    %22 = vector.shape_cast %21 : vector<1x240x256xbf16> to vector<240x256xbf16>
    %cst_23 = arith.constant dense<0.000000e+00> : vector<128x256xf32>
    %23 = tpu.matmul %20, %22, %cst_23 {dimension_numbers = #tpu.dot_dimension_numbers<[1], [0], [0], [1], [0, 0, 1, 1], [], []>} : vector<128x240xbf16>, vector<240x256xbf16>, vector<128x256xf32> -> vector<128x256xf32>
    %24 = arith.addf %18, %23 : vector<128x256xf32>
    %c0_24 = arith.constant 0 : index
    %c4 = arith.constant 4 : index
    %c0_25 = arith.constant 0 : index
    %25 = vector.load %arg1[%c0_24, %c4, %c0_25] : memref<4x36x240xbf16, #tpu.memory_space<vmem>>, vector<4x32x240xbf16>
    %26 = vector.shape_cast %25 : vector<4x32x240xbf16> to vector<128x240xbf16>
    %c4_26 = arith.constant 4 : index
    %c0_27 = arith.constant 0 : index
    %c0_28 = arith.constant 0 : index
    %27 = vector.load %arg2[%c4_26, %c0_27, %c0_28] : memref<5x240x256xbf16, #tpu.memory_space<vmem>>, vector<1x240x256xbf16>
    %28 = vector.shape_cast %27 : vector<1x240x256xbf16> to vector<240x256xbf16>
    %cst_29 = arith.constant dense<0.000000e+00> : vector<128x256xf32>
    %29 = tpu.matmul %26, %28, %cst_29 {dimension_numbers = #tpu.dot_dimension_numbers<[1], [0], [0], [1], [0, 0, 1, 1], [], []>} : vector<128x240xbf16>, vector<240x256xbf16>, vector<128x256xf32> -> vector<128x256xf32>
    %30 = arith.addf %24, %29 : vector<128x256xf32>
    %c0_30 = arith.constant 0 : index
    %c0_31 = arith.constant 0 : index
    %31 = vector.load %arg3[%c0_30, %c0_31] : memref<1x256xf32, #tpu.memory_space<vmem>>, vector<1x256xf32>
    %32 = vector.broadcast %31 : vector<1x256xf32> to vector<128x256xf32>
    %33 = arith.mulf %30, %32 : vector<128x256xf32>
    %c0_32 = arith.constant 0 : index
    %c0_33 = arith.constant 0 : index
    %34 = vector.load %arg4[%c0_32, %c0_33] : memref<1x256xf32, #tpu.memory_space<vmem>>, vector<1x256xf32>
    %35 = vector.broadcast %34 : vector<1x256xf32> to vector<128x256xf32>
    %36 = arith.addf %33, %35 : vector<128x256xf32>
    %cst_34 = arith.constant 0.000000e+00 : f32
    %37 = vector.broadcast %cst_34 : f32 to vector<128x256xf32>
    %38 = arith.maximumf %36, %37 : vector<128x256xf32>
    %39 = vector.shape_cast %38 : vector<128x256xf32> to vector<4x32x256xf32>
    %40 = arith.truncf %39 : vector<4x32x256xf32> to vector<4x32x256xbf16>
    %c0_35 = arith.constant 0 : index
    %c0_36 = arith.constant 0 : index
    %c0_37 = arith.constant 0 : index
    %41 = vector.load %arg5[%c0_35, %c0_36, %c0_37] : memref<4x32x256xbf16, #tpu.memory_space<vmem>>, vector<4x32x256xbf16>
    tpu.vector_store %arg5[%c0_35, %c0_36, %c0_37], %40 {strides = array<i32>} : memref<4x32x256xbf16, #tpu.memory_space<vmem>>, vector<4x32x256xbf16>,
    return
  }
  func.func @transform_0(%arg0: i32) -> (i32, i32, i32) {
    %c0_i32 = arith.constant 0 : i32
    %c0_i32_0 = arith.constant 0 : i32
    %c0_i32_1 = arith.constant 0 : i32
    return %arg0, %c0_i32, %c0_i32_0 : i32, i32, i32
  }
  func.func @transform_1(%arg0: i32) -> (i32, i32, i32) {
    %c0_i32 = arith.constant 0 : i32
    %c0_i32_0 = arith.constant 0 : i32
    %c0_i32_1 = arith.constant 0 : i32
    %c0_i32_2 = arith.constant 0 : i32
    return %c0_i32, %c0_i32_0, %c0_i32_1 : i32, i32, i32
  }
  func.func @transform_2(%arg0: i32) -> (i32, i32) {
    %c0_i32 = arith.constant 0 : i32
    %c0_i32_0 = arith.constant 0 : i32
    %c0_i32_1 = arith.constant 0 : i32
    return %c0_i32, %c0_i32_0 : i32, i32
  }
  func.func @transform_3(%arg0: i32) -> (i32, i32) {
    %c0_i32 = arith.constant 0 : i32
    %c0_i32_0 = arith.constant 0 : i32
    %c0_i32_1 = arith.constant 0 : i32
    return %c0_i32, %c0_i32_0 : i32, i32
  }
  func.func @transform_4(%arg0: i32) -> (i32, i32, i32) {
    %c0_i32 = arith.constant 0 : i32
    %c0_i32_0 = arith.constant 0 : i32
    %c0_i32_1 = arith.constant 0 : i32
    return %arg0, %c0_i32, %c0_i32_0 : i32, i32, i32
  }
}

module attributes {stable_mosaic.version = 11 : i64} {
  func.func @_band_conv_kernel(%arg0: i32, %arg1: memref<4x36x256xbf16, #tpu.memory_space<vmem>>, %arg2: memref<5x256x32xbf16, #tpu.memory_space<vmem>>, %arg3: memref<1x32xf32, #tpu.memory_space<vmem>>, %arg4: memref<4x32x32xf32, #tpu.memory_space<vmem>>) attributes {dimension_semantics = [#tpu.dimension_semantics<parallel>], iteration_bounds = array<i64: 4>, scalar_prefetch = 0 : i64, scratch_operands = 0 : i64, tpu.core_type = #tpu.core_type<tc>, window_params = [{transform_indices = @transform_0, window_bounds = array<i64: 4, 36, 256>}, {pipeline_mode = #tpu.pipeline_mode<synchronous>, transform_indices = @transform_1, window_bounds = array<i64: 5, 256, 32>}, {pipeline_mode = #tpu.pipeline_mode<synchronous>, transform_indices = @transform_2, window_bounds = array<i64: 1, 32>}, {transform_indices = @transform_3, window_bounds = array<i64: 4, 32, 32>}]} {
    %cst = arith.constant 0.000000e+00 : f32
    %0 = vector.broadcast %cst : f32 to vector<128x32xf32>
    %c0 = arith.constant 0 : index
    %c0_0 = arith.constant 0 : index
    %c0_1 = arith.constant 0 : index
    %1 = vector.load %arg1[%c0, %c0_0, %c0_1] : memref<4x36x256xbf16, #tpu.memory_space<vmem>>, vector<4x32x256xbf16>
    %2 = vector.shape_cast %1 : vector<4x32x256xbf16> to vector<128x256xbf16>
    %c0_2 = arith.constant 0 : index
    %c0_3 = arith.constant 0 : index
    %c0_4 = arith.constant 0 : index
    %3 = vector.load %arg2[%c0_2, %c0_3, %c0_4] : memref<5x256x32xbf16, #tpu.memory_space<vmem>>, vector<1x256x32xbf16>
    %4 = vector.shape_cast %3 : vector<1x256x32xbf16> to vector<256x32xbf16>
    %cst_5 = arith.constant dense<0.000000e+00> : vector<128x32xf32>
    %5 = tpu.matmul %2, %4, %cst_5 {dimension_numbers = #tpu.dot_dimension_numbers<[1], [0], [0], [1], [0, 0, 1, 1], [], []>} : vector<128x256xbf16>, vector<256x32xbf16>, vector<128x32xf32> -> vector<128x32xf32>
    %6 = arith.addf %0, %5 : vector<128x32xf32>
    %c0_6 = arith.constant 0 : index
    %c1 = arith.constant 1 : index
    %c0_7 = arith.constant 0 : index
    %7 = vector.load %arg1[%c0_6, %c1, %c0_7] : memref<4x36x256xbf16, #tpu.memory_space<vmem>>, vector<4x32x256xbf16>
    %8 = vector.shape_cast %7 : vector<4x32x256xbf16> to vector<128x256xbf16>
    %c1_8 = arith.constant 1 : index
    %c0_9 = arith.constant 0 : index
    %c0_10 = arith.constant 0 : index
    %9 = vector.load %arg2[%c1_8, %c0_9, %c0_10] : memref<5x256x32xbf16, #tpu.memory_space<vmem>>, vector<1x256x32xbf16>
    %10 = vector.shape_cast %9 : vector<1x256x32xbf16> to vector<256x32xbf16>
    %cst_11 = arith.constant dense<0.000000e+00> : vector<128x32xf32>
    %11 = tpu.matmul %8, %10, %cst_11 {dimension_numbers = #tpu.dot_dimension_numbers<[1], [0], [0], [1], [0, 0, 1, 1], [], []>} : vector<128x256xbf16>, vector<256x32xbf16>, vector<128x32xf32> -> vector<128x32xf32>
    %12 = arith.addf %6, %11 : vector<128x32xf32>
    %c0_12 = arith.constant 0 : index
    %c2 = arith.constant 2 : index
    %c0_13 = arith.constant 0 : index
    %13 = vector.load %arg1[%c0_12, %c2, %c0_13] : memref<4x36x256xbf16, #tpu.memory_space<vmem>>, vector<4x32x256xbf16>
    %14 = vector.shape_cast %13 : vector<4x32x256xbf16> to vector<128x256xbf16>
    %c2_14 = arith.constant 2 : index
    %c0_15 = arith.constant 0 : index
    %c0_16 = arith.constant 0 : index
    %15 = vector.load %arg2[%c2_14, %c0_15, %c0_16] : memref<5x256x32xbf16, #tpu.memory_space<vmem>>, vector<1x256x32xbf16>
    %16 = vector.shape_cast %15 : vector<1x256x32xbf16> to vector<256x32xbf16>
    %cst_17 = arith.constant dense<0.000000e+00> : vector<128x32xf32>
    %17 = tpu.matmul %14, %16, %cst_17 {dimension_numbers = #tpu.dot_dimension_numbers<[1], [0], [0], [1], [0, 0, 1, 1], [], []>} : vector<128x256xbf16>, vector<256x32xbf16>, vector<128x32xf32> -> vector<128x32xf32>
    %18 = arith.addf %12, %17 : vector<128x32xf32>
    %c0_18 = arith.constant 0 : index
    %c3 = arith.constant 3 : index
    %c0_19 = arith.constant 0 : index
    %19 = vector.load %arg1[%c0_18, %c3, %c0_19] : memref<4x36x256xbf16, #tpu.memory_space<vmem>>, vector<4x32x256xbf16>
    %20 = vector.shape_cast %19 : vector<4x32x256xbf16> to vector<128x256xbf16>
    %c3_20 = arith.constant 3 : index
    %c0_21 = arith.constant 0 : index
    %c0_22 = arith.constant 0 : index
    %21 = vector.load %arg2[%c3_20, %c0_21, %c0_22] : memref<5x256x32xbf16, #tpu.memory_space<vmem>>, vector<1x256x32xbf16>
    %22 = vector.shape_cast %21 : vector<1x256x32xbf16> to vector<256x32xbf16>
    %cst_23 = arith.constant dense<0.000000e+00> : vector<128x32xf32>
    %23 = tpu.matmul %20, %22, %cst_23 {dimension_numbers = #tpu.dot_dimension_numbers<[1], [0], [0], [1], [0, 0, 1, 1], [], []>} : vector<128x256xbf16>, vector<256x32xbf16>, vector<128x32xf32> -> vector<128x32xf32>
    %24 = arith.addf %18, %23 : vector<128x32xf32>
    %c0_24 = arith.constant 0 : index
    %c4 = arith.constant 4 : index
    %c0_25 = arith.constant 0 : index
    %25 = vector.load %arg1[%c0_24, %c4, %c0_25] : memref<4x36x256xbf16, #tpu.memory_space<vmem>>, vector<4x32x256xbf16>
    %26 = vector.shape_cast %25 : vector<4x32x256xbf16> to vector<128x256xbf16>
    %c4_26 = arith.constant 4 : index
    %c0_27 = arith.constant 0 : index
    %c0_28 = arith.constant 0 : index
    %27 = vector.load %arg2[%c4_26, %c0_27, %c0_28] : memref<5x256x32xbf16, #tpu.memory_space<vmem>>, vector<1x256x32xbf16>
    %28 = vector.shape_cast %27 : vector<1x256x32xbf16> to vector<256x32xbf16>
    %cst_29 = arith.constant dense<0.000000e+00> : vector<128x32xf32>
    %29 = tpu.matmul %26, %28, %cst_29 {dimension_numbers = #tpu.dot_dimension_numbers<[1], [0], [0], [1], [0, 0, 1, 1], [], []>} : vector<128x256xbf16>, vector<256x32xbf16>, vector<128x32xf32> -> vector<128x32xf32>
    %30 = arith.addf %24, %29 : vector<128x32xf32>
    %c0_30 = arith.constant 0 : index
    %c0_31 = arith.constant 0 : index
    %31 = vector.load %arg3[%c0_30, %c0_31] : memref<1x32xf32, #tpu.memory_space<vmem>>, vector<1x32xf32>
    %32 = vector.broadcast %31 : vector<1x32xf32> to vector<128x32xf32>
    %33 = arith.addf %30, %32 : vector<128x32xf32>
    %34 = arith.negf %33 : vector<128x32xf32>
    %35 = math.exp %34 : vector<128x32xf32>
    %cst_32 = arith.constant 1.000000e+00 : f32
    %36 = vector.broadcast %cst_32 : f32 to vector<128x32xf32>
    %37 = arith.addf %36, %35 : vector<128x32xf32>
    %38 = arith.divf %36, %37 : vector<128x32xf32>
    %39 = vector.shape_cast %38 : vector<128x32xf32> to vector<4x32x32xf32>
    %c0_33 = arith.constant 0 : index
    %c0_34 = arith.constant 0 : index
    %c0_35 = arith.constant 0 : index
    %40 = vector.load %arg4[%c0_33, %c0_34, %c0_35] : memref<4x32x32xf32, #tpu.memory_space<vmem>>, vector<4x32x32xf32>
    tpu.vector_store %arg4[%c0_33, %c0_34, %c0_35], %39 {strides = array<i32>} : memref<4x32x32xf32, #tpu.memory_space<vmem>>, vector<4x32x32xf32>,
    return
  }
  func.func @transform_0(%arg0: i32) -> (i32, i32, i32) {
    %c0_i32 = arith.constant 0 : i32
    %c0_i32_0 = arith.constant 0 : i32
    %c0_i32_1 = arith.constant 0 : i32
    return %arg0, %c0_i32, %c0_i32_0 : i32, i32, i32
  }
  func.func @transform_1(%arg0: i32) -> (i32, i32, i32) {
    %c0_i32 = arith.constant 0 : i32
    %c0_i32_0 = arith.constant 0 : i32
    %c0_i32_1 = arith.constant 0 : i32
    %c0_i32_2 = arith.constant 0 : i32
    return %c0_i32, %c0_i32_0, %c0_i32_1 : i32, i32, i32
  }
  func.func @transform_2(%arg0: i32) -> (i32, i32) {
    %c0_i32 = arith.constant 0 : i32
    %c0_i32_0 = arith.constant 0 : i32
    %c0_i32_1 = arith.constant 0 : i32
    return %c0_i32, %c0_i32_0 : i32, i32
  }
  func.func @transform_3(%arg0: i32) -> (i32, i32, i32) {
    %c0_i32 = arith.constant 0 : i32
    %c0_i32_0 = arith.constant 0 : i32
    %c0_i32_1 = arith.constant 0 : i32
    return %arg0, %c0_i32, %c0_i32_0 : i32, i32, i32
  }
}

</mosaic_0001>

<bundles_post_ra>
// kernel: _lambda_.4
= control target key start
LH: loop header
LB: loop body
LE: loop exit
PB: predicated region body
PF: predicated region fallthrough
CT: control target
= control target key end

     0   :  { %s2047_s15 = smov 0   ;;  %s2518_s0 = inlined_call_operand.vmem [shape: bf16[16,1,32], index: 0, kind: input, shape index: {}]   ;;  %s2519_s1 = inlined_call_operand.vmem [shape: bf16[1,32,1568], index: 1, kind: input, shape index: {}]   ;;  %s2520_s2 = inlined_call_operand.vmem [shape: f32[1,1568], index: 2, kind: input, shape index: {}]   ;;  %s2521_s3 = inlined_call_operand.vmem [shape: f32[1,1568], index: 3, kind: input, shape index: {}]   ;;  %s2522_s4 = inlined_call_operand.vmem [shape: bf16[16,1,1568], index: 4, kind: output, shape index: {}]  }
   0x1 LB: > { %s1878_s16 = sadd.s32 4294967295, %s2016_s15   ;;  %p1882_p0 = scmp.ge.s32.totalorder %s2016_s15, 1  ;;  %s2016_s15 = sphi %s2047_s15, %s14_s15  }
   0x2   : > { %p162_p1 = scmp.lt.s32.totalorder %s2016_s15, 5 }
   0x4   : > { %p163_p2 = pnand %p1882_p0, %p162_p1 }
   0x5   : > { %v1972_v0 = vld [vmem:[%s2519_s1 + $0x4] ss:$52 sps:$4 sm:$0xff] (!%p163_p2)   ;;  %s1883_s19 = sshll.u32 (!%p163_p2), %s1878_s16, 2  ;;  %v1974_v1 = vld [vmem:[%s2519_s1] ss:$52 sps:$4 sm:$0xff] (!%p163_p2)   ;;  %v2018_v2 = vmov (!%p163_p2), 0   ;;  %v245_v3 = vlaneseq (!%p163_p2) }
   0x6   : > { %166 = sbr.rel (%p163_p2) target bundleno = 317 (0x13d), region = 36  ;;  %473 = vmatprep.mubr.bf16.mxu0 (!%p163_p2), %v2018_v2  ;;  %514 = vmatprep.mubr.bf16.mxu1 (!%p163_p2), %v2018_v2  ;;  %p188_p3 = scmp.lt.s32.totalorder (!%p163_p2), %s1883_s19, 15  ;;  %v1975_v4 = vld [vmem:[%s2519_s1 + $0xc] ss:$52 sps:$4 sm:$0xff] (!%p163_p2)   ;;  %v1977_v5 = vld [vmem:[%s2519_s1 + $0x8] ss:$52 sps:$4 sm:$0xff] (!%p163_p2)  }
   0x7   : > { %441 = vmatprep.subr.bf16.mxu0 (!%p163_p2), %v1972_v0  ;;  %v1978_v6 = vld [vmem:[%s2519_s1 + $0x6c] ss:$52 sps:$4 sm:$0xff] (!%p163_p2)   ;;  %v1980_v7 = vld [vmem:[%s2519_s1 + $0x68] ss:$52 sps:$4 sm:$0xff] (!%p163_p2)   ;;  %482 = vmatprep.subr.bf16.mxu1 (!%p163_p2), %v1975_v4  ;;  %v1983_v9 = vld [vmem:[%s2519_s1 + $0x70] ss:$52 sps:$4 sm:$0xff] (!%p163_p2)  }
   0x8   : > { %442 = vmatpush1.bf16.msra.mxu0 (!%p163_p2), %v1974_v1  ;;  %v1981_v8 = vld [vmem:[%s2519_s1 + $0x74] ss:$52 sps:$4 sm:$0xff] (!%p163_p2)   ;;  %483 = vmatpush1.bf16.msra.mxu1 (!%p163_p2), %v1977_v5  ;;  %v2019_v10 = vmov (!%p163_p2), 1966171168   ;;  %v2087_v12 = vshrl.u32 (!%p163_p2), %v245_v3, 7  ;;  %vm296_vm0 = vcmask (!%p163_p2), 1041409  }
   0x9   : > { %443 = vmatprep.subr.bf16.mxu0 (!%p163_p2), %v1978_v6  ;;  %v243_v11 = vunpack.c.l.s4 (!%p163_p2), %v2019_v10  ;;  %484 = vmatprep.subr.bf16.mxu1 (!%p163_p2), %v1981_v8  ;;  %v1986_v13 = vld [vmem:[%s2519_s1 + $0x14] ss:$52 sps:$4 sm:$0xff] (!%p163_p2)   ;;  %vm299_vm1 = vcmask (!%p163_p2), 1042434   ;;  %vm1767_vm2 = vcmask (!%p163_p2), 1040384   ;;  %vm1768_vm3 = vsmask.f32 (!%p163_p2), 256 }
   0xa   : > { %vm2095_vm4 = vmand (!%p163_p2), %vm1767_vm2, %vm1768_vm3  ;;  %vm1771_vm5 = vsmask.f32 (!%p163_p2), 1280  ;;  %vm1775_vm7 = vsmask.f32 (!%p163_p2), 2304  ;;  %vm302_vm9 = vcmask (!%p163_p2), 1043459   ;;  %vm437_vm15 = vcmask (!%p163_p2), 261120  }
   0xb   : > { %v244_v15 = vunpack.c.0.s8 (!%p163_p2), %v243_v11  ;;  %vm2100_vm6 = vmand (!%p163_p2), %vm296_vm0, %vm1771_vm5  ;;  %vm1779_vm11 = vsmask.f32 (!%p163_p2), 3328  ;;  %v1989_v31 = vld [vmem:[%s2519_s1 + $0x1c] ss:$52 sps:$4 sm:$0xff] (!%p163_p2)   ;;  %v1987_v40 = vld [vmem:[%s2519_s1 + $0x18] ss:$52 sps:$4 sm:$0xff] (!%p163_p2)  }
   0xc   : > { %444 = vmatpush1.bf16.msra.mxu0 (!%p163_p2), %v1980_v7  ;;  %485 = vmatpush1.bf16.msra.mxu1 (!%p163_p2), %v1983_v9  ;;  %vm1773_vm8 = vmor (!%p163_p2), %vm2100_vm6, %vm2095_vm4  ;;  %v1984_v38 = vld [vmem:[%s2519_s1 + $0x10] ss:$52 sps:$4 sm:$0xff] (!%p163_p2)   ;;  %v1990_v44 = vld [vmem:[%s2519_s1 + $0x78] ss:$52 sps:$4 sm:$0xff] (!%p163_p2)   ;;  %v2020_v55 = vmov (!%p163_p2), 0.0   ;;  %v2192_v57 = vsub.s32 (!%p163_p2), 0, %v2087_v12 }
   0xd   : > { %s2544_s19 = smov (!%p188_p3, %s1883_s19), 15  ;;  %523 = vmatprep.subr.bf16.mxu0 %v1986_v13  ;;  %v2093_v18 = vsub.s32 %v244_v15, %v2087_v12  ;;  %vm1776_vm10 = vmand %vm299_vm1, %vm1775_vm7  ;;  %564 = vmatprep.subr.bf16.mxu1 %v1989_v31  ;;  %v1992_v42 = vld [vmem:[%s2519_s1 + $0x7c] ss:$52 sps:$4 sm:$0xff]   ;;  %v1995_v43 = vld [vmem:[%s2519_s1 + $0x84] ss:$52 sps:$4 sm:$0xff]   ;;  %v2195_v58 = vsub.s32 2, %v2087_v12 }
   0xe   : > { %s190_s10 = scalar_lea.vmem %s2518_s0, %s2544_s19  ;;  %vm2113_vm12 = vmor %vm1776_vm10, %vm1773_vm8  ;;  %v1993_v45 = vld [vmem:[%s2519_s1 + $0x80] ss:$52 sps:$4 sm:$0xff]   ;;  %v1998_v46 = vld [vmem:[%s2519_s1 + $0x24] ss:$52 sps:$4 sm:$0xff]   ;;  %v2201_v60 = vsub.s32 1, %v2087_v12  ;;  %v2204_v61 = vsub.s32 3, %v2087_v12 }
   0xf   : > { %v1885_v14 = vld.sshfl [vmem:[%s190_s10] sm:$0x1 pattern:$0x75316420]  ;;  %vm2121_vm13 = vmand %vm302_vm9, %vm1779_vm11  ;;  %v1999_v49 = vld [vmem:[%s2519_s1 + $0x28] ss:$52 sps:$4 sm:$0xff]  }
  0x10   : > { %v1886_v16 = vld.sshfl [vmem:[%s190_s10 + $0x1] sm:$0x1 pattern:$0x75316420]  ;;  %v248_v22 = vrot.slane %v1885_v14, %v2093_v18  ;;  %vm1781_vm14 = vmor %vm2121_vm13, %vm2113_vm12  ;;  %v2007_v51 = vld [vmem:[%s2519_s1 + $0x94] ss:$52 sps:$4 sm:$0xff]  }
  0x11   : > { %v1887_v17 = vld.sshfl [vmem:[%s190_s10 + $0x2] sm:$0x1 pattern:$0x75316420]  ;;  %v262_v23 = vrot.slane %v1886_v16, %v2093_v18  ;;  %v2002_v52 = vld [vmem:[%s2519_s1 + $0x88] ss:$52 sps:$4 sm:$0xff]  }
  0x12   : > { %v1888_v20 = vld.sshfl [vmem:[%s190_s10 + $0x3] sm:$0x1 pattern:$0x75316420]  ;;  %v276_v24 = vrot.slane %v1887_v17, %v2093_v18  ;;  %v291_v26 = vunpack.c.l.b16 %v248_v22  ;;  %v2005_v53 = vld [vmem:[%s2519_s1 + $0x90] ss:$52 sps:$4 sm:$0xff]  }
  0x13   : > { %v290_v25 = vrot.slane %v1888_v20, %v2093_v18  ;;  %v292_v27 = vunpack.c.l.b16 %v262_v23  ;;  %v2001_v47 = vld [vmem:[%s2519_s1 + $0x2c] ss:$52 sps:$4 sm:$0xff]   ;;  %v2008_v54 = vld [vmem:[%s2519_s1 + $0x30] ss:$52 sps:$4 sm:$0xff]   ;;  %v2224_v14 = vsub.s32 4, %v2087_v12  ;;  %v2227_v15 = vsub.s32 6, %v2087_v12 }
  0x14   : > { %v293_v28 = vunpack.c.l.b16 %v276_v24  ;;  %v1996_v48 = vld [vmem:[%s2519_s1 + $0x20] ss:$52 sps:$4 sm:$0xff]   ;;  %v2009_v56 = vld [vmem:[%s2519_s1 + $0x98] ss:$52 sps:$4 sm:$0xff]   ;;  %v2230_v21 = vsub.s32 5, %v2087_v12  ;;  %v2233_v22 = vsub.s32 7, %v2087_v12 }
  0x15   : > { %v294_v29 = vunpack.c.l.b16 %v290_v25  ;;  %v295_v33 = vrot.slane %v292_v27, 7  ;;  %v2004_v50 = vld [vmem:[%s2519_s1 + $0x8c] ss:$52 sps:$4 sm:$0xff]   ;;  %vm1783_vm2 = vsmask.f32 4352  ;;  %vm1786_vm3 = vcmask 1045509  }
  0x16   : > { %v298_v34 = vrot.slane %v293_v28, 6  ;;  %v727_v59 = vld [vmem:[%s2520_s2] sm:$0xff]  ;;  %vm1787_vm4 = vsmask.f32 5376  ;;  %vm1790_vm5 = vcmask 1046534   ;;  %vm1794_vm8 = vcmask 1047559  }
  0x17   : > { %v301_v35 = vrot.slane %v294_v29, 5  ;;  %v297_v36 = vsel %vm296_vm0, %v295_v33, %v291_v26  ;;  %vm2021_vm0 = vmmov 0   ;;  %v2209_v62 = vld [vmem:[%s2521_s3] sm:$0xff]  ;;  %v734_v63 = vrot.slane %v727_v59, %v2192_v57  ;;  %vm2330_vm11 = vmand %vm1786_vm3, %vm1787_vm4  ;;  %s1959_s7 = smul.u32 13, %s2544_s19 }
  0x18   : > { %v300_v37 = vsel %vm299_vm1, %v298_v34, %v297_v36  ;;  %v742_v0 = vrot.slane %v727_v59, %v2195_v58  ;;  %v738_v1 = vrot.slane %v727_v59, %v2201_v60  ;;  %v816_v3 = vrot.slane %v2209_v62, %v2192_v57 }
  0x19   : > { %v303_v39 = vsel %vm302_vm9, %v301_v35, %v300_v37  ;;  %v824_v4 = vrot.slane %v2209_v62, %v2195_v58  ;;  %v820_v7 = vrot.slane %v2209_v62, %v2201_v60  ;;  %v828_v8 = vrot.slane %v2209_v62, %v2204_v61  ;;  %s2393_s9 = scalar_lea.vmem %s2522_s4, %s1959_s7 }
  0x1a   : > { %v304_v41 = vpack.c.b16 %v303_v39, %v303_v39  ;;  %v750_v33 = vrot.slane %v727_v59, %v2224_v14  ;;  %v758_v34 = vrot.slane %v727_v59, %v2227_v15  ;;  %v754_v37 = vrot.slane %v727_v59, %v2230_v21  ;;  %v1810_v32 = vld [vmem:[%s2393_s9 + $0x15] sm:$0x1f] }
  0x1b   : > { %v832_v12 = vrot.slane %v2209_v62, %v2224_v14  ;;  %v840_v39 = vrot.slane %v2209_v62, %v2227_v15  ;;  %vm1782_vm1 = vcmask 1044484   ;;  %vm1791_vm6 = vsmask.f32 6400 }
  0x1c   : > { %1915 = vmatmul.mubr.msk.bf16.vlgmr.msra.gmra.mrb[0].mxu0 %vm437_vm15, %v304_v41  ;;  %1916 = vmatmul.mubr.msk.bf16.vlgmr.msra.gmra.mrb[0].mxu1 %vm437_vm15, %v304_v41  ;;  %vm2297_vm7 = vmand %vm1782_vm1, %vm1783_vm2  ;;  %vm1795_vm9 = vsmask.f32 7424 }
  0x1d   : > { %524 = vmatpush1.bf16.msra.mxu0 %v1984_v38  ;;  %565 = vmatpush1.bf16.msra.mxu1 %v1987_v40  ;;  %v762_v38 = vrot.slane %v727_v59, %v2233_v22  ;;  %vm2320_vm10 = vmor %vm2297_vm7, %vm1781_vm14 }
  0x1e   : > { %525 = vmatprep.subr.bf16.mxu0 %v1992_v42  ;;  %566 = vmatprep.subr.bf16.mxu1 %v1995_v43  ;;  %vm1796_vm3 = vmand %vm1794_vm8, %vm1795_vm9 }
  0x1f   : > { %555 = vmatprep.mubr.bf16.mxu0 %v2018_v2  ;;  %596 = vmatprep.mubr.bf16.mxu1 %v2018_v2 }
  0x21   : > { %526 = vmatpush1.bf16.msra.mxu0 %v1990_v44  ;;  %567 = vmatpush1.bf16.msra.mxu1 %v1993_v45  ;;  %v836_v44 = vrot.slane %v2209_v62, %v2230_v21  ;;  %v844_v45 = vrot.slane %v2209_v62, %v2233_v22 }
  0x22   : > { %605 = vmatprep.subr.bf16.mxu0 %v1998_v46  ;;  %646 = vmatprep.subr.bf16.mxu1 %v2001_v47 }
  0x24   : > { %1917 = vmatmul.mubr.msk.bf16.vlgmr.msra.gmra.mrb[4].mxu0 %vm437_vm15, %v304_v41  ;;  %1918 = vmatmul.mubr.msk.bf16.vlgmr.msra.gmra.mrb[4].mxu1 %vm437_vm15, %v304_v41 }
  0x25   : > { %606 = vmatpush1.bf16.msra.mxu0 %v1996_v48  ;;  %647 = vmatpush1.bf16.msra.mxu1 %v1999_v49 }
  0x26   : > { %607 = vmatprep.subr.bf16.mxu0 %v2004_v50  ;;  %648 = vmatprep.subr.bf16.mxu1 %v2007_v51 }
  0x27   : > { %637 = vmatprep.mubr.bf16.mxu0 %v2018_v2  ;;  %678 = vmatprep.mubr.bf16.mxu1 %v2018_v2  ;;  %v746_v2 = vrot.slane %v727_v59, %v2204_v61 }
  0x29   : > { %608 = vmatpush1.bf16.msra.mxu0 %v2002_v52  ;;  %649 = vmatpush1.bf16.msra.mxu1 %v2005_v53 }
  0x2a   : > { %1951 = vmatprep.subr.bf16.mxu0 %v2020_v55 }
  0x2c   : > { %1919 = vmatmul.mubr.msk.bf16.vlgmr.msra.gmra.mrb[8].mxu0 %vm437_vm15, %v304_v41  ;;  %1920 = vmatmul.mubr.msk.bf16.vlgmr.msra.gmra.mrb[8].mxu1 %vm437_vm15, %v304_v41 }
  0x2d   : > { %1952 = vmatpush3.bf16.msra.mxu0 %v2008_v54  ;;  %1955 = vmatprep.mubr.msk.bf16.mxu0 %vm2021_vm0, %v2020_v55  ;;  %vm1792_vm0 = vmand %vm1790_vm5, %vm1791_vm6  ;;  %vm1801_vm5 = vcmask 258052  }
  0x2e   : > { %1953 = vmatprep.subr.bf16.mxu0 %v2020_v55  ;;  %vm1802_vm6 = vmand %vm1801_vm5, %vm1783_vm2 }
  0x2f   : > { %vm2488_vm2 = vmor %vm1802_vm6, %vm1781_vm14 }
  0x31   : > { %1954 = vmatpush3.bf16.msra.mxu0 %v2009_v56  ;;  %v2252_v56 = vld [vmem:[%s2520_s2 + $0x8] sm:$0x1f] }
  0x34   : > { %1956 = vmatmul.mubr.msk.bf16.vlgmr.msra.gmra.mrb[12].mxu0 %vm437_vm15, %v304_v41  ;;  %vm1789_vm15 = vmor %vm2330_vm11, %vm2320_vm10 }
  0x35   : > { %vm2382_vm1 = vmor %vm1792_vm0, %vm1789_vm15 }
  0x36   : > { %vm2403_vm4 = vmor %vm1796_vm3, %vm2382_vm1 }
  0xef   : > { %v475_v5 = vpop.f32.mrb[0].mxu0  ;;  %v516_v6 = vpop.f32.mrb[0].mxu1 }
  0xf0   : > { %v796_v9 = vmul.f32 %v734_v63, %v475_v5  ;;  %v798_v10 = vmul.f32 %v742_v0, %v516_v6  ;;  %v477_v11 = vpop.f32.mrb[1].mxu0  ;;  %v518_v13 = vpop.f32.mrb[1].mxu1  ;;  %v2257_v5 = vld [vmem:[%s2521_s3 + $0x8] sm:$0x1f] }
  0xf1   : > { %v797_v16 = vmul.f32 %v738_v1, %v477_v11  ;;  %v799_v17 = vmul.f32 %v746_v2, %v518_v13  ;;  %v479_v19 = vpop.f32.mrb[2].mxu0  ;;  %v520_v20 = vpop.f32.mrb[2].mxu1  ;;  %v770_v13 = vrot.slane %v2252_v56, %v2201_v60 }
  0xf2   : > { %v878_v23 = vadd.f32 %v816_v3, %v796_v9  ;;  %v880_v24 = vadd.f32 %v824_v4, %v798_v10  ;;  %v480_v25 = vpop.f32.mrb[3].mxu0  ;;  %v521_v26 = vpop.f32.mrb[3].mxu1  ;;  %v774_v9 = vrot.slane %v2252_v56, %v2195_v58  ;;  %v856_v19 = vrot.slane %v2257_v5, %v2195_v58 }
  0xf3   : > { %v879_v27 = vadd.f32 %v820_v7, %v797_v16  ;;  %v881_v28 = vadd.f32 %v828_v8, %v799_v17  ;;  %v766_v8 = vrot.slane %v2252_v56, %v2192_v57  ;;  %v778_v16 = vrot.slane %v2252_v56, %v2204_v61 }
  0xf4   : > { %v891_v29 = vmax.f32 %v878_v23, 0.0  ;;  %v893_v31 = vmax.f32 %v880_v24, 0.0  ;;  %v848_v17 = vrot.slane %v2257_v5, %v2192_v57  ;;  %v852_v26 = vrot.slane %v2257_v5, %v2201_v60 }
  0xf5   : > { %v892_v35 = vmax.f32 %v879_v27, 0.0  ;;  %v894_v36 = vmax.f32 %v881_v28, 0.0  ;;  %v860_v27 = vrot.slane %v2257_v5, %v2204_v61 }
  0xf7   : > { %v917_v40 = vcombine.low %v891_v29, %v892_v35  ;;  %v918_v41 = vcombine.low %v893_v31, %v894_v36  ;;  %v557_v42 = vpop.f32.mrb[4].mxu0  ;;  %v598_v43 = vpop.f32.mrb[4].mxu1 }
  0xf8   : > { %v800_v46 = vmul.f32 %v750_v33, %v557_v42  ;;  %v802_v47 = vmul.f32 %v758_v34, %v598_v43  ;;  %v559_v48 = vpop.f32.mrb[5].mxu0  ;;  %v600_v49 = vpop.f32.mrb[5].mxu1  ;;  %v782_v43 = vrot.slane %v2252_v56, %v2224_v14 }
  0xf9   : > { %v927_v50 = vrot.slane %v917_v40, %v2093_v18  ;;  %v934_v51 = vrot.slane %v918_v41, %v2093_v18  ;;  %v801_v52 = vmul.f32 %v754_v37, %v559_v48  ;;  %v803_v53 = vmul.f32 %v762_v38, %v600_v49  ;;  %v561_v54 = vpop.f32.mrb[6].mxu0  ;;  %v602_v55 = vpop.f32.mrb[6].mxu1 }
  0xfa   : > { %v882_v59 = vadd.f32 %v832_v12, %v800_v46  ;;  %v884_v63 = vadd.f32 %v840_v39, %v802_v47  ;;  %v562_v62 = vpop.f32.mrb[7].mxu0  ;;  %v603_v0 = vpop.f32.mrb[7].mxu1 }
  0xfb   : > { %v949_v1 = vcombine.low %v927_v50, %v934_v51  ;;  %v950_v2 = vcombine.high %v927_v50, %v934_v51  ;;  %v883_v3 = vadd.f32 %v836_v44, %v801_v52  ;;  %v885_v4 = vadd.f32 %v844_v45, %v803_v53 }
  0xfc   : > { %v895_v6 = vmax.f32 %v882_v59, 0.0  ;;  %v897_v7 = vmax.f32 %v884_v63, 0.0 }
  0xfd   : > { %v896_v10 = vmax.f32 %v883_v3, 0.0  ;;  %v898_v11 = vmax.f32 %v885_v4, 0.0  ;;  %v959_v48 = vrot.slane %v949_v1, %v2093_v18  ;;  %v966_v49 = vrot.slane %v950_v2, %v2093_v18 }
  0xfe   : > { %v864_v4 = vrot.slane %v2257_v5, %v2224_v14 }
  0xff   : > { %v919_v20 = vcombine.low %v895_v6, %v896_v10  ;;  %v920_v23 = vcombine.low %v897_v7, %v898_v11  ;;  %v639_v24 = vpop.f32.mrb[8].mxu0  ;;  %v680_v25 = vpop.f32.mrb[8].mxu1 }
 0x100   : > { %v804_v28 = vmul.f32 %v766_v8, %v639_v24  ;;  %v806_v29 = vmul.f32 %v774_v9, %v680_v25  ;;  %v641_v31 = vpop.f32.mrb[9].mxu0  ;;  %v682_v33 = vpop.f32.mrb[9].mxu1 }
 0x101   : > { %v941_v34 = vrot.slane %v919_v20, %v2093_v18  ;;  %v948_v35 = vrot.slane %v920_v23, %v2093_v18  ;;  %v805_v36 = vmul.f32 %v770_v13, %v641_v31  ;;  %v807_v37 = vmul.f32 %v778_v16, %v682_v33  ;;  %v643_v38 = vpop.f32.mrb[10].mxu0  ;;  %v684_v12 = vpop.f32.mrb[10].mxu1 }
 0x102   : > { %v886_v39 = vadd.f32 %v848_v17, %v804_v28  ;;  %v888_v40 = vadd.f32 %v856_v19, %v806_v29  ;;  %v644_v41 = vpop.f32.mrb[11].mxu0  ;;  %v685_v42 = vpop.f32.mrb[11].mxu1 }
 0x103   : > { %v951_v44 = vcombine.low %v941_v34, %v948_v35  ;;  %v952_v45 = vcombine.high %v941_v34, %v948_v35  ;;  %v887_v46 = vadd.f32 %v852_v26, %v805_v36  ;;  %v889_v47 = vadd.f32 %v860_v27, %v807_v37  ;;  %v1798_v35 = vld [vmem:[%s2393_s9] sm:$0xff] }
 0x104   : > { %v899_v50 = vmax.f32 %v886_v39, 0.0  ;;  %v901_v51 = vmax.f32 %v888_v40, 0.0 }
 0x105   : > { %v973_v52 = vrot.slane %v951_v44, %v2093_v18  ;;  %v980_v53 = vrot.slane %v952_v45, %v2093_v18  ;;  %v900_v54 = vmax.f32 %v887_v46, 0.0  ;;  %v902_v55 = vmax.f32 %v889_v47, 0.0 }
 0x107   : > { %v981_v56 = vcombine.low %v959_v48, %v973_v52  ;;  %v2283_v59 = vcombine.high %v959_v48, %v973_v52  ;;  %v983_v63 = vcombine.low %v966_v49, %v980_v53  ;;  %v2285_v62 = vcombine.high %v966_v49, %v980_v53  ;;  %v721_v0 = vpop.f32.mrb[12].mxu0 }
 0x108   : > { %v2287_v1 = vcombine.low %v899_v50, %v900_v54  ;;  %v2289_v2 = vcombine.low %v901_v51, %v902_v55  ;;  %v2291_v3 = vmul.f32 %v782_v43, %v721_v0  ;;  %v1957_v6 = vpop.f32.mrb[13].mxu0 }
 0x109   : > { %v1046_v8 = vrot.slane %v981_v56, %v2192_v57  ;;  %v1050_v9 = vrot.slane %v981_v56, %v2201_v60  ;;  %v1054_v10 = vrot.slane %v981_v56, %v2195_v58  ;;  %v1058_v11 = vrot.slane %v981_v56, %v2204_v61  ;;  %v724_v13 = vpop.f32.mrb[14].mxu0 }
 0x10a   : > { %v1062_v16 = vrot.slane %v981_v56, %v2224_v14  ;;  %v1066_v17 = vrot.slane %v981_v56, %v2230_v21  ;;  %v1070_v19 = vrot.slane %v981_v56, %v2227_v15  ;;  %v1074_v20 = vrot.slane %v981_v56, %v2233_v22  ;;  %v1958_v23 = vpop.f32.mrb[15].mxu0 }
 0x10b   : > { %v1098_v24 = vrot.slane %v983_v63, %v2192_v57  ;;  %v1102_v25 = vrot.slane %v983_v63, %v2201_v60  ;;  %v1106_v26 = vrot.slane %v983_v63, %v2195_v58  ;;  %v1110_v27 = vrot.slane %v983_v63, %v2204_v61 }
 0x10c   : > { %v1114_v29 = vrot.slane %v983_v63, %v2224_v14  ;;  %v1118_v31 = vrot.slane %v983_v63, %v2230_v21  ;;  %v1122_v33 = vrot.slane %v983_v63, %v2227_v15  ;;  %v1126_v34 = vrot.slane %v983_v63, %v2233_v22 }
 0x10d   : > { %v1150_v36 = vrot.slane %v2283_v59, %v2192_v57  ;;  %v1154_v37 = vrot.slane %v2283_v59, %v2201_v60  ;;  %v1158_v38 = vrot.slane %v2283_v59, %v2195_v58  ;;  %v1162_v12 = vrot.slane %v2283_v59, %v2204_v61 }
 0x10e   : > { %v1166_v39 = vrot.slane %v2283_v59, %v2224_v14  ;;  %v1170_v40 = vrot.slane %v2283_v59, %v2230_v21  ;;  %v1174_v41 = vrot.slane %v2283_v59, %v2227_v15  ;;  %v1178_v42 = vrot.slane %v2283_v59, %v2233_v22 }
 0x10f   : > { %v1202_v43 = vrot.slane %v2285_v62, %v2192_v57  ;;  %v1206_v44 = vrot.slane %v2285_v62, %v2201_v60  ;;  %v1210_v45 = vrot.slane %v2285_v62, %v2195_v58  ;;  %v1214_v46 = vrot.slane %v2285_v62, %v2204_v61 }
 0x110   : > { %v1218_v47 = vrot.slane %v2285_v62, %v2224_v14  ;;  %v1222_v48 = vrot.slane %v2285_v62, %v2230_v21  ;;  %v1226_v49 = vrot.slane %v2285_v62, %v2227_v15  ;;  %v1230_v50 = vrot.slane %v2285_v62, %v2233_v22 }
 0x111   : > { %v1922_v51 = vpack.c.bf16 %v1050_v9, %v1046_v8  ;;  %v1923_v52 = vpack.c.bf16 %v1058_v11, %v1054_v10  ;;  %v1924_v53 = vpack.c.bf16 %v1066_v17, %v1062_v16  ;;  %v1925_v54 = vpack.c.bf16 %v1074_v20, %v1070_v19 }
 0x112   : > { %v1928_v55 = vpack.c.bf16 %v1102_v25, %v1098_v24  ;;  %v1929_v56 = vpack.c.bf16 %v1110_v27, %v1106_v26  ;;  %v1930_v59 = vpack.c.bf16 %v1118_v31, %v1114_v29  ;;  %v1931_v63 = vpack.c.bf16 %v1126_v34, %v1122_v33 }
 0x113   : > { %v1417_v21 = vrot.slane %v1922_v51, %v2093_v18  ;;  %v1424_v0 = vrot.slane %v1923_v52, %v2093_v18  ;;  %v1431_v15 = vrot.slane %v1924_v53, %v2093_v18  ;;  %v1438_v22 = vrot.slane %v1925_v54, %v2093_v18 }
 0x114   : > { %v1505_v6 = vrot.slane %v1928_v55, %v2093_v18  ;;  %v1512_v7 = vrot.slane %v1929_v56, %v2093_v18  ;;  %v1519_v8 = vrot.slane %v1930_v59, %v2093_v18  ;;  %v1526_v9 = vrot.slane %v1931_v63, %v2093_v18 }
 0x115   : > { %v1439_v10 = vcombine.low %v1417_v21, %v1424_v0  ;;  %v1440_v11 = vcombine.low %v1431_v15, %v1438_v22  ;;  %v1934_v13 = vpack.c.bf16 %v1154_v37, %v1150_v36  ;;  %v1935_v16 = vpack.c.bf16 %v1162_v12, %v1158_v38 }
 0x116   : > { %v1527_v17 = vcombine.low %v1505_v6, %v1512_v7  ;;  %v1528_v19 = vcombine.low %v1519_v8, %v1526_v9  ;;  %v1936_v20 = vpack.c.bf16 %v1170_v40, %v1166_v39  ;;  %v1937_v23 = vpack.c.bf16 %v1178_v42, %v1174_v41  ;;  %v1807_v39 = vld [vmem:[%s2393_s9 + $0xd] sm:$0xff] }
 0x117   : > { %v1447_v24 = vrot.slane %v1439_v10, %v2093_v18  ;;  %v1454_v25 = vrot.slane %v1440_v11, %v2093_v18  ;;  %v1593_v26 = vrot.slane %v1934_v13, %v2093_v18  ;;  %v1600_v27 = vrot.slane %v1935_v16, %v2093_v18 }
 0x118   : > { %v1535_v29 = vrot.slane %v1527_v17, %v2093_v18  ;;  %v1542_v31 = vrot.slane %v1528_v19, %v2093_v18  ;;  %v1607_v33 = vrot.slane %v1936_v20, %v2093_v18  ;;  %v1614_v34 = vrot.slane %v1937_v23, %v2093_v18 }
 0x119   : > { %v1455_v36 = vcombine.low %v1447_v24, %v1454_v25  ;;  %v1615_v37 = vcombine.low %v1593_v26, %v1600_v27  ;;  %v1940_v38 = vpack.c.bf16 %v1206_v44, %v1202_v43  ;;  %v1941_v12 = vpack.c.bf16 %v1214_v46, %v1210_v45 }
 0x11a   : > { %v1543_v40 = vcombine.low %v1535_v29, %v1542_v31  ;;  %v1616_v41 = vcombine.low %v1607_v33, %v1614_v34  ;;  %v1942_v42 = vpack.c.bf16 %v1222_v48, %v1218_v47  ;;  %v1943_v51 = vpack.c.bf16 %v1230_v50, %v1226_v49  ;;  %v1813_v47 = vld [vmem:[%s2393_s9 + $0x1a] sm:$0xff] }
 0x11b   : > { %v1623_v52 = vrot.slane %v1615_v37, %v2093_v18  ;;  %v1681_v53 = vrot.slane %v1940_v38, %v2093_v18  ;;  %v1688_v54 = vrot.slane %v1941_v12, %v2093_v18  ;;  %v1799_v55 = vsel %vm2403_vm4, %v1455_v36, %v1798_v35 }
 0x11c   : > { %v1630_v56 = vrot.slane %v1616_v41, %v2093_v18  ;;  %v1695_v43 = vrot.slane %v1942_v42, %v2093_v18  ;;  %v1702_v44 = vrot.slane %v1943_v51, %v2093_v18  ;;  %1800 = vst [vmem:[%s2393_s9] sm:$0xff] %v1799_v55  ;;  %v1808_v45 = vsel %vm2403_vm4, %v1543_v40, %v1807_v39 }
 0x11d   : > { %v1703_v46 = vcombine.low %v1681_v53, %v1688_v54  ;;  %1809 = vst [vmem:[%s2393_s9 + $0xd] sm:$0xff] %v1808_v45  ;;  %v993_v48 = vrot.slane %v2287_v1, %v2093_v18  ;;  %v1000_v49 = vrot.slane %v2289_v2, %v2093_v18  ;;  %v890_v50 = vadd.f32 %v864_v4, %v2291_v3  ;;  %v1819_v2 = vld [vmem:[%s2393_s9 + $0x27] sm:$0xff] }
 0x11e   : > { %v1631_v59 = vcombine.low %v1623_v52, %v1630_v56  ;;  %v1704_v63 = vcombine.low %v1695_v43, %v1702_v44 }
 0x11f   : > { %v1711_v21 = vrot.slane %v1703_v46, %v2093_v18  ;;  %v1008_v0 = vcombine.low %v993_v48, %v1000_v49  ;;  %v1009_v15 = vcombine.high %v993_v48, %v1000_v49  ;;  %v903_v22 = vmax.f32 %v890_v50, 0.0 }
 0x120   : > { %v1718_v62 = vrot.slane %v1704_v63, %v2093_v18  ;;  %v1814_v1 = vsel %vm2403_vm4, %v1631_v59, %v1813_v47 }
 0x121   : > { %1815 = vst [vmem:[%s2393_s9 + $0x1a] sm:$0xff] %v1814_v1  ;;  %v1007_v6 = vrot.slane %v903_v22, %v2093_v18  ;;  %v1017_v3 = vrot.slane %v1008_v0, %v2093_v18  ;;  %v1024_v9 = vrot.slane %v1009_v15, %v2093_v18 }
 0x122   : > { %v1719_v7 = vcombine.low %v1711_v21, %v1718_v62 }
 0x123   : > { %v1010_v5 = vcombine.high %v1007_v6, %v1007_v6  ;;  %v1031_v4 = vrot.slane %v1007_v6, %v2093_v18 }
 0x124   : > { %v1820_v8 = vsel %vm2403_vm4, %v1719_v7, %v1819_v2 }
 0x125   : > { %1821 = vst [vmem:[%s2393_s9 + $0x27] sm:$0xff] %v1820_v8  ;;  %v1038_v10 = vrot.slane %v1010_v5, %v2093_v18  ;;  %v1039_v11 = vcombine.low %v1017_v3, %v1031_v4  ;;  %v1040_v13 = vcombine.high %v1017_v3, %v1031_v4  ;;  %v1804_v3 = vld [vmem:[%s2393_s9 + $0x8] sm:$0x1f] }
 0x127   : > { %v1041_v16 = vcombine.low %v1024_v9, %v1038_v10  ;;  %v1042_v17 = vcombine.high %v1024_v9, %v1038_v10  ;;  %v1078_v19 = vrot.slane %v1039_v11, %v2192_v57  ;;  %v1082_v20 = vrot.slane %v1039_v11, %v2201_v60 }
 0x128   : > { %v1086_v23 = vrot.slane %v1039_v11, %v2195_v58  ;;  %v1090_v24 = vrot.slane %v1039_v11, %v2204_v61  ;;  %v1094_v25 = vrot.slane %v1039_v11, %v2224_v14  ;;  %v1182_v29 = vrot.slane %v1040_v13, %v2192_v57 }
 0x129   : > { %v1130_v26 = vrot.slane %v1041_v16, %v2192_v57  ;;  %v1134_v27 = vrot.slane %v1041_v16, %v2201_v60  ;;  %v1138_v28 = vrot.slane %v1041_v16, %v2195_v58  ;;  %v1142_v31 = vrot.slane %v1041_v16, %v2204_v61 }
 0x12a   : > { %v1146_v33 = vrot.slane %v1041_v16, %v2224_v14  ;;  %v1186_v34 = vrot.slane %v1040_v13, %v2201_v60  ;;  %v1190_v35 = vrot.slane %v1040_v13, %v2195_v58  ;;  %v1194_v36 = vrot.slane %v1040_v13, %v2204_v61 }
 0x12b   : > { %v1198_v37 = vrot.slane %v1040_v13, %v2224_v14  ;;  %v1234_v38 = vrot.slane %v1042_v17, %v2192_v57  ;;  %v1238_v12 = vrot.slane %v1042_v17, %v2201_v60  ;;  %v1242_v39 = vrot.slane %v1042_v17, %v2195_v58  ;;  %v1816_v13 = vld [vmem:[%s2393_s9 + $0x22] sm:$0x1f] }
 0x12c   : > { %v1250_v40 = vrot.slane %v1042_v17, %v2224_v14  ;;  %v1315_v41 = vpack.c.bf16 %v1094_v25, %v1094_v25  ;;  %v1328_v42 = vpack.c.bf16 %v1146_v33, %v1146_v33  ;;  %v1246_v51 = vrot.slane %v1042_v17, %v2204_v61 }
 0x12d   : > { %v1926_v52 = vpack.c.bf16 %v1082_v20, %v1078_v19  ;;  %v1927_v53 = vpack.c.bf16 %v1090_v24, %v1086_v23  ;;  %v1932_v54 = vpack.c.bf16 %v1134_v27, %v1130_v26  ;;  %v1341_v55 = vpack.c.bf16 %v1198_v37, %v1198_v37  ;;  %v1822_v23 = vld [vmem:[%s2393_s9 + $0x2f] sm:$0x1f] }
 0x12e   : > { %v1478_v56 = vrot.slane %v1315_v41, %v2093_v18  ;;  %v1933_v43 = vpack.c.bf16 %v1142_v31, %v1138_v28  ;;  %v1566_v44 = vrot.slane %v1328_v42, %v2093_v18  ;;  %v1938_v14 = vpack.c.bf16 %v1186_v34, %v1182_v29 }
 0x12f   : > { %v1464_v57 = vrot.slane %v1926_v52, %v2093_v18  ;;  %v1471_v60 = vrot.slane %v1927_v53, %v2093_v18  ;;  %v1552_v58 = vrot.slane %v1932_v54, %v2093_v18  ;;  %v1354_v45 = vpack.c.bf16 %v1250_v40, %v1250_v40 }
 0x130   : > { %v1559_v46 = vrot.slane %v1933_v43, %v2093_v18  ;;  %v1939_v61 = vpack.c.bf16 %v1194_v36, %v1190_v35  ;;  %v1640_v48 = vrot.slane %v1938_v14, %v2093_v18  ;;  %v1944_v49 = vpack.c.bf16 %v1238_v12, %v1234_v38 }
 0x131   : > { %v1479_v47 = vcombine.low %v1464_v57, %v1471_v60  ;;  %v1654_v63 = vrot.slane %v1341_v55, %v2093_v18  ;;  %v1945_v21 = vpack.c.bf16 %v1246_v51, %v1242_v39  ;;  %v1493_v15 = vrot.slane %v1478_v56, %v2093_v18 }
 0x132   : > { %v1567_v50 = vcombine.low %v1552_v58, %v1559_v46  ;;  %v1647_v59 = vrot.slane %v1939_v61, %v2093_v18  ;;  %v1581_v22 = vrot.slane %v1566_v44, %v2093_v18  ;;  %v1728_v62 = vrot.slane %v1944_v49, %v2093_v18 }
 0x133   : > { %v1486_v0 = vrot.slane %v1479_v47, %v2093_v18  ;;  %v1735_v7 = vrot.slane %v1945_v21, %v2093_v18  ;;  %v1742_v5 = vrot.slane %v1354_v45, %v2093_v18  ;;  %v1669_v9 = vrot.slane %v1654_v63, %v2093_v18 }
 0x134   : > { %v1574_v2 = vrot.slane %v1567_v50, %v2093_v18  ;;  %v1655_v6 = vcombine.low %v1640_v48, %v1647_v59 }
 0x135   : > { %v1494_v4 = vcombine.low %v1486_v0, %v1493_v15  ;;  %v1743_v10 = vcombine.low %v1728_v62, %v1735_v7  ;;  %v1757_v19 = vrot.slane %v1742_v5, %v2093_v18 }
 0x136   : > { %v1582_v30 = vcombine.low %v1574_v2, %v1581_v22  ;;  %v1662_v8 = vrot.slane %v1655_v6, %v2093_v18 }
 0x137   : > { %v1805_v11 = vsel %vm2488_vm2, %v1494_v4, %v1804_v3  ;;  %v1750_v17 = vrot.slane %v1743_v10, %v2093_v18 }
 0x138   : > { %v1670_v16 = vcombine.low %v1662_v8, %v1669_v9  ;;  %1806 = vst [vmem:[%s2393_s9 + $0x8] sm:$0x1f] %v1805_v11  ;;  %v1811_v20 = vsel %vm2488_vm2, %v1582_v30, %v1810_v32 }
 0x139   : > { %1812 = vst [vmem:[%s2393_s9 + $0x15] sm:$0x1f] %v1811_v20  ;;  %v1758_v24 = vcombine.low %v1750_v17, %v1757_v19 }
 0x13a   : > { %v1817_v25 = vsel %vm2488_vm2, %v1670_v16, %v1816_v13 }
 0x13b   : > { %1818 = vst [vmem:[%s2393_s9 + $0x22] sm:$0x1f] %v1817_v25  ;;  %v1823_v26 = vsel %vm2488_vm2, %v1758_v24, %v1822_v23 }
 0x13c   : > { %1824 = vst [vmem:[%s2393_s9 + $0x2f] sm:$0x1f] %v1823_v26 }
 0x13d PF: > { %s14_s15 = sadd.s32 1, %s2016_s15  }
 0x13e   : > { %p11_p4 = scmp.ge.s32.totalorder %s14_s15, 6  }
 0x140   :  { %13 = sbr.rel (!%p11_p4) target bundleno = 1 (0x1), region = 66 }

// kernel: _lambda_.5
= control target key start
LH: loop header
LB: loop body
LE: loop exit
PB: predicated region body
PF: predicated region fallthrough
CT: control target
= control target key end

     0   :  { %s6188_s15 = smov 0   ;;  %s7591_s0 = inlined_call_operand.vmem [shape: bf16[16,19,224], index: 0, kind: input, shape index: {}]   ;;  %s7592_s1 = inlined_call_operand.vmem [shape: bf16[5,224,240], index: 1, kind: input, shape index: {}]   ;;  %s7593_s2 = inlined_call_operand.vmem [shape: f32[1,240], index: 2, kind: input, shape index: {}]   ;;  %s7594_s3 = inlined_call_operand.vmem [shape: f32[1,240], index: 3, kind: input, shape index: {}]   ;;  %s7595_s4 = inlined_call_operand.vmem [shape: bf16[16,15,240], index: 4, kind: output, shape index: {}]  }
   0x1 LB: > { %s5405_s16 = sadd.s32 4294967295, %s6160_s15   ;;  %p5409_p0 = scmp.ge.s32.totalorder %s6160_s15, 1  ;;  %s6160_s15 = sphi %s6188_s15, %s14_s15  }
   0x2   : > { %p164_p1 = scmp.lt.s32.totalorder %s6160_s15, 5 }
   0x4   : > { %p165_p2 = pnand %p5409_p0, %p164_p1 }
   0x6   : > { %168 = sbr.rel (%p165_p2) target bundleno = 488 (0x1e8), region = 36 }
   0xd   : > { %v5944_v0 = vld [vmem:[%s7592_s1 + $0xe4] ss:$8 sps:$4 sm:$0xff]   ;;  %v5948_v2 = vld [vmem:[%s7592_s1 + $0xe0] ss:$8 sps:$4 sm:$0xff]   ;;  %v5950_v4 = vld [vmem:[%s7592_s1 + $0xf4] ss:$8 sps:$4 sm:$0xff]   ;;  %v234_v32 = vlaneseq }
   0xe   : > { %v5946_v1 = vld [vmem:[%s7592_s1 + $0x1c4] ss:$8 sps:$4 sm:$0xff]   ;;  %978 = vmatprep.subr.bf16.mxu1 %v5944_v0  ;;  %v5949_v3 = vld [vmem:[%s7592_s1 + $0x1c0] ss:$8 sps:$4 sm:$0xff]   ;;  %v5952_v5 = vld [vmem:[%s7592_s1 + $0x1d4] ss:$8 sps:$4 sm:$0xff]  }
   0xf   : > { %2367 = vmatprep.subr.bf16.mxu0 %v5946_v1  ;;  %979 = vmatpush1.bf16.msra.mxu1 %v5948_v2  ;;  %v5954_v6 = vld [vmem:[%s7592_s1 + $0xf0] ss:$8 sps:$4 sm:$0xff]   ;;  %v5956_v8 = vld [vmem:[%s7592_s1 + $0x104] ss:$8 sps:$4 sm:$0xff]   ;;  %v5960_v10 = vld [vmem:[%s7592_s1 + $0x100] ss:$8 sps:$4 sm:$0xff]  }
  0x10   : > { %2368 = vmatpush1.bf16.msra.mxu0 %v5949_v3  ;;  %980 = vmatprep.subr.bf16.mxu1 %v5950_v4  ;;  %v5955_v7 = vld [vmem:[%s7592_s1 + $0x1d0] ss:$8 sps:$4 sm:$0xff]   ;;  %v5958_v9 = vld [vmem:[%s7592_s1 + $0x1e4] ss:$8 sps:$4 sm:$0xff]   ;;  %v5961_v11 = vld [vmem:[%s7592_s1 + $0x1e0] ss:$8 sps:$4 sm:$0xff]  }
  0x11   : > { %2369 = vmatprep.subr.bf16.mxu0 %v5952_v5  ;;  %v5962_v12 = vld [vmem:[%s7592_s1 + $0x114] ss:$8 sps:$4 sm:$0xff]   ;;  %v5966_v14 = vld [vmem:[%s7592_s1 + $0x110] ss:$8 sps:$4 sm:$0xff]   ;;  %v5968_v16 = vld [vmem:[%s7592_s1 + $0x124] ss:$8 sps:$4 sm:$0xff]  }
  0x12   : > { %v5964_v13 = vld [vmem:[%s7592_s1 + $0x1f4] ss:$8 sps:$4 sm:$0xff]   ;;  %v5967_v15 = vld [vmem:[%s7592_s1 + $0x1f0] ss:$8 sps:$4 sm:$0xff]   ;;  %v5970_v17 = vld [vmem:[%s7592_s1 + $0x204] ss:$8 sps:$4 sm:$0xff]  }
  0x13   : > { %981 = vmatpush1.bf16.msra.mxu1 %v5954_v6  ;;  %v5972_v18 = vld [vmem:[%s7592_s1 + $0x120] ss:$8 sps:$4 sm:$0xff]   ;;  %v5974_v20 = vld [vmem:[%s7592_s1 + $0x134] ss:$8 sps:$4 sm:$0xff]   ;;  %v5978_v22 = vld [vmem:[%s7592_s1 + $0x130] ss:$8 sps:$4 sm:$0xff]  }
  0x14   : > { %2370 = vmatpush1.bf16.msra.mxu0 %v5955_v7  ;;  %982 = vmatprep.subr.bf16.mxu1 %v5956_v8  ;;  %v5973_v19 = vld [vmem:[%s7592_s1 + $0x200] ss:$8 sps:$4 sm:$0xff]   ;;  %v5976_v21 = vld [vmem:[%s7592_s1 + $0x214] ss:$8 sps:$4 sm:$0xff]   ;;  %s5410_s13 = sshll.u32 %s5405_s16, 2  ;;  %v6303_v38 = vshrl.u32 %v234_v32, 7 }
  0x15   : > { %2371 = vmatprep.subr.bf16.mxu0 %v5958_v9  ;;  %v5979_v23 = vld [vmem:[%s7592_s1 + $0x210] ss:$8 sps:$4 sm:$0xff]   ;;  %v5980_v24 = vld [vmem:[%s7592_s1 + $0x144] ss:$8 sps:$4 sm:$0xff]   ;;  %p193_p3 = scmp.lt.s32.totalorder %s5410_s13, 15  ;;  %vm965_vm0 = vcmask 785408  }
  0x16   : > { %v5982_v25 = vld [vmem:[%s7592_s1 + $0x224] ss:$8 sps:$4 sm:$0xff]   ;;  %v5984_v26 = vld [vmem:[%s7592_s1 + $0x140] ss:$8 sps:$4 sm:$0xff]   ;;  %v5986_v28 = vld [vmem:[%s7592_s1 + $0x154] ss:$8 sps:$4 sm:$0xff]  }
  0x17   : > { %983 = vmatpush1.bf16.msra.mxu1 %v5960_v10  ;;  %v5985_v27 = vld [vmem:[%s7592_s1 + $0x220] ss:$8 sps:$4 sm:$0xff]   ;;  %v5988_v29 = vld [vmem:[%s7592_s1 + $0x234] ss:$8 sps:$4 sm:$0xff]   ;;  %s7662_s13 = smov (!%p193_p3, %s5410_s13), 15  ;;  %7618 = vst [vmem:[#allocation2_spill] sm:$0xff] %v6303_v38 }
  0x18   : > { %2372 = vmatpush1.bf16.msra.mxu0 %v5961_v11  ;;  %984 = vmatprep.subr.bf16.mxu1 %v5962_v12  ;;  %v6162_v30 = vmov 1966171168   ;;  %v5990_v33 = vld [vmem:[%s7592_s1 + $0x150] ss:$8 sps:$4 sm:$0xff]   ;;  %v5992_v35 = vld [vmem:[%s7592_s1 + $0x164] ss:$8 sps:$4 sm:$0xff]  }
  0x19   : > { %2373 = vmatprep.subr.bf16.mxu0 %v5964_v13  ;;  %v232_v31 = vunpack.c.l.s4 %v6162_v30  ;;  %v5991_v34 = vld [vmem:[%s7592_s1 + $0x230] ss:$8 sps:$4 sm:$0xff]   ;;  %v5994_v36 = vld [vmem:[%s7592_s1 + $0x244] ss:$8 sps:$4 sm:$0xff]   ;;  %s5934_s11 = smul.u32 24, %s7662_s13  ;;  %vm5321_vm1 = vcmask 1043456  }
  0x1a   : > { %v5996_v39 = vld [vmem:[%s7592_s1 + $0x160] ss:$8 sps:$4 sm:$0xff]   ;;  %v5998_v41 = vld [vmem:[%s7592_s1 + $0x174] ss:$8 sps:$4 sm:$0xff]   ;;  %v6002_v44 = vld [vmem:[%s7592_s1 + $0x170] ss:$8 sps:$4 sm:$0xff]  }
  0x1b   : > { %985 = vmatpush1.bf16.msra.mxu1 %v5966_v14  ;;  %v233_v37 = vunpack.c.0.s8 %v232_v31  ;;  %v5997_v40 = vld [vmem:[%s7592_s1 + $0x240] ss:$8 sps:$4 sm:$0xff]   ;;  %v6000_v42 = vld [vmem:[%s7592_s1 + $0x254] ss:$8 sps:$4 sm:$0xff]   ;;  %s6320_s24 = scalar_lea.vmem %s7591_s0, %s5934_s11  ;;  %v6003_v45 = vld [vmem:[%s7592_s1 + $0x250] ss:$8 sps:$4 sm:$0xff]  }
  0x1c   : > { %2374 = vmatpush1.bf16.msra.mxu0 %v5967_v15  ;;  %986 = vmatprep.subr.bf16.mxu1 %v5968_v16  ;;  %v6004_v46 = vld [vmem:[%s7592_s1 + $0x184] ss:$8 sps:$4 sm:$0xff]   ;;  %v5417_v50 = vld.sshfl [vmem:[%s6320_s24 + $0x18] sm:$0xff pattern:$0x75316420]  ;;  %vm5322_vm2 = vcmask 916484  }
  0x1d   : > { %2375 = vmatprep.subr.bf16.mxu0 %v5970_v17  ;;  %v6323_v43 = vsub.s32 %v233_v37, %v6303_v38  ;;  %v6006_v47 = vld [vmem:[%s7592_s1 + $0x264] ss:$8 sps:$4 sm:$0xff]   ;;  %v6008_v53 = vld [vmem:[%s7592_s1 + $0x180] ss:$8 sps:$4 sm:$0xff]   ;;  %v278_v56 = vcombine.high %v5417_v50, %v5417_v50  ;;  %v6010_v62 = vld [vmem:[%s7592_s1 + $0x194] ss:$8 sps:$4 sm:$0xff]  }
  0x1e   : > { %v5415_v48 = vld.sshfl [vmem:[%s6320_s24] sm:$0xff pattern:$0x75316420]  ;;  %v5416_v49 = vld.sshfl [vmem:[%s6320_s24 + $0x8] sm:$0xff pattern:$0x75316420]  ;;  %vm7396_vm5 = vmor %vm5322_vm2, %vm5321_vm1 }
  0x1f   : > { %987 = vmatpush1.bf16.msra.mxu1 %v5972_v18  ;;  %v230_v51 = vcombine.high %v5415_v48, %v5415_v48  ;;  %v6341_v52 = vrot.slane %v5415_v48, %v6323_v43  ;;  %v254_v54 = vcombine.high %v5416_v49, %v5416_v49  ;;  %v6347_v55 = vrot.slane %v5416_v49, %v6323_v43  ;;  %v6009_v58 = vld [vmem:[%s7592_s1 + $0x260] ss:$8 sps:$4 sm:$0xff]   ;;  %v6012_v63 = vld [vmem:[%s7592_s1 + $0x274] ss:$8 sps:$4 sm:$0xff]   ;;  %v6014_v4 = vld [vmem:[%s7592_s1 + $0x190] ss:$8 sps:$4 sm:$0xff]  }
  0x20   : > { %2376 = vmatpush1.bf16.msra.mxu0 %v5973_v19  ;;  %988 = vmatprep.subr.bf16.mxu1 %v5974_v20  ;;  %v6350_v57 = vrot.slane %v5417_v50, %v6323_v43  ;;  %v6375_v2 = vrot.slane %v278_v56, %v6323_v43  ;;  %v6015_v5 = vld [vmem:[%s7592_s1 + $0x270] ss:$8 sps:$4 sm:$0xff]   ;;  %v5548_v10 = vld.sshfl [vmem:[%s6320_s24] sm:$0xfa pattern:$0x75316420] }
  0x21   : > { %2377 = vmatprep.subr.bf16.mxu0 %v5976_v21  ;;  %v6356_v59 = vrot.slane %v230_v51, %v6323_v43  ;;  %v245_v60 = vcombine.high %v6341_v52, %v6341_v52  ;;  %v416_v61 = vunpack.i.h.s16 %v6341_v52  ;;  %v6368_v0 = vrot.slane %v254_v54, %v6323_v43  ;;  %v5550_v15 = vld.sshfl [vmem:[%s6320_s24 + $0x10] sm:$0x5 pattern:$0x75316420]  ;;  %v6016_v21 = vld [vmem:[%s7592_s1 + $0x1a4] ss:$8 sps:$4 sm:$0xff]  }
  0x22   : > { %v6372_v1 = vcombine.high %v6347_v55, %v6347_v55  ;;  %v424_v3 = vunpack.i.h.s16 %v6347_v55  ;;  %v431_v9 = vunpack.i.h.s16 %v6350_v57  ;;  %v5551_v20 = vld.sshfl [vmem:[%s6320_s24 + $0x18] sm:$0xfa pattern:$0x75316420]  ;;  %v1603_v30 = vrot.slane %v5548_v10, %v6323_v43  ;;  %v6020_v31 = vld [vmem:[%s7592_s1 + $0x1a0] ss:$8 sps:$4 sm:$0xff]  }
  0x23   : > { %989 = vmatpush1.bf16.msra.mxu1 %v5978_v22  ;;  %v246_v6 = vcombine.high %v6356_v59, %v6356_v59  ;;  %v418_v7 = vunpack.i.h.s16 %v6356_v59  ;;  %v420_v8 = vunpack.i.h.s16 %v245_v60  ;;  %v6391_v11 = vcombine.high %v6368_v0, %v6368_v0  ;;  %v6018_v22 = vld [vmem:[%s7592_s1 + $0x284] ss:$8 sps:$4 sm:$0xff]   ;;  %v6026_v51 = vld [vmem:[%s7592_s1 + $0x1b0] ss:$8 sps:$4 sm:$0xff]   ;;  %s5833_s25 = sshll.u32 %s7662_s13, 4 }
  0x24   : > { %2378 = vmatpush1.bf16.msra.mxu0 %v5979_v23  ;;  %990 = vmatprep.subr.bf16.mxu1 %v5980_v24  ;;  %v426_v12 = vunpack.i.h.s16 %v6368_v0  ;;  %v428_v13 = vunpack.i.h.s16 %v6372_v1  ;;  %v5451_v14 = vpack.i.b16 %v6356_v59, %v416_v61  ;;  %v6398_v19 = vpack.i.b16 %v6368_v0, %v424_v3  ;;  %s7392_s27 = scalar_lea.vmem %s7595_s4, %s5833_s25 }
  0x25   : > { %2379 = vmatprep.subr.bf16.mxu0 %v5982_v25  ;;  %v422_v16 = vunpack.i.h.s16 %v246_v6  ;;  %v5452_v17 = vpack.i.b16 %v245_v60, %v418_v7  ;;  %v5453_v18 = vpack.i.b16 %v246_v6, %v420_v8  ;;  %v7599_v23 = vunpack.i.h.s16 %v6391_v11  ;;  %v6027_v60 = vld [vmem:[%s7592_s1 + $0x290] ss:$8 sps:$4 sm:$0xff]   ;;  %v6033_v7 = vld [vmem:[%s7592_s1 + $0x2a4] ss:$8 sps:$4 sm:$0xff]  }
  0x26   : > { %v6409_v24 = vpack.i.b16 %v6372_v1, %v426_v12  ;;  %v6412_v25 = vpack.i.b16 %v6391_v11, %v428_v13  ;;  %v1958_v50 = vcombine.low %v6368_v0, %v6372_v1  ;;  %v6464_v56 = vcombine.high %v6350_v57, %v6350_v57 }
  0x27   : > { %991 = vmatpush1.bf16.msra.mxu1 %v5984_v26  ;;  %v6415_v26 = vpack.i.b16 %v6375_v2, %v431_v9  ;;  %v543_v32 = vpack.i.b16 %v431_v9, %v7599_v23  ;;  %vm5326_vm3 = vsmask.f32 3328  ;;  %vm5329_vm4 = vsmask.f32 7424 }
  0x28   : > { %2380 = vmatpush1.bf16.msra.mxu0 %v5985_v27  ;;  %992 = vmatprep.subr.bf16.mxu1 %v5986_v28  ;;  %v5454_v27 = vpack.i.b16 %v6347_v55, %v422_v16  ;;  %v566_v28 = vcombine.low %v5451_v14, %v5452_v17  ;;  %v1980_v6 = vrot.slane %v1958_v50, %v6323_v43  ;;  %vm7419_vm6 = vmand %vm5321_vm1, %vm5326_vm3 }
  0x29   : > { %2381 = vmatprep.subr.bf16.mxu0 %v5988_v29  ;;  %v1596_v29 = vcombine.high %v5548_v10, %v5548_v10  ;;  %v6492_v16 = vrot.slane %v5551_v20, %v6323_v43  ;;  %v5499_v50 = vpack.i.b16 %v6350_v57, %v6391_v11  ;;  %v5515_v57 = vcombine.high %v6341_v52, %v6356_v59  ;;  %vm5330_vm7 = vmand %vm5322_vm2, %vm5329_vm4 }
  0x2a   : > { %v567_v37 = vcombine.low %v5453_v18, %v5454_v27  ;;  %vm7436_vm8 = vmor %vm5330_vm7, %vm7419_vm6 }
  0x2b   : > { %993 = vmatpush1.bf16.msra.mxu1 %v5990_v33  ;;  %v568_v33 = vcombine.low %v6398_v19, %v6409_v24 }
  0x2c   : > { %2382 = vmatpush1.bf16.msra.mxu0 %v5991_v34  ;;  %994 = vmatprep.subr.bf16.mxu1 %v5992_v35  ;;  %v6427_v34 = vrot.slane %v5550_v15, %v6323_v43  ;;  %v1658_v35 = vcombine.high %v5551_v20, %v5551_v20  ;;  %v632_v15 = vcombine.low %v6375_v2, %v6464_v56  ;;  %v6028_v20 = vld [vmem:[%s7592_s1] ss:$8 sps:$4 sm:$0xff]  }
  0x2d   : > { %2383 = vmatprep.subr.bf16.mxu0 %v5994_v36  ;;  %v6021_v36 = vld [vmem:[%s7592_s1 + $0x280] ss:$8 sps:$4 sm:$0xff]  }
  0x2e   : > { %v6452_v49 = vrot.slane %v1658_v35, %v6323_v43 }
  0x2f   : > { %995 = vmatpush1.bf16.msra.mxu1 %v5996_v39  ;;  %v576_v39 = vrot.slane %v566_v28, %v6323_v43 }
  0x30   : > { %2384 = vmatpush1.bf16.msra.mxu0 %v5997_v40  ;;  %996 = vmatprep.subr.bf16.mxu1 %v5998_v41  ;;  %v6434_v40 = vrot.slane %v1596_v29, %v6323_v43  ;;  %v6022_v41 = vld [vmem:[%s7592_s1 + $0x1b4] ss:$8 sps:$4 sm:$0xff]   ;;  %v7596_v29 = vunpack.i.h.s16 %v6452_v49 }
  0x31   : > { %2385 = vmatprep.subr.bf16.mxu0 %v6000_v42  ;;  %v6024_v42 = vld [vmem:[%s7592_s1 + $0x294] ss:$8 sps:$4 sm:$0xff]  }
  0x32   : > { %v6449_v48 = vcombine.high %v6434_v40, %v6434_v40 }
  0x33   : > { %997 = vmatpush1.bf16.msra.mxu1 %v6002_v44  ;;  %v569_v44 = vcombine.low %v6412_v25, %v543_v32 }
  0x34   : > { %2386 = vmatpush1.bf16.msra.mxu0 %v6003_v45  ;;  %998 = vmatprep.subr.bf16.mxu1 %v6004_v46  ;;  %v590_v45 = vrot.slane %v568_v33, %v6323_v43  ;;  %v6444_v46 = vcombine.high %v1603_v30, %v1603_v30  ;;  %v6503_v33 = vrot.slane %v632_v15, %v6323_v43 }
  0x35   : > { %2387 = vmatprep.subr.bf16.mxu0 %v6006_v47  ;;  %v583_v47 = vrot.slane %v567_v37, %v6323_v43  ;;  %v6036_v37 = vld [vmem:[%s7592_s1 + $0x14] ss:$8 sps:$4 sm:$0xff]   ;;  %v6563_v15 = vrot.slane %v5515_v57, %v6323_v43  ;;  %v6046_v57 = vld [vmem:[%s7592_s1 + $0x30] ss:$8 sps:$4 sm:$0xff]  }
  0x36   : > { %v1956_v54 = vcombine.low %v6434_v40, %v6444_v46 }
  0x37   : > { %999 = vmatpush1.bf16.msra.mxu1 %v6008_v53  ;;  %v597_v53 = vrot.slane %v569_v44, %v6323_v43  ;;  %v599_v61 = vcombine.high %v576_v39, %v583_v47  ;;  %v598_v12 = vcombine.low %v576_v39, %v583_v47  ;;  %v1673_v39 = vcombine.high %v6492_v16, %v6492_v16  ;;  %v6031_v44 = vld [vmem:[%s7592_s1 + $0x2a0] ss:$8 sps:$4 sm:$0xff]   ;;  %v6034_v47 = vld [vmem:[%s7592_s1 + $0x10] ss:$8 sps:$4 sm:$0xff]  }
  0x38   : > { %2388 = vmatpush1.bf16.msra.mxu0 %v6009_v58  ;;  %1000 = vmatprep.subr.bf16.mxu1 %v6010_v62  ;;  %v6468_v58 = vcombine.high %v6375_v2, %v6375_v2  ;;  %v5588_v62 = vpack.i.b16 %v6452_v49, %v6427_v34 }
  0x39   : > { %2389 = vmatprep.subr.bf16.mxu0 %v6012_v63  ;;  %v1957_v63 = vcombine.low %v6449_v48, %v6347_v55  ;;  %v601_v3 = vcombine.high %v590_v45, %v597_v53  ;;  %v615_v8 = vrot.slane %v599_v61, %v6323_v43  ;;  %v600_v14 = vcombine.low %v590_v45, %v597_v53  ;;  %v6039_v53 = vld [vmem:[%s7592_s1 + $0x2b4] ss:$8 sps:$4 sm:$0xff]  }
  0x3a   : > { %v1959_v9 = vcombine.low %v6391_v11, %v5588_v62  ;;  %v6534_v62 = vpack.i.b16 %v1673_v39, %v7596_v29 }
  0x3b   : > { %1001 = vmatpush1.bf16.msra.mxu1 %v6014_v4  ;;  %v6030_v4 = vld [vmem:[%s7592_s1 + $0x4] ss:$8 sps:$4 sm:$0xff]   ;;  %v1973_v10 = vrot.slane %v1957_v63, %v6323_v43  ;;  %v629_v13 = vrot.slane %v601_v3, %v6323_v43  ;;  %v622_v27 = vrot.slane %v600_v14, %v6323_v43 }
  0x3c   : > { %2390 = vmatpush1.bf16.msra.mxu0 %v6015_v5  ;;  %1002 = vmatprep.subr.bf16.mxu1 %v6016_v21  ;;  %v1966_v5 = vrot.slane %v1956_v54, %v6323_v43  ;;  %v1987_v17 = vrot.slane %v1959_v9, %v6323_v43  ;;  %v608_v21 = vrot.slane %v598_v12, %v6323_v43  ;;  %v6042_v54 = vld [vmem:[%s7592_s1 + $0x24] ss:$8 sps:$4 sm:$0xff]  }
  0x3d   : > { %2391 = vmatprep.subr.bf16.mxu0 %v6018_v22  ;;  %v631_v22 = vcombine.low %v615_v8, %v629_v13 }
  0x3e   : > { %v1989_v18 = vcombine.high %v1966_v5, %v1973_v10  ;;  %v1988_v28 = vcombine.low %v1966_v5, %v1973_v10  ;;  %v1991_v30 = vcombine.high %v1980_v6, %v1987_v17  ;;  %v1990_v32 = vcombine.low %v1980_v6, %v1987_v17  ;;  %v5419_v5 = vld.sshfl [vmem:[%s6320_s24 + $0x30] sm:$0xff pattern:$0x75316420] }
  0x3f   : > { %1003 = vmatpush1.bf16.msra.mxu1 %v6020_v31  ;;  %5495 = vmatprep.mubr.msk.bf16.mxu1 %vm965_vm0, %v631_v22  ;;  %v630_v35 = vcombine.low %v608_v21, %v622_v27  ;;  %v326_v10 = vcombine.high %v5419_v5, %v5419_v5  ;;  %v6549_v12 = vrot.slane %v5419_v5, %v6323_v43  ;;  %v6037_v17 = vld [vmem:[%s7592_s1 + $0x2b0] ss:$8 sps:$4 sm:$0xff]   ;;  %v6051_v5 = vld [vmem:[%s7592_s1 + $0x2d4] ss:$8 sps:$4 sm:$0xff]  }
  0x40   : > { %2392 = vmatpush1.bf16.msra.mxu0 %v6021_v36  ;;  %1004 = vmatprep.subr.bf16.mxu1 %v6022_v41  ;;  %v2005_v31 = vrot.slane %v1989_v18, %v6323_v43  ;;  %v1998_v36 = vrot.slane %v1988_v28, %v6323_v43  ;;  %v1674_v41 = vcombine.high %v6452_v49, %v6452_v49  ;;  %v6040_v28 = vld [vmem:[%s7592_s1 + $0x20] ss:$8 sps:$4 sm:$0xff]  }
  0x41   : > { %2393 = vmatprep.subr.bf16.mxu0 %v6024_v42  ;;  %v2019_v42 = vrot.slane %v1991_v30, %v6323_v43  ;;  %v2012_v45 = vrot.slane %v1990_v32, %v6323_v43  ;;  %v6574_v22 = vrot.slane %v326_v10, %v6323_v43  ;;  %v446_v27 = vunpack.i.h.s16 %v6549_v12 }
  0x42   : > { %v1857_v61 = vunpack.i.h.s16 %v1674_v41 }
  0x43   : > { %1005 = vmatpush1.bf16.msra.mxu1 %v6026_v51  ;;  %v1081_v51 = vcombine.low %v6341_v52, %v6356_v59  ;;  %v2021_v63 = vcombine.low %v2005_v31, %v2019_v42  ;;  %v2020_v3 = vcombine.low %v1998_v36, %v2012_v45  ;;  %v5553_v52 = vld.sshfl [vmem:[%s6320_s24 + $0x28] sm:$0x5 pattern:$0x75316420]  ;;  %7619 = vst [vmem:[#allocation3_spill] sm:$0xff] %v6574_v22 }
  0x44   : > { %2394 = vmatpush1.bf16.msra.mxu0 %v6027_v60  ;;  %1492 = vmatprep.subr.bf16.mxu1 %v6030_v4  ;;  %v1855_v60 = vunpack.i.h.s16 %v1673_v39  ;;  %v5418_v4 = vld.sshfl [vmem:[%s6320_s24 + $0x20] sm:$0xff pattern:$0x75316420]  ;;  %v6557_v13 = vrot.slane %v5553_v52, %v6323_v43  ;;  %v6048_v36 = vld [vmem:[%s7592_s1 + $0x34] ss:$8 sps:$4 sm:$0xff]   ;;  %v5458_v39 = vpack.i.b16 %v6574_v22, %v446_v27 }
  0x45   : > { %3258 = vmatprep.subr.bf16.mxu0 %v6033_v7  ;;  %v6543_v7 = vcombine.low %v6372_v1, %v5499_v50  ;;  %v302_v8 = vcombine.high %v5418_v4, %v5418_v4  ;;  %v6546_v9 = vrot.slane %v5418_v4, %v6323_v43  ;;  %5634 = vmatprep.mubr.msk.bf16.mxu0 %vm965_vm0, %v2021_v63  ;;  %v6554_v59 = vld.sshfl [vmem:[%s6320_s24 + $0x30] sm:$0xfa pattern:$0x75316420] }
  0x46   : > { %1011 = vmatmul.mubr.bf16.vlgmr.msra.gmra.mrb[0].mxu1 %v630_v35  ;;  %v5590_v14 = vpack.i.b16 %v1674_v41, %v1855_v60  ;;  %v6560_v1 = vrot.slane %v1081_v51, %v6323_v43  ;;  %v1720_v30 = vcombine.high %v6554_v59, %v6554_v59  ;;  %v6045_v35 = vld [vmem:[%s7592_s1 + $0x2c4] ss:$8 sps:$4 sm:$0xff]   ;;  %v6043_v51 = vld [vmem:[%s7592_s1 + $0x2c0] ss:$8 sps:$4 sm:$0xff]  }
  0x47   : > { %1493 = vmatpush1.bf16.msra.mxu1 %v6028_v20  ;;  %2400 = vmatmul.mubr.bf16.vlgmr.msra.gmra.mrb[0].mxu0 %v2020_v3  ;;  %v6569_v18 = vrot.slane %v302_v8, %v6323_v43  ;;  %v317_v21 = vcombine.high %v6546_v9, %v6546_v9  ;;  %v633_v20 = vcombine.low %v6468_v58, %v6546_v9  ;;  %v1859_v31 = vunpack.i.h.s16 %v6546_v9  ;;  %v6054_v8 = vld [vmem:[%s7592_s1 + $0x44] ss:$8 sps:$4 sm:$0xff]  }
  0x48   : > { %1494 = vmatprep.subr.bf16.mxu1 %v6036_v37  ;;  %3259 = vmatpush1.bf16.msra.mxu0 %v6031_v44  ;;  %v5591_v32 = vpack.i.b16 %v6546_v9, %v1857_v61  ;;  %v6599_v45 = vrot.slane %v1720_v30, %v6323_v43  ;;  %v2022_v4 = vcombine.low %v6534_v62, %v5590_v14 }
  0x49   : > { %3260 = vmatprep.subr.bf16.mxu0 %v6039_v53  ;;  %v318_v37 = vcombine.high %v6569_v18, %v6569_v18  ;;  %v634_v41 = vcombine.low %v6569_v18, %v317_v21  ;;  %v1861_v42 = vunpack.i.h.s16 %v6569_v18  ;;  %v649_v44 = vrot.slane %v633_v20, %v6323_v43 }
  0x4a   : > { %v6602_v50 = vpack.i.b16 %v6569_v18, %v1859_v31  ;;  %v2032_v14 = vrot.slane %v2022_v4, %v6323_v43 }
  0x4b   : > { %1495 = vmatpush1.bf16.msra.mxu1 %v6034_v47  ;;  %v1863_v47 = vunpack.i.h.s16 %v317_v21  ;;  %v635_v53 = vcombine.low %v318_v37, %v5458_v39  ;;  %v1865_v60 = vunpack.i.h.s16 %v318_v37  ;;  %v6608_v61 = vpack.i.b16 %v317_v21, %v1861_v42  ;;  %v6060_v42 = vld [vmem:[%s7592_s1 + $0x54] ss:$8 sps:$4 sm:$0xff]  }
  0x4c   : > { %1496 = vmatprep.subr.bf16.mxu1 %v6042_v54  ;;  %v656_v54 = vrot.slane %v634_v41, %v6323_v43  ;;  %3261 = vmatpush1.bf16.msra.mxu0 %v6037_v17  ;;  %v665_v63 = vcombine.high %v6503_v33, %v649_v44  ;;  %v2023_v17 = vcombine.low %v5591_v32, %v6602_v50  ;;  %v5420_v32 = vld.sshfl [vmem:[%s6320_s24 + $0x38] sm:$0xff pattern:$0x75316420] }
  0x4d   : > { %v6614_v3 = vpack.i.b16 %v318_v37, %v1863_v47  ;;  %3262 = vmatprep.subr.bf16.mxu0 %v6045_v35  ;;  %v663_v10 = vrot.slane %v635_v53, %v6323_v43  ;;  %v5595_v52 = vpack.i.b16 %v6557_v13, %v1865_v60  ;;  %v664_v27 = vcombine.low %v6503_v33, %v649_v44  ;;  %v6057_v33 = vld [vmem:[%s7592_s1 + $0x2e4] ss:$8 sps:$4 sm:$0xff]  }
  0x4e   : > { %v681_v21 = vrot.slane %v665_v63, %v6323_v43  ;;  %v2039_v31 = vrot.slane %v2023_v17, %v6323_v43  ;;  %v6647_v41 = vcombine.high %v6549_v12, %v6549_v12  ;;  %v448_v53 = vunpack.i.h.s16 %v6574_v22  ;;  %v6055_v17 = vld [vmem:[%s7592_s1 + $0x2e0] ss:$8 sps:$4 sm:$0xff]  }
  0x4f   : > { %1497 = vmatpush1.bf16.msra.mxu1 %v6040_v28  ;;  %v2024_v62 = vcombine.low %v6608_v61, %v6614_v3  ;;  %v6049_v28 = vld [vmem:[%s7592_s1 + $0x2d0] ss:$8 sps:$4 sm:$0xff]   ;;  %v667_v20 = vcombine.high %v656_v54, %v663_v10  ;;  %v2025_v30 = vcombine.low %v5595_v52, %v6599_v45  ;;  %v666_v35 = vcombine.low %v656_v54, %v663_v10  ;;  %v5421_v52 = vld.sshfl [vmem:[%s6320_s24 + $0x48] sm:$0xff pattern:$0x75316420] }
  0x50   : > { %1498 = vmatprep.subr.bf16.mxu1 %v6048_v36  ;;  %3263 = vmatpush1.bf16.msra.mxu0 %v6043_v51  ;;  %v6052_v36 = vld [vmem:[%s7592_s1 + $0x40] ss:$8 sps:$4 sm:$0xff]   ;;  %v674_v39 = vrot.slane %v664_v27, %v6323_v43  ;;  %7620 = vst [vmem:[#allocation4_spill] sm:$0xff] %v6647_v41  ;;  %v2055_v51 = vcombine.high %v2032_v14, %v2039_v31 }
  0x51   : > { %v2046_v37 = vrot.slane %v2024_v62, %v6323_v43  ;;  %3264 = vmatprep.subr.bf16.mxu0 %v6051_v5  ;;  %v695_v44 = vrot.slane %v667_v20, %v6323_v43  ;;  %v2053_v47 = vrot.slane %v2025_v30, %v6323_v43  ;;  %v688_v54 = vrot.slane %v666_v35, %v6323_v43  ;;  %v6058_v62 = vld [vmem:[%s7592_s1 + $0x50] ss:$8 sps:$4 sm:$0xff]   ;;  %v6066_v30 = vld [vmem:[%s7592_s1 + $0x64] ss:$8 sps:$4 sm:$0xff]  }
  0x52   : > { %v2054_v60 = vcombine.low %v2032_v14, %v2039_v31  ;;  %v350_v63 = vcombine.high %v5420_v32, %v5420_v32  ;;  %v450_v20 = vunpack.i.h.s16 %v6647_v41 }
  0x53   : > { %1499 = vmatpush1.bf16.msra.mxu1 %v6046_v57  ;;  %v6658_v57 = vcombine.high %v6574_v22, %v6574_v22  ;;  %v697_v4 = vcombine.low %v681_v21, %v695_v44  ;;  %v2057_v5 = vcombine.high %v2046_v37, %v2053_v47  ;;  %v2056_v10 = vcombine.low %v2046_v37, %v2053_v47  ;;  %v6064_v37 = vld [vmem:[%s7592_s1 + $0x60] ss:$8 sps:$4 sm:$0xff]  }
  0x54   : > { %1500 = vmatprep.subr.bf16.mxu1 %v6054_v8  ;;  %v2071_v8 = vrot.slane %v2055_v51, %v6323_v43  ;;  %3265 = vmatpush1.bf16.msra.mxu0 %v6049_v28  ;;  %v696_v14 = vcombine.low %v674_v39, %v688_v54  ;;  %v2064_v27 = vrot.slane %v2054_v60, %v6323_v43  ;;  %v6063_v28 = vld [vmem:[%s7592_s1 + $0x2f4] ss:$8 sps:$4 sm:$0xff]  }
  0x55   : > { %7621 = vst [vmem:[#allocation5_spill] sm:$0xff] %v6658_v57  ;;  %v6670_v21 = vrot.slane %v5420_v32, %v6323_v43  ;;  %3266 = vmatprep.subr.bf16.mxu0 %v6057_v33  ;;  %v2085_v31 = vrot.slane %v2057_v5, %v6323_v43  ;;  %v2078_v35 = vrot.slane %v2056_v10, %v6323_v43  ;;  %v6061_v33 = vld [vmem:[%s7592_s1 + $0x2f0] ss:$8 sps:$4 sm:$0xff]  }
  0x56   : > { %v6682_v32 = vrot.slane %v350_v63, %v6323_v43  ;;  %5496 = vmatprep.mubr.msk.bf16.mxu1 %vm965_vm0, %v697_v4  ;;  %v6697_v44 = vrot.slane %v5421_v52, %v6323_v43  ;;  %v5556_v4 = vld.sshfl [vmem:[%s6320_s24 + $0x40] sm:$0x5 pattern:$0x75316420] }
  0x57   : > { %1501 = vmatpush1.bf16.msra.mxu1 %v6052_v36  ;;  %7622 = vst [vmem:[#allocation6_spill] sm:$0xff] %v6670_v21  ;;  %v452_v36 = vunpack.i.h.s16 %v6658_v57  ;;  %v6694_v39 = vcombine.high %v6670_v21, %v6670_v21  ;;  %v454_v47 = vunpack.i.h.s16 %v6670_v21  ;;  %v2087_v51 = vcombine.low %v2071_v8, %v2085_v31 }
  0x58   : > { %1502 = vmatprep.subr.bf16.mxu1 %v6060_v42  ;;  %7623 = vst [vmem:[#allocation7_spill] sm:$0xff] %v6682_v32  ;;  %v374_v42 = vcombine.high %v5421_v52, %v5421_v52  ;;  %7625 = vst [vmem:[#allocation9_spill] sm:$0xff] %v6697_v44  ;;  %1021 = vmatmul.mubr.bf16.gmra.mrb[4].mxu1 %v696_v14  ;;  %v2086_v54 = vcombine.low %v2064_v27, %v2078_v35  ;;  %v456_v63 = vunpack.i.h.s16 %v6682_v32  ;;  %v5557_v14 = vld.sshfl [vmem:[%s6320_s24 + $0x48] sm:$0xfa pattern:$0x75316420] }
  0x59   : > { %7624 = vst [vmem:[#allocation8_spill] sm:$0xff] %v6694_v39  ;;  %v6702_v60 = vcombine.high %v6682_v32, %v6682_v32  ;;  %3267 = vmatpush1.bf16.msra.mxu0 %v6055_v17  ;;  %v458_v10 = vunpack.i.h.s16 %v6694_v39  ;;  %v7598_v52 = vunpack.i.h.s16 %v6697_v44  ;;  %v5459_v8 = vpack.i.b16 %v6647_v41, %v448_v53  ;;  %v6069_v27 = vld [vmem:[%s7592_s1 + $0x304] ss:$8 sps:$4 sm:$0xff]   ;;  %v6072_v17 = vld [vmem:[%s7592_s1 + $0x74] ss:$8 sps:$4 sm:$0xff]   ;;  %5635 = vmatprep.mubr.msk.bf16.mxu0 %vm965_vm0, %v2087_v51 }
  0x5a   : > { %v6707_v5 = vrot.slane %v374_v42, %v6323_v43  ;;  %3268 = vmatprep.subr.bf16.mxu0 %v6063_v28  ;;  %v5460_v31 = vpack.i.b16 %v6658_v57, %v450_v20  ;;  %v5461_v35 = vpack.i.b16 %v6670_v21, %v452_v36  ;;  %v6723_v42 = vpack.i.b16 %v6682_v32, %v454_v47  ;;  %v6067_v20 = vld [vmem:[%s7592_s1 + $0x300] ss:$8 sps:$4 sm:$0xff]  }
  0x5b   : > { %1503 = vmatpush1.bf16.msra.mxu1 %v6058_v62  ;;  %v7597_v62 = vunpack.i.h.s16 %v6702_v60  ;;  %v6727_v53 = vpack.i.b16 %v6694_v39, %v456_v63  ;;  %v6730_v28 = vpack.i.b16 %v6702_v60, %v458_v10  ;;  %v6737_v29 = vrot.slane %v5556_v4, %v6323_v43  ;;  %2410 = vmatmul.mubr.bf16.gmra.mrb[4].mxu0 %v2086_v54 }
  0x5c   : > { %7626 = vst [vmem:[#allocation10_spill] sm:$0xff] %v6707_v5  ;;  %1504 = vmatprep.subr.bf16.mxu1 %v6066_v30  ;;  %7627 = vst [vmem:[#allocation11_spill] sm:$0xff] %v6723_v42  ;;  %v6734_v30 = vrot.slane %v6554_v59, %v6323_v43  ;;  %v698_v47 = vcombine.low %v5459_v8, %v5460_v31  ;;  %v699_v51 = vcombine.low %v5461_v35, %v6723_v42  ;;  %v6070_v59 = vld [vmem:[%s7592_s1 + $0x70] ss:$8 sps:$4 sm:$0xff]   ;;  %v6075_v8 = vld [vmem:[%s7592_s1 + $0x314] ss:$8 sps:$4 sm:$0xff]  }
  0x5d   : > { %7628 = vst [vmem:[#allocation12_spill] sm:$0xff] %v6727_v53  ;;  %7629 = vst [vmem:[#allocation13_spill] sm:$0xff] %v6730_v28  ;;  %v558_v36 = vpack.i.b16 %v7598_v52, %v7597_v62  ;;  %v1782_v63 = vcombine.high %v5557_v14, %v5557_v14  ;;  %3269 = vmatpush1.bf16.msra.mxu0 %v6061_v33  ;;  %v700_v4 = vcombine.low %v6727_v53, %v6730_v28  ;;  %v6078_v33 = vld [vmem:[%s7592_s1 + $0x84] ss:$8 sps:$4 sm:$0xff]   ;;  %v6079_v53 = vld [vmem:[%s7592_s1 + $0x320] ss:$8 sps:$4 sm:$0xff]  }
  0x5e   : > { %v1789_v54 = vrot.slane %v5557_v14, %v6323_v43  ;;  %v5604_v10 = vcombine.high %v6734_v30, %v6599_v45  ;;  %3270 = vmatprep.subr.bf16.mxu0 %v6069_v27  ;;  %v708_v31 = vrot.slane %v698_v47, %v6323_v43  ;;  %v715_v35 = vrot.slane %v699_v51, %v6323_v43  ;;  %v6073_v27 = vld [vmem:[%s7592_s1 + $0x310] ss:$8 sps:$4 sm:$0xff]   ;;  %v6076_v47 = vld [vmem:[%s7592_s1 + $0x80] ss:$8 sps:$4 sm:$0xff]  }
  0x5f   : > { %1505 = vmatpush1.bf16.msra.mxu1 %v6064_v37  ;;  %v701_v37 = vcombine.low %v558_v36, %v6707_v5  ;;  %v6770_v62 = vrot.slane %v1782_v63, %v6323_v43  ;;  %v2089_v36 = vcombine.low %v6670_v21, %v6682_v32  ;;  %v5605_v23 = vcombine.high %v6670_v21, %v6682_v32  ;;  %v5422_v28 = vld.sshfl [vmem:[%s6320_s24 + $0x50] sm:$0xff pattern:$0x75316420] }
  0x60   : > { %1506 = vmatprep.subr.bf16.mxu1 %v6072_v17  ;;  %v722_v17 = vrot.slane %v700_v4, %v6323_v43  ;;  %v6772_v52 = vcombine.high %v1789_v54, %v1789_v54  ;;  %v731_v14 = vcombine.high %v708_v31, %v715_v35  ;;  %v2098_v4 = vrot.slane %v5604_v10, %v6323_v43 }
  0x61   : > { %7630 = vst [vmem:[#allocation14_spill] sm:$0xff] %v6770_v62  ;;  %v729_v51 = vrot.slane %v701_v37, %v6323_v43  ;;  %3271 = vmatpush1.bf16.msra.mxu0 %v6067_v20  ;;  %v5596_v54 = vpack.i.b16 %v6770_v62, %v6737_v29  ;;  %v2105_v6 = vrot.slane %v2089_v36, %v6323_v43  ;;  %v6081_v37 = vld [vmem:[%s7592_s1 + $0x324] ss:$8 sps:$4 sm:$0xff]   ;;  %v6084_v20 = vld [vmem:[%s7592_s1 + $0x94] ss:$8 sps:$4 sm:$0xff]  }
  0x62   : > { %7631 = vst [vmem:[#allocation15_spill] sm:$0xff] %v6772_v52  ;;  %v730_v38 = vcombine.low %v708_v31, %v715_v35  ;;  %3272 = vmatprep.subr.bf16.mxu0 %v6075_v8  ;;  %v747_v10 = vrot.slane %v731_v14, %v6323_v43  ;;  %v2112_v63 = vrot.slane %v5605_v23, %v6323_v43  ;;  %v7632_v31 = vunpack.i.h.s16 %v6770_v62 }
  0x63   : > { %1507 = vmatpush1.bf16.msra.mxu1 %v6070_v59  ;;  %v733_v59 = vcombine.high %v722_v17, %v729_v51  ;;  %v732_v35 = vcombine.low %v722_v17, %v729_v51  ;;  %v2120_v39 = vcombine.low %v2098_v4, %v2105_v6  ;;  %v398_v14 = vcombine.high %v5422_v28, %v5422_v28 }
  0x64   : > { %1508 = vmatprep.subr.bf16.mxu1 %v6078_v33  ;;  %v5597_v8 = vpack.i.b16 %v6772_v52, %v7632_v31  ;;  %v2121_v33 = vcombine.high %v2098_v4, %v2105_v6  ;;  %v740_v36 = vrot.slane %v730_v38, %v6323_v43  ;;  %v6806_v23 = vrot.slane %v5422_v28, %v6323_v43  ;;  %v6082_v31 = vld [vmem:[%s7592_s1 + $0x90] ss:$8 sps:$4 sm:$0xff]   ;;  %v6087_v6 = vld [vmem:[%s7592_s1 + $0x334] ss:$8 sps:$4 sm:$0xff]  }
  0x65   : > { %v761_v32 = vrot.slane %v733_v59, %v6323_v43  ;;  %3273 = vmatpush1.bf16.msra.mxu0 %v6073_v27  ;;  %v754_v51 = vrot.slane %v732_v35, %v6323_v43  ;;  %v1885_v42 = vunpack.i.h.s16 %v6772_v52  ;;  %v6090_v27 = vld [vmem:[%s7592_s1 + $0xa4] ss:$8 sps:$4 sm:$0xff]   ;;  %v6822_v4 = vrot.slane %v398_v14, %v6323_v43 }
  0x66   : > { %v2091_v17 = vcombine.low %v5596_v54, %v5597_v8  ;;  %v2137_v38 = vrot.slane %v2121_v33, %v6323_v43  ;;  %3274 = vmatprep.subr.bf16.mxu0 %v6081_v37  ;;  %v1889_v54 = vunpack.i.h.s16 %v6806_v23  ;;  %v5559_v8 = vld.sshfl [vmem:[%s6320_s24 + $0x58] sm:$0x5 pattern:$0x75316420]  ;;  %v6843_v35 = vcombine.high %v6806_v23, %v6806_v23 }
  0x67   : > { %1509 = vmatpush1.bf16.msra.mxu1 %v6076_v47  ;;  %v763_v28 = vcombine.low %v747_v10, %v761_v32  ;;  %v2130_v47 = vrot.slane %v2120_v39, %v6323_v43  ;;  %v762_v37 = vcombine.low %v740_v36, %v754_v51  ;;  %v6831_v32 = vcombine.high %v6770_v62, %v6770_v62  ;;  %v6085_v39 = vld [vmem:[%s7592_s1 + $0x330] ss:$8 sps:$4 sm:$0xff]   ;;  %v6093_v62 = vld [vmem:[%s7592_s1 + $0x344] ss:$8 sps:$4 sm:$0xff]  }
  0x68   : > { %1510 = vmatprep.subr.bf16.mxu1 %v6084_v20  ;;  %v2119_v59 = vrot.slane %v2091_v17, %v6323_v43  ;;  %v5465_v20 = vcombine.high %v6697_v44, %v6707_v5  ;;  %v765_v10 = vcombine.low %v6806_v23, %v6822_v4  ;;  %v5466_v33 = vcombine.high %v6806_v23, %v6822_v4  ;;  %v6088_v17 = vld [vmem:[%s7592_s1 + $0xa0] ss:$8 sps:$4 sm:$0xff]  }
  0x69   : > { %5497 = vmatprep.mubr.msk.bf16.mxu1 %vm965_vm0, %v763_v28  ;;  %v6847_v36 = vcombine.high %v6822_v4, %v6822_v4  ;;  %3275 = vmatpush1.bf16.msra.mxu0 %v6079_v53  ;;  %v1887_v52 = vunpack.i.h.s16 %v6831_v32  ;;  %v6096_v53 = vld [vmem:[%s7592_s1 + $0xb4] ss:$8 sps:$4 sm:$0xff]   ;;  %v2728_v44 = vunpack.i.h.s16 %v6434_v40 }
  0x6a   : > { %v2123_v14 = vcombine.high %v2112_v63, %v2119_v59  ;;  %v2122_v51 = vcombine.low %v2112_v63, %v2119_v59  ;;  %v773_v28 = vrot.slane %v5465_v20, %v6323_v43  ;;  %3276 = vmatprep.subr.bf16.mxu0 %v6087_v6  ;;  %1031 = vmatmul.mubr.bf16.gmra.mrb[8].mxu1 %v762_v37  ;;  %v1891_v59 = vunpack.i.h.s16 %v6822_v4 }
  0x6b   : > { %1511 = vmatpush1.bf16.msra.mxu1 %v6082_v31  ;;  %v780_v31 = vrot.slane %v765_v10, %v6323_v43  ;;  %v787_v57 = vrot.slane %v5466_v33, %v6323_v43  ;;  %v6863_v63 = vrot.slane %v5559_v8, %v6323_v43  ;;  %v1893_v20 = vunpack.i.h.s16 %v6843_v35 }
  0x6c   : > { %v2151_v6 = vrot.slane %v2123_v14, %v6323_v43  ;;  %1512 = vmatprep.subr.bf16.mxu1 %v6090_v27  ;;  %v2144_v37 = vrot.slane %v2122_v51, %v6323_v43  ;;  %v1895_v21 = vunpack.i.h.s16 %v6847_v36  ;;  %v5598_v10 = vpack.i.b16 %v6831_v32, %v1885_v42  ;;  %v6091_v14 = vld [vmem:[%s7592_s1 + $0x340] ss:$8 sps:$4 sm:$0xff]   ;;  %v6094_v27 = vld [vmem:[%s7592_s1 + $0xb0] ss:$8 sps:$4 sm:$0xff]  }
  0x6d   : > { %v789_v22 = vcombine.high %v773_v28, %v780_v31  ;;  %v790_v41 = vcombine.high %v787_v57, %v787_v57  ;;  %v5599_v33 = vpack.i.b16 %v6806_v23, %v1887_v52  ;;  %3277 = vmatpush1.bf16.msra.mxu0 %v6085_v39  ;;  %v6879_v51 = vpack.i.b16 %v6822_v4, %v1889_v54  ;;  %v6099_v52 = vld [vmem:[%s7592_s1 + $0x354] ss:$8 sps:$4 sm:$0xff]  }
  0x6e   : > { %v2153_v8 = vcombine.low %v2137_v38, %v2151_v6  ;;  %v2152_v5 = vcombine.low %v2130_v47, %v2144_v37  ;;  %3278 = vmatprep.subr.bf16.mxu0 %v6093_v62  ;;  %v6888_v47 = vpack.i.b16 %v6843_v35, %v1891_v59  ;;  %v2730_v39 = vunpack.i.h.s16 %v6444_v46 }
  0x6f   : > { %1513 = vmatpush1.bf16.msra.mxu1 %v6088_v17  ;;  %v804_v42 = vrot.slane %v789_v22, %v6323_v43  ;;  %v818_v38 = vrot.slane %v790_v41, %v6323_v43  ;;  %v6893_v54 = vpack.i.b16 %v6847_v36, %v1893_v20  ;;  %v5603_v40 = vpack.i.b16 %v6863_v63, %v1895_v21  ;;  %v6102_v22 = vld [vmem:[%s7592_s1 + $0xc4] ss:$8 sps:$4 sm:$0xff]   ;;  %v6097_v21 = vld [vmem:[%s7592_s1 + $0x350] ss:$8 sps:$4 sm:$0xff]  }
  0x70   : > { %1514 = vmatprep.subr.bf16.mxu1 %v6096_v53  ;;  %5636 = vmatprep.mubr.msk.bf16.mxu0 %vm965_vm0, %v2153_v8  ;;  %v2154_v62 = vcombine.low %v5598_v10, %v5599_v33  ;;  %v788_v17 = vcombine.low %v773_v28, %v780_v31  ;;  %v2155_v53 = vcombine.low %v6879_v51, %v6888_v47  ;;  %v2732_v20 = vunpack.i.h.s16 %v6449_v48  ;;  %v6105_v10 = vld [vmem:[%s7592_s1 + $0x364] ss:$8 sps:$4 sm:$0xff]  }
  0x71   : > { %2420 = vmatmul.mubr.bf16.gmra.mrb[8].mxu0 %v2152_v5  ;;  %v820_v41 = vcombine.low %v804_v42, %v818_v38  ;;  %v811_v59 = vrot.slane %v787_v57, %v6323_v43  ;;  %v7633_v6 = vcombine.low %v6347_v55, %v6368_v0  ;;  %v2156_v28 = vcombine.low %v6893_v54, %v5603_v40  ;;  %v6100_v57 = vld [vmem:[%s7592_s1 + $0xc0] ss:$8 sps:$4 sm:$0xff]   ;;  %v6108_v42 = vld [vmem:[%s7592_s1 + $0xd4] ss:$8 sps:$4 sm:$0xff]  }
  0x72   : > { %3279 = vmatpush1.bf16.msra.mxu0 %v6091_v14  ;;  %v2163_v5 = vrot.slane %v2154_v62, %v6323_v43  ;;  %v797_v31 = vrot.slane %v788_v17, %v6323_v43  ;;  %v2170_v0 = vrot.slane %v2155_v53, %v6323_v43  ;;  %v1112_v33 = vrot.slane %v6543_v7, %v6323_v43 }
  0x73   : > { %v1105_v37 = vrot.slane %v7633_v6, %v6323_v43  ;;  %1515 = vmatpush1.bf16.msra.mxu1 %v6094_v27  ;;  %3280 = vmatprep.subr.bf16.mxu0 %v6099_v52  ;;  %v1113_v8 = vcombine.low %v6560_v1, %v6563_v15  ;;  %v435_v14 = vunpack.i.h.s16 %v6464_v56  ;;  %v2177_v27 = vrot.slane %v2156_v28, %v6323_v43 }
  0x74   : > { %5498 = vmatprep.mubr.msk.bf16.mxu1 %vm965_vm0, %v820_v41  ;;  %v819_v52 = vcombine.low %v797_v31, %v811_v59  ;;  %1516 = vmatprep.subr.bf16.mxu1 %v6102_v22  ;;  %v1114_v38 = vcombine.high %v6560_v1, %v6563_v15  ;;  %v5678_v40 = vpack.i.b16 %v6444_v46, %v2728_v44  ;;  %v6103_v22 = vld [vmem:[%s7592_s1 + $0x360] ss:$8 sps:$4 sm:$0xff]   ;;  %v437_v28 = vunpack.i.h.s16 %v6468_v58  ;;  %v6106_v15 = vld [vmem:[%s7592_s1 + $0xd0] ss:$8 sps:$4 sm:$0xff]   ;;  %v6111_v44 = vld [vmem:[%s7592_s1 + $0x374] ss:$8 sps:$4 sm:$0xff]  }
  0x75   : > { %v2179_v62 = vcombine.high %v2163_v5, %v2170_v0  ;;  %v2178_v7 = vcombine.low %v2163_v5, %v2170_v0  ;;  %v1115_v17 = vcombine.low %v1105_v37, %v1112_v33  ;;  %v1116_v41 = vcombine.high %v1105_v37, %v1112_v33 }
  0x76   : > { %3281 = vmatpush1.bf16.msra.mxu0 %v6097_v21  ;;  %v2180_v53 = vcombine.high %v2177_v27, %v2177_v27  ;;  %1041 = vmatmul.mubr.bf16.gmra.mrb[12].mxu1 %v819_v52  ;;  %v2201_v6 = vrot.slane %v2177_v27, %v6323_v43  ;;  %v1130_v59 = vrot.slane %v1114_v38, %v6323_v43  ;;  %v7634_v0 = vunpack.i.h.s16 %v6391_v11 }
  0x77   : > { %v2194_v1 = vrot.slane %v2179_v62, %v6323_v43  ;;  %v2187_v46 = vrot.slane %v2178_v7, %v6323_v43  ;;  %3282 = vmatprep.subr.bf16.mxu0 %v6105_v10  ;;  %1517 = vmatpush1.bf16.msra.mxu1 %v6100_v57  ;;  %v1144_v37 = vrot.slane %v1116_v41, %v6323_v43  ;;  %v7635_v27 = vunpack.i.h.s16 %v6427_v34 }
  0x78   : > { %v2208_v21 = vrot.slane %v2180_v53, %v6323_v43  ;;  %1518 = vmatprep.subr.bf16.mxu1 %v6108_v42  ;;  %v5679_v5 = vpack.i.b16 %v6449_v48, %v2730_v39  ;;  %v5680_v31 = vpack.i.b16 %v6347_v55, %v2732_v20  ;;  %v5684_v57 = vpack.i.b16 %v6427_v34, %v7634_v0  ;;  %v6114_v48 = vld [vmem:[%s7592_s1 + $0x384] ss:$8 sps:$4 sm:$0xff]   ;;  %v6109_v55 = vld [vmem:[%s7592_s1 + $0x370] ss:$8 sps:$4 sm:$0xff]  }
  0x79   : > { %v2209_v10 = vcombine.low %v2187_v46, %v2201_v6  ;;  %v1146_v33 = vcombine.low %v1130_v59, %v1144_v37  ;;  %v7636_v52 = vunpack.i.h.s16 %v6452_v49  ;;  %v2849_v62 = vcombine.low %v6409_v24, %v6412_v25  ;;  %v6117_v6 = vld [vmem:[%s7592_s1 + $0x394] ss:$8 sps:$4 sm:$0xff]  }
  0x7a   : > { %v2210_v39 = vcombine.low %v2194_v1, %v2208_v21  ;;  %3283 = vmatpush1.bf16.msra.mxu0 %v6103_v22  ;;  %v2847_v11 = vcombine.low %v5678_v40, %v5679_v5  ;;  %v2848_v20 = vcombine.low %v5680_v31, %v6398_v19  ;;  %v1123_v34 = vrot.slane %v1113_v8, %v6323_v43  ;;  %v6112_v19 = vld [vmem:[%s7592_s1 + $0x380] ss:$8 sps:$4 sm:$0xff]  }
  0x7b   : > { %v2824_v38 = vpack.i.b16 %v7636_v52, %v7635_v27  ;;  %3284 = vmatprep.subr.bf16.mxu0 %v6111_v44  ;;  %1519 = vmatpush1.bf16.msra.mxu1 %v6106_v15  ;;  %v2871_v24 = vrot.slane %v2849_v62, %v6323_v43  ;;  %v1137_v25 = vrot.slane %v1115_v17, %v6323_v43  ;;  %v7637_v8 = vunpack.i.h.s16 %v6375_v2 }
  0x7c   : > { %5637 = vmatprep.mubr.msk.bf16.mxu0 %vm965_vm0, %v2210_v39  ;;  %5544 = vmatprep.mubr.msk.bf16.mxu1 %vm965_vm0, %v1146_v33  ;;  %v2857_v7 = vrot.slane %v2847_v11, %v6323_v43  ;;  %v2864_v41 = vrot.slane %v2848_v20, %v6323_v43  ;;  %v5502_v22 = vpack.i.b16 %v6468_v58, %v435_v14  ;;  %v2758_v59 = vunpack.i.h.s16 %v6599_v45  ;;  %v6115_v58 = vld [vmem:[%s7592_s1 + $0x390] ss:$8 sps:$4 sm:$0xff]   ;;  %v6118_v39 = vld [vmem:[%s7592_s1 + $0x3a0] ss:$8 sps:$4 sm:$0xff]  }
  0x7d   : > { %v2850_v42 = vcombine.low %v5684_v57, %v2824_v38  ;;  %v5501_v40 = vpack.i.b16 %v6464_v56, %v7637_v8  ;;  %2430 = vmatmul.mubr.bf16.gmra.mrb[12].mxu0 %v2209_v10  ;;  %v1145_v17 = vcombine.low %v1123_v34, %v1137_v25  ;;  %5842 = vmatprep.subr.bf16.mxu1 %v6114_v48  ;;  %v2772_v44 = vunpack.i.h.s16 %v6737_v29  ;;  %v6120_v57 = vld [vmem:[%s7592_s1 + $0x3a4] ss:$8 sps:$4 sm:$0xff]  }
  0x7e   : > { %3285 = vmatpush1.bf16.msra.mxu0 %v6109_v55  ;;  %v2879_v1 = vcombine.low %v2857_v7, %v2864_v41  ;;  %v2880_v46 = vcombine.high %v2857_v7, %v2864_v41  ;;  %v5503_v2 = vpack.i.b16 %v6546_v9, %v437_v28  ;;  %v1149_v0 = vcombine.low %v6602_v50, %v6608_v61  ;;  %v7638_v7 = vld [vmem:[#allocation9_spill] sm:$0xff] }
  0x7f   : > { %v2878_v53 = vrot.slane %v2850_v42, %v6323_v43  ;;  %1525 = vmatmul.mubr.bf16.vlgmr.msra.gmra.mrb[0].mxu1 %v1145_v17  ;;  %4181 = vmatprep.subr.bf16.mxu0 %v6114_v48  ;;  %v1147_v14 = vcombine.low %v6415_v26, %v5501_v40  ;;  %v1150_v10 = vcombine.low %v6614_v3, %v6549_v12 }
  0x80   : > { %v2896_v37 = vrot.slane %v2880_v46, %v6323_v43  ;;  %v2889_v21 = vrot.slane %v2879_v1, %v6323_v43  ;;  %5856 = vmatpush1.bf16.msra.mxu1 %v6112_v19  ;;  %v1148_v31 = vcombine.low %v5502_v22, %v5503_v2  ;;  %v7006_v26 = vcombine.high %v6734_v30, %v6734_v30  ;;  %v7640_v22 = vld [vmem:[#allocation10_spill] sm:$0xff]  ;;  %v7641_v1 = vld [vmem:[#allocation4_spill] sm:$0xff]  ;;  %v7642_v46 = vld [vmem:[#allocation3_spill] sm:$0xff] }
  0x81   : > { %v2881_v15 = vcombine.low %v2871_v24, %v2878_v53  ;;  %v2882_v56 = vcombine.high %v2871_v24, %v2878_v53  ;;  %5843 = vmatprep.subr.bf16.mxu1 %v6117_v6  ;;  %v1157_v33 = vrot.slane %v1147_v14, %v6323_v43  ;;  %v5692_v27 = vcombine.high %v6492_v16, %v6452_v49 }
  0x82   : > { %v1164_v50 = vrot.slane %v1148_v31, %v6323_v43  ;;  %v1171_v61 = vrot.slane %v1149_v0, %v6323_v43  ;;  %v1178_v62 = vrot.slane %v1150_v10, %v6323_v43  ;;  %v5685_v12 = vpack.i.b16 %v7006_v26, %v2758_v59  ;;  %v7645_v10 = vld [vmem:[#allocation8_spill] sm:$0xff] }
  0x83   : > { %v2910_v5 = vrot.slane %v2882_v56, %v6323_v43  ;;  %v2903_v28 = vrot.slane %v2881_v15, %v6323_v43  ;;  %v2914_v3 = vcombine.low %v6546_v9, %v6569_v18  ;;  %v5693_v30 = vcombine.high %v6546_v9, %v6569_v18  ;;  %v6123_v18 = vld [vmem:[%s7592_s1 + $0x3b4] ss:$8 sps:$4 sm:$0xff]   ;;  %v7643_v15 = vld [vmem:[#allocation6_spill] sm:$0xff] }
  0x84   : > { %5857 = vmatpush1.bf16.msra.mxu1 %v6115_v58  ;;  %v1180_v49 = vcombine.high %v1157_v33, %v1164_v50  ;;  %v2923_v16 = vrot.slane %v5692_v27, %v6323_v43  ;;  %v1179_v48 = vcombine.low %v1157_v33, %v1164_v50  ;;  %v2760_v55 = vunpack.i.h.s16 %v7006_v26  ;;  %v7644_v56 = vld [vmem:[#allocation5_spill] sm:$0xff]  ;;  %v7646_v33 = vld [vmem:[#allocation7_spill] sm:$0xff] }
  0x85   : > { %v2912_v52 = vcombine.low %v2896_v37, %v2910_v5  ;;  %v2911_v38 = vcombine.low %v2889_v21, %v2903_v28  ;;  %5844 = vmatprep.subr.bf16.mxu1 %v6120_v57  ;;  %v1182_v11 = vcombine.high %v1171_v61, %v1178_v62  ;;  %v2916_v20 = vcombine.low %v6557_v13, %v5685_v12  ;;  %v6121_v28 = vld [vmem:[%s7592_s1 + $0x3b0] ss:$8 sps:$4 sm:$0xff]  }
  0x86   : > { %v2930_v34 = vrot.slane %v2914_v3, %v6323_v43  ;;  %v2937_v9 = vrot.slane %v5693_v30, %v6323_v43  ;;  %v1196_v42 = vrot.slane %v1180_v49, %v6323_v43  ;;  %v1181_v24 = vcombine.low %v1171_v61, %v1178_v62 }
  0x87   : > { %5722 = vmatprep.mubr.msk.bf16.mxu0 %vm965_vm0, %v2912_v52  ;;  %v1189_v25 = vrot.slane %v1179_v48, %v6323_v43  ;;  %v5507_v41 = vpack.i.b16 %v7638_v7, %v6702_v60  ;;  %v1210_v13 = vrot.slane %v1182_v11, %v6323_v43  ;;  %v2944_v8 = vrot.slane %v2916_v20, %v6323_v43  ;;  %v6126_v52 = vld [vmem:[%s7592_s1 + $0x3c4] ss:$8 sps:$4 sm:$0xff]  }
  0x88   : > { %3291 = vmatmul.mubr.bf16.vlgmr.msra.gmra.mrb[0].mxu0 %v2911_v38  ;;  %v2946_v40 = vcombine.high %v2923_v16, %v2930_v34  ;;  %v2945_v53 = vcombine.low %v2923_v16, %v2930_v34  ;;  %v1203_v17 = vrot.slane %v1181_v24, %v6323_v43  ;;  %5858 = vmatpush1.bf16.msra.mxu1 %v6118_v39  ;;  %v463_v61 = vunpack.i.h.s16 %v7640_v22  ;;  %v7648_v11 = vld [vmem:[#allocation14_spill] sm:$0xff] }
  0x89   : > { %4182 = vmatpush1.bf16.msra.mxu0 %v6112_v19  ;;  %v7639_v19 = vunpack.i.h.s16 %v7638_v7  ;;  %v1213_v2 = vcombine.low %v7642_v46, %v7641_v1  ;;  %v1214_v37 = vcombine.low %v7644_v56, %v7643_v15  ;;  %v2948_v21 = vcombine.high %v2937_v9, %v2944_v8  ;;  %5845 = vmatprep.subr.bf16.mxu1 %v6123_v18 }
  0x8a   : > { %4183 = vmatprep.subr.bf16.mxu0 %v6117_v6  ;;  %v1212_v6 = vcombine.low %v1196_v42, %v1210_v13  ;;  %v2962_v14 = vrot.slane %v2946_v40, %v6323_v43  ;;  %v2947_v5 = vcombine.low %v2937_v9, %v2944_v8  ;;  %v1211_v31 = vcombine.low %v1189_v25, %v1203_v17  ;;  %v6124_v9 = vld [vmem:[%s7592_s1 + $0x3c0] ss:$8 sps:$4 sm:$0xff]   ;;  %v7652_v13 = vld [vmem:[#allocation13_spill] sm:$0xff] }
  0x8b   : > { %v5508_v59 = vpack.i.b16 %v7640_v22, %v7639_v19  ;;  %v2955_v0 = vrot.slane %v2945_v53, %v6323_v43  ;;  %v1215_v26 = vcombine.low %v7646_v33, %v7645_v10  ;;  %v2976_v38 = vrot.slane %v2948_v21, %v6323_v43  ;;  %v7653_v40 = vld [vmem:[#allocation15_spill] sm:$0xff] }
  0x8c   : > { %5545 = vmatprep.mubr.msk.bf16.mxu1 %vm965_vm0, %v1212_v6  ;;  %v2969_v50 = vrot.slane %v2947_v5, %v6323_v43  ;;  %v1230_v62 = vrot.slane %v1214_v37, %v6323_v43  ;;  %v2627_v30 = vcombine.high %v6599_v45, %v6599_v45  ;;  %5859 = vmatpush1.bf16.msra.mxu1 %v6121_v28  ;;  %v7647_v48 = vunpack.i.h.s16 %v6702_v60  ;;  %v6129_v60 = vld [vmem:[%s7592_s1 + $0x3d4] ss:$8 sps:$4 sm:$0xff]  }
  0x8d   : > { %4184 = vmatpush1.bf16.msra.mxu0 %v6115_v58  ;;  %v1216_v27 = vcombine.low %v5507_v41, %v5508_v59  ;;  %v1223_v58 = vrot.slane %v1213_v2, %v6323_v43  ;;  %1535 = vmatmul.mubr.bf16.gmra.mrb[4].mxu1 %v1211_v31  ;;  %v1237_v12 = vrot.slane %v1215_v26, %v6323_v43  ;;  %v7649_v20 = vunpack.i.h.s16 %v7648_v11  ;;  %v7651_v41 = vld [vmem:[#allocation11_spill] sm:$0xff]  ;;  %v6127_v2 = vld [vmem:[%s7592_s1 + $0x3d0] ss:$8 sps:$4 sm:$0xff]  }
  0x8e   : > { %4185 = vmatprep.subr.bf16.mxu0 %v6120_v57  ;;  %v2978_v49 = vcombine.low %v2962_v14, %v2976_v38  ;;  %v2977_v16 = vcombine.low %v2955_v0, %v2969_v50  ;;  %v5691_v57 = vpack.i.b16 %v6737_v29, %v7647_v48  ;;  %v2762_v45 = vunpack.i.h.s16 %v2627_v30  ;;  %5846 = vmatprep.subr.bf16.mxu1 %v6126_v52  ;;  %v7650_v29 = vld [vmem:[#allocation12_spill] sm:$0xff] }
  0x8f   : > { %v1244_v3 = vrot.slane %v1216_v27, %v6323_v43  ;;  %v2839_v34 = vpack.i.b16 %v7649_v20, %v2772_v44  ;;  %v1246_v42 = vcombine.high %v1223_v58, %v1230_v62  ;;  %v5686_v25 = vpack.i.b16 %v2627_v30, %v2760_v55  ;;  %v6135_v30 = vld [vmem:[%s7592_s1 + $0x3f4] ss:$8 sps:$4 sm:$0xff]  }
  0x90   : > { %5723 = vmatprep.mubr.msk.bf16.mxu0 %vm965_vm0, %v2978_v49  ;;  %v2980_v44 = vcombine.low %v7651_v41, %v7650_v29  ;;  %v2981_v8 = vcombine.low %v7652_v13, %v5691_v57  ;;  %v5687_v17 = vpack.i.b16 %v7643_v15, %v2762_v45  ;;  %v1245_v19 = vcombine.low %v1223_v58, %v1230_v62  ;;  %v6132_v15 = vld [vmem:[%s7592_s1 + $0x3e4] ss:$8 sps:$4 sm:$0xff]   ;;  %v6136_v45 = vld [vmem:[%s7592_s1 + $0x400] ss:$8 sps:$4 sm:$0xff]  }
  0x91   : > { %4186 = vmatpush1.bf16.msra.mxu0 %v6118_v39  ;;  %v1248_v24 = vcombine.high %v1237_v12, %v1244_v3  ;;  %v2982_v53 = vcombine.low %v2839_v34, %v7653_v40  ;;  %v1262_v39 = vrot.slane %v1246_v42, %v6323_v43  ;;  %v1247_v46 = vcombine.low %v1237_v12, %v1244_v3  ;;  %v7121_v57 = vld.sshfl [vmem:[%s6320_s24] sm:$0xaa pattern:$0x75316420] }
  0x92   : > { %4187 = vmatprep.subr.bf16.mxu0 %v6123_v18  ;;  %3301 = vmatmul.mubr.bf16.gmra.mrb[4].mxu0 %v2977_v16  ;;  %v2996_v59 = vrot.slane %v2980_v44, %v6323_v43  ;;  %v3003_v1 = vrot.slane %v2981_v8, %v6323_v43  ;;  %v2979_v37 = vcombine.low %v5686_v25, %v5687_v17  ;;  %v6141_v44 = vld [vmem:[%s7592_s1 + $0x414] ss:$8 sps:$4 sm:$0xff]   ;;  %v5727_v13 = vld.sshfl [vmem:[%s6320_s24 + $0x8] sm:$0xff pattern:$0x75316420] }
  0x93   : > { %v1276_v55 = vrot.slane %v1248_v24, %v6323_v43  ;;  %v3010_v18 = vrot.slane %v2982_v53, %v6323_v43  ;;  %5860 = vmatpush1.bf16.msra.mxu1 %v6124_v9  ;;  %v1255_v6 = vrot.slane %v1245_v19, %v6323_v43  ;;  %v1269_v14 = vrot.slane %v1247_v46, %v6323_v43  ;;  %v5733_v17 = vld.sshfl [vmem:[%s6320_s24 + $0x38] sm:$0xff pattern:$0x75316420] }
  0x94   : > { %5847 = vmatprep.subr.bf16.mxu1 %v6129_v60  ;;  %v389_v31 = vcombine.high %v7638_v7, %v7638_v7  ;;  %v390_v0 = vcombine.high %v7640_v22, %v7640_v22  ;;  %v3045_v16 = vcombine.low %v6831_v32, %v6806_v23  ;;  %v3046_v48 = vcombine.low %v6822_v4, %v6843_v35 }
  0x95   : > { %4188 = vmatpush1.bf16.msra.mxu0 %v6121_v28  ;;  %v1278_v56 = vcombine.low %v1262_v39, %v1276_v55  ;;  %v3014_v21 = vcombine.high %v3003_v1, %v3010_v18  ;;  %v3013_v5 = vcombine.low %v3003_v1, %v3010_v18  ;;  %v2989_v28 = vrot.slane %v2979_v37, %v6323_v43  ;;  %v5728_v55 = vld.sshfl [vmem:[%s6320_s24 + $0x10] sm:$0x55 pattern:$0x75316420] }
  0x96   : > { %4189 = vmatprep.subr.bf16.mxu0 %v6126_v52  ;;  %v1277_v33 = vcombine.low %v1255_v6, %v1269_v14  ;;  %v465_v27 = vunpack.i.h.s16 %v389_v31  ;;  %v6130_v52 = vld [vmem:[%s7592_s1 + $0x3e0] ss:$8 sps:$4 sm:$0xff]   ;;  %v467_v50 = vunpack.i.h.s16 %v390_v0  ;;  %v5509_v22 = vpack.i.b16 %v389_v31, %v463_v61  ;;  %v6133_v61 = vld [vmem:[%s7592_s1 + $0x3f0] ss:$8 sps:$4 sm:$0xff]  }
  0x97   : > { %5546 = vmatprep.mubr.msk.bf16.mxu1 %vm965_vm0, %v1278_v56  ;;  %v3042_v10 = vrot.slane %v3014_v21, %v6323_v43  ;;  %v3035_v26 = vrot.slane %v3013_v5, %v6323_v43  ;;  %5861 = vmatpush1.bf16.msra.mxu1 %v6127_v2  ;;  %v3012_v38 = vcombine.high %v2989_v28, %v2996_v59  ;;  %v7157_v18 = vld.sshfl [vmem:[%s6320_s24 + $0x18] sm:$0xaa pattern:$0x75316420] }
  0x98   : > { %v3011_v7 = vcombine.low %v2989_v28, %v2996_v59  ;;  %5848 = vmatprep.subr.bf16.mxu1 %v6132_v15  ;;  %1545 = vmatmul.mubr.bf16.gmra.mrb[8].mxu1 %v1277_v33  ;;  %v5510_v58 = vpack.i.b16 %v390_v0, %v465_v27  ;;  %v5511_v3 = vpack.i.b16 %v6806_v23, %v467_v50  ;;  %v6139_v28 = vld [vmem:[%s7592_s1 + $0x410] ss:$8 sps:$4 sm:$0xff]  }
  0x99   : > { %4190 = vmatpush1.bf16.msra.mxu0 %v6124_v9  ;;  %v3028_v62 = vrot.slane %v3012_v38, %v6323_v43  ;;  %v3047_v9 = vcombine.low %v6847_v36, %v6863_v63  ;;  %v1281_v23 = vcombine.low %v6888_v47, %v6893_v54  ;;  %v3054_v32 = vrot.slane %v3045_v16, %v6323_v43  ;;  %v6138_v36 = vld [vmem:[%s7592_s1 + $0x404] ss:$8 sps:$4 sm:$0xff]  }
  0x9a   : > { %4191 = vmatprep.subr.bf16.mxu0 %v6129_v60  ;;  %v3021_v12 = vrot.slane %v3011_v7, %v6323_v43  ;;  %v1279_v49 = vcombine.low %v5509_v22, %v5510_v58  ;;  %v1280_v34 = vcombine.low %v5511_v3, %v6879_v51  ;;  %v3061_v35 = vrot.slane %v3046_v48, %v6323_v43 }
  0x9b   : > { %5862 = vmatpush1.bf16.msra.mxu1 %v6130_v52  ;;  %v3044_v11 = vcombine.low %v3028_v62, %v3042_v10  ;;  %v3068_v24 = vrot.slane %v3047_v9, %v6323_v43  ;;  %v3378_v63 = vcombine.high %v7121_v57, %v7121_v57  ;;  %v1302_v51 = vrot.slane %v1281_v23, %v6323_v43  ;;  %v5734_v62 = vld.sshfl [vmem:[%s6320_s24 + $0x40] sm:$0x55 pattern:$0x75316420] }
  0x9c   : > { %v3043_v20 = vcombine.low %v3021_v12, %v3035_v26  ;;  %v1288_v4 = vrot.slane %v1279_v49, %v6323_v43  ;;  %v1295_v42 = vrot.slane %v1280_v34, %v6323_v43  ;;  %5849 = vmatprep.subr.bf16.mxu1 %v6135_v30  ;;  %v3070_v47 = vcombine.high %v3054_v32, %v3061_v35  ;;  %v6144_v26 = vld [vmem:[%s7592_s1 + $0x424] ss:$8 sps:$4 sm:$0xff]   ;;  %v6142_v49 = vld [vmem:[%s7592_s1 + $0x420] ss:$8 sps:$4 sm:$0xff]  }
  0x9d   : > { %4192 = vmatpush1.bf16.msra.mxu0 %v6127_v2  ;;  %5724 = vmatprep.mubr.msk.bf16.mxu0 %vm965_vm0, %v3044_v11  ;;  %v3069_v54 = vcombine.low %v3054_v32, %v3061_v35  ;;  %v3071_v60 = vcombine.high %v3068_v24, %v3068_v24  ;;  %v3092_v41 = vrot.slane %v3068_v24, %v6323_v43  ;;  %v6147_v11 = vld [vmem:[%s7592_s1 + $0x434] ss:$8 sps:$4 sm:$0xff]  }
  0x9e   : > { %4193 = vmatprep.subr.bf16.mxu0 %v6132_v15  ;;  %3311 = vmatmul.mubr.bf16.gmra.mrb[8].mxu0 %v3043_v20  ;;  %v1304_v25 = vcombine.high %v1288_v4, %v1295_v42  ;;  %v1303_v29 = vcombine.low %v1288_v4, %v1295_v42  ;;  %v1305_v8 = vcombine.high %v1302_v51, %v1302_v51  ;;  %v7164_v15 = vld.sshfl [vmem:[%s6320_s24 + $0x30] sm:$0xaa pattern:$0x75316420] }
  0x9f   : > { %5863 = vmatpush1.bf16.msra.mxu1 %v6133_v61  ;;  %v3085_v40 = vrot.slane %v3070_v47, %v6323_v43  ;;  %v1326_v53 = vrot.slane %v1302_v51, %v6323_v43  ;;  %v3078_v39 = vrot.slane %v3069_v54, %v6323_v43  ;;  %v3099_v59 = vrot.slane %v3071_v60, %v6323_v43  ;;  %v6145_v47 = vld [vmem:[%s7592_s1 + $0x430] ss:$8 sps:$4 sm:$0xff]  }
  0xa0   : > { %v1319_v19 = vrot.slane %v1304_v25, %v6323_v43  ;;  %v1312_v1 = vrot.slane %v1303_v29, %v6323_v43  ;;  %5850 = vmatprep.subr.bf16.mxu1 %v6138_v36  ;;  %v3385_v46 = vrot.slane %v7121_v57, %v6323_v43  ;;  %v1333_v2 = vrot.slane %v1305_v8, %v6323_v43  ;;  %v6150_v29 = vld [vmem:[%s7592_s1 + $0x444] ss:$8 sps:$4 sm:$0xff]  }
  0xa1   : > { %4194 = vmatpush1.bf16.msra.mxu0 %v6130_v52  ;;  %v3100_v56 = vcombine.low %v3078_v39, %v3092_v41  ;;  %v3392_v37 = vrot.slane %v3378_v63, %v6323_v43  ;;  %v3402_v6 = vcombine.high %v5727_v13, %v5727_v13  ;;  %v3101_v21 = vcombine.low %v3085_v40, %v3099_v59 }
  0xa2   : > { %4195 = vmatprep.subr.bf16.mxu0 %v6135_v30  ;;  %v1334_v14 = vcombine.low %v1312_v1, %v1326_v53  ;;  %v3409_v5 = vrot.slane %v5727_v13, %v6323_v43  ;;  %v1335_v31 = vcombine.low %v1319_v19, %v1333_v2  ;;  %v3426_v10 = vcombine.high %v5728_v55, %v5728_v55  ;;  %v6148_v2 = vld [vmem:[%s7592_s1 + $0x440] ss:$8 sps:$4 sm:$0xff]  }
  0xa3   : > { %5864 = vmatpush1.bf16.msra.mxu1 %v6136_v45  ;;  %v3416_v0 = vrot.slane %v3402_v6, %v6323_v43  ;;  %v3433_v33 = vrot.slane %v5728_v55, %v6323_v43  ;;  %5725 = vmatprep.mubr.msk.bf16.mxu0 %vm965_vm0, %v3101_v21  ;;  %v3455_v27 = vrot.slane %v7157_v18, %v6323_v43  ;;  %v6153_v21 = vld [vmem:[%s7592_s1 + $0x454] ss:$8 sps:$4 sm:$0xff]  }
  0xa4   : > { %5851 = vmatprep.subr.bf16.mxu1 %v6141_v44  ;;  %v5782_v52 = vcombine.high %v3385_v46, %v3392_v37  ;;  %v3518_v38 = vcombine.high %v7164_v15, %v7164_v15  ;;  %v3542_v7 = vcombine.high %v5733_v17, %v5733_v17  ;;  %5547 = vmatprep.mubr.msk.bf16.mxu1 %vm965_vm0, %v1335_v31  ;;  %v5730_v46 = vld.sshfl [vmem:[%s6320_s24 + $0x20] sm:$0xff pattern:$0x75316420] }
  0xa5   : > { %4196 = vmatpush1.bf16.msra.mxu0 %v6133_v61  ;;  %v3440_v50 = vrot.slane %v3426_v10, %v6323_v43  ;;  %v3771_v22 = vcombine.low %v3409_v5, %v3416_v0  ;;  %v5783_v58 = vcombine.high %v3409_v5, %v3416_v0  ;;  %1555 = vmatmul.mubr.bf16.gmra.mrb[12].mxu1 %v1334_v14  ;;  %v5735_v61 = vld.sshfl [vmem:[%s6320_s24 + $0x48] sm:$0xaa pattern:$0x75316420] }
  0xa6   : > { %4197 = vmatprep.subr.bf16.mxu0 %v6138_v36  ;;  %3321 = vmatmul.mubr.bf16.gmra.mrb[12].mxu0 %v3100_v56  ;;  %v7183_v12 = vcombine.high %v3455_v27, %v3455_v27  ;;  %v3780_v3 = vrot.slane %v5782_v52, %v6323_v43  ;;  %v3532_v30 = vrot.slane %v3518_v38, %v6323_v43  ;;  %v5731_v10 = vld.sshfl [vmem:[%s6320_s24 + $0x28] sm:$0x55 pattern:$0x75316420] }
  0xa7   : > { %5865 = vmatpush1.bf16.msra.mxu1 %v6139_v28  ;;  %v3787_v16 = vrot.slane %v3771_v22, %v6323_v43  ;;  %v3794_v48 = vrot.slane %v5783_v58, %v6323_v43  ;;  %v3549_v57 = vrot.slane %v5733_v17, %v6323_v43  ;;  %v3556_v9 = vrot.slane %v3542_v7, %v6323_v43  ;;  %v6151_v22 = vld [vmem:[%s7592_s1 + $0x450] ss:$8 sps:$4 sm:$0xff]  }
  0xa8   : > { %5852 = vmatprep.subr.bf16.mxu1 %v6144_v26  ;;  %v5766_v20 = vpack.i.b16 %v7183_v12, %v3440_v50  ;;  %v3534_v34 = vcombine.high %v3532_v30, %v3532_v30  ;;  %v3566_v23 = vcombine.high %v5734_v62, %v5734_v62  ;;  %v3573_v42 = vrot.slane %v5734_v62, %v6323_v43 }
  0xa9   : > { %4198 = vmatpush1.bf16.msra.mxu0 %v6136_v45  ;;  %v3802_v4 = vcombine.low %v3780_v3, %v3787_v16  ;;  %v3803_v32 = vcombine.high %v3780_v3, %v3787_v16  ;;  %v3557_v35 = vcombine.high %v3549_v57, %v3549_v57  ;;  %v3558_v36 = vcombine.high %v3556_v9, %v3556_v9 }
  0xaa   : > { %4199 = vmatprep.subr.bf16.mxu0 %v6141_v44  ;;  %v3773_v24 = vcombine.low %v3433_v33, %v5766_v20  ;;  %v3580_v63 = vrot.slane %v3566_v23, %v6323_v43  ;;  %v3588_v51 = vcombine.high %v5735_v61, %v5735_v61  ;;  %v3595_v45 = vrot.slane %v5735_v61, %v6323_v43 }
  0xab   : > { %5866 = vmatpush1.bf16.msra.mxu1 %v6142_v49  ;;  %v3819_v54 = vrot.slane %v3803_v32, %v6323_v43  ;;  %v3902_v25 = vcombine.low %v3534_v34, %v3549_v57  ;;  %v3667_v60 = vunpack.i.h.s16 %v7183_v12  ;;  %v3903_v13 = vcombine.low %v3556_v9, %v3557_v35 }
  0xac   : > { %5853 = vmatprep.subr.bf16.mxu1 %v6147_v11  ;;  %v3801_v41 = vrot.slane %v3773_v24, %v6323_v43  ;;  %v3602_v44 = vrot.slane %v3588_v51, %v6323_v43  ;;  %v3904_v8 = vcombine.low %v3558_v36, %v3573_v42  ;;  %v3603_v40 = vcombine.high %v3595_v45, %v3595_v45  ;;  %v5736_v24 = vld.sshfl [vmem:[%s6320_s24 + $0x50] sm:$0xff pattern:$0x75316420] }
  0xad   : > { %4200 = vmatpush1.bf16.msra.mxu0 %v6139_v28  ;;  %v3912_v53 = vrot.slane %v3902_v25, %v6323_v43  ;;  %v7214_v39 = vrot.slane %v3802_v4, %v6323_v43  ;;  %v3448_v55 = vcombine.high %v7157_v18, %v7157_v18  ;;  %v3919_v1 = vrot.slane %v3903_v13, %v6323_v43 }
  0xae   : > { %4201 = vmatprep.subr.bf16.mxu0 %v6144_v26  ;;  %v3804_v17 = vcombine.low %v3794_v48, %v3801_v41  ;;  %v3805_v19 = vcombine.high %v3794_v48, %v3801_v41  ;;  %v7218_v59 = vcombine.high %v3602_v44, %v3602_v44  ;;  %v3697_v56 = vunpack.i.h.s16 %v3603_v40  ;;  %v5737_v44 = vld.sshfl [vmem:[%s6320_s24 + $0x58] sm:$0x55 pattern:$0x75316420] }
  0xaf   : > { %5867 = vmatpush1.bf16.msra.mxu1 %v6145_v47  ;;  %v5774_v37 = vpack.i.b16 %v3603_v40, %v3580_v63  ;;  %v3926_v6 = vrot.slane %v3904_v8, %v6323_v43  ;;  %v3462_v18 = vrot.slane %v3448_v55, %v6323_v43  ;;  %v3934_v5 = vcombine.low %v3912_v53, %v3919_v1 }
  0xb0   : > { %5854 = vmatprep.subr.bf16.mxu1 %v6150_v29  ;;  %v3833_v14 = vrot.slane %v3805_v19, %v6323_v43  ;;  %v3935_v31 = vcombine.high %v3912_v53, %v3919_v1  ;;  %v7232_v28 = vrot.slane %v3804_v17, %v6323_v43  ;;  %v5775_v0 = vpack.i.b16 %v7218_v59, %v3697_v56 }
  0xb1   : > { %4202 = vmatpush1.bf16.msra.mxu0 %v6142_v49  ;;  %v3464_v33 = vcombine.high %v3462_v18, %v3462_v18  ;;  %v3472_v26 = vcombine.high %v5730_v46, %v5730_v46  ;;  %v3479_v27 = vrot.slane %v5730_v46, %v6323_v43  ;;  %v3944_v50 = vrot.slane %v3934_v5, %v6323_v43 }
  0xb2   : > { %4203 = vmatprep.subr.bf16.mxu0 %v6147_v11  ;;  %v3835_v52 = vcombine.low %v3819_v54, %v3833_v14  ;;  %v3951_v38 = vrot.slane %v3935_v31, %v6323_v43  ;;  %v3834_v7 = vcombine.low %v7214_v39, %v7232_v28  ;;  %v3905_v58 = vcombine.low %v5774_v37, %v5775_v0 }
  0xb3   : > { %5868 = vmatpush1.bf16.msra.mxu1 %v6148_v2  ;;  %v3486_v62 = vrot.slane %v3472_v26, %v6323_v43  ;;  %v3487_v12 = vcombine.high %v3479_v27, %v3479_v27  ;;  %v3669_v3 = vunpack.i.h.s16 %v3464_v33  ;;  %v3496_v30 = vcombine.high %v5731_v10, %v5731_v10 }
  0xb4   : > { %5855 = vmatprep.subr.bf16.mxu1 %v6153_v21  ;;  %5812 = vmatprep.mubr.msk.bf16.mxu0 %vm965_vm0, %v3835_v52  ;;  %v3503_v49 = vrot.slane %v5731_v10, %v6323_v43  ;;  %v3525_v16 = vrot.slane %v7164_v15, %v6323_v43  ;;  %v3671_v48 = vunpack.i.h.s16 %v3479_v27  ;;  %v3933_v61 = vrot.slane %v3905_v58, %v6323_v43 }
  0xb5   : > { %4204 = vmatpush1.bf16.msra.mxu0 %v6145_v47  ;;  %v3488_v57 = vcombine.high %v3486_v62, %v3486_v62  ;;  %v3673_v11 = vunpack.i.h.s16 %v3486_v62  ;;  %v3675_v20 = vunpack.i.h.s16 %v3487_v12  ;;  %v3510_v34 = vrot.slane %v3496_v30, %v6323_v43 }
  0xb6   : > { %4205 = vmatprep.subr.bf16.mxu0 %v6150_v29  ;;  %v3533_v9 = vcombine.high %v3525_v16, %v3525_v16  ;;  %v3679_v23 = vunpack.i.h.s16 %v3503_v49  ;;  %v5767_v4 = vpack.i.b16 %v3464_v33, %v3667_v60  ;;  %v3936_v32 = vcombine.low %v3926_v6, %v3933_v61 }
  0xb7   : > { %5869 = vmatpush1.bf16.msra.mxu1 %v6151_v22  ;;  %v3937_v35 = vcombine.high %v3926_v6, %v3933_v61  ;;  %v3677_v42 = vunpack.i.h.s16 %v3488_v57  ;;  %v5768_v15 = vpack.i.b16 %v3479_v27, %v3669_v3  ;;  %v5769_v36 = vpack.i.b16 %v3486_v62, %v3671_v48 }
  0xb8   : > { %v5770_v63 = vpack.i.b16 %v3487_v12, %v3673_v11  ;;  %v5771_v51 = vpack.i.b16 %v3488_v57, %v3675_v20  ;;  %v5773_v47 = vpack.i.b16 %v3510_v34, %v3679_v23  ;;  %v3958_v45 = vrot.slane %v3936_v32, %v6323_v43 }
  0xb9   : > { %4206 = vmatpush1.bf16.msra.mxu0 %v6148_v2  ;;  %v3965_v54 = vrot.slane %v3937_v35, %v6323_v43  ;;  %v5772_v25 = vpack.i.b16 %v3503_v49, %v3677_v42  ;;  %v3836_v29 = vcombine.low %v5767_v4, %v5768_v15  ;;  %v3612_v13 = vcombine.high %v5736_v24, %v5736_v24 }
  0xba   : > { %4207 = vmatprep.subr.bf16.mxu0 %v6153_v21  ;;  %v3837_v60 = vcombine.low %v5769_v36, %v5770_v63  ;;  %v3839_v41 = vcombine.low %v5773_v47, %v3533_v9  ;;  %v3619_v8 = vrot.slane %v5736_v24, %v6323_v43  ;;  %v3966_v53 = vcombine.low %v3944_v50, %v3958_v45 }
  0xbb   : > { %v3967_v40 = vcombine.low %v3951_v38, %v3965_v54  ;;  %v3838_v39 = vcombine.low %v5771_v51, %v5772_v25  ;;  %v3846_v55 = vrot.slane %v3836_v29, %v6323_v43  ;;  %v3626_v1 = vrot.slane %v3612_v13, %v6323_v43 }
  0xbc   : > { %v3853_v17 = vrot.slane %v3837_v60, %v6323_v43  ;;  %v3867_v19 = vrot.slane %v3839_v41, %v6323_v43  ;;  %v3627_v46 = vcombine.high %v3619_v8, %v3619_v8  ;;  %v3636_v56 = vcombine.high %v5737_v44, %v5737_v44 }
  0xbd   : > { %4208 = vmatpush1.bf16.msra.mxu0 %v6151_v22  ;;  %5814 = vmatprep.mubr.msk.bf16.mxu1 %vm965_vm0, %v3967_v40  ;;  %v3860_v2 = vrot.slane %v3838_v39, %v6323_v43  ;;  %v3643_v37 = vrot.slane %v5737_v44, %v6323_v43  ;;  %v3699_v6 = vunpack.i.h.s16 %v7218_v59  ;;  %v3628_v21 = vcombine.high %v3626_v1, %v3626_v1 }
  0xbe   : > { %4234 = vmatmul.mubr.bf16.vlgmr.msra.gmra.mrb[16].mxu1 %v3966_v53  ;;  %v3869_v18 = vcombine.high %v3846_v55, %v3853_v17  ;;  %v3701_v14 = vunpack.i.h.s16 %v3619_v8  ;;  %v3703_v5 = vunpack.i.h.s16 %v3626_v1  ;;  %v3650_v28 = vrot.slane %v3636_v56, %v6323_v43 }
  0xbf   : > { %v3871_v31 = vcombine.high %v3860_v2, %v3867_v19  ;;  %v3705_v0 = vunpack.i.h.s16 %v3627_v46  ;;  %v3709_v10 = vunpack.i.h.s16 %v3643_v37  ;;  %v3707_v26 = vunpack.i.h.s16 %v3628_v21 }
  0xc0   : > { %4214 = vmatmul.mubr.bf16.vlgmr.msra.gmra.mrb[0].mxu0 %v3834_v7  ;;  %v3885_v33 = vrot.slane %v3869_v18, %v6323_v43  ;;  %v5776_v27 = vpack.i.b16 %v3619_v8, %v3699_v6  ;;  %v5777_v52 = vpack.i.b16 %v3626_v1, %v3701_v14  ;;  %v5778_v7 = vpack.i.b16 %v3627_v46, %v3703_v5 }
  0xc1   : > { %v3899_v38 = vrot.slane %v3871_v31, %v6323_v43  ;;  %v5779_v50 = vpack.i.b16 %v3628_v21, %v3705_v0  ;;  %v5781_v59 = vpack.i.b16 %v3650_v28, %v3709_v10  ;;  %v5780_v22 = vpack.i.b16 %v3643_v37, %v3707_v26  ;;  %v7654_v10 = vld [vmem:[#allocation2_spill] sm:$0xff] }
  0xc2   : > { %v3968_v58 = vcombine.low %v5776_v27, %v5777_v52  ;;  %v3868_v62 = vcombine.low %v3846_v55, %v3853_v17  ;;  %v3870_v12 = vcombine.low %v3860_v2, %v3867_v19  ;;  %v4270_v26 = vld [vmem:[%s7593_s2] sm:$0x3]  ;;  %v4278_v27 = vsub.s32 1, %v7654_v10 }
  0xc3   : > { %v3901_v3 = vcombine.low %v3885_v33, %v3899_v38  ;;  %v3969_v30 = vcombine.low %v5778_v7, %v5779_v50  ;;  %v3970_v49 = vcombine.low %v5780_v22, %v5781_v59  ;;  %v4274_v33 = vsub.s32 0, %v7654_v10  ;;  %v4298_v52 = vld [vmem:[%s7594_s3] sm:$0x3] }
  0xc4   : > { %v3977_v16 = vrot.slane %v3968_v58, %v6323_v43  ;;  %v3878_v48 = vrot.slane %v3868_v62, %v6323_v43  ;;  %v3892_v61 = vrot.slane %v3870_v12, %v6323_v43  ;;  %v7304_v50 = vrot.slane %v4270_v26, %v4278_v27 }
  0xc5   : > { %5813 = vmatprep.mubr.msk.bf16.mxu0 %vm965_vm0, %v3901_v3  ;;  %v3984_v57 = vrot.slane %v3969_v30, %v6323_v43  ;;  %v3991_v11 = vrot.slane %v3970_v49, %v6323_v43  ;;  %v7302_v38 = vrot.slane %v4270_v26, %v4274_v33  ;;  %v7306_v22 = vrot.slane %v4298_v52, %v4274_v33 }
  0xc6   : > { %v3900_v20 = vcombine.low %v3878_v48, %v3892_v61  ;;  %v7308_v30 = vrot.slane %v4298_v52, %v4278_v27 }
  0xc7   : > { %v3993_v34 = vcombine.high %v3977_v16, %v3984_v57  ;;  %v3992_v9 = vcombine.low %v3977_v16, %v3984_v57  ;;  %v3994_v23 = vcombine.high %v3991_v11, %v3991_v11  ;;  %v4015_v4 = vrot.slane %v3991_v11, %v6323_v43 }
  0xc8   : > { %4224 = vmatmul.mubr.bf16.gmra.mrb[4].mxu0 %v3900_v20 }
  0xc9   : > { %v4008_v32 = vrot.slane %v3993_v34, %v6323_v43  ;;  %v4001_v35 = vrot.slane %v3992_v9, %v6323_v43  ;;  %v4022_v42 = vrot.slane %v3994_v23, %v6323_v43 }
  0xcb   : > { %v4023_v15 = vcombine.low %v4001_v35, %v4015_v4  ;;  %v4024_v24 = vcombine.low %v4008_v32, %v4022_v42 }
  0xcd   : > { %5815 = vmatprep.mubr.msk.bf16.mxu1 %vm965_vm0, %v4024_v24 }
  0xce   : > { %4244 = vmatmul.mubr.bf16.gmra.mrb[20].mxu1 %v4023_v15 }
 0x152   : > { %v1526_v36 = vpop.f32.mrb[0].mxu1 }
 0x153   : > { %v1528_v63 = vpop.f32.mrb[1].mxu1 }
 0x154   : > { %v1530_v51 = vpop.f32.mrb[2].mxu1 }
 0x155   : > { %v1532_v47 = vpop.f32.mrb[3].mxu1 }
 0x160   : > { %v7278_v54 = vpop.f32.mrb[4].mxu1 }
 0x161   : > { %v7280_v45 = vpop.f32.mrb[5].mxu1 }
 0x162   : > { %v7282_v25 = vpop.f32.mrb[6].mxu1 }
 0x163   : > { %v7284_v29 = vpop.f32.mrb[7].mxu1 }
 0x16b   : > { %v1546_v60 = vpop.f32.mrb[8].mxu1 }
 0x16c   : > { %v1548_v41 = vpop.f32.mrb[9].mxu1 }
 0x16d   : > { %v1550_v44 = vpop.f32.mrb[10].mxu1 }
 0x16e   : > { %v1552_v13 = vpop.f32.mrb[11].mxu1 }
 0x171   : > { %v3312_v8 = vpop.f32.mrb[8].mxu0 }
 0x172   : > { %v5878_v40 = vadd.f32 %v3312_v8, %v1546_v60  ;;  %v3314_v53 = vpop.f32.mrb[9].mxu0 }
 0x173   : > { %v5880_v39 = vadd.f32 %v3314_v53, %v1548_v41  ;;  %v3316_v55 = vpop.f32.mrb[10].mxu0 }
 0x174   : > { %v5882_v17 = vadd.f32 %v3316_v55, %v1550_v44  ;;  %v3318_v19 = vpop.f32.mrb[11].mxu0 }
 0x175   : > { %v5884_v1 = vadd.f32 %v3318_v19, %v1552_v13 }
 0x178   : > { %v1556_v2 = vpop.f32.mrb[12].mxu1 }
 0x179   : > { %v3322_v46 = vpop.f32.mrb[12].mxu0  ;;  %v1558_v6 = vpop.f32.mrb[13].mxu1 }
 0x17a   : > { %v3324_v56 = vpop.f32.mrb[13].mxu0  ;;  %v7286_v37 = vadd.f32 %v3322_v46, %v1556_v2  ;;  %v1560_v14 = vpop.f32.mrb[14].mxu1 }
 0x17b   : > { %v3326_v18 = vpop.f32.mrb[14].mxu0  ;;  %v7288_v21 = vadd.f32 %v3324_v56, %v1558_v6  ;;  %v1562_v28 = vpop.f32.mrb[15].mxu1 }
 0x17c   : > { %v3328_v5 = vpop.f32.mrb[15].mxu0  ;;  %v7290_v31 = vadd.f32 %v3326_v18, %v1560_v14 }
 0x17d   : > { %v7292_v0 = vadd.f32 %v3328_v5, %v1562_v28 }
 0x191   : > { %v4235_v58 = vpop.f32.mrb[16].mxu1 }
 0x192   : > { %v5879_v12 = vadd.f32 %v5878_v40, %v4235_v58  ;;  %v4237_v49 = vpop.f32.mrb[17].mxu1 }
 0x193   : > { %v4215_v7 = vpop.f32.mrb[0].mxu0  ;;  %v5881_v61 = vadd.f32 %v5880_v39, %v4237_v49  ;;  %v4239_v11 = vpop.f32.mrb[18].mxu1 }
 0x194   : > { %v5870_v59 = vadd.f32 %v4215_v7, %v1526_v36  ;;  %v4217_v62 = vpop.f32.mrb[1].mxu0  ;;  %v4290_v34 = vmul.f32 %v5879_v12, %v7302_v38  ;;  %v5883_v23 = vadd.f32 %v5882_v17, %v4239_v11  ;;  %v4241_v32 = vpop.f32.mrb[19].mxu1 }
 0x195   : > { %v5871_v3 = vadd.f32 %v4217_v62, %v1528_v63  ;;  %v4219_v16 = vpop.f32.mrb[2].mxu0  ;;  %v4291_v42 = vmul.f32 %v5881_v61, %v7304_v50  ;;  %v5885_v24 = vadd.f32 %v5884_v1, %v4241_v32 }
 0x196   : > { %v4282_v48 = vmul.f32 %v5870_v59, %v7302_v38  ;;  %v5872_v57 = vadd.f32 %v4219_v16, %v1530_v51  ;;  %v4221_v20 = vpop.f32.mrb[3].mxu0  ;;  %v4318_v36 = vadd.f32 %v7306_v22, %v4290_v34  ;;  %v4292_v51 = vmul.f32 %v5883_v23, %v7302_v38 }
 0x197   : > { %v4283_v9 = vmul.f32 %v5871_v3, %v7304_v50  ;;  %v5873_v4 = vadd.f32 %v4221_v20, %v1532_v47  ;;  %v4319_v44 = vadd.f32 %v7308_v30, %v4291_v42  ;;  %v4293_v13 = vmul.f32 %v5885_v24, %v7304_v50 }
 0x198   : > { %v4310_v35 = vadd.f32 %v7306_v22, %v4282_v48  ;;  %v4284_v15 = vmul.f32 %v5872_v57, %v7302_v38  ;;  %v4334_v8 = vmax.f32 %v4318_v36, 0.0  ;;  %v4320_v53 = vadd.f32 %v7306_v22, %v4292_v51 }
 0x199   : > { %v4311_v63 = vadd.f32 %v7308_v30, %v4283_v9  ;;  %v4285_v60 = vmul.f32 %v5873_v4, %v7304_v50  ;;  %v4335_v55 = vmax.f32 %v4319_v44, 0.0  ;;  %v4321_v19 = vadd.f32 %v7308_v30, %v4293_v13 }
 0x19a   : > { %v4326_v41 = vmax.f32 %v4310_v35, 0.0  ;;  %v4312_v47 = vadd.f32 %v7306_v22, %v4284_v15  ;;  %v4336_v2 = vmax.f32 %v4320_v53, 0.0 }
 0x19b   : > { %v4327_v40 = vmax.f32 %v4311_v63, 0.0  ;;  %v4313_v39 = vadd.f32 %v7308_v30, %v4285_v60  ;;  %v4558_v6 = vcombine.low %v4334_v8, %v4335_v55  ;;  %v4559_v18 = vcombine.high %v4334_v8, %v4335_v55  ;;  %v7326_v5 = vpop.f32.mrb[4].mxu0 }
 0x19c   : > { %v4328_v17 = vmax.f32 %v4312_v47, 0.0  ;;  %v4337_v14 = vmax.f32 %v4321_v19, 0.0  ;;  %v7330_v27 = vpop.f32.mrb[5].mxu0 }
 0x19d   : > { %v4358_v1 = vcombine.low %v4326_v41, %v4327_v40  ;;  %v4359_v46 = vcombine.high %v4326_v41, %v4327_v40  ;;  %v4329_v56 = vmax.f32 %v4313_v39, 0.0  ;;  %v4566_v52 = vrot.slane %v4558_v6, %v6323_v43  ;;  %v7334_v62 = vpop.f32.mrb[6].mxu0 }
 0x19e   : > { %v4573_v7 = vrot.slane %v4559_v18, %v6323_v43  ;;  %v4608_v59 = vcombine.low %v4336_v2, %v4337_v14  ;;  %v4609_v58 = vcombine.high %v4336_v2, %v4337_v14  ;;  %v7336_v49 = vpop.f32.mrb[7].mxu0 }
 0x19f   : > { %v4366_v28 = vrot.slane %v4358_v1, %v6323_v43  ;;  %v4373_v10 = vrot.slane %v4359_v46, %v6323_v43  ;;  %v4408_v33 = vcombine.low %v4328_v17, %v4329_v56  ;;  %v4409_v26 = vcombine.high %v4328_v17, %v4329_v56 }
 0x1a0   : > { %v4574_v48 = vcombine.high %v4566_v52, %v4566_v52  ;;  %v4575_v61 = vcombine.high %v4573_v7, %v4573_v7  ;;  %v7343_v34 = vrot.slane %v4566_v52, %v6323_v43  ;;  %v4589_v9 = vrot.slane %v4573_v7, %v6323_v43 }
 0x1a1   : > { %v4374_v12 = vcombine.high %v4366_v28, %v4366_v28  ;;  %v4375_v3 = vcombine.high %v4373_v10, %v4373_v10  ;;  %v4382_v16 = vrot.slane %v4366_v28, %v6323_v43  ;;  %v4389_v57 = vrot.slane %v4373_v10, %v6323_v43  ;;  %v7351_v36 = vpop.f32.mrb[20].mxu1 }
 0x1a2   : > { %v7347_v23 = vrot.slane %v4574_v48, %v6323_v43  ;;  %v4603_v4 = vrot.slane %v4575_v61, %v6323_v43  ;;  %v4416_v32 = vrot.slane %v4408_v33, %v6323_v43  ;;  %v4423_v60 = vrot.slane %v4409_v26, %v6323_v43  ;;  %v7357_v44 = vpop.f32.mrb[21].mxu1 }
 0x1a3   : > { %v4396_v11 = vrot.slane %v4374_v12, %v6323_v43  ;;  %v4403_v20 = vrot.slane %v4375_v3, %v6323_v43  ;;  %v4616_v41 = vrot.slane %v4608_v59, %v6323_v43  ;;  %v7363_v53 = vpop.f32.mrb[22].mxu1  ;;  %v4623_v19 = vrot.slane %v4609_v58, %v6323_v43 }
 0x1a4   : > { %v5820_v63 = vcombine.high %v7343_v34, %v7347_v23  ;;  %v4998_v51 = vcombine.low %v4589_v9, %v4603_v4  ;;  %v5821_v17 = vcombine.high %v4589_v9, %v4603_v4  ;;  %v7372_v1 = vpop.f32.mrb[23].mxu1  ;;  %v4424_v28 = vcombine.high %v4416_v32, %v4416_v32 }
 0x1a5   : > { %v4733_v35 = vcombine.low %v4382_v16, %v4396_v11  ;;  %v5816_v42 = vcombine.high %v4382_v16, %v4396_v11  ;;  %v4735_v15 = vcombine.low %v4389_v57, %v4403_v20  ;;  %v5817_v24 = vcombine.high %v4389_v57, %v4403_v20 }
 0x1a6   : > { %v7366_v39 = vrot.slane %v5820_v63, %v6323_v43  ;;  %v7369_v55 = vrot.slane %v4998_v51, %v6323_v43  ;;  %v4425_v10 = vcombine.high %v4423_v60, %v4423_v60  ;;  %v4432_v59 = vrot.slane %v4416_v32, %v6323_v43 }
 0x1a7   : > { %v4743_v47 = vrot.slane %v4733_v35, %v6323_v43  ;;  %v4750_v13 = vrot.slane %v5816_v42, %v6323_v43  ;;  %v4757_v8 = vrot.slane %v4735_v15, %v6323_v43  ;;  %v4764_v40 = vrot.slane %v5817_v24, %v6323_v43 }
 0x1a8   : > { %v5029_v18 = vcombine.low %v7366_v39, %v7369_v55  ;;  %v5030_v14 = vcombine.high %v7366_v39, %v7369_v55  ;;  %v4439_v58 = vrot.slane %v4423_v60, %v6323_v43  ;;  %v4446_v16 = vrot.slane %v4424_v28, %v6323_v43 }
 0x1a9   : > { %v4765_v46 = vcombine.low %v4743_v47, %v4750_v13  ;;  %v4766_v2 = vcombine.high %v4743_v47, %v4750_v13  ;;  %v4767_v56 = vcombine.low %v4757_v8, %v4764_v40  ;;  %v4768_v6 = vcombine.high %v4757_v8, %v4764_v40 }
 0x1aa   : > { %v7387_v48 = vrot.slane %v4425_v10, %v6323_v43  ;;  %v5070_v57 = vrot.slane %v5821_v17, %v6323_v43  ;;  %v4455_v11 = vcombine.high %v4439_v58, %v4439_v58  ;;  %v4624_v20 = vcombine.high %v4616_v41, %v4616_v41 }
 0x1ab   : > { %v4775_v33 = vrot.slane %v4765_v46, %v6323_v43  ;;  %v4782_v26 = vrot.slane %v4766_v2, %v6323_v43  ;;  %v4789_v52 = vrot.slane %v4767_v56, %v6323_v43  ;;  %v4796_v7 = vrot.slane %v4768_v6, %v6323_v43 }
 0x1ac   : > { %v4625_v9 = vcombine.high %v4623_v19, %v4623_v19  ;;  %v4799_v32 = vcombine.low %v4432_v59, %v4446_v16  ;;  %v5818_v35 = vcombine.high %v4432_v59, %v4446_v16  ;;  %v4801_v42 = vcombine.low %v4439_v58, %v7387_v48 }
 0x1ad   : > { %v4797_v12 = vcombine.low %v4775_v33, %v4789_v52  ;;  %v4798_v3 = vcombine.low %v4782_v26, %v4796_v7  ;;  %v4829_v15 = vrot.slane %v4455_v11, %v6323_v43  ;;  %v4632_v24 = vrot.slane %v4616_v41, %v6323_v43 }
 0x1ae   : > { %v4639_v63 = vrot.slane %v4623_v19, %v6323_v43  ;;  %v4646_v51 = vrot.slane %v4624_v20, %v6323_v43  ;;  %v4808_v60 = vrot.slane %v4799_v32, %v6323_v43  ;;  %v4815_v47 = vrot.slane %v5818_v35, %v6323_v43  ;;  %v5332_v32 = vld [vmem:[%s7392_s27 + $0x8] sm:$0xff] }
 0x1af   : > { %v5834_v4 = vpack.c.bf16 %v4798_v3, %v4797_v12  ;;  %v4822_v13 = vrot.slane %v4801_v42, %v6323_v43  ;;  %v5874_v8 = vadd.f32 %v7326_v5, %v7278_v54  ;;  %v7415_v40 = vrot.slane %v4625_v9, %v6323_v43 }
 0x1b0   : > { %v4655_v41 = vcombine.high %v4639_v63, %v4639_v63  ;;  %v5062_v17 = vcombine.low %v4632_v24, %v4646_v51  ;;  %v5822_v19 = vcombine.high %v4632_v24, %v4646_v51  ;;  %v4830_v46 = vcombine.low %v4808_v60, %v4815_v47 }
 0x1b1   : > { %5324 = vst.msk [vmem:[%s7392_s27] sm:$0xff] %vm7396_vm5, %v5834_v4  ;;  %v4831_v2 = vcombine.high %v4808_v60, %v4815_v47  ;;  %v4832_v56 = vcombine.low %v4822_v13, %v4829_v15  ;;  %v4833_v6 = vcombine.high %v4822_v13, %v4829_v15  ;;  %v5091_v5 = vrot.slane %v4639_v63, %v6323_v43 }
 0x1b2   : > { %v5077_v10 = vrot.slane %v5062_v17, %v6323_v43  ;;  %v5084_v54 = vrot.slane %v5822_v19, %v6323_v43  ;;  %v4286_v33 = vmul.f32 %v5874_v8, %v7302_v38  ;;  %v4840_v26 = vrot.slane %v4830_v46, %v6323_v43  ;;  %v5340_v46 = vld [vmem:[%s7392_s27 + $0x28] sm:$0xff] }
 0x1b3   : > { %v4847_v52 = vrot.slane %v4831_v2, %v6323_v43  ;;  %v4854_v7 = vrot.slane %v4832_v56, %v6323_v43  ;;  %v4861_v59 = vrot.slane %v4833_v6, %v6323_v43  ;;  %v4996_v24 = vcombine.low %v7343_v34, %v7347_v23 }
 0x1b4   : > { %v5092_v58 = vcombine.low %v5070_v57, %v5077_v10  ;;  %v5093_v12 = vcombine.high %v5070_v57, %v5077_v10  ;;  %v5094_v3 = vcombine.low %v5084_v54, %v5091_v5  ;;  %v5095_v16 = vcombine.high %v5084_v54, %v5091_v5 }
 0x1b5   : > { %v4862_v11 = vcombine.low %v4840_v26, %v4854_v7  ;;  %v4863_v20 = vcombine.low %v4847_v52, %v4861_v59  ;;  %v4314_v9 = vadd.f32 %v7306_v22, %v4286_v33  ;;  %v5887_v51 = vadd.f32 %v7286_v37, %v7351_v36 }
 0x1b6   : > { %v5102_v35 = vrot.slane %v5092_v58, %v6323_v43  ;;  %v5109_v42 = vrot.slane %v5093_v12, %v6323_v43  ;;  %v5116_v57 = vrot.slane %v5094_v3, %v6323_v43  ;;  %v5123_v15 = vrot.slane %v5095_v16, %v6323_v43 }
 0x1b7   : > { %v5835_v63 = vpack.c.bf16 %v4863_v20, %v4862_v11  ;;  %v5875_v60 = vadd.f32 %v7330_v27, %v7280_v45  ;;  %v5126_v8 = vcombine.low %v7415_v40, %v4655_v41  ;;  %v5889_v17 = vadd.f32 %v7288_v21, %v7357_v44 }
 0x1b8   : > { %v5124_v47 = vcombine.low %v5102_v35, %v5116_v57  ;;  %v5125_v13 = vcombine.low %v5109_v42, %v5123_v15  ;;  %v4330_v2 = vmax.f32 %v4314_v9, 0.0  ;;  %v4294_v34 = vmul.f32 %v5887_v51, %v7302_v38 }
 0x1b9   : > { %v5333_v19 = vsel %vm7436_vm8, %v5835_v63, %v5332_v32  ;;  %v4287_v37 = vmul.f32 %v5875_v60, %v7304_v50  ;;  %v4295_v45 = vmul.f32 %v5889_v17, %v7304_v50  ;;  %v5876_v27 = vadd.f32 %v7334_v62, %v7282_v25 }
 0x1ba   : > { %5334 = vst [vmem:[%s7392_s27 + $0x8] sm:$0xff] %v5333_v19  ;;  %v5839_v23 = vpack.c.bf16 %v5125_v13, %v5124_v47  ;;  %v5891_v21 = vadd.f32 %v7290_v31, %v7363_v53  ;;  %v4322_v36 = vadd.f32 %v7306_v22, %v4294_v34  ;;  %v5877_v41 = vadd.f32 %v7336_v49, %v7284_v29 }
 0x1bb   : > { %v4315_v44 = vadd.f32 %v7308_v30, %v4287_v37  ;;  %v5893_v56 = vadd.f32 %v7292_v0, %v7372_v1  ;;  %v4323_v28 = vadd.f32 %v7308_v30, %v4295_v45  ;;  %v4288_v25 = vmul.f32 %v5876_v27, %v7302_v38 }
 0x1bc   : > { %v5341_v6 = vsel %vm7436_vm8, %v5839_v23, %v5340_v46  ;;  %v4296_v62 = vmul.f32 %v5891_v21, %v7302_v38  ;;  %v4338_v31 = vmax.f32 %v4322_v36, 0.0  ;;  %v4289_v10 = vmul.f32 %v5877_v41, %v7304_v50 }
 0x1bd   : > { %5342 = vst [vmem:[%s7392_s27 + $0x28] sm:$0xff] %v5341_v6  ;;  %v4331_v53 = vmax.f32 %v4315_v44, 0.0  ;;  %v4297_v54 = vmul.f32 %v5893_v56, %v7304_v50  ;;  %v4339_v29 = vmax.f32 %v4323_v28, 0.0  ;;  %v7480_v49 = vadd.f32 %v7306_v22, %v4288_v25 }
 0x1be   : > { %v7483_v0 = vadd.f32 %v7306_v22, %v4296_v62  ;;  %v7486_v1 = vrot.slane %v4996_v24, %v6323_v43  ;;  %v7489_v5 = vrot.slane %v5126_v8, %v6323_v43  ;;  %v4457_v26 = vcombine.high %v7387_v48, %v7387_v48 }
 0x1bf   : > { %v4458_v38 = vcombine.low %v4330_v2, %v4331_v53  ;;  %v4459_v33 = vcombine.high %v4330_v2, %v4331_v53  ;;  %v4657_v50 = vcombine.high %v7415_v40, %v7415_v40  ;;  %v4658_v52 = vcombine.low %v4338_v31, %v4339_v29 }
 0x1c0   : > { %v4659_v7 = vcombine.high %v4338_v31, %v4339_v29  ;;  %v4317_v58 = vadd.f32 %v7308_v30, %v4289_v10  ;;  %v4325_v12 = vadd.f32 %v7308_v30, %v4297_v54  ;;  %v4332_v11 = vmax.f32 %v7480_v49, 0.0 }
 0x1c1   : > { %v4466_v59 = vrot.slane %v4458_v38, %v6323_v43  ;;  %v4473_v22 = vrot.slane %v4459_v33, %v6323_v43  ;;  %v4666_v3 = vrot.slane %v4658_v52, %v6323_v43  ;;  %v4340_v48 = vmax.f32 %v7483_v0, 0.0 }
 0x1c2   : > { %v4673_v16 = vrot.slane %v4659_v7, %v6323_v43  ;;  %v4333_v45 = vmax.f32 %v4317_v58, 0.0  ;;  %v4341_v44 = vmax.f32 %v4325_v12, 0.0 }
 0x1c3   : > { %v4474_v20 = vcombine.high %v4466_v59, %v4466_v59  ;;  %v4475_v40 = vcombine.high %v4473_v22, %v4473_v22  ;;  %v4482_v9 = vrot.slane %v4466_v59, %v6323_v43  ;;  %v4489_v32 = vrot.slane %v4473_v22, %v6323_v43 }
 0x1c4   : > { %v4674_v35 = vcombine.high %v4666_v3, %v4666_v3  ;;  %v4675_v42 = vcombine.high %v4673_v16, %v4673_v16  ;;  %v4682_v57 = vrot.slane %v4666_v3, %v6323_v43  ;;  %v4689_v30 = vrot.slane %v4673_v16, %v6323_v43 }
 0x1c5   : > { %v4496_v15 = vrot.slane %v4474_v20, %v6323_v43  ;;  %v4503_v24 = vrot.slane %v4475_v40, %v6323_v43  ;;  %v4504_v63 = vcombine.high %v4482_v9, %v4482_v9  ;;  %v4505_v51 = vcombine.high %v4489_v32, %v4489_v32 }
 0x1c6   : > { %v4864_v60 = vcombine.low %v4457_v26, %v4482_v9  ;;  %v4696_v47 = vrot.slane %v4674_v35, %v6323_v43  ;;  %v7511_v13 = vrot.slane %v4675_v42, %v6323_v43  ;;  %v4704_v8 = vcombine.high %v4682_v57, %v4682_v57 }
 0x1c7   : > { %v4506_v17 = vcombine.high %v4496_v15, %v4496_v15  ;;  %v4865_v19 = vcombine.low %v4496_v15, %v4504_v63  ;;  %v4867_v46 = vcombine.low %v4503_v24, %v4505_v51  ;;  %v4705_v2 = vcombine.high %v4689_v30, %v4689_v30 }
 0x1c8   : > { %v4706_v34 = vcombine.high %v4696_v47, %v4696_v47  ;;  %v5127_v37 = vcombine.low %v4657_v50, %v4682_v57  ;;  %v5128_v23 = vcombine.low %v4696_v47, %v4704_v8  ;;  %v4874_v21 = vrot.slane %v4864_v60, %v6323_v43 }
 0x1c9   : > { %v4866_v27 = vcombine.low %v4506_v17, %v4489_v32  ;;  %v4881_v36 = vrot.slane %v4865_v19, %v6323_v43  ;;  %v4895_v41 = vrot.slane %v4867_v46, %v6323_v43  ;;  %v5192_v28 = vcombine.low %v7511_v13, %v4705_v2 }
 0x1ca   : > { %v5129_v56 = vcombine.low %v4706_v34, %v4689_v30  ;;  %v5143_v6 = vrot.slane %v5127_v37, %v6323_v43  ;;  %v5150_v53 = vrot.slane %v5128_v23, %v6323_v43  ;;  %v4508_v49 = vcombine.low %v4332_v11, %v4333_v45 }
 0x1cb   : > { %v4888_v25 = vrot.slane %v4866_v27, %v6323_v43  ;;  %v4896_v62 = vcombine.low %v4874_v21, %v4881_v36  ;;  %v4897_v31 = vcombine.high %v4874_v21, %v4881_v36  ;;  %v4507_v26 = vcombine.high %v4503_v24, %v4503_v24 }
 0x1cc   : > { %v5157_v10 = vrot.slane %v5129_v56, %v6323_v43  ;;  %v5158_v54 = vcombine.low %v7489_v5, %v5143_v6  ;;  %v5159_v29 = vcombine.high %v7489_v5, %v5143_v6  ;;  %v4509_v12 = vcombine.high %v4332_v11, %v4333_v45 }
 0x1cd   : > { %v4898_v0 = vcombine.low %v4888_v25, %v4895_v41  ;;  %v4899_v38 = vcombine.high %v4888_v25, %v4895_v41  ;;  %v4906_v33 = vrot.slane %v4896_v62, %v6323_v43  ;;  %v4913_v50 = vrot.slane %v4897_v31, %v6323_v43 }
 0x1ce   : > { %v5160_v52 = vcombine.low %v5150_v53, %v5157_v10  ;;  %v5161_v7 = vcombine.high %v5150_v53, %v5157_v10  ;;  %v5168_v59 = vrot.slane %v5158_v54, %v6323_v43  ;;  %v4516_v3 = vrot.slane %v4508_v49, %v6323_v43 }
 0x1cf   : > { %v4920_v22 = vrot.slane %v4898_v0, %v6323_v43  ;;  %v4927_v58 = vrot.slane %v4899_v38, %v6323_v43  ;;  %v5175_v5 = vrot.slane %v5159_v29, %v6323_v43  ;;  %v4708_v40 = vcombine.low %v4340_v48, %v4341_v44 }
 0x1d0   : > { %v5182_v16 = vrot.slane %v5160_v52, %v6323_v43  ;;  %v5189_v20 = vrot.slane %v5161_v7, %v6323_v43  ;;  %v4523_v35 = vrot.slane %v4509_v12, %v6323_v43  ;;  %v4524_v42 = vcombine.high %v4516_v3, %v4516_v3 }
 0x1d1   : > { %v4928_v9 = vcombine.low %v4906_v33, %v4920_v22  ;;  %v4929_v32 = vcombine.low %v4913_v50, %v4927_v58  ;;  %v4532_v15 = vrot.slane %v4516_v3, %v6323_v43  ;;  %v4715_v11 = vrot.slane %v4708_v40, %v6323_v43  ;;  %v5336_v40 = vld [vmem:[%s7392_s27 + $0x18] sm:$0xff] }
 0x1d2   : > { %v5190_v57 = vcombine.low %v5168_v59, %v5182_v16  ;;  %v5191_v30 = vcombine.low %v5175_v5, %v5189_v20  ;;  %v4525_v63 = vcombine.high %v4523_v35, %v4523_v35  ;;  %v4546_v51 = vrot.slane %v4524_v42, %v6323_v43 }
 0x1d3   : > { %v5836_v24 = vpack.c.bf16 %v4929_v32, %v4928_v9  ;;  %v4707_v48 = vcombine.high %v7511_v13, %v7511_v13  ;;  %v4554_v47 = vcombine.high %v4532_v15, %v4532_v15  ;;  %v4930_v8 = vcombine.low %v4507_v26, %v4532_v15 }
 0x1d4   : > { %v5840_v60 = vpack.c.bf16 %v5191_v30, %v5190_v57  ;;  %v4716_v17 = vcombine.high %v4715_v11, %v4715_v11  ;;  %v4539_v19 = vrot.slane %v4523_v35, %v6323_v43  ;;  %v4553_v46 = vrot.slane %v4525_v63, %v6323_v43 }
 0x1d5   : > { %5335 = vst.msk [vmem:[%s7392_s27 + $0x10] sm:$0xff] %vm7396_vm5, %v5836_v24  ;;  %v4556_v2 = vcombine.high %v4546_v51, %v4546_v51  ;;  %v4723_v34 = vrot.slane %v4715_v11, %v6323_v43  ;;  %v5051_v37 = vrot.slane %v5029_v18, %v6323_v43  ;;  %v4931_v13 = vcombine.low %v4546_v51, %v4554_v47  ;;  %v5344_v24 = vld [vmem:[%s7392_s27 + $0x38] sm:$0xff] }
 0x1d6   : > { %5343 = vst.msk [vmem:[%s7392_s27 + $0x30] sm:$0xff] %vm7396_vm5, %v5840_v60  ;;  %v4939_v23 = vrot.slane %v4930_v8, %v6323_v43  ;;  %v4730_v45 = vrot.slane %v4716_v17, %v6323_v43  ;;  %v5058_v27 = vrot.slane %v5030_v14, %v6323_v43  ;;  %v5819_v36 = vcombine.high %v4539_v19, %v4553_v46 }
 0x1d7   : > { %v4932_v21 = vcombine.low %v4556_v2, %v4539_v19  ;;  %v4731_v44 = vcombine.high %v4723_v34, %v4723_v34  ;;  %v5201_v41 = vrot.slane %v5192_v28, %v6323_v43  ;;  %v4946_v18 = vrot.slane %v4931_v13, %v6323_v43 }
 0x1d8   : > { %v4732_v56 = vcombine.high %v4730_v45, %v4730_v45  ;;  %v5193_v6 = vcombine.low %v4707_v48, %v4723_v34  ;;  %v4960_v62 = vrot.slane %v4553_v46, %v6323_v43  ;;  %v5005_v31 = vrot.slane %v5819_v36, %v6323_v43 }
 0x1d9   : > { %v4953_v25 = vrot.slane %v4932_v21, %v6323_v43  ;;  %v5194_v53 = vcombine.low %v4730_v45, %v4731_v44  ;;  %v4961_v10 = vcombine.low %v4939_v23, %v4946_v18  ;;  %v4962_v54 = vcombine.high %v4939_v23, %v4946_v18 }
 0x1da   : > { %v5208_v39 = vrot.slane %v5193_v6, %v6323_v43  ;;  %v5222_v55 = vrot.slane %v4732_v56, %v6323_v43  ;;  %v5027_v28 = vcombine.low %v5005_v31, %v7486_v1  ;;  %v5028_v49 = vcombine.high %v5005_v31, %v7486_v1 }
 0x1db   : > { %v4963_v14 = vcombine.low %v4953_v25, %v4960_v62  ;;  %v4964_v29 = vcombine.high %v4953_v25, %v4960_v62  ;;  %v4971_v0 = vrot.slane %v4961_v10, %v6323_v43  ;;  %v4978_v38 = vrot.slane %v4962_v54, %v6323_v43 }
 0x1dc   : > { %v5215_v33 = vrot.slane %v5194_v53, %v6323_v43  ;;  %v5223_v26 = vcombine.low %v5201_v41, %v5208_v39  ;;  %v5037_v7 = vrot.slane %v5027_v28, %v6323_v43  ;;  %v5044_v59 = vrot.slane %v5028_v49, %v6323_v43 }
 0x1dd   : > { %v4985_v50 = vrot.slane %v4963_v14, %v6323_v43  ;;  %v4992_v52 = vrot.slane %v4964_v29, %v6323_v43  ;;  %v5224_v22 = vcombine.high %v5201_v41, %v5208_v39 }
 0x1de   : > { %v5225_v58 = vcombine.low %v5215_v33, %v5222_v55  ;;  %v5226_v1 = vcombine.high %v5215_v33, %v5222_v55  ;;  %v5233_v12 = vrot.slane %v5223_v26, %v6323_v43  ;;  %v5059_v16 = vcombine.low %v5037_v7, %v5051_v37 }
 0x1df   : > { %v4993_v3 = vcombine.low %v4971_v0, %v4985_v50  ;;  %v4994_v5 = vcombine.low %v4978_v38, %v4992_v52  ;;  %v5060_v20 = vcombine.low %v5044_v59, %v5058_v27  ;;  %v5240_v9 = vrot.slane %v5224_v22, %v6323_v43 }
 0x1e0   : > { %v5247_v32 = vrot.slane %v5225_v58, %v6323_v43  ;;  %v5254_v35 = vrot.slane %v5226_v1, %v6323_v43 }
 0x1e1   : > { %v5837_v42 = vpack.c.bf16 %v4994_v5, %v4993_v3  ;;  %v5838_v57 = vpack.c.bf16 %v5060_v20, %v5059_v16 }
 0x1e2   : > { %v5255_v30 = vcombine.low %v5233_v12, %v5247_v32  ;;  %v5256_v15 = vcombine.low %v5240_v9, %v5254_v35 }
 0x1e3   : > { %v5337_v11 = vsel %vm7436_vm8, %v5837_v42, %v5336_v40  ;;  %5339 = vst.msk [vmem:[%s7392_s27 + $0x20] sm:$0xff] %vm7396_vm5, %v5838_v57 }
 0x1e4   : > { %5338 = vst [vmem:[%s7392_s27 + $0x18] sm:$0xff] %v5337_v11  ;;  %v5841_v63 = vpack.c.bf16 %v5256_v15, %v5255_v30 }
 0x1e6   : > { %v5345_v51 = vsel %vm7436_vm8, %v5841_v63, %v5344_v24 }
 0x1e7   : > { %5346 = vst [vmem:[%s7392_s27 + $0x38] sm:$0xff] %v5345_v51 }
 0x1e8 PF: > { %s14_s15 = sadd.s32 1, %s6160_s15  }
 0x1e9   : > { %p11_p4 = scmp.ge.s32.totalorder %s14_s15, 6  }
 0x1eb   :  { %13 = sbr.rel (!%p11_p4) target bundleno = 1 (0x1), region = 70 }

// kernel: _lambda_.6
= control target key start
LH: loop header
LB: loop body
LE: loop exit
PB: predicated region body
PF: predicated region fallthrough
CT: control target
= control target key end

     0   :  { %s3843_s15 = smov 0   ;;  %s5268_s0 = inlined_call_operand.vmem [shape: bf16[16,36,240], index: 0, kind: input, shape index: {}]   ;;  %s5269_s1 = inlined_call_operand.vmem [shape: bf16[5,240,256], index: 1, kind: input, shape index: {}]   ;;  %s5270_s2 = inlined_call_operand.vmem [shape: f32[1,256], index: 2, kind: input, shape index: {}]   ;;  %s5271_s3 = inlined_call_operand.vmem [shape: f32[1,256], index: 3, kind: input, shape index: {}]   ;;  %s5272_s4 = inlined_call_operand.vmem [shape: bf16[16,32,256], index: 4, kind: output, shape index: {}]  }
   0x1 LB: > { %s2951_s16 = sadd.s32 4294967295, %s3816_s15   ;;  %p2955_p0 = scmp.ge.s32.totalorder %s3816_s15, 1  ;;  %s3816_s15 = sphi %s3843_s15, %s14_s15  }
   0x2   : > { %p164_p1 = scmp.lt.s32.totalorder %s3816_s15, 5 }
   0x4   : > { %p165_p2 = pnand %p2955_p0, %p164_p1 }
   0x5   : > { %v3561_v0 = vld [vmem:[%s5269_s1 + $0xf4] ss:$8 sps:$4 sm:$0xff] (!%p165_p2)   ;;  %v3563_v1 = vld [vmem:[%s5269_s1 + $0x1e4] ss:$8 sps:$4 sm:$0xff] (!%p165_p2)   ;;  %v3565_v2 = vld [vmem:[%s5269_s1 + $0xf0] ss:$8 sps:$4 sm:$0xff] (!%p165_p2)  }
   0x6   : > { %168 = sbr.rel (%p165_p2) target bundleno = 450 (0x1c2), region = 36  ;;  %698 = vmatprep.subr.bf16.mxu1 (!%p165_p2), %v3561_v0  ;;  %v3566_v3 = vld [vmem:[%s5269_s1 + $0x1e0] ss:$8 sps:$4 sm:$0xff] (!%p165_p2)   ;;  %1498 = vmatprep.subr.bf16.mxu0 (!%p165_p2), %v3563_v1  ;;  %v3567_v4 = vld [vmem:[%s5269_s1 + $0x104] ss:$8 sps:$4 sm:$0xff] (!%p165_p2)   ;;  %s2956_s21 = sshll.u32 (!%p165_p2), %s2951_s16, 2 }
   0x7   : > { %699 = vmatpush1.bf16.msra.mxu1 (!%p165_p2), %v3565_v2  ;;  %1499 = vmatpush1.bf16.msra.mxu0 (!%p165_p2), %v3566_v3  ;;  %v3569_v5 = vld [vmem:[%s5269_s1 + $0x1f4] ss:$8 sps:$4 sm:$0xff] (!%p165_p2)   ;;  %v3571_v6 = vld [vmem:[%s5269_s1 + $0x100] ss:$8 sps:$4 sm:$0xff] (!%p165_p2)   ;;  %v3572_v7 = vld [vmem:[%s5269_s1 + $0x1f0] ss:$8 sps:$4 sm:$0xff] (!%p165_p2)  }
   0x8   : > { %700 = vmatprep.subr.bf16.mxu1 (!%p165_p2), %v3567_v4  ;;  %1500 = vmatprep.subr.bf16.mxu0 (!%p165_p2), %v3569_v5  ;;  %v3573_v8 = vld [vmem:[%s5269_s1 + $0x114] ss:$8 sps:$4 sm:$0xff] (!%p165_p2)   ;;  %v3575_v9 = vld [vmem:[%s5269_s1 + $0x204] ss:$8 sps:$4 sm:$0xff] (!%p165_p2)   ;;  %v3577_v10 = vld [vmem:[%s5269_s1 + $0x110] ss:$8 sps:$4 sm:$0xff] (!%p165_p2)  }
   0x9   : > { %v3578_v11 = vld [vmem:[%s5269_s1 + $0x200] ss:$8 sps:$4 sm:$0xff] (!%p165_p2)   ;;  %v3579_v12 = vld [vmem:[%s5269_s1 + $0x124] ss:$8 sps:$4 sm:$0xff] (!%p165_p2)   ;;  %v3581_v13 = vld [vmem:[%s5269_s1 + $0x214] ss:$8 sps:$4 sm:$0xff] (!%p165_p2)  }
   0xa   : > { %v3583_v14 = vld [vmem:[%s5269_s1 + $0x120] ss:$8 sps:$4 sm:$0xff] (!%p165_p2)   ;;  %v3584_v15 = vld [vmem:[%s5269_s1 + $0x210] ss:$8 sps:$4 sm:$0xff] (!%p165_p2)   ;;  %v3585_v16 = vld [vmem:[%s5269_s1 + $0x134] ss:$8 sps:$4 sm:$0xff] (!%p165_p2)  }
   0xb   : > { %701 = vmatpush1.bf16.msra.mxu1 (!%p165_p2), %v3571_v6  ;;  %1501 = vmatpush1.bf16.msra.mxu0 (!%p165_p2), %v3572_v7  ;;  %v3587_v17 = vld [vmem:[%s5269_s1 + $0x224] ss:$8 sps:$4 sm:$0xff] (!%p165_p2)   ;;  %v3589_v18 = vld [vmem:[%s5269_s1 + $0x130] ss:$8 sps:$4 sm:$0xff] (!%p165_p2)   ;;  %v3590_v19 = vld [vmem:[%s5269_s1 + $0x220] ss:$8 sps:$4 sm:$0xff] (!%p165_p2)  }
   0xc   : > { %702 = vmatprep.subr.bf16.mxu1 (!%p165_p2), %v3573_v8  ;;  %1502 = vmatprep.subr.bf16.mxu0 (!%p165_p2), %v3575_v9  ;;  %v3591_v20 = vld [vmem:[%s5269_s1 + $0x144] ss:$8 sps:$4 sm:$0xff] (!%p165_p2)   ;;  %v3593_v21 = vld [vmem:[%s5269_s1 + $0x234] ss:$8 sps:$4 sm:$0xff] (!%p165_p2)   ;;  %v3595_v22 = vld [vmem:[%s5269_s1 + $0x140] ss:$8 sps:$4 sm:$0xff] (!%p165_p2)  }
   0xd   : > { %v3596_v23 = vld [vmem:[%s5269_s1 + $0x230] ss:$8 sps:$4 sm:$0xff]   ;;  %v3597_v24 = vld [vmem:[%s5269_s1 + $0x154] ss:$8 sps:$4 sm:$0xff]   ;;  %v3599_v25 = vld [vmem:[%s5269_s1 + $0x244] ss:$8 sps:$4 sm:$0xff]  }
   0xe   : > { %v3601_v26 = vld [vmem:[%s5269_s1 + $0x150] ss:$8 sps:$4 sm:$0xff]   ;;  %v3602_v27 = vld [vmem:[%s5269_s1 + $0x240] ss:$8 sps:$4 sm:$0xff]   ;;  %v3603_v28 = vld [vmem:[%s5269_s1 + $0x164] ss:$8 sps:$4 sm:$0xff]  }
   0xf   : > { %703 = vmatpush1.bf16.msra.mxu1 %v3577_v10  ;;  %1503 = vmatpush1.bf16.msra.mxu0 %v3578_v11  ;;  %v3605_v29 = vld [vmem:[%s5269_s1 + $0x254] ss:$8 sps:$4 sm:$0xff]   ;;  %p193_p3 = scmp.lt.s32.totalorder %s2956_s21, 15  ;;  %v3607_v30 = vld [vmem:[%s5269_s1 + $0x160] ss:$8 sps:$4 sm:$0xff]   ;;  %vm1182_vm0 = vcmask 1042432  }
  0x10   : > { %704 = vmatprep.subr.bf16.mxu1 %v3579_v12  ;;  %1504 = vmatprep.subr.bf16.mxu0 %v3581_v13  ;;  %v3608_v31 = vld [vmem:[%s5269_s1 + $0x250] ss:$8 sps:$4 sm:$0xff]   ;;  %v3609_v32 = vld [vmem:[%s5269_s1 + $0x174] ss:$8 sps:$4 sm:$0xff]   ;;  %v3611_v33 = vld [vmem:[%s5269_s1 + $0x264] ss:$8 sps:$4 sm:$0xff]  }
  0x11   : > { %s5305_s21 = smov (!%p193_p3, %s2956_s21), 15  ;;  %v3613_v34 = vld [vmem:[%s5269_s1 + $0x170] ss:$8 sps:$4 sm:$0xff]   ;;  %v3614_v35 = vld [vmem:[%s5269_s1 + $0x260] ss:$8 sps:$4 sm:$0xff]   ;;  %vm1183_vm3 = vcmask 1046532  }
  0x12   : > { %v3615_v36 = vld [vmem:[%s5269_s1 + $0x184] ss:$8 sps:$4 sm:$0xff]   ;;  %v3617_v37 = vld [vmem:[%s5269_s1 + $0x274] ss:$8 sps:$4 sm:$0xff]   ;;  %s3552_s22 = smul.u32 40, %s5305_s21  ;;  %vm4021_vm4 = vmor %vm1182_vm0, %vm1183_vm3  ;;  %vm673_vm6 = vcmask 916480  }
  0x13   : > { %705 = vmatpush1.bf16.msra.mxu1 %v3583_v14  ;;  %1505 = vmatpush1.bf16.msra.mxu0 %v3584_v15  ;;  %v3619_v38 = vld [vmem:[%s5269_s1 + $0x180] ss:$8 sps:$4 sm:$0xff]   ;;  %v3620_v39 = vld [vmem:[%s5269_s1 + $0x270] ss:$8 sps:$4 sm:$0xff]   ;;  %v3621_v40 = vld [vmem:[%s5269_s1 + $0x194] ss:$8 sps:$4 sm:$0xff]  }
  0x14   : > { %706 = vmatprep.subr.bf16.mxu1 %v3585_v16  ;;  %1506 = vmatprep.subr.bf16.mxu0 %v3587_v17  ;;  %v3623_v41 = vld [vmem:[%s5269_s1 + $0x284] ss:$8 sps:$4 sm:$0xff]   ;;  %s3985_s6 = scalar_lea.vmem %s5268_s0, %s3552_s22  ;;  %v3625_v42 = vld [vmem:[%s5269_s1 + $0x190] ss:$8 sps:$4 sm:$0xff]   ;;  %vm257_vm1 = vsmask.f32 3328 }
  0x15   : > { %v3626_v43 = vld [vmem:[%s5269_s1 + $0x280] ss:$8 sps:$4 sm:$0xff]   ;;  %v3627_v44 = vld [vmem:[%s5269_s1 + $0x1a4] ss:$8 sps:$4 sm:$0xff]   ;;  %v3629_v45 = vld [vmem:[%s5269_s1 + $0x294] ss:$8 sps:$4 sm:$0xff]  }
  0x16   : > { %v207_v46 = vld [vmem:[%s3985_s6] sm:$0xff]  ;;  %v208_v47 = vld [vmem:[%s3985_s6 + $0x8] sm:$0xff]  ;;  %v4002_v48 = vld [vmem:[%s3985_s6 + $0x10] sm:$0xff]  ;;  %vm258_vm2 = vsmask.f32 7440  ;;  %vm2200_vm10 = vcmask 1041408  }
  0x17   : > { %707 = vmatpush1.bf16.msra.mxu1 %v3589_v18  ;;  %1507 = vmatpush1.bf16.msra.mxu0 %v3590_v19  ;;  %v261_v49 = vshrl.u32 %v207_v46, 16  ;;  %v264_v50 = vshll.u32 %v207_v46, 16  ;;  %v270_v51 = vshll.u32 %v208_v47, 16  ;;  %v274_v52 = vshrl.u32 %v208_v47, 16  ;;  %v4005_v53 = vld [vmem:[%s3985_s6] sm:$0xee]  ;;  %vm4034_vm5 = vmor %vm257_vm1, %vm258_vm2 }
  0x18   : > { %708 = vmatprep.subr.bf16.mxu1 %v3591_v20  ;;  %1508 = vmatprep.subr.bf16.mxu0 %v3593_v21  ;;  %v280_v54 = vshll.u32 %v4002_v48, 16  ;;  %v284_v55 = vshrl.u32 %v4002_v48, 16  ;;  %v3099_v56 = vrot.slane %v4005_v53, 9  ;;  %v1187_v57 = vrot.slane %v208_v47, 5  ;;  %v3631_v58 = vld [vmem:[%s5269_s1 + $0x1a0] ss:$8 sps:$4 sm:$0xff]  }
  0x19   : > { %v263_v59 = vrot.slane %v261_v49, 4  ;;  %v266_v60 = vrot.slane %v264_v50, 5  ;;  %v272_v61 = vrot.slane %v270_v51, 5  ;;  %v276_v62 = vrot.slane %v274_v52, 4  ;;  %v3632_v63 = vld [vmem:[%s5269_s1 + $0x290] ss:$8 sps:$4 sm:$0xff]  }
  0x1a   : > { %v3633_v0 = vld [vmem:[%s5269_s1 + $0x1b4] ss:$8 sps:$4 sm:$0xff]   ;;  %v3635_v2 = vld [vmem:[%s5269_s1 + $0x2a4] ss:$8 sps:$4 sm:$0xff]   ;;  %v282_v5 = vrot.slane %v280_v54, 5  ;;  %v286_v6 = vrot.slane %v284_v55, 4  ;;  %v4044_v15 = vsel %vm4021_vm4, %v3099_v56, %v1187_v57 }
  0x1b   : > { %709 = vmatpush1.bf16.msra.mxu1 %v3595_v22  ;;  %1509 = vmatpush1.bf16.msra.mxu0 %v3596_v23  ;;  %v267_v3 = vor.u32 %v266_v60, %v263_v59  ;;  %v277_v4 = vor.u32 %v276_v62, %v272_v61  ;;  %v1659_v8 = vrot.slane %v274_v52, 5  ;;  %v1660_v9 = vrot.slane %v270_v51, 6  ;;  %v3637_v12 = vld [vmem:[%s5269_s1 + $0x1b0] ss:$8 sps:$4 sm:$0xff]   ;;  %v3638_v16 = vld [vmem:[%s5269_s1 + $0x2a0] ss:$8 sps:$4 sm:$0xff]  }
  0x1c   : > { %710 = vmatprep.subr.bf16.mxu1 %v3597_v24  ;;  %1510 = vmatprep.subr.bf16.mxu0 %v3599_v25  ;;  %v1189_v10 = vrot.slane %v1187_v57, 4  ;;  %v1190_v11 = vrot.slane %v4002_v48, 5  ;;  %v1651_v18 = vshrl.u32 %v4005_v53, 16  ;;  %v1654_v19 = vshll.u32 %v4005_v53, 16  ;;  %v3639_v20 = vld [vmem:[%s5269_s1 + $0x1c4] ss:$8 sps:$4 sm:$0xff]  }
  0x1d   : > { %v268_v13 = vrot.slane %v267_v3, 4  ;;  %v278_v14 = vrot.slane %v277_v4, 4  ;;  %v3641_v21 = vld [vmem:[%s5269_s1 + $0x2b4] ss:$8 sps:$4 sm:$0xff]   ;;  %v287_v24 = vor.u32 %v286_v6, %v282_v5  ;;  %v3643_v25 = vld [vmem:[%s5269_s1 + $0x1c0] ss:$8 sps:$4 sm:$0xff]  }
  0x1e   : > { %v4051_v17 = vsel %vm4021_vm4, %v1189_v10, %v1190_v11  ;;  %vm1647_vm7 = vsmask.f32 2304  ;;  %vm1648_vm8 = vsmask.f32 6416  ;;  %v3650_v47 = vld [vmem:[%s5269_s1 + $0x2c0] ss:$8 sps:$4 sm:$0xff]  }
  0x1f   : > { %711 = vmatpush1.bf16.msra.mxu1 %v3601_v26  ;;  %1511 = vmatpush1.bf16.msra.mxu0 %v3602_v27  ;;  %v4063_v22 = vsel %vm4034_vm5, %v268_v13, %v272_v61  ;;  %v4067_v23 = vsel %vm4034_vm5, %v278_v14, %v282_v5  ;;  %v3644_v26 = vld [vmem:[%s5269_s1 + $0x2b0] ss:$8 sps:$4 sm:$0xff]   ;;  %v3133_v49 = vcombine.low %v4044_v15, %v4051_v17  ;;  %v1665_v53 = vrot.slane %v280_v54, 6  ;;  %v3653_v56 = vld [vmem:[%s5269_s1 + $0x4] ss:$8 sps:$4 sm:$0xff]   ;;  %vm4178_vm9 = vmor %vm1647_vm7, %vm1648_vm8  ;;  %s3377_s22 = sshll.u32 %s5305_s21, 5 }
  0x20   : > { %712 = vmatprep.subr.bf16.mxu1 %v3603_v28  ;;  %1512 = vmatprep.subr.bf16.mxu0 %v3605_v29  ;;  %v2992_v27 = vcombine.high %v4063_v22, %v4067_v23  ;;  %v3134_v28 = vcombine.high %v4044_v15, %v4051_v17  ;;  %v4080_v29 = vld [vmem:[%s3985_s6 + $0x18] sm:$0xff]  ;;  %v2991_v52 = vcombine.low %v4063_v22, %v4067_v23  ;;  %v4123_v59 = vld [vmem:[%s3985_s6 + $0x28] sm:$0xff]  ;;  %v1664_v10 = vrot.slane %v284_v55, 5  ;;  %s5175_s24 = scalar_lea.vmem %s5272_s4, %s3377_s22 }
  0x21   : > { %v3656_v57 = vld [vmem:[%s5269_s1 + $0x2d4] ss:$8 sps:$4 sm:$0xff]   ;;  %v4141_v3 = vld [vmem:[%s3985_s6 + $0x28] sm:$0xee]  ;;  %v3654_v5 = vld [vmem:[%s5269_s1 + $0x2d0] ss:$8 sps:$4 sm:$0xff]  }
  0x22   : > { %3037 = vmatprep.mubr.msk.bf16.mxu1 %vm673_vm6, %v2992_v27  ;;  %3179 = vmatprep.mubr.msk.bf16.mxu0 %vm673_vm6, %v3134_v28  ;;  %v3651_v4 = vld [vmem:[%s5269_s1] ss:$8 sps:$4 sm:$0xff]   ;;  %v308_v6 = vshll.u32 %v4123_v59, 16  ;;  %v3100_v22 = vrot.slane %v4141_v3, 9  ;;  %v4186_v28 = vor.u32 %v1665_v53, %v1664_v10  ;;  %vm2201_vm11 = vcmask 1045508  }
  0x23   : > { %713 = vmatpush1.bf16.msra.mxu1 %v3607_v30  ;;  %1513 = vmatpush1.bf16.msra.mxu0 %v3608_v31  ;;  %v253_v30 = vld [vmem:[%s3985_s6 + $0x20] sm:$0x11]  ;;  %v4083_v31 = vor.u32 %v1660_v9, %v1659_v8  ;;  %vm4755_vm12 = vmor %vm2200_vm10, %vm2201_vm11 }
  0x24   : > { %714 = vmatprep.subr.bf16.mxu1 %v3609_v32  ;;  %1514 = vmatprep.subr.bf16.mxu0 %v3611_v33  ;;  %v3645_v32 = vld [vmem:[%s5269_s1 + $0x1d4] ss:$8 sps:$4 sm:$0xff]   ;;  %v290_v33 = vshll.u32 %v4080_v29, 16 }
  0x25   : > { %v1663_v17 = vrot.slane %v4083_v31, 4 }
  0x27   : > { %715 = vmatpush1.bf16.msra.mxu1 %v3613_v34  ;;  %1515 = vmatpush1.bf16.msra.mxu0 %v3614_v35  ;;  %v294_v34 = vshrl.u32 %v4080_v29, 16  ;;  %v300_v35 = vshll.u32 %v253_v30, 16 }
  0x28   : > { %716 = vmatprep.subr.bf16.mxu1 %v3615_v36  ;;  %1516 = vmatprep.subr.bf16.mxu0 %v3617_v37  ;;  %v1193_v36 = vrot.slane %v4080_v29, 5  ;;  %v3647_v37 = vld [vmem:[%s5269_s1 + $0x2c4] ss:$8 sps:$4 sm:$0xff]  }
  0x29   : > { %v302_v51 = vrot.slane %v300_v35, 5 }
  0x2a   : > { %v1195_v46 = vrot.slane %v1193_v36, 4 }
  0x2b   : > { %717 = vmatpush1.bf16.msra.mxu1 %v3619_v38  ;;  %1517 = vmatpush1.bf16.msra.mxu0 %v3620_v39  ;;  %v1192_v38 = vrot.slane %v1190_v11, 4  ;;  %v1653_v39 = vrot.slane %v1651_v18, 5  ;;  %v3659_v11 = vld [vmem:[%s5269_s1 + $0x14] ss:$8 sps:$4 sm:$0xff]   ;;  %v3662_v18 = vld [vmem:[%s5269_s1 + $0x2e4] ss:$8 sps:$4 sm:$0xff]  }
  0x2c   : > { %718 = vmatprep.subr.bf16.mxu1 %v3621_v40  ;;  %1518 = vmatprep.subr.bf16.mxu0 %v3623_v41  ;;  %v1656_v40 = vrot.slane %v1654_v19, 6  ;;  %v288_v41 = vrot.slane %v287_v24, 4  ;;  %v3657_v24 = vld [vmem:[%s5269_s1 + $0x10] ss:$8 sps:$4 sm:$0xff]  }
  0x2e   : > { %v1657_v60 = vor.u32 %v1656_v40, %v1653_v39  ;;  %v3665_v39 = vld [vmem:[%s5269_s1 + $0x24] ss:$8 sps:$4 sm:$0xff]  }
  0x2f   : > { %719 = vmatpush1.bf16.msra.mxu1 %v3625_v42  ;;  %1519 = vmatpush1.bf16.msra.mxu0 %v3626_v43  ;;  %v292_v42 = vrot.slane %v290_v33, 5  ;;  %v296_v43 = vrot.slane %v294_v34, 4 }
  0x30   : > { %720 = vmatprep.subr.bf16.mxu1 %v3627_v44  ;;  %1520 = vmatprep.subr.bf16.mxu0 %v3629_v45  ;;  %v1196_v44 = vrot.slane %v253_v30, 5  ;;  %v3649_v45 = vld [vmem:[%s5269_s1 + $0x1d0] ss:$8 sps:$4 sm:$0xff]   ;;  %v1658_v55 = vrot.slane %v1657_v60, 4  ;;  %v3660_v30 = vld [vmem:[%s5269_s1 + $0x2e0] ss:$8 sps:$4 sm:$0xff]  }
  0x31   : > { %v297_v50 = vor.u32 %v296_v43, %v292_v42  ;;  %v4127_v54 = vsel %vm4034_vm5, %v288_v41, %v292_v42  ;;  %v4202_v41 = vld [vmem:[%s3985_s6 + $0x40] sm:$0xff]  ;;  %v254_v42 = vld [vmem:[%s3985_s6 + $0x48] sm:$0x11]  ;;  %v4208_v43 = vsel %vm4178_vm9, %v1663_v17, %v4186_v28 }
  0x32   : > { %v4131_v62 = vsel %vm4021_vm4, %v1195_v46, %v1196_v44  ;;  %v3668_v44 = vld [vmem:[%s5269_s1 + $0x2f4] ss:$8 sps:$4 sm:$0xff]   ;;  %v334_v53 = vshll.u32 %v4202_v41, 16  ;;  %v344_v60 = vshll.u32 %v254_v42, 16 }
  0x33   : > { %721 = vmatpush1.bf16.msra.mxu1 %v3631_v58  ;;  %1521 = vmatpush1.bf16.msra.mxu0 %v3632_v63  ;;  %v4120_v58 = vsel %vm4021_vm4, %v1192_v38, %v1193_v36  ;;  %v298_v61 = vrot.slane %v297_v50, 4  ;;  %v4134_v63 = vld [vmem:[%s3985_s6 + $0x30] sm:$0xff]  ;;  %v3663_v50 = vld [vmem:[%s5269_s1 + $0x20] ss:$8 sps:$4 sm:$0xff]  }
  0x34   : > { %722 = vmatprep.subr.bf16.mxu1 %v3633_v0  ;;  %1522 = vmatprep.subr.bf16.mxu0 %v3635_v2  ;;  %v4137_v0 = vld [vmem:[%s3985_s6 + $0x38] sm:$0xff]  ;;  %v305_v2 = vshrl.u32 %v4123_v59, 16  ;;  %v314_v8 = vshll.u32 %v4134_v63, 16  ;;  %v318_v9 = vshrl.u32 %v4134_v63, 16  ;;  %v1200_v15 = vrot.slane %v4134_v63, 5 }
  0x35   : > { %v5275_v14 = vshll.u32 %v4137_v0, 16  ;;  %v1203_v27 = vrot.slane %v4137_v0, 5  ;;  %v5276_v36 = vshrl.u32 %v4137_v0, 16  ;;  %v3135_v38 = vcombine.low %v4120_v58, %v4131_v62 }
  0x36   : > { %v307_v13 = vrot.slane %v305_v2, 4  ;;  %v316_v48 = vrot.slane %v314_v8, 5  ;;  %v4215_v46 = vsel %vm4021_vm4, %v3100_v22, %v1200_v15  ;;  %v4281_v22 = vld [vmem:[%s3985_s6 + $0x60] sm:$0xff] }
  0x37   : > { %723 = vmatpush1.bf16.msra.mxu1 %v3637_v12  ;;  %1523 = vmatpush1.bf16.msra.mxu0 %v3638_v16  ;;  %v4159_v12 = vsel %vm4034_vm5, %v298_v61, %v302_v51  ;;  %v310_v16 = vrot.slane %v308_v6, 5  ;;  %v326_v35 = vrot.slane %v5275_v14, 5  ;;  %v3671_v61 = vld [vmem:[%s5269_s1 + $0x34] ss:$8 sps:$4 sm:$0xff]   ;;  %v1205_v10 = vrot.slane %v1203_v27, 4 }
  0x38   : > { %724 = vmatprep.subr.bf16.mxu1 %v3639_v20  ;;  %1524 = vmatprep.subr.bf16.mxu0 %v3641_v21  ;;  %v2994_v19 = vcombine.high %v4127_v54, %v4159_v12  ;;  %v3136_v20 = vcombine.high %v4120_v58, %v4131_v62  ;;  %v320_v21 = vrot.slane %v318_v9, 4  ;;  %v336_v62 = vrot.slane %v334_v53, 5 }
  0x3b   : > { %725 = vmatpush1.bf16.msra.mxu1 %v3643_v25  ;;  %1525 = vmatpush1.bf16.msra.mxu0 %v3644_v26  ;;  %v311_v25 = vor.u32 %v310_v16, %v307_v13  ;;  %v1202_v26 = vrot.slane %v1200_v15, 4  ;;  %v3672_v13 = vld [vmem:[%s5269_s1 + $0x300] ss:$8 sps:$4 sm:$0xff]   ;;  %v1209_v16 = vrot.slane %v254_v42, 5 }
  0x3c   : > { %726 = vmatprep.subr.bf16.mxu1 %v3645_v32  ;;  %1526 = vmatprep.subr.bf16.mxu0 %v3647_v37  ;;  %v321_v32 = vor.u32 %v320_v21, %v316_v48  ;;  %v2993_v37 = vcombine.low %v4127_v54, %v4159_v12  ;;  %v1206_v54 = vrot.slane %v4202_v41, 5  ;;  %v3669_v12 = vld [vmem:[%s5269_s1 + $0x30] ss:$8 sps:$4 sm:$0xff]  }
  0x3d   : > { %v312_v40 = vrot.slane %v311_v25, 4  ;;  %v4278_v21 = vld [vmem:[%s3985_s6 + $0x58] sm:$0xff] }
  0x3f   : > { %727 = vmatpush1.bf16.msra.mxu1 %v3649_v45  ;;  %1527 = vmatpush1.bf16.msra.mxu0 %v3650_v47  ;;  %v322_v45 = vrot.slane %v321_v32, 4  ;;  %v330_v47 = vrot.slane %v5276_v36, 4  ;;  %v4231_v51 = vsel %vm4034_vm5, %v312_v40, %v316_v48  ;;  %v4268_v48 = vld [vmem:[%s3985_s6 + $0x50] sm:$0xff]  ;;  %v362_v32 = vshrl.u32 %v4278_v21, 16  ;;  %v3701_v36 = vld [vmem:[%s5269_s1 + $0x84] ss:$8 sps:$4 sm:$0xff]  }
  0x40   : > { %1057 = vmatprep.subr.bf16.mxu1 %v3653_v56  ;;  %2043 = vmatprep.subr.bf16.mxu0 %v3656_v57  ;;  %v3666_v56 = vld [vmem:[%s5269_s1 + $0x2f0] ss:$8 sps:$4 sm:$0xff]   ;;  %v352_v25 = vshll.u32 %v4268_v48, 16 }
  0x41   : > { %v4244_v57 = vsel %vm4034_vm5, %v322_v45, %v326_v35  ;;  %v331_v58 = vor.u32 %v330_v47, %v326_v35  ;;  %v4292_v35 = vsel %vm4021_vm4, %v1205_v10, %v1206_v54  ;;  %v4299_v40 = vld [vmem:[%s3985_s6 + $0x50] sm:$0xee]  ;;  %v364_v47 = vrot.slane %v362_v32, 4 }
  0x42   : > { %731 = vmatmul.mubr.bf16.vlgmr.msra.gmra.mrb[0].mxu1 %v2991_v52  ;;  %1531 = vmatmul.mubr.bf16.vlgmr.msra.gmra.mrb[0].mxu0 %v3133_v49  ;;  %v4222_v49 = vsel %vm4178_vm9, %v1658_v55, %v4083_v31  ;;  %v4235_v52 = vsel %vm4021_vm4, %v1202_v26, %v1203_v27  ;;  %v338_v31 = vshrl.u32 %v4202_v41, 16  ;;  %v3680_v26 = vld [vmem:[%s5269_s1 + $0x314] ss:$8 sps:$4 sm:$0xff]  }
  0x43   : > { %1058 = vmatpush1.bf16.msra.mxu1 %v3651_v4  ;;  %2044 = vmatpush1.bf16.msra.mxu0 %v3654_v5  ;;  %v3674_v4 = vld [vmem:[%s5269_s1 + $0x304] ss:$8 sps:$4 sm:$0xff]   ;;  %v2996_v5 = vcombine.high %v4231_v51, %v4244_v57  ;;  %v3138_v6 = vcombine.high %v4215_v46, %v4235_v52  ;;  %v3218_v17 = vcombine.high %v4222_v49, %v4208_v43 }
  0x44   : > { %1059 = vmatprep.subr.bf16.mxu1 %v3659_v11  ;;  %2045 = vmatprep.subr.bf16.mxu0 %v3662_v18  ;;  %v340_v2 = vrot.slane %v338_v31, 4  ;;  %v1208_v11 = vrot.slane %v1206_v54, 4  ;;  %v3677_v18 = vld [vmem:[%s5269_s1 + $0x44] ss:$8 sps:$4 sm:$0xff]   ;;  %v3137_v42 = vcombine.low %v4215_v46, %v4235_v52  ;;  %v3683_v46 = vld [vmem:[%s5269_s1 + $0x54] ss:$8 sps:$4 sm:$0xff]  }
  0x45   : > { %3038 = vmatprep.mubr.msk.bf16.mxu1 %vm673_vm6, %v2994_v19  ;;  %3180 = vmatprep.mubr.msk.bf16.mxu0 %vm673_vm6, %v3136_v20  ;;  %v332_v19 = vrot.slane %v331_v58, 4  ;;  %v346_v20 = vrot.slane %v344_v60, 5  ;;  %v3678_v58 = vld [vmem:[%s5269_s1 + $0x310] ss:$8 sps:$4 sm:$0xff]   ;;  %v1702_v1 = vrot.slane %v338_v31, 5 }
  0x46   : > { %v341_v15 = vor.u32 %v340_v2, %v336_v62  ;;  %v3734_v31 = vld [vmem:[%s5269_s1 + $0x3a4] ss:$8 sps:$4 sm:$0xff]  }
  0x47   : > { %1060 = vmatpush1.bf16.msra.mxu1 %v3657_v24  ;;  %2046 = vmatpush1.bf16.msra.mxu0 %v3660_v30  ;;  %v349_v24 = vshrl.u32 %v4268_v48, 16  ;;  %v358_v30 = vshll.u32 %v4278_v21, 16  ;;  %v4323_v52 = vsel %vm4034_vm5, %v332_v19, %v336_v62  ;;  %v3101_v62 = vrot.slane %v4299_v40, 9  ;;  %v4348_v19 = vld [vmem:[%s3985_s6 + $0x70] sm:$0x11] }
  0x48   : > { %1061 = vmatprep.subr.bf16.mxu1 %v3665_v39  ;;  %2047 = vmatprep.subr.bf16.mxu0 %v3668_v44  ;;  %v342_v27 = vrot.slane %v341_v15, 4  ;;  %v354_v39 = vrot.slane %v352_v25, 5  ;;  %v3675_v44 = vld [vmem:[%s5269_s1 + $0x40] ss:$8 sps:$4 sm:$0xff]  }
  0x49   : > { %v360_v45 = vrot.slane %v358_v30, 5 }
  0x4a   : > { %741 = vmatmul.mubr.bf16.gmra.mrb[4].mxu1 %v2993_v37  ;;  %1541 = vmatmul.mubr.bf16.gmra.mrb[4].mxu0 %v3135_v38  ;;  %v4296_v37 = vsel %vm4021_vm4, %v1208_v11, %v1209_v16  ;;  %v351_v38 = vrot.slane %v349_v24, 4  ;;  %v4327_v60 = vsel %vm4034_vm5, %v342_v27, %v346_v20  ;;  %v1216_v16 = vrot.slane %v4281_v22, 5  ;;  %v3684_v27 = vld [vmem:[%s5269_s1 + $0x320] ss:$8 sps:$4 sm:$0xff]  }
  0x4b   : > { %1062 = vmatpush1.bf16.msra.mxu1 %v3663_v50  ;;  %2048 = vmatpush1.bf16.msra.mxu0 %v3666_v56  ;;  %v5273_v50 = vshll.u32 %v4281_v22, 16  ;;  %v2995_v56 = vcombine.low %v4231_v51, %v4244_v57  ;;  %v3686_v51 = vld [vmem:[%s5269_s1 + $0x324] ss:$8 sps:$4 sm:$0xff]   ;;  %v3140_v57 = vcombine.high %v4292_v35, %v4296_v37  ;;  %v365_v2 = vor.u32 %v364_v47, %v360_v45 }
  0x4c   : > { %1063 = vmatprep.subr.bf16.mxu1 %v3671_v61  ;;  %2049 = vmatprep.subr.bf16.mxu0 %v3674_v4  ;;  %v355_v54 = vor.u32 %v354_v39, %v351_v38  ;;  %v4330_v61 = vld [vmem:[%s3985_s6 + $0x68] sm:$0xff]  ;;  %v1213_v4 = vrot.slane %v4278_v21, 5  ;;  %v3139_v38 = vcombine.low %v4292_v35, %v4296_v37  ;;  %v388_v35 = vshll.u32 %v4348_v19, 16 }
  0x4d   : > { %3039 = vmatprep.mubr.msk.bf16.mxu1 %vm673_vm6, %v2996_v5  ;;  %3181 = vmatprep.mubr.msk.bf16.mxu0 %vm673_vm6, %v3138_v6  ;;  %v370_v5 = vrot.slane %v5273_v50, 5  ;;  %v5274_v6 = vshrl.u32 %v4281_v22, 16  ;;  %v378_v10 = vshll.u32 %v4330_v61, 16  ;;  %v382_v11 = vshrl.u32 %v4330_v61, 16  ;;  %v3689_v39 = vld [vmem:[%s5269_s1 + $0x64] ss:$8 sps:$4 sm:$0xff]  }
  0x4e   : > { %v366_v15 = vrot.slane %v365_v2, 4  ;;  %v4374_v47 = vsel %vm4021_vm4, %v3101_v62, %v1213_v4  ;;  %v1219_v37 = vrot.slane %v4330_v61, 5  ;;  %v1222_v62 = vrot.slane %v4348_v19, 5 }
  0x4f   : > { %1064 = vmatpush1.bf16.msra.mxu1 %v3669_v12  ;;  %2050 = vmatpush1.bf16.msra.mxu0 %v3672_v13  ;;  %v2998_v12 = vcombine.high %v4323_v52, %v4327_v60  ;;  %v356_v13 = vrot.slane %v355_v54, 4  ;;  %v374_v20 = vrot.slane %v5274_v6, 4  ;;  %v380_v24 = vrot.slane %v378_v10, 5  ;;  %v3695_v54 = vld [vmem:[%s5269_s1 + $0x74] ss:$8 sps:$4 sm:$0xff]  }
  0x50   : > { %1065 = vmatprep.subr.bf16.mxu1 %v3677_v18  ;;  %2051 = vmatprep.subr.bf16.mxu0 %v3680_v26  ;;  %v1215_v18 = vrot.slane %v1213_v4, 4  ;;  %v384_v25 = vrot.slane %v382_v11, 4  ;;  %v3681_v26 = vld [vmem:[%s5269_s1 + $0x50] ss:$8 sps:$4 sm:$0xff]  }
  0x51   : > { %v4406_v4 = vld [vmem:[%s3985_s6 + $0x78] sm:$0xff] }
  0x52   : > { %751 = vmatmul.mubr.bf16.gmra.mrb[8].mxu1 %v2995_v56  ;;  %1551 = vmatmul.mubr.bf16.gmra.mrb[8].mxu0 %v3137_v42  ;;  %v2997_v42 = vcombine.low %v4323_v52, %v4327_v60  ;;  %v3687_v56 = vld [vmem:[%s5269_s1 + $0x60] ss:$8 sps:$4 sm:$0xff]   ;;  %v375_v52 = vor.u32 %v374_v20, %v370_v5  ;;  %v385_v60 = vor.u32 %v384_v25, %v380_v24  ;;  %v1221_v20 = vrot.slane %v1219_v37, 4 }
  0x53   : > { %1066 = vmatpush1.bf16.msra.mxu1 %v3675_v44  ;;  %2052 = vmatpush1.bf16.msra.mxu0 %v3678_v58  ;;  %v3692_v44 = vld [vmem:[%s5269_s1 + $0x334] ss:$8 sps:$4 sm:$0xff]   ;;  %v3690_v58 = vld [vmem:[%s5269_s1 + $0x330] ss:$8 sps:$4 sm:$0xff]   ;;  %v4402_v2 = vsel %vm4021_vm4, %v1215_v18, %v1216_v16  ;;  %v4412_v25 = vld [vmem:[%s3985_s6 + $0x88] sm:$0xff] }
  0x54   : > { %1067 = vmatprep.subr.bf16.mxu1 %v3683_v46  ;;  %2053 = vmatprep.subr.bf16.mxu0 %v3686_v51  ;;  %v4388_v46 = vsel %vm4034_vm5, %v356_v13, %v360_v45  ;;  %v3698_v51 = vld [vmem:[%s5269_s1 + $0x344] ss:$8 sps:$4 sm:$0xff]   ;;  %v1218_v45 = vrot.slane %v1216_v16, 4  ;;  %v376_v13 = vrot.slane %v375_v52, 4  ;;  %v386_v18 = vrot.slane %v385_v60, 4 }
  0x55   : > { %3040 = vmatprep.mubr.msk.bf16.mxu1 %vm673_vm6, %v2998_v12  ;;  %3182 = vmatprep.mubr.msk.bf16.mxu0 %vm673_vm6, %v3140_v57  ;;  %v4398_v57 = vsel %vm4034_vm5, %v366_v15, %v370_v5  ;;  %v4409_v12 = vld [vmem:[%s3985_s6 + $0x80] sm:$0xff]  ;;  %v393_v5 = vshrl.u32 %v4406_v4, 16  ;;  %v396_v15 = vshll.u32 %v4406_v4, 16  ;;  %v390_v16 = vrot.slane %v388_v35, 5 }
  0x56   : > { %v402_v19 = vshll.u32 %v4409_v12, 16  ;;  %v406_v50 = vshrl.u32 %v4409_v12, 16  ;;  %v3000_v52 = vcombine.high %v4388_v46, %v4398_v57  ;;  %v3141_v35 = vcombine.low %v4374_v47, %v4402_v2 }
  0x57   : > { %1068 = vmatpush1.bf16.msra.mxu1 %v3681_v26  ;;  %2054 = vmatpush1.bf16.msra.mxu0 %v3684_v27  ;;  %v3693_v26 = vld [vmem:[%s5269_s1 + $0x70] ss:$8 sps:$4 sm:$0xff]   ;;  %v3696_v27 = vld [vmem:[%s5269_s1 + $0x340] ss:$8 sps:$4 sm:$0xff]   ;;  %v4434_v60 = vsel %vm4021_vm4, %v1218_v45, %v1219_v37  ;;  %v395_v6 = vrot.slane %v393_v5, 4  ;;  %v398_v55 = vrot.slane %v396_v15, 5 }
  0x58   : > { %1069 = vmatprep.subr.bf16.mxu1 %v3689_v39  ;;  %2055 = vmatprep.subr.bf16.mxu0 %v3692_v44  ;;  %v3142_v39 = vcombine.high %v4374_v47, %v4402_v2  ;;  %v2999_v44 = vcombine.low %v4388_v46, %v4398_v57  ;;  %v5277_v14 = vshll.u32 %v4412_v25, 16  ;;  %v4442_v46 = vsel %vm4034_vm5, %v376_v13, %v380_v24  ;;  %v4453_v37 = vld [vmem:[%s3985_s6 + $0x78] sm:$0xee] }
  0x59   : > { %v408_v47 = vrot.slane %v406_v50, 4  ;;  %v4460_v24 = vsel %vm4034_vm5, %v386_v18, %v390_v16  ;;  %v1226_v57 = vrot.slane %v4409_v12, 5  ;;  %v3102_v5 = vrot.slane %v4453_v37, 9  ;;  %v4483_v18 = vld [vmem:[%s3985_s6 + $0x90] sm:$0xff] }
  0x5a   : > { %761 = vmatmul.mubr.bf16.gmra.mrb[12].mxu1 %v2997_v42  ;;  %1561 = vmatmul.mubr.bf16.gmra.mrb[12].mxu0 %v3139_v38  ;;  %v4446_v38 = vsel %vm4021_vm4, %v1221_v20, %v1222_v62  ;;  %v404_v42 = vrot.slane %v402_v19, 5  ;;  %v414_v20 = vrot.slane %v5277_v14, 5  ;;  %v1229_v15 = vrot.slane %v4412_v25, 5  ;;  %v3707_v16 = vld [vmem:[%s5269_s1 + $0x94] ss:$8 sps:$4 sm:$0xff]  }
  0x5b   : > { %1070 = vmatpush1.bf16.msra.mxu1 %v3687_v56  ;;  %2056 = vmatpush1.bf16.msra.mxu0 %v3690_v58  ;;  %v3704_v56 = vld [vmem:[%s5269_s1 + $0x354] ss:$8 sps:$4 sm:$0xff]   ;;  %v399_v58 = vor.u32 %v398_v55, %v395_v6  ;;  %v5278_v55 = vshrl.u32 %v4412_v25, 16  ;;  %v3002_v62 = vcombine.high %v4442_v46, %v4460_v24  ;;  %v4510_v14 = vsel %vm4021_vm4, %v3102_v5, %v1226_v57 }
  0x5c   : > { %1071 = vmatprep.subr.bf16.mxu1 %v3695_v54  ;;  %2057 = vmatprep.subr.bf16.mxu0 %v3698_v51  ;;  %v3699_v54 = vld [vmem:[%s5269_s1 + $0x80] ss:$8 sps:$4 sm:$0xff]   ;;  %v3702_v51 = vld [vmem:[%s5269_s1 + $0x350] ss:$8 sps:$4 sm:$0xff]   ;;  %v409_v45 = vor.u32 %v408_v47, %v404_v42  ;;  %v5279_v47 = vshll.u32 %v4483_v18, 16 }
  0x5d   : > { %3041 = vmatprep.mubr.msk.bf16.mxu1 %vm673_vm6, %v3000_v52  ;;  %3183 = vmatprep.mubr.msk.bf16.mxu0 %vm673_vm6, %v3142_v39  ;;  %v400_v13 = vrot.slane %v399_v58, 4  ;;  %v1228_v39 = vrot.slane %v1226_v57, 4  ;;  %v426_v58 = vshrl.u32 %v4483_v18, 16  ;;  %v4493_v6 = vld [vmem:[%s3985_s6 + $0x98] sm:$0x11] }
  0x5e   : > { %v410_v52 = vrot.slane %v409_v45, 4  ;;  %v3710_v45 = vld [vmem:[%s5269_s1 + $0x364] ss:$8 sps:$4 sm:$0xff]   ;;  %v432_v5 = vshll.u32 %v4493_v6, 16 }
  0x5f   : > { %1072 = vmatpush1.bf16.msra.mxu1 %v3693_v26  ;;  %2058 = vmatpush1.bf16.msra.mxu0 %v3696_v27  ;;  %v418_v26 = vrot.slane %v5278_v55, 4  ;;  %v3144_v27 = vcombine.high %v4434_v60, %v4446_v38  ;;  %v4514_v55 = vrot.slane %v5279_v47, 5  ;;  %v4528_v57 = vsel %vm4021_vm4, %v1228_v39, %v1229_v15  ;;  %v3717_v47 = vld [vmem:[%s5269_s1 + $0xb0] ss:$8 sps:$4 sm:$0xff]  }
  0x60   : > { %1073 = vmatprep.subr.bf16.mxu1 %v3701_v36  ;;  %2059 = vmatprep.subr.bf16.mxu0 %v3704_v56  ;;  %v3705_v36 = vld [vmem:[%s5269_s1 + $0x90] ss:$8 sps:$4 sm:$0xff]   ;;  %v3708_v56 = vld [vmem:[%s5269_s1 + $0x360] ss:$8 sps:$4 sm:$0xff]   ;;  %v4524_v2 = vsel %vm4034_vm5, %v410_v52, %v414_v20  ;;  %v3143_v39 = vcombine.low %v4434_v60, %v4446_v38  ;;  %v3719_v60 = vld [vmem:[%s5269_s1 + $0xb4] ss:$8 sps:$4 sm:$0xff]  }
  0x61   : > { %v1231_v38 = vrot.slane %v1229_v15, 4  ;;  %v3722_v15 = vld [vmem:[%s5269_s1 + $0x384] ss:$8 sps:$4 sm:$0xff]  }
  0x62   : > { %771 = vmatmul.mubr.bf16.gmra.mrb[16].mxu1 %v2999_v44  ;;  %1571 = vmatmul.mubr.bf16.gmra.mrb[16].mxu0 %v3141_v35  ;;  %v428_v44 = vrot.slane %v426_v58, 4  ;;  %v4520_v35 = vsel %vm4034_vm5, %v400_v13, %v404_v42  ;;  %v3716_v42 = vld [vmem:[%s5269_s1 + $0x374] ss:$8 sps:$4 sm:$0xff]   ;;  %v1232_v13 = vrot.slane %v4483_v18, 5  ;;  %v3725_v52 = vld [vmem:[%s5269_s1 + $0xc4] ss:$8 sps:$4 sm:$0xff]  }
  0x63   : > { %1074 = vmatpush1.bf16.msra.mxu1 %v3699_v54  ;;  %2060 = vmatpush1.bf16.msra.mxu0 %v3702_v51  ;;  %v3713_v54 = vld [vmem:[%s5269_s1 + $0xa4] ss:$8 sps:$4 sm:$0xff]   ;;  %v419_v51 = vor.u32 %v418_v26, %v414_v20  ;;  %v3001_v26 = vcombine.low %v4442_v46, %v4460_v24  ;;  %v3146_v46 = vcombine.high %v4510_v14, %v4528_v57  ;;  %v1670_v24 = vrot.slane %v290_v33, 6 }
  0x64   : > { %3042 = vmatprep.mubr.msk.bf16.mxu1 %vm673_vm6, %v3002_v62  ;;  %1075 = vmatprep.subr.bf16.mxu1 %v3707_v16  ;;  %v429_v62 = vor.u32 %v428_v44, %v4514_v55  ;;  %v1669_v16 = vrot.slane %v294_v34, 5  ;;  %v3714_v34 = vld [vmem:[%s5269_s1 + $0x370] ss:$8 sps:$4 sm:$0xff]   ;;  %v434_v44 = vrot.slane %v432_v5, 5  ;;  %v1235_v33 = vrot.slane %v4493_v6, 5 }
  0x65   : > { %3184 = vmatprep.mubr.msk.bf16.mxu0 %vm673_vm6, %v3144_v27  ;;  %2061 = vmatprep.subr.bf16.mxu0 %v3710_v45  ;;  %v3711_v27 = vld [vmem:[%s5269_s1 + $0xa0] ss:$8 sps:$4 sm:$0xff]   ;;  %v1668_v45 = vrot.slane %v4186_v28, 4  ;;  %v3004_v28 = vcombine.high %v4520_v35, %v4524_v2  ;;  %v420_v20 = vrot.slane %v419_v51, 4  ;;  %v3728_v6 = vld [vmem:[%s5269_s1 + $0x394] ss:$8 sps:$4 sm:$0xff]  }
  0x66   : > { %v430_v29 = vrot.slane %v429_v62, 4  ;;  %v3720_v5 = vld [vmem:[%s5269_s1 + $0x380] ss:$8 sps:$4 sm:$0xff]   ;;  %v4596_v62 = vsel %vm4021_vm4, %v1231_v38, %v1232_v13  ;;  %v3003_v38 = vcombine.low %v4520_v35, %v4524_v2  ;;  %v1703_v2 = vrot.slane %v334_v53, 6 }
  0x67   : > { %1076 = vmatpush1.bf16.msra.mxu1 %v3705_v36  ;;  %2062 = vmatpush1.bf16.msra.mxu0 %v3708_v56  ;;  %v1234_v36 = vrot.slane %v1232_v13, 4  ;;  %v4574_v56 = vld [vmem:[%s3985_s6 + $0x20] sm:$0x33]  ;;  %v425_v13 = vsel %vm4034_vm5, %v420_v20, %v4514_v55  ;;  %v3726_v55 = vld [vmem:[%s5269_s1 + $0x390] ss:$8 sps:$4 sm:$0xff]  }
  0x68   : > { %1077 = vmatprep.subr.bf16.mxu1 %v3713_v54  ;;  %2063 = vmatprep.subr.bf16.mxu0 %v3716_v42  ;;  %v1671_v54 = vor.u32 %v1670_v24, %v1669_v16  ;;  %v1675_v42 = vshrl.u32 %v4574_v56, 16  ;;  %v1678_v51 = vshll.u32 %v4574_v56, 16  ;;  %v1693_v24 = vrot.slane %v314_v8, 6  ;;  %v3723_v8 = vld [vmem:[%s5269_s1 + $0xc0] ss:$8 sps:$4 sm:$0xff]  }
  0x6a   : > { %781 = vmatmul.mubr.bf16.gmra.mrb[20].mxu1 %v3001_v26  ;;  %1581 = vmatmul.mubr.bf16.gmra.mrb[20].mxu0 %v3143_v39  ;;  %v4600_v39 = vsel %vm4178_vm9, %v1668_v45, %v1671_v54  ;;  %v1677_v16 = vrot.slane %v1675_v42, 5  ;;  %v1673_v26 = vrot.slane %v1671_v54, 4  ;;  %v435_v45 = vsel %vm4034_vm5, %v430_v29, %v434_v44  ;;  %v3729_v44 = vld [vmem:[%s5269_s1 + $0xd0] ss:$8 sps:$4 sm:$0xff]  }
  0x6b   : > { %1078 = vmatpush1.bf16.msra.mxu1 %v3711_v27  ;;  %2064 = vmatpush1.bf16.msra.mxu0 %v3714_v34  ;;  %v1680_v27 = vrot.slane %v1678_v51, 6  ;;  %v1692_v34 = vrot.slane %v318_v9, 5  ;;  %v3145_v9 = vcombine.low %v4510_v14, %v4528_v57  ;;  %v3006_v14 = vcombine.high %v425_v13, %v435_v45  ;;  %v3735_v51 = vld [vmem:[%s5269_s1 + $0xe0] ss:$8 sps:$4 sm:$0xff]  }
  0x6c   : > { %3043 = vmatprep.mubr.msk.bf16.mxu1 %vm673_vm6, %v3004_v28  ;;  %1079 = vmatprep.subr.bf16.mxu1 %v3719_v60  ;;  %v1236_v60 = vsel %vm4021_vm4, %v1234_v36, %v1235_v33  ;;  %v3732_v28 = vld [vmem:[%s5269_s1 + $0x3a0] ss:$8 sps:$4 sm:$0xff]   ;;  %v3737_v36 = vld [vmem:[%s5269_s1 + $0xe4] ss:$8 sps:$4 sm:$0xff]   ;;  %v1687_v29 = vshll.u32 %v4141_v3, 16  ;;  %v1725_v54 = vrot.slane %v362_v32, 5 }
  0x6d   : > { %3185 = vmatprep.mubr.msk.bf16.mxu0 %vm673_vm6, %v3146_v46  ;;  %2065 = vmatprep.subr.bf16.mxu0 %v3722_v15  ;;  %v1681_v20 = vor.u32 %v1680_v27, %v1677_v16  ;;  %v4625_v7 = vor.u32 %v1693_v24, %v1692_v34  ;;  %v3148_v35 = vcombine.high %v4596_v62, %v1236_v60  ;;  %v1684_v15 = vshrl.u32 %v4141_v3, 16  ;;  %v3740_v33 = vld [vmem:[%s5269_s1 + $0x3b4] ss:$8 sps:$4 sm:$0xff]   ;;  %v3738_v16 = vld [vmem:[%s5269_s1 + $0x3b0] ss:$8 sps:$4 sm:$0xff]   ;;  %v4681_v27 = vld [vmem:[%s3985_s6 + $0x8] sm:$0xff] }
  0x6e   : > { %v4649_v46 = vor.u32 %v1703_v2, %v1702_v1  ;;  %v1726_v42 = vrot.slane %v358_v30, 6  ;;  %v3147_v3 = vcombine.low %v4596_v62, %v1236_v60  ;;  %v1736_v32 = vrot.slane %v378_v10, 6  ;;  %v3802_v62 = vld [vmem:[%s3985_s6] sm:$0xff] }
  0x6f   : > { %1080 = vmatpush1.bf16.msra.mxu1 %v3717_v47  ;;  %2066 = vmatpush1.bf16.msra.mxu0 %v3720_v5  ;;  %v4634_v57 = vsel %vm4178_vm9, %v1673_v26, %v1681_v20  ;;  %v3731_v47 = vld [vmem:[%s5269_s1 + $0xd4] ss:$8 sps:$4 sm:$0xff]   ;;  %v3005_v5 = vcombine.low %v425_v13, %v435_v45  ;;  %v1686_v30 = vrot.slane %v1684_v15, 5  ;;  %v1689_v26 = vrot.slane %v1687_v29, 6  ;;  %v3745_v10 = vld [vmem:[%s5269_s1 + $0x3c4] ss:$8 sps:$4 sm:$0xff]  }
  0x70   : > { %1081 = vmatprep.subr.bf16.mxu1 %v3725_v52  ;;  %2067 = vmatprep.subr.bf16.mxu0 %v3728_v6  ;;  %v3220_v53 = vcombine.high %v4600_v39, %v4634_v57  ;;  %v3219_v52 = vcombine.low %v4600_v39, %v4634_v57  ;;  %v1735_v6 = vrot.slane %v382_v11, 5  ;;  %v3046_v34 = vcombine.high %v3802_v62, %v4681_v27 }
  0x71   : > { %v4684_v24 = vor.u32 %v1726_v42, %v1725_v54  ;;  %v1690_v13 = vor.u32 %v1689_v26, %v1686_v30  ;;  %v1758_v45 = vrot.slane %v406_v50, 5  ;;  %v5286_v60 = vshrl.u32 %v4137_v0, 16  ;;  %v4705_v50 = vld [vmem:[%s3985_s6 + $0x48] sm:$0x33]  ;;  %v2190_v54 = vld [vmem:[%s3985_s6 + $0x50] sm:$0xcc] }
  0x72   : > { %791 = vmatmul.mubr.bf16.gmra.mrb[24].mxu1 %v3003_v38  ;;  %1591 = vmatmul.mubr.bf16.gmra.mrb[24].mxu0 %v3145_v9  ;;  %v4686_v11 = vor.u32 %v1736_v32, %v1735_v6  ;;  %v5287_v9 = vshll.u32 %v4137_v0, 16  ;;  %v3045_v20 = vcombine.low %v3802_v62, %v4681_v27  ;;  %v3743_v0 = vld [vmem:[%s5269_s1 + $0x3c0] ss:$8 sps:$4 sm:$0xff]   ;;  %v3746_v42 = vld [vmem:[%s5269_s1 + $0x3d0] ss:$8 sps:$4 sm:$0xff]   ;;  %v1717_v6 = vshrl.u32 %v4299_v40, 16 }
  0x73   : > { %1082 = vmatpush1.bf16.msra.mxu1 %v3723_v8  ;;  %2068 = vmatpush1.bf16.msra.mxu0 %v3726_v55  ;;  %v1697_v38 = vrot.slane %v5286_v60, 5  ;;  %v1759_v55 = vrot.slane %v402_v19, 6  ;;  %v1691_v2 = vrot.slane %v1690_v13, 4  ;;  %v5288_v19 = vshll.u32 %v4483_v18, 16  ;;  %v3756_v13 = vld [vmem:[%s5269_s1 + $0x3f4] ss:$8 sps:$4 sm:$0xff]  }
  0x74   : > { %3044 = vmatprep.mubr.msk.bf16.mxu1 %vm673_vm6, %v3006_v14  ;;  %3186 = vmatprep.mubr.msk.bf16.mxu0 %vm673_vm6, %v3148_v35  ;;  %v1698_v8 = vrot.slane %v5287_v9, 6  ;;  %v3748_v35 = vld [vmem:[%s5269_s1 + $0x3d4] ss:$8 sps:$4 sm:$0xff]   ;;  %v2231_v30 = vrot.slane %v4278_v21, 6  ;;  %v2234_v26 = vrot.slane %v4281_v22, 6  ;;  %v5292_v57 = vshrl.u32 %v4281_v22, 16 }
  0x75   : > { %1083 = vmatprep.subr.bf16.mxu1 %v3731_v47  ;;  %2069 = vmatprep.subr.bf16.mxu0 %v3734_v31  ;;  %v4708_v1 = vor.u32 %v1759_v55, %v1758_v45  ;;  %v1769_v14 = vrot.slane %v5288_v19, 6  ;;  %v1696_v47 = vrot.slane %v4625_v7, 4  ;;  %v3050_v45 = vcombine.high %v4123_v59, %v4134_v63  ;;  %v2191_v19 = vld [vmem:[%s3985_s6 + $0x78] sm:$0xcc] }
  0x76   : > { %v1699_v31 = vor.u32 %v1698_v8, %v1697_v38  ;;  %v1706_v38 = vrot.slane %v4649_v46, 4  ;;  %v1719_v8 = vrot.slane %v1717_v6, 5 }
  0x77   : > { %1084 = vmatpush1.bf16.msra.mxu1 %v3729_v44  ;;  %2070 = vmatpush1.bf16.msra.mxu0 %v3732_v28  ;;  %v1708_v44 = vshrl.u32 %v4705_v50, 16  ;;  %v4724_v28 = vld [vmem:[%s3985_s6 + $0x10] sm:$0xff] }
  0x78   : > { %1085 = vmatprep.subr.bf16.mxu1 %v3737_v36  ;;  %2071 = vmatprep.subr.bf16.mxu0 %v3740_v33  ;;  %v4727_v36 = vld [vmem:[%s3985_s6 + $0x18] sm:$0xff]  ;;  %v5289_v33 = vcombine.low %v4222_v49, %v4208_v43  ;;  %v4750_v43 = vsel %vm4178_vm9, %v1696_v47, %v1699_v31  ;;  %v3761_v47 = vld [vmem:[%s5269_s1 + $0x404] ss:$8 sps:$4 sm:$0xff]  }
  0x79   : > { %v3048_v15 = vcombine.high %v4724_v28, %v4727_v36  ;;  %v1710_v49 = vrot.slane %v1708_v44, 5  ;;  %v3047_v62 = vcombine.low %v4724_v28, %v4727_v36 }
  0x7a   : > { %801 = vmatmul.mubr.bf16.gmra.mrb[28].mxu1 %v3005_v5  ;;  %1601 = vmatmul.mubr.bf16.gmra.mrb[28].mxu0 %v3147_v3  ;;  %v4743_v5 = vsel %vm4178_vm9, %v1691_v2, %v4625_v7  ;;  %v3753_v3 = vld [vmem:[%s5269_s1 + $0x3e4] ss:$8 sps:$4 sm:$0xff]   ;;  %v1720_v7 = vshll.u32 %v4299_v40, 16  ;;  %v2233_v40 = vrot.slane %v2231_v30, 4  ;;  %v2237_v2 = vrot.slane %v4330_v61, 6 }
  0x7b   : > { %1086 = vmatpush1.bf16.msra.mxu1 %v3735_v51  ;;  %2072 = vmatpush1.bf16.msra.mxu0 %v3738_v16  ;;  %v3273_v16 = vrot.slane %v2190_v54, 10  ;;  %v3222_v60 = vcombine.high %v4743_v5, %v4750_v43  ;;  %v3274_v54 = vrot.slane %v2191_v19, 10 }
  0x7c   : > { %3091 = vmatprep.mubr.msk.bf16.mxu1 %vm673_vm6, %v3046_v34  ;;  %3263 = vmatprep.mubr.msk.bf16.mxu0 %vm673_vm6, %v3218_v17  ;;  %v1768_v17 = vrot.slane %v426_v58, 5  ;;  %v1711_v58 = vshll.u32 %v4705_v50, 16  ;;  %v3751_v34 = vld [vmem:[%s5269_s1 + $0x3e0] ss:$8 sps:$4 sm:$0xff]   ;;  %v1722_v55 = vrot.slane %v1720_v7, 6  ;;  %v3221_v7 = vcombine.low %v4743_v5, %v4750_v43 }
  0x7d   : > { %2516 = vmatprep.subr.bf16.mxu0 %v3745_v10  ;;  %3394 = vmatprep.subr.bf16.mxu1 %v3745_v10  ;;  %v1701_v10 = vrot.slane %v1699_v31, 4  ;;  %v3764_v43 = vld [vmem:[%s5269_s1 + $0x414] ss:$8 sps:$4 sm:$0xff]  }
  0x7e   : > { %v4731_v29 = vor.u32 %v1769_v14, %v1768_v17  ;;  %v1713_v51 = vrot.slane %v1711_v58, 6  ;;  %v2236_v17 = vrot.slane %v2234_v26, 4  ;;  %v3754_v14 = vld [vmem:[%s5269_s1 + $0x3f0] ss:$8 sps:$4 sm:$0xff]  }
  0x7f   : > { %v4806_v39 = vsel %vm4178_vm9, %v1701_v10, %v4649_v46  ;;  %v5293_v46 = vshll.u32 %v4281_v22, 16  ;;  %v4854_v10 = vld [vmem:[%s3985_s6 + $0x38] sm:$0xff] }
  0x80   : > { %v1714_v9 = vor.u32 %v1713_v51, %v1710_v49  ;;  %v4822_v58 = vsel %vm4755_vm12, %v2236_v17, %v2237_v2  ;;  %v3806_v49 = vld [vmem:[%s3985_s6 + $0x28] sm:$0xff]  ;;  %v4830_v51 = vld [vmem:[%s3985_s6 + $0x30] sm:$0xff]  ;;  %v1729_v17 = vrot.slane %v4684_v24, 4 }
  0x81   : > { %v1731_v44 = vrot.slane %v5293_v46, 6  ;;  %v3049_v6 = vcombine.low %v3806_v49, %v4830_v51 }
  0x82   : > { %1090 = vmatmul.mubr.bf16.vlgmr.msra.gmra.mrb[0].mxu1 %v3045_v20  ;;  %2076 = vmatmul.mubr.bf16.vlgmr.msra.gmra.mrb[0].mxu0 %v5289_v33  ;;  %v4786_v20 = vsel %vm4755_vm12, %v2233_v40, %v2234_v26  ;;  %v4816_v31 = vsel %vm4178_vm9, %v1706_v38, %v1714_v9  ;;  %v1723_v33 = vor.u32 %v1722_v55, %v1719_v8 }
  0x83   : > { %2517 = vmatpush1.bf16.msra.mxu0 %v3743_v0  ;;  %3409 = vmatpush1.bf16.msra.mxu1 %v3743_v0  ;;  %v4792_v0 = vld [vmem:[%s3985_s6 + $0x70] sm:$0x33]  ;;  %v3052_v40 = vcombine.high %v4854_v10, %v4202_v41 }
  0x84   : > { %2518 = vmatprep.subr.bf16.mxu0 %v3748_v35  ;;  %3395 = vmatprep.subr.bf16.mxu1 %v3748_v35  ;;  %v2240_v35 = vrot.slane %v4792_v0, 6  ;;  %v1724_v38 = vrot.slane %v1723_v33, 4  ;;  %v1744_v9 = vshll.u32 %v4792_v0, 16 }
  0x85   : > { %3092 = vmatprep.mubr.msk.bf16.mxu1 %vm673_vm6, %v3048_v15  ;;  %3264 = vmatprep.mubr.msk.bf16.mxu0 %vm673_vm6, %v3220_v53  ;;  %v4774_v53 = vsel %vm4755_vm12, %v3273_v16, %v2231_v30  ;;  %v2239_v15 = vrot.slane %v2237_v2, 4  ;;  %v3759_v30 = vld [vmem:[%s5269_s1 + $0x400] ss:$8 sps:$4 sm:$0xff]   ;;  %v4868_v2 = vld [vmem:[%s3985_s6 + $0x98] sm:$0x33] }
  0x86   : > { %v3313_v59 = vcombine.low %v4774_v53, %v4786_v20  ;;  %v3314_v63 = vcombine.high %v4774_v53, %v4786_v20  ;;  %v2227_v20 = vrot.slane %v4705_v50, 6 }
  0x87   : > { %2519 = vmatpush1.bf16.msra.mxu0 %v3746_v42  ;;  %3410 = vmatpush1.bf16.msra.mxu1 %v3746_v42  ;;  %v2244_v42 = vrot.slane %v4409_v12, 6  ;;  %v4837_v16 = vsel %vm4755_vm12, %v2239_v15, %v2240_v35  ;;  %v1750_v35 = vshrl.u32 %v4453_v37, 16  ;;  %v4891_v15 = vld [vmem:[%s3985_s6 + $0x40] sm:$0xff] }
  0x88   : > { %2520 = vmatprep.subr.bf16.mxu0 %v3753_v3  ;;  %3396 = vmatprep.subr.bf16.mxu1 %v3753_v3  ;;  %v2247_v3 = vrot.slane %v4412_v25, 6  ;;  %v3316_v26 = vcombine.high %v4822_v58, %v4837_v16  ;;  %v3051_v33 = vcombine.low %v4854_v10, %v4891_v15 }
  0x89   : > { %v2246_v5 = vrot.slane %v2244_v42, 4 }
  0x8a   : > { %1100 = vmatmul.mubr.bf16.gmra.mrb[4].mxu1 %v3047_v62  ;;  %2086 = vmatmul.mubr.bf16.gmra.mrb[4].mxu0 %v3219_v52  ;;  %v1730_v52 = vrot.slane %v5292_v57, 5  ;;  %v3315_v62 = vcombine.low %v4822_v58, %v4837_v16  ;;  %v2249_v55 = vrot.slane %v2247_v3, 4  ;;  %v2253_v57 = vrot.slane %v4868_v2, 6 }
  0x8b   : > { %2521 = vmatpush1.bf16.msra.mxu0 %v3751_v34  ;;  %3411 = vmatpush1.bf16.msra.mxu1 %v3751_v34  ;;  %v4848_v34 = vsel %vm4755_vm12, %v3274_v54, %v2244_v42  ;;  %v4864_v8 = vsel %vm4755_vm12, %v2246_v5, %v2247_v3  ;;  %v1746_v42 = vrot.slane %v1744_v9, 6  ;;  %v3223_v3 = vcombine.low %v4806_v39, %v4816_v31  ;;  %v3777_v9 = vld [vmem:[%s5269_s1 + $0x444] ss:$8 sps:$4 sm:$0xff]  }
  0x8c   : > { %2522 = vmatprep.subr.bf16.mxu0 %v3756_v13  ;;  %3397 = vmatprep.subr.bf16.mxu1 %v3756_v13  ;;  %v3224_v13 = vcombine.high %v4806_v39, %v4816_v31  ;;  %v3318_v41 = vcombine.high %v4848_v34, %v4864_v8  ;;  %v3317_v19 = vcombine.low %v4848_v34, %v4864_v8 }
  0x8d   : > { %3093 = vmatprep.mubr.msk.bf16.mxu1 %vm673_vm6, %v3050_v45  ;;  %3265 = vmatprep.mubr.msk.bf16.mxu0 %vm673_vm6, %v3222_v60  ;;  %v1732_v45 = vor.u32 %v1731_v44, %v1730_v52  ;;  %v1741_v60 = vshrl.u32 %v4792_v0, 16  ;;  %v2250_v0 = vrot.slane %v4483_v18, 6  ;;  %v3769_v52 = vld [vmem:[%s5269_s1 + $0x424] ss:$8 sps:$4 sm:$0xff]  }
  0x8f   : > { %2523 = vmatpush1.bf16.msra.mxu0 %v3754_v14  ;;  %3412 = vmatpush1.bf16.msra.mxu1 %v3754_v14  ;;  %v3762_v14 = vld [vmem:[%s5269_s1 + $0x410] ss:$8 sps:$4 sm:$0xff]   ;;  %v4886_v46 = vsel %vm4755_vm12, %v2249_v55, %v2250_v0  ;;  %v2252_v44 = vrot.slane %v2250_v0, 4  ;;  %v1743_v54 = vrot.slane %v1741_v60, 5  ;;  %v1733_v49 = vsel %vm4178_vm9, %v1729_v17, %v1732_v45 }
  0x90   : > { %2524 = vmatprep.subr.bf16.mxu0 %v3761_v47  ;;  %3398 = vmatprep.subr.bf16.mxu1 %v3761_v47  ;;  %v1753_v47 = vshll.u32 %v4453_v37, 16  ;;  %v1728_v37 = vsel %vm4178_vm9, %v1724_v38, %v4684_v24  ;;  %v3772_v24 = vld [vmem:[%s5269_s1 + $0x434] ss:$8 sps:$4 sm:$0xff]   ;;  %v3770_v38 = vld [vmem:[%s5269_s1 + $0x430] ss:$8 sps:$4 sm:$0xff]  }
  0x91   : > { %v1747_v60 = vor.u32 %v1746_v42, %v1743_v54  ;;  %v3781_v54 = vld [vmem:[%s5269_s1 + $0x454] ss:$8 sps:$4 sm:$0xff]   ;;  %v1762_v42 = vrot.slane %v4708_v1, 4 }
  0x92   : > { %1110 = vmatmul.mubr.bf16.gmra.mrb[8].mxu1 %v3049_v6  ;;  %2096 = vmatmul.mubr.bf16.gmra.mrb[8].mxu0 %v3221_v7  ;;  %v4904_v6 = vsel %vm4755_vm12, %v2252_v44, %v2253_v57  ;;  %v3767_v7 = vld [vmem:[%s5269_s1 + $0x420] ss:$8 sps:$4 sm:$0xff]   ;;  %v1755_v5 = vrot.slane %v1753_v47, 6  ;;  %v3225_v47 = vcombine.low %v1728_v37, %v1733_v49 }
  0x93   : > { %2525 = vmatpush1.bf16.msra.mxu0 %v3759_v30  ;;  %3413 = vmatpush1.bf16.msra.mxu1 %v3759_v30  ;;  %v3320_v39 = vcombine.high %v4886_v46, %v4904_v6  ;;  %v3319_v31 = vcombine.low %v4886_v46, %v4904_v6  ;;  %v1752_v30 = vrot.slane %v1750_v35, 5  ;;  %v3775_v44 = vld [vmem:[%s5269_s1 + $0x440] ss:$8 sps:$4 sm:$0xff]  }
  0x94   : > { %2526 = vmatprep.subr.bf16.mxu0 %v3764_v43  ;;  %3399 = vmatprep.subr.bf16.mxu1 %v3764_v43  ;;  %v3226_v43 = vcombine.high %v1728_v37, %v1733_v49  ;;  %v1777_v37 = vshll.u32 %v4868_v2, 16  ;;  %v5297_v49 = vcombine.low %v4268_v48, %v4278_v21 }
  0x95   : > { %3094 = vmatprep.mubr.msk.bf16.mxu1 %vm673_vm6, %v3052_v40  ;;  %3266 = vmatprep.mubr.msk.bf16.mxu0 %vm673_vm6, %v3224_v13  ;;  %v1734_v40 = vrot.slane %v1732_v45, 4  ;;  %v1739_v13 = vrot.slane %v4686_v11, 4  ;;  %v1756_v55 = vor.u32 %v1755_v5, %v1752_v30  ;;  %v5294_v45 = vcombine.high %v4268_v48, %v4278_v21 }
  0x96   : > { %v5298_v30 = vcombine.high %v4281_v22, %v4330_v61 }
  0x97   : > { %2527 = vmatpush1.bf16.msra.mxu0 %v3762_v14  ;;  %3414 = vmatpush1.bf16.msra.mxu1 %v3762_v14  ;;  %v1738_v17 = vsel %vm4178_vm9, %v1734_v40, %v4686_v11  ;;  %v1748_v0 = vsel %vm4178_vm9, %v1739_v13, %v1747_v60  ;;  %v5295_v14 = vshrl.u32 %v4412_v25, 16  ;;  %v1757_v11 = vrot.slane %v1756_v55, 4  ;;  %v3783_v13 = vld [vmem:[%s5269_s1 + $0x460] ss:$8 sps:$4 sm:$0xff]  }
  0x98   : > { %2528 = vmatprep.subr.bf16.mxu0 %v3769_v52  ;;  %3400 = vmatprep.subr.bf16.mxu1 %v3769_v52  ;;  %v5296_v52 = vshll.u32 %v4412_v25, 16  ;;  %v3227_v40 = vcombine.low %v1738_v17, %v1748_v0 }
  0x99   : > { %v1763_v57 = vrot.slane %v5295_v14, 5  ;;  %v1761_v48 = vsel %vm4178_vm9, %v1757_v11, %v4708_v1  ;;  %v3793_v14 = vld [vmem:[%s5269_s1 + $0x484] ss:$8 sps:$4 sm:$0xff]   ;;  %v2208_v11 = vrot.slane %v4724_v28, 6 }
  0x9a   : > { %1120 = vmatmul.mubr.bf16.gmra.mrb[12].mxu1 %v3051_v33  ;;  %2106 = vmatmul.mubr.bf16.gmra.mrb[12].mxu0 %v3223_v3  ;;  %v1764_v35 = vrot.slane %v5296_v52, 6  ;;  %v3228_v33 = vcombine.high %v1738_v17, %v1748_v0  ;;  %v3787_v17 = vld [vmem:[%s5269_s1 + $0x470] ss:$8 sps:$4 sm:$0xff]   ;;  %v5300_v0 = vcombine.high %v4406_v4, %v4409_v12  ;;  %v3801_v28 = vld [vmem:[%s5269_s1 + $0x4a4] ss:$8 sps:$4 sm:$0xff]  }
  0x9b   : > { %2529 = vmatpush1.bf16.msra.mxu0 %v3767_v7  ;;  %3415 = vmatpush1.bf16.msra.mxu1 %v3767_v7  ;;  %v1774_v7 = vshrl.u32 %v4868_v2, 16  ;;  %v3785_v2 = vld [vmem:[%s5269_s1 + $0x464] ss:$8 sps:$4 sm:$0xff]  }
  0x9c   : > { %2530 = vmatprep.subr.bf16.mxu0 %v3772_v24  ;;  %3401 = vmatprep.subr.bf16.mxu1 %v3772_v24  ;;  %v1765_v3 = vor.u32 %v1764_v35, %v1763_v57  ;;  %v3779_v24 = vld [vmem:[%s5269_s1 + $0x450] ss:$8 sps:$4 sm:$0xff]   ;;  %v2205_v57 = vrot.slane %v4681_v27, 6  ;;  %v2188_v35 = vld [vmem:[%s3985_s6] sm:$0xcc]  ;;  %v5301_v27 = vcombine.low %v4406_v4, %v4409_v12  ;;  %v2211_v4 = vrot.slane %v4727_v36, 6 }
  0x9d   : > { %3095 = vmatprep.mubr.msk.bf16.mxu1 %vm673_vm6, %v5294_v45  ;;  %3267 = vmatprep.mubr.msk.bf16.mxu0 %vm673_vm6, %v3226_v43  ;;  %v1776_v5 = vrot.slane %v1774_v7, 5  ;;  %v1779_v43 = vrot.slane %v1777_v37, 6  ;;  %v5299_v45 = vcombine.low %v4281_v22, %v4330_v61  ;;  %v3799_v37 = vld [vmem:[%s5269_s1 + $0x4a0] ss:$8 sps:$4 sm:$0xff]   ;;  %v2210_v36 = vrot.slane %v2208_v11, 4 }
  0x9e   : > { %v1766_v21 = vsel %vm4178_vm9, %v1762_v42, %v1765_v3  ;;  %v1767_v1 = vrot.slane %v1765_v3, 4  ;;  %v2207_v23 = vrot.slane %v2205_v57, 4  ;;  %v5302_v42 = vcombine.high %v4412_v25, %v4483_v18 }
  0x9f   : > { %2531 = vmatpush1.bf16.msra.mxu0 %v3770_v38  ;;  %3416 = vmatpush1.bf16.msra.mxu1 %v3770_v38  ;;  %v3230_v60 = vcombine.high %v1761_v48, %v1766_v21  ;;  %v3789_v38 = vld [vmem:[%s5269_s1 + $0x474] ss:$8 sps:$4 sm:$0xff]   ;;  %v1780_v55 = vor.u32 %v1779_v43, %v1776_v5  ;;  %v3229_v52 = vcombine.low %v1761_v48, %v1766_v21  ;;  %v2218_v21 = vrot.slane %v4830_v51, 6 }
  0xa0   : > { %2532 = vmatprep.subr.bf16.mxu0 %v3777_v9  ;;  %3402 = vmatprep.subr.bf16.mxu1 %v3777_v9  ;;  %v1772_v9 = vrot.slane %v4731_v29, 4  ;;  %v1771_v22 = vsel %vm4178_vm9, %v1767_v1, %v4731_v29  ;;  %v3798_v29 = vld [vmem:[%s5269_s1 + $0x494] ss:$8 sps:$4 sm:$0xff]   ;;  %v2209_v3 = vsel %vm4755_vm12, %v2207_v23, %v2208_v11  ;;  %v2212_v48 = vsel %vm4755_vm12, %v2210_v36, %v2211_v4 }
  0xa2   : > { %1130 = vmatmul.mubr.bf16.gmra.mrb[16].mxu1 %v5297_v49  ;;  %2116 = vmatmul.mubr.bf16.gmra.mrb[16].mxu0 %v3225_v47  ;;  %v1781_v61 = vsel %vm4178_vm9, %v1772_v9, %v1780_v55  ;;  %v3791_v47 = vld [vmem:[%s5269_s1 + $0x480] ss:$8 sps:$4 sm:$0xff]  }
  0xa3   : > { %2533 = vmatpush1.bf16.msra.mxu0 %v3775_v44  ;;  %3417 = vmatpush1.bf16.msra.mxu1 %v3775_v44  ;;  %v3232_v44 = vcombine.high %v1771_v22, %v1781_v61  ;;  %v3231_v7 = vcombine.low %v1771_v22, %v1781_v61 }
  0xa4   : > { %3096 = vmatprep.mubr.msk.bf16.mxu1 %vm673_vm6, %v5298_v30  ;;  %3268 = vmatprep.mubr.msk.bf16.mxu0 %vm673_vm6, %v3228_v33  ;;  %v3271_v33 = vrot.slane %v2188_v35, 10  ;;  %v2214_v30 = vrot.slane %v4574_v56, 6 }
  0xa5   : > { %2534 = vmatprep.subr.bf16.mxu0 %v3781_v54  ;;  %3403 = vmatprep.subr.bf16.mxu1 %v3781_v54  ;;  %v3796_v54 = vld [vmem:[%s5269_s1 + $0x490] ss:$8 sps:$4 sm:$0xff]  }
  0xa6   : > { %v2206_v12 = vsel %vm4755_vm12, %v3271_v33, %v2205_v57 }
  0xa7   : > { %2535 = vmatpush1.bf16.msra.mxu0 %v3779_v24  ;;  %3418 = vmatpush1.bf16.msra.mxu1 %v3779_v24  ;;  %v3306_v49 = vcombine.high %v2206_v12, %v2209_v3  ;;  %v2213_v24 = vrot.slane %v2211_v4, 4 }
  0xa8   : > { %2536 = vmatprep.subr.bf16.mxu0 %v3785_v2  ;;  %3404 = vmatprep.subr.bf16.mxu1 %v3785_v2  ;;  %v5303_v2 = vcombine.low %v4412_v25, %v4483_v18  ;;  %v2189_v25 = vld [vmem:[%s3985_s6 + $0x28] sm:$0xcc]  ;;  %v3305_v18 = vcombine.low %v2206_v12, %v2209_v3 }
  0xa9   : > { %v2215_v56 = vsel %vm4755_vm12, %v2213_v24, %v2214_v30  ;;  %v3272_v43 = vrot.slane %v2189_v25, 10 }
  0xaa   : > { %1140 = vmatmul.mubr.bf16.gmra.mrb[20].mxu1 %v5299_v45  ;;  %2126 = vmatmul.mubr.bf16.gmra.mrb[20].mxu0 %v3227_v40  ;;  %v3308_v5 = vcombine.high %v2212_v48, %v2215_v56  ;;  %v2220_v40 = vrot.slane %v2218_v21, 4 }
  0xab   : > { %2537 = vmatpush1.bf16.msra.mxu0 %v3783_v13  ;;  %3419 = vmatpush1.bf16.msra.mxu1 %v3783_v13  ;;  %v2221_v13 = vrot.slane %v4854_v10, 6  ;;  %v2224_v10 = vrot.slane %v4891_v15, 6 }
  0xac   : > { %3097 = vmatprep.mubr.msk.bf16.mxu1 %vm673_vm6, %v5300_v0  ;;  %3269 = vmatprep.mubr.msk.bf16.mxu0 %vm673_vm6, %v3230_v60  ;;  %v3307_v60 = vcombine.low %v2212_v48, %v2215_v56 }
  0xad   : > { %2538 = vmatprep.subr.bf16.mxu0 %v3789_v38  ;;  %3405 = vmatprep.subr.bf16.mxu1 %v3789_v38  ;;  %v2222_v51 = vsel %vm4755_vm12, %v2220_v40, %v2221_v13  ;;  %v2223_v1 = vrot.slane %v2221_v13, 4  ;;  %v2226_v53 = vrot.slane %v2224_v10, 4 }
  0xaf   : > { %2539 = vmatpush1.bf16.msra.mxu0 %v3787_v17  ;;  %3420 = vmatpush1.bf16.msra.mxu1 %v3787_v17 }
  0xb0   : > { %2540 = vmatprep.subr.bf16.mxu0 %v3793_v14  ;;  %3406 = vmatprep.subr.bf16.mxu1 %v3793_v14 }
  0xb2   : > { %1150 = vmatmul.mubr.bf16.gmra.mrb[24].mxu1 %v5301_v27  ;;  %2136 = vmatmul.mubr.bf16.gmra.mrb[24].mxu0 %v3229_v52 }
  0xb3   : > { %2541 = vmatpush1.bf16.msra.mxu0 %v3791_v47  ;;  %3421 = vmatpush1.bf16.msra.mxu1 %v3791_v47 }
  0xb4   : > { %3098 = vmatprep.mubr.msk.bf16.mxu1 %vm673_vm6, %v5302_v42  ;;  %3270 = vmatprep.mubr.msk.bf16.mxu0 %vm673_vm6, %v3232_v44 }
  0xb5   : > { %2542 = vmatprep.subr.bf16.mxu0 %v3798_v29  ;;  %3407 = vmatprep.subr.bf16.mxu1 %v3798_v29 }
  0xb7   : > { %2543 = vmatpush1.bf16.msra.mxu0 %v3796_v54  ;;  %3422 = vmatpush1.bf16.msra.mxu1 %v3796_v54 }
  0xb8   : > { %2544 = vmatprep.subr.bf16.mxu0 %v3801_v28  ;;  %3408 = vmatprep.subr.bf16.mxu1 %v3801_v28 }
  0xba   : > { %1160 = vmatmul.mubr.bf16.gmra.mrb[28].mxu1 %v5303_v2  ;;  %2146 = vmatmul.mubr.bf16.gmra.mrb[28].mxu0 %v3231_v7 }
  0xbb   : > { %2545 = vmatpush1.bf16.msra.mxu0 %v3799_v37  ;;  %3423 = vmatpush1.bf16.msra.mxu1 %v3799_v37 }
  0xbc   : > { %3351 = vmatprep.mubr.msk.bf16.mxu0 %vm673_vm6, %v3306_v49  ;;  %3355 = vmatprep.mubr.msk.bf16.mxu1 %vm673_vm6, %v3314_v63  ;;  %v2219_v63 = vsel %vm4755_vm12, %v3272_v43, %v2218_v21 }
  0xbd   : > { %v3310_v38 = vcombine.high %v2219_v63, %v2222_v51  ;;  %v3309_v15 = vcombine.low %v2219_v63, %v2222_v51  ;;  %v2663_v63 = vlaneseq }
  0xc2   : > { %2549 = vmatmul.mubr.bf16.vlgmr.msra.gmra.mrb[0].mxu0 %v3305_v18  ;;  %2589 = vmatmul.mubr.bf16.vlgmr.msra.gmra.mrb[32].mxu1 %v3313_v59  ;;  %v2225_v59 = vsel %vm4755_vm12, %v2223_v1, %v2224_v10  ;;  %v2664_v10 = vshrl.u32 %v2663_v63, 7 }
  0xc3   : > { %3352 = vmatprep.mubr.msk.bf16.mxu0 %vm673_vm6, %v3308_v5  ;;  %3356 = vmatprep.mubr.msk.bf16.mxu1 %vm673_vm6, %v3316_v26  ;;  %v2228_v26 = vsel %vm4755_vm12, %v2226_v53, %v2227_v20 }
  0xc4   : > { %v3312_v50 = vcombine.high %v2225_v59, %v2228_v26  ;;  %v3311_v58 = vcombine.low %v2225_v59, %v2228_v26 }
  0xca   : > { %2559 = vmatmul.mubr.bf16.gmra.mrb[4].mxu0 %v3307_v60  ;;  %2599 = vmatmul.mubr.bf16.gmra.mrb[36].mxu1 %v3315_v62 }
  0xcb   : > { %3353 = vmatprep.mubr.msk.bf16.mxu0 %vm673_vm6, %v3310_v38  ;;  %3357 = vmatprep.mubr.msk.bf16.mxu1 %vm673_vm6, %v3318_v41 }
  0xd2   : > { %2569 = vmatmul.mubr.bf16.gmra.mrb[8].mxu0 %v3309_v15  ;;  %2609 = vmatmul.mubr.bf16.gmra.mrb[40].mxu1 %v3317_v19 }
  0xd3   : > { %3354 = vmatprep.mubr.msk.bf16.mxu0 %vm673_vm6, %v3312_v50  ;;  %3358 = vmatprep.mubr.msk.bf16.mxu1 %vm673_vm6, %v3320_v39 }
  0xda   : > { %2579 = vmatmul.mubr.bf16.gmra.mrb[12].mxu0 %v3311_v58  ;;  %2619 = vmatmul.mubr.bf16.gmra.mrb[44].mxu1 %v3319_v31 }
 0x155   : > { %v5075_v32 = vpop.f32.mrb[0].mxu1 }
 0x156   : > { %v5077_v16 = vpop.f32.mrb[1].mxu1 }
 0x157   : > { %v5079_v62 = vpop.f32.mrb[2].mxu1 }
 0x158   : > { %v5081_v34 = vpop.f32.mrb[3].mxu1 }
 0x15d   : > { %v5083_v8 = vpop.f32.mrb[4].mxu1 }
 0x15e   : > { %v5085_v41 = vpop.f32.mrb[5].mxu1 }
 0x15f   : > { %v5087_v19 = vpop.f32.mrb[6].mxu1 }
 0x160   : > { %v5089_v39 = vpop.f32.mrb[7].mxu1 }
 0x165   : > { %v5091_v9 = vpop.f32.mrb[8].mxu1 }
 0x166   : > { %v5093_v46 = vpop.f32.mrb[9].mxu1 }
 0x167   : > { %v5095_v6 = vpop.f32.mrb[10].mxu1 }
 0x168   : > { %v5097_v31 = vpop.f32.mrb[11].mxu1 }
 0x16d   : > { %v5099_v55 = vpop.f32.mrb[12].mxu1 }
 0x16e   : > { %v5101_v45 = vpop.f32.mrb[13].mxu1 }
 0x16f   : > { %v5103_v17 = vpop.f32.mrb[14].mxu1 }
 0x170   : > { %v5105_v0 = vpop.f32.mrb[15].mxu1 }
 0x175   : > { %v1131_v14 = vpop.f32.mrb[16].mxu1  ;;  %v2117_v22 = vpop.f32.mrb[16].mxu0 }
 0x176   : > { %v3440_v61 = vadd.f32 %v2117_v22, %v1131_v14  ;;  %v1133_v57 = vpop.f32.mrb[17].mxu1  ;;  %v2119_v52 = vpop.f32.mrb[17].mxu0  ;;  %v2665_v22 = vsub.s32 0, %v2664_v10 }
 0x177   : > { %v3442_v35 = vadd.f32 %v2119_v52, %v1133_v57  ;;  %v1135_v47 = vpop.f32.mrb[18].mxu1  ;;  %v2121_v44 = vpop.f32.mrb[18].mxu0  ;;  %v2661_v52 = vld [vmem:[%s5270_s2] sm:$0x3] }
 0x178   : > { %v5107_v29 = vadd.f32 %v2121_v44, %v1135_v47  ;;  %v1137_v33 = vpop.f32.mrb[19].mxu1  ;;  %v2123_v23 = vpop.f32.mrb[19].mxu0  ;;  %v2669_v47 = vsub.s32 1, %v2664_v10  ;;  %v2705_v44 = vld [vmem:[%s5271_s3] sm:$0x3] }
 0x179   : > { %v5109_v11 = vadd.f32 %v2123_v23, %v1137_v33  ;;  %v5141_v33 = vrot.slane %v2661_v52, %v2665_v22 }
 0x17d   : > { %v1141_v27 = vpop.f32.mrb[20].mxu1  ;;  %v2127_v54 = vpop.f32.mrb[20].mxu0 }
 0x17e   : > { %v5111_v42 = vadd.f32 %v2127_v54, %v1141_v27  ;;  %v1143_v28 = vpop.f32.mrb[21].mxu1  ;;  %v2129_v4 = vpop.f32.mrb[21].mxu0  ;;  %v5143_v54 = vrot.slane %v2661_v52, %v2669_v47 }
 0x17f   : > { %v5113_v12 = vadd.f32 %v2129_v4, %v1143_v28  ;;  %v1145_v3 = vpop.f32.mrb[22].mxu1  ;;  %v2131_v7 = vpop.f32.mrb[22].mxu0  ;;  %v5146_v4 = vrot.slane %v2705_v44, %v2665_v22 }
 0x180   : > { %v5115_v37 = vadd.f32 %v2131_v7, %v1145_v3  ;;  %v1147_v49 = vpop.f32.mrb[23].mxu1  ;;  %v2133_v36 = vpop.f32.mrb[23].mxu0 }
 0x181   : > { %v5117_v24 = vadd.f32 %v2133_v36, %v1147_v49 }
 0x185   : > { %v1151_v30 = vpop.f32.mrb[24].mxu1  ;;  %v2137_v2 = vpop.f32.mrb[24].mxu0 }
 0x186   : > { %v5119_v48 = vadd.f32 %v2137_v2, %v1151_v30  ;;  %v1153_v56 = vpop.f32.mrb[25].mxu1  ;;  %v2139_v21 = vpop.f32.mrb[25].mxu0  ;;  %v5149_v30 = vrot.slane %v2705_v44, %v2669_v47 }
 0x187   : > { %v5121_v25 = vadd.f32 %v2139_v21, %v1153_v56  ;;  %v1155_v18 = vpop.f32.mrb[26].mxu1  ;;  %v2141_v5 = vpop.f32.mrb[26].mxu0 }
 0x188   : > { %v5123_v43 = vadd.f32 %v2141_v5, %v1155_v18  ;;  %v1157_v40 = vpop.f32.mrb[27].mxu1  ;;  %v2143_v13 = vpop.f32.mrb[27].mxu0 }
 0x189   : > { %v5125_v51 = vadd.f32 %v2143_v13, %v1157_v40 }
 0x18d   : > { %v1161_v60 = vpop.f32.mrb[28].mxu1  ;;  %v2147_v38 = vpop.f32.mrb[28].mxu0 }
 0x18e   : > { %v5127_v1 = vadd.f32 %v2147_v38, %v1161_v60  ;;  %v1163_v53 = vpop.f32.mrb[29].mxu1  ;;  %v2149_v20 = vpop.f32.mrb[29].mxu0 }
 0x18f   : > { %v5129_v59 = vadd.f32 %v2149_v20, %v1163_v53  ;;  %v1165_v26 = vpop.f32.mrb[30].mxu1  ;;  %v2151_v15 = vpop.f32.mrb[30].mxu0 }
 0x190   : > { %v5131_v50 = vadd.f32 %v2151_v15, %v1165_v26  ;;  %v1167_v58 = vpop.f32.mrb[31].mxu1  ;;  %v2153_v14 = vpop.f32.mrb[31].mxu0 }
 0x191   : > { %v5133_v57 = vadd.f32 %v2153_v14, %v1167_v58 }
 0x195   : > { %v2550_v23 = vpop.f32.mrb[0].mxu0  ;;  %v2590_v27 = vpop.f32.mrb[32].mxu1 }
 0x196   : > { %v3424_v28 = vadd.f32 %v2550_v23, %v5075_v32  ;;  %v3441_v3 = vadd.f32 %v3440_v61, %v2590_v27  ;;  %v2552_v7 = vpop.f32.mrb[1].mxu0  ;;  %v2592_v49 = vpop.f32.mrb[33].mxu1 }
 0x197   : > { %v3425_v36 = vadd.f32 %v2552_v7, %v5077_v16  ;;  %v3443_v2 = vadd.f32 %v3442_v35, %v2592_v49  ;;  %v2554_v56 = vpop.f32.mrb[2].mxu0  ;;  %v2594_v21 = vpop.f32.mrb[34].mxu1 }
 0x198   : > { %v2673_v18 = vmul.f32 %v3424_v28, %v5141_v33  ;;  %v2689_v5 = vmul.f32 %v3441_v3, %v5141_v33  ;;  %v3426_v40 = vadd.f32 %v2554_v56, %v5079_v62  ;;  %v3445_v32 = vadd.f32 %v5107_v29, %v2594_v21  ;;  %v2556_v13 = vpop.f32.mrb[3].mxu0  ;;  %v2596_v61 = vpop.f32.mrb[35].mxu1 }
 0x199   : > { %v2674_v63 = vmul.f32 %v3425_v36, %v5143_v54  ;;  %v2690_v16 = vmul.f32 %v3443_v2, %v5143_v54  ;;  %v3427_v10 = vadd.f32 %v2556_v13, %v5081_v34  ;;  %v3447_v35 = vadd.f32 %v5109_v11, %v2596_v61 }
 0x19a   : > { %v2717_v60 = vadd.f32 %v5146_v4, %v2673_v18  ;;  %v2733_v38 = vadd.f32 %v5146_v4, %v2689_v5  ;;  %v2675_v53 = vmul.f32 %v3426_v40, %v5141_v33  ;;  %v2691_v62 = vmul.f32 %v3445_v32, %v5141_v33 }
 0x19b   : > { %v2718_v29 = vadd.f32 %v5149_v30, %v2674_v63  ;;  %v2734_v20 = vadd.f32 %v5149_v30, %v2690_v16  ;;  %v2676_v26 = vmul.f32 %v3427_v10, %v5143_v54  ;;  %v2692_v15 = vmul.f32 %v3447_v35, %v5143_v54 }
 0x19c   : > { %v2749_v34 = vmax.f32 %v2717_v60, 0.0  ;;  %v2765_v58 = vmax.f32 %v2733_v38, 0.0  ;;  %v2719_v11 = vadd.f32 %v5146_v4, %v2675_v53  ;;  %v2735_v14 = vadd.f32 %v5146_v4, %v2691_v62 }
 0x19d   : > { %v2750_v22 = vmax.f32 %v2718_v29, 0.0  ;;  %v2766_v52 = vmax.f32 %v2734_v20, 0.0  ;;  %v2720_v47 = vadd.f32 %v5149_v30, %v2676_v26  ;;  %v2736_v44 = vadd.f32 %v5149_v30, %v2692_v15  ;;  %v2560_v23 = vpop.f32.mrb[4].mxu0  ;;  %v2600_v27 = vpop.f32.mrb[36].mxu1 }
 0x19e   : > { %v2751_v28 = vmax.f32 %v2719_v11, 0.0  ;;  %v2767_v3 = vmax.f32 %v2735_v14, 0.0  ;;  %v3428_v7 = vadd.f32 %v2560_v23, %v5083_v8  ;;  %v3449_v49 = vadd.f32 %v5111_v42, %v2600_v27  ;;  %v2562_v36 = vpop.f32.mrb[5].mxu0  ;;  %v2602_v2 = vpop.f32.mrb[37].mxu1 }
 0x19f   : > { %v3378_v56 = vpack.c.bf16 %v2750_v22, %v2749_v34  ;;  %v3386_v21 = vpack.c.bf16 %v2766_v52, %v2765_v58  ;;  %v2752_v18 = vmax.f32 %v2720_v47, 0.0  ;;  %v2768_v5 = vmax.f32 %v2736_v44, 0.0  ;;  %v2564_v40 = vpop.f32.mrb[6].mxu0  ;;  %v2604_v32 = vpop.f32.mrb[38].mxu1 }
 0x1a0   : > { %v2677_v13 = vmul.f32 %v3428_v7, %v5141_v33  ;;  %v2693_v61 = vmul.f32 %v3449_v49, %v5141_v33  ;;  %v3429_v8 = vadd.f32 %v2562_v36, %v5085_v41  ;;  %v3451_v63 = vadd.f32 %v5113_v12, %v2602_v2  ;;  %v2566_v42 = vpop.f32.mrb[7].mxu0  ;;  %v2606_v16 = vpop.f32.mrb[39].mxu1 }
 0x1a1   : > { %2877 = vst [vmem:[%s5175_s24] sm:$0xff] %v3378_v56  ;;  %2885 = vst [vmem:[%s5175_s24 + $0x40] sm:$0xff] %v3386_v21  ;;  %v3379_v10 = vpack.c.bf16 %v2752_v18, %v2751_v28  ;;  %v3387_v35 = vpack.c.bf16 %v2768_v5, %v2767_v3  ;;  %v3430_v60 = vadd.f32 %v2564_v40, %v5087_v19 }
 0x1a2   : > { %v3453_v38 = vadd.f32 %v5115_v37, %v2604_v32  ;;  %v2721_v53 = vadd.f32 %v5146_v4, %v2677_v13  ;;  %v2737_v62 = vadd.f32 %v5146_v4, %v2693_v61  ;;  %v2678_v29 = vmul.f32 %v3429_v8, %v5143_v54 }
 0x1a3   : > { %v2694_v41 = vmul.f32 %v3451_v63, %v5143_v54  ;;  %2878 = vst [vmem:[%s5175_s24 + $0x8] sm:$0xff] %v3379_v10  ;;  %2886 = vst [vmem:[%s5175_s24 + $0x48] sm:$0xff] %v3387_v35  ;;  %v2679_v12 = vmul.f32 %v3430_v60, %v5141_v33  ;;  %v3431_v26 = vadd.f32 %v2566_v42, %v5089_v39 }
 0x1a4   : > { %v2695_v20 = vmul.f32 %v3453_v38, %v5141_v33  ;;  %v3455_v19 = vadd.f32 %v5117_v24, %v2606_v16  ;;  %v2753_v15 = vmax.f32 %v2721_v53, 0.0  ;;  %v2769_v37 = vmax.f32 %v2737_v62, 0.0 }
 0x1a5   : > { %v2722_v34 = vadd.f32 %v5149_v30, %v2678_v29  ;;  %v2738_v58 = vadd.f32 %v5149_v30, %v2694_v41  ;;  %v2723_v11 = vadd.f32 %v5146_v4, %v2679_v12  ;;  %v2680_v22 = vmul.f32 %v3431_v26, %v5143_v54  ;;  %v2570_v47 = vpop.f32.mrb[8].mxu0  ;;  %v2610_v44 = vpop.f32.mrb[40].mxu1 }
 0x1a6   : > { %v2739_v14 = vadd.f32 %v5146_v4, %v2695_v20  ;;  %v2696_v52 = vmul.f32 %v3455_v19, %v5143_v54  ;;  %v3432_v24 = vadd.f32 %v2570_v47, %v5091_v9  ;;  %v3457_v27 = vadd.f32 %v5119_v48, %v2610_v44  ;;  %v2572_v28 = vpop.f32.mrb[9].mxu0  ;;  %v2612_v3 = vpop.f32.mrb[41].mxu1 }
 0x1a7   : > { %v2754_v23 = vmax.f32 %v2722_v34, 0.0  ;;  %v2770_v39 = vmax.f32 %v2738_v58, 0.0  ;;  %v2755_v7 = vmax.f32 %v2723_v11, 0.0  ;;  %v2724_v36 = vadd.f32 %v5149_v30, %v2680_v22  ;;  %v2574_v56 = vpop.f32.mrb[10].mxu0  ;;  %v2614_v21 = vpop.f32.mrb[42].mxu1 }
 0x1a8   : > { %v2771_v49 = vmax.f32 %v2739_v14, 0.0  ;;  %v2740_v2 = vadd.f32 %v5149_v30, %v2696_v52  ;;  %v2681_v40 = vmul.f32 %v3432_v24, %v5141_v33  ;;  %v2697_v9 = vmul.f32 %v3457_v27, %v5141_v33  ;;  %v2576_v32 = vpop.f32.mrb[11].mxu0  ;;  %v2616_v48 = vpop.f32.mrb[43].mxu1 }
 0x1a9   : > { %v3380_v18 = vpack.c.bf16 %v2754_v23, %v2753_v15  ;;  %v3388_v5 = vpack.c.bf16 %v2770_v39, %v2769_v37  ;;  %v2756_v13 = vmax.f32 %v2724_v36, 0.0  ;;  %v3433_v8 = vadd.f32 %v2572_v28, %v5093_v46 }
 0x1aa   : > { %v2772_v61 = vmax.f32 %v2740_v2, 0.0  ;;  %v3459_v63 = vadd.f32 %v5121_v25, %v2612_v3  ;;  %v2725_v42 = vadd.f32 %v5146_v4, %v2681_v40  ;;  %v2741_v16 = vadd.f32 %v5146_v4, %v2697_v9 }
 0x1ab   : > { %2879 = vst [vmem:[%s5175_s24 + $0x10] sm:$0xff] %v3380_v18  ;;  %2887 = vst [vmem:[%s5175_s24 + $0x50] sm:$0xff] %v3388_v5  ;;  %v3434_v10 = vadd.f32 %v2574_v56, %v5095_v6  ;;  %v3461_v35 = vadd.f32 %v5123_v43, %v2614_v21  ;;  %v3381_v60 = vpack.c.bf16 %v2756_v13, %v2755_v7 }
 0x1ac   : > { %v3389_v38 = vpack.c.bf16 %v2772_v61, %v2771_v49  ;;  %v2682_v53 = vmul.f32 %v3433_v8, %v5143_v54  ;;  %v2698_v46 = vmul.f32 %v3459_v63, %v5143_v54  ;;  %v2757_v62 = vmax.f32 %v2725_v42, 0.0 }
 0x1ad   : > { %v2773_v29 = vmax.f32 %v2741_v16, 0.0  ;;  %v2683_v25 = vmul.f32 %v3434_v10, %v5141_v33  ;;  %v2699_v41 = vmul.f32 %v3461_v35, %v5141_v33  ;;  %2880 = vst [vmem:[%s5175_s24 + $0x18] sm:$0xff] %v3381_v60  ;;  %v3435_v43 = vadd.f32 %v2576_v32, %v5097_v31  ;;  %v2580_v26 = vpop.f32.mrb[12].mxu0  ;;  %v2620_v19 = vpop.f32.mrb[44].mxu1 }
 0x1ae   : > { %2888 = vst [vmem:[%s5175_s24 + $0x58] sm:$0xff] %v3389_v38  ;;  %v2726_v12 = vadd.f32 %v5149_v30, %v2682_v53  ;;  %v2742_v6 = vadd.f32 %v5149_v30, %v2698_v46  ;;  %v3463_v20 = vadd.f32 %v5125_v51, %v2616_v48  ;;  %v3436_v34 = vadd.f32 %v2580_v26, %v5099_v55  ;;  %v2582_v11 = vpop.f32.mrb[13].mxu0  ;;  %v2622_v14 = vpop.f32.mrb[45].mxu1 }
 0x1af   : > { %v2727_v15 = vadd.f32 %v5146_v4, %v2683_v25  ;;  %v2743_v37 = vadd.f32 %v5146_v4, %v2699_v41  ;;  %v3465_v58 = vadd.f32 %v5127_v1, %v2620_v19  ;;  %v2684_v47 = vmul.f32 %v3435_v43, %v5143_v54  ;;  %v2584_v44 = vpop.f32.mrb[14].mxu0  ;;  %v2624_v51 = vpop.f32.mrb[46].mxu1 }
 0x1b0   : > { %v2758_v22 = vmax.f32 %v2726_v12, 0.0  ;;  %v2774_v52 = vmax.f32 %v2742_v6, 0.0  ;;  %v2700_v31 = vmul.f32 %v3463_v20, %v5143_v54  ;;  %v2685_v24 = vmul.f32 %v3436_v34, %v5141_v33  ;;  %v2586_v27 = vpop.f32.mrb[15].mxu0  ;;  %v2626_v1 = vpop.f32.mrb[47].mxu1 }
 0x1b1   : > { %v2759_v23 = vmax.f32 %v2727_v15, 0.0  ;;  %v2775_v39 = vmax.f32 %v2743_v37, 0.0  ;;  %v2701_v55 = vmul.f32 %v3465_v58, %v5141_v33  ;;  %v2728_v7 = vadd.f32 %v5149_v30, %v2684_v47 }
 0x1b2   : > { %v3382_v28 = vpack.c.bf16 %v2758_v22, %v2757_v62  ;;  %v3390_v3 = vpack.c.bf16 %v2774_v52, %v2773_v29  ;;  %v2744_v49 = vadd.f32 %v5149_v30, %v2700_v31  ;;  %v2729_v36 = vadd.f32 %v5146_v4, %v2685_v24 }
 0x1b3   : > { %v2745_v2 = vadd.f32 %v5146_v4, %v2701_v55  ;;  %v3437_v56 = vadd.f32 %v2582_v11, %v5101_v45  ;;  %v3467_v21 = vadd.f32 %v5129_v59, %v2622_v14  ;;  %v2760_v18 = vmax.f32 %v2728_v7, 0.0 }
 0x1b4   : > { %2881 = vst [vmem:[%s5175_s24 + $0x20] sm:$0xff] %v3382_v28  ;;  %2889 = vst [vmem:[%s5175_s24 + $0x60] sm:$0xff] %v3390_v3  ;;  %v2776_v5 = vmax.f32 %v2744_v49, 0.0  ;;  %v3438_v40 = vadd.f32 %v2584_v44, %v5103_v17  ;;  %v3469_v9 = vadd.f32 %v5131_v50, %v2624_v51  ;;  %v2761_v32 = vmax.f32 %v2729_v36, 0.0 }
 0x1b5   : > { %v2777_v48 = vmax.f32 %v2745_v2, 0.0  ;;  %v2686_v13 = vmul.f32 %v3437_v56, %v5143_v54  ;;  %v2702_v61 = vmul.f32 %v3467_v21, %v5143_v54  ;;  %v3383_v8 = vpack.c.bf16 %v2760_v18, %v2759_v23 }
 0x1b6   : > { %v3391_v45 = vpack.c.bf16 %v2776_v5, %v2775_v39  ;;  %v2687_v59 = vmul.f32 %v3438_v40, %v5141_v33  ;;  %v2703_v63 = vmul.f32 %v3469_v9, %v5141_v33  ;;  %v3439_v17 = vadd.f32 %v2586_v27, %v5105_v0 }
 0x1b7   : > { %v2730_v42 = vadd.f32 %v5149_v30, %v2686_v13  ;;  %v2746_v16 = vadd.f32 %v5149_v30, %v2702_v61  ;;  %v3471_v50 = vadd.f32 %v5133_v57, %v2626_v1  ;;  %2882 = vst [vmem:[%s5175_s24 + $0x28] sm:$0xff] %v3383_v8 }
 0x1b8   : > { %2890 = vst [vmem:[%s5175_s24 + $0x68] sm:$0xff] %v3391_v45  ;;  %v2731_v10 = vadd.f32 %v5146_v4, %v2687_v59  ;;  %v2747_v35 = vadd.f32 %v5146_v4, %v2703_v63  ;;  %v2688_v33 = vmul.f32 %v3439_v17, %v5143_v54 }
 0x1b9   : > { %v2762_v60 = vmax.f32 %v2730_v42, 0.0  ;;  %v2778_v38 = vmax.f32 %v2746_v16, 0.0  ;;  %v2704_v53 = vmul.f32 %v3471_v50, %v5143_v54 }
 0x1ba   : > { %v2763_v46 = vmax.f32 %v2731_v10, 0.0  ;;  %v2779_v0 = vmax.f32 %v2747_v35, 0.0  ;;  %v2732_v57 = vadd.f32 %v5149_v30, %v2688_v33 }
 0x1bb   : > { %v3384_v62 = vpack.c.bf16 %v2762_v60, %v2761_v32  ;;  %v3392_v29 = vpack.c.bf16 %v2778_v38, %v2777_v48  ;;  %v2748_v25 = vadd.f32 %v5149_v30, %v2704_v53 }
 0x1bc   : > { %v2764_v41 = vmax.f32 %v2732_v57, 0.0 }
 0x1bd   : > { %2883 = vst [vmem:[%s5175_s24 + $0x30] sm:$0xff] %v3384_v62  ;;  %2891 = vst [vmem:[%s5175_s24 + $0x70] sm:$0xff] %v3392_v29  ;;  %v2780_v4 = vmax.f32 %v2748_v25, 0.0 }
 0x1be   : > { %v3385_v12 = vpack.c.bf16 %v2764_v41, %v2763_v46 }
 0x1bf   : > { %v3393_v6 = vpack.c.bf16 %v2780_v4, %v2779_v0 }
 0x1c0   : > { %2884 = vst [vmem:[%s5175_s24 + $0x38] sm:$0xff] %v3385_v12 }
 0x1c1   : > { %2892 = vst [vmem:[%s5175_s24 + $0x78] sm:$0xff] %v3393_v6 }
 0x1c2 PF: > { %s14_s15 = sadd.s32 1, %s3816_s15  }
 0x1c3   : > { %p11_p4 = scmp.ge.s32.totalorder %s14_s15, 6  }
 0x1c5   :  { %13 = sbr.rel (!%p11_p4) target bundleno = 1 (0x1), region = 70 }

// kernel: _lambda_.7
= control target key start
LH: loop header
LB: loop body
LE: loop exit
PB: predicated region body
PF: predicated region fallthrough
CT: control target
= control target key end

     0   :  { %8 = vsyncpa [#allocation3], 0  ;;  %s4396_s0 = inlined_call_operand.vmem [shape: bf16[16,36,256], index: 0, kind: input, shape index: {}]   ;;  %s4397_s1 = inlined_call_operand.vmem [shape: bf16[5,256,32], index: 1, kind: input, shape index: {}]   ;;  %s4398_s2 = inlined_call_operand.vmem [shape: f32[1,32], index: 2, kind: input, shape index: {}]   ;;  %s4399_s3 = inlined_call_operand.hbm [shape: f32[16,32,32], index: 3, kind: output, shape index: {}]  }
   0x1   :  { %10 = vsyncpa [#allocation3 + $0x1], 0  ;;  %s3336_s12 = smov 0   ;;  %s3338_s13 = smov 0  }
   0x2   :  { %s3340_s14 = smov 0   ;;  %s3342_s15 = smov 0  }
   0x3 LB: > { %s3357_s16 = sadd.s32 4294967295, %s3311_s15   ;;  %s2374_s17 = sadd.s32 4294967294, %s3311_s15   ;;  %s3311_s15 = sphi %s3342_s15, %s4421_s15   ;;  %s3307_s14 = sphi %s3340_s14, %s4420_s14   ;;  %s3303_s13 = sphi %s3338_s13, %s4419_s13   ;;  %s3299_s12 = sphi %s3336_s12, %s4418_s12  }
   0x4   : > { %s3361_s18 = sadd.s32 1, %s3311_s15   ;;  %s91_s19 = sadd.s32 1, %s3307_s14 }
   0x5   : > { %s88_s20 = ssub.s32 %s3311_s15, %s3361_s18  ;;  %p101_p0 = scmp.ne.s32.totalorder %s3307_s14, %s3303_s13 }
   0x6   : > { %p89_p1 = scmp.eq.s32.totalorder %s88_s20, 0  ;;  %p102_p2 = scmp.eq.s32.totalorder %s3357_s16, 3 }
   0x7   : > { %p107_p3 = scmp.ne.s32.totalorder %s3303_s13, %s3299_s12  ;;  %p108_p4 = scmp.eq.s32.totalorder %s2374_s17, 3 }
   0x8   : > { %s3372_s21 = scalar_select %p89_p1, %s3307_s14, %s91_s19  }
   0x9   : > { %p3374_p5 = por %p102_p2, %p101_p0  ;;  %p3378_p6 = por %p108_p4, %p107_p3 }
   0xa   : > { %p2377_p7 = scmp.ge.s32.totalorder %s3311_s15, 1  ;;  %p142_p8 = scmp.lt.s32.totalorder %s3311_s15, 5 }
   0xc   : > { %p143_p9 = pnand %p2377_p7, %p142_p8 }
   0xd   : > { %v3080_v0 = vld [vmem:[%s4397_s1 + $0xc0] sm:$0xff] (!%p143_p9)   ;;  %s2379_s26 = sshll.u32 (!%p143_p9), %s3357_s16, 2  ;;  %v3082_v2 = vld [vmem:[%s4397_s1 + $0xc8] sm:$0xff] (!%p143_p9)   ;;  %v3084_v4 = vld [vmem:[%s4397_s1 + $0xd0] sm:$0xff] (!%p143_p9)   ;;  %vm228_vm0 = vsmask.f32 (!%p143_p9), 3328 }
   0xe   : > { %146 = sbr.rel (%p143_p9) target bundleno = 470 (0x1d6), region = 32  ;;  %v3081_v1 = vld [vmem:[%s4397_s1 + $0x80] sm:$0xff] (!%p143_p9)   ;;  %p168_p10 = scmp.lt.s32.totalorder (!%p143_p9), %s2379_s26, 15  ;;  %2702 = vmatprep.subr.bf16.mxu0 (!%p143_p9), %v3080_v0  ;;  %3022 = vmatprep.subr.bf16.mxu1 (!%p143_p9), %v3080_v0  ;;  %v3083_v3 = vld [vmem:[%s4397_s1 + $0x88] sm:$0xff] (!%p143_p9)   ;;  %v3085_v5 = vld [vmem:[%s4397_s1 + $0x90] sm:$0xff] (!%p143_p9)   ;;  %vm982_vm3 = vcmask (!%p143_p9), 1042432  }
   0xf   : > { %2703 = vmatpush3.bf16.msra.mxu0 (!%p143_p9), %v3081_v1  ;;  %3030 = vmatpush3.bf16.msra.mxu1 (!%p143_p9), %v3081_v1  ;;  %v3086_v6 = vld [vmem:[%s4397_s1 + $0xd8] sm:$0xff] (!%p143_p9)   ;;  %v3088_v8 = vld [vmem:[%s4397_s1 + $0xe0] sm:$0xff] (!%p143_p9)   ;;  %v3090_v10 = vld [vmem:[%s4397_s1 + $0xe8] sm:$0xff] (!%p143_p9)   ;;  %vm229_vm1 = vsmask.f32 (!%p143_p9), 7440  ;;  %vm983_vm4 = vcmask (!%p143_p9), 1046532  }
  0x10   : > { %2704 = vmatprep.subr.bf16.mxu0 (!%p143_p9), %v3082_v2  ;;  %3023 = vmatprep.subr.bf16.mxu1 (!%p143_p9), %v3082_v2  ;;  %v3087_v7 = vld [vmem:[%s4397_s1 + $0x98] sm:$0xff] (!%p143_p9)   ;;  %v3089_v9 = vld [vmem:[%s4397_s1 + $0xa0] sm:$0xff] (!%p143_p9)   ;;  %v3091_v18 = vld [vmem:[%s4397_s1 + $0xa8] sm:$0xff] (!%p143_p9)   ;;  %vm1347_vm6 = vsmask.f32 (!%p143_p9), 2304  ;;  %vm1800_vm9 = vcmask (!%p143_p9), 1041408  }
  0x11   : > { %v3092_v28 = vld [vmem:[%s4397_s1 + $0xf0] sm:$0xff] (!%p143_p9)   ;;  %vm3463_vm2 = vmor (!%p143_p9), %vm228_vm0, %vm229_vm1  ;;  %v3094_v45 = vld [vmem:[%s4397_s1 + $0xf8] sm:$0xff] (!%p143_p9)   ;;  %vm1348_vm7 = vsmask.f32 (!%p143_p9), 6416  ;;  %vm1801_vm10 = vcmask (!%p143_p9), 1045508   ;;  %s164_s9 = sand.u32 (!%p143_p9), 1, %s3303_s13  }
  0x12   : > { %v3093_v35 = vld [vmem:[%s4397_s1 + $0xb0] sm:$0xff] (!%p143_p9)   ;;  %v3095_v52 = vld [vmem:[%s4397_s1 + $0xb8] sm:$0xff] (!%p143_p9)   ;;  %v3096_v59 = vld [vmem:[%s4397_s1 + $0x40] sm:$0xff] (!%p143_p9)   ;;  %s2378_s10 = sshll.u32 (!%p143_p9), %s164_s9, 7  ;;  %vm2280_vm12 = vcmask (!%p143_p9), 261120   ;;  %s4355_s27 = scalar_lea.sflag (!%p143_p9), [#allocation3], %s164_s9 }
  0x13   : > { %2705 = vmatpush3.bf16.msra.mxu0 (!%p143_p9), %v3083_v3  ;;  %3031 = vmatpush3.bf16.msra.mxu1 (!%p143_p9), %v3083_v3  ;;  %v3097_v61 = vld [vmem:[%s4397_s1 + $0x140] sm:$0xff] (!%p143_p9)   ;;  %vm3710_vm5 = vmor (!%p143_p9), %vm982_vm3, %vm983_vm4  ;;  %s4294_s11 = scalar_lea.vmem (!%p143_p9), [#allocation2], %s2378_s10  ;;  %s3313_s28 = smov (!%p143_p9), [#allocation2]  }
  0x14   : > { %2706 = vmatprep.subr.bf16.mxu0 (!%p143_p9), %v3084_v4  ;;  %3024 = vmatprep.subr.bf16.mxu1 (!%p143_p9), %v3084_v4  ;;  %v3098_v63 = vld [vmem:[%s4397_s1] sm:$0xff] (!%p143_p9)   ;;  %vm3923_vm8 = vmor (!%p143_p9), %vm1347_vm6, %vm1348_vm7  ;;  %s2312_s19 = sshll.u32 (!%p143_p9), %s4294_s11, 4  ;;  %s3253_s30 = sshll.u32 (!%p143_p9), %s3313_s28, 4  ;;  %s4347_s19 = int_to_ptr.vmem [resolvable:$true] %s2312_s19  ;;  %s3254_s30 = int_to_ptr.vmem [resolvable:$false] %s3253_s30 }
  0x15   : > { %s4423_s26 = smov (!%p168_p10, %s2379_s26), 15  ;;  %v3099_v0 = vld [vmem:[%s4397_s1 + $0x100] sm:$0xff]   ;;  %vm4054_vm11 = vmor %vm1800_vm9, %vm1801_vm10  ;;  %s3255_s4 = scalar_lea.vmem %s3254_s30, 4096 }
  0x16   : > { %s3038_s17 = smul.u32 40, %s4423_s26  ;;  %p3256_p0 = scmp.lt.s32.totalorder %s4347_s19, %s3254_s30 }
  0x17   : > { %2707 = vmatpush3.bf16.msra.mxu0 %v3085_v5  ;;  %3032 = vmatpush3.bf16.msra.mxu1 %v3085_v5  ;;  %v3100_v5 = vld [vmem:[%s4397_s1 + $0x48] sm:$0xff]  }
  0x18   : > { %2708 = vmatprep.subr.bf16.mxu0 %v3086_v6  ;;  %3025 = vmatprep.subr.bf16.mxu1 %v3086_v6  ;;  %s3415_s29 = scalar_lea.vmem %s4396_s0, %s3038_s17  ;;  %s2701_s17 = sshll.u32 %s3357_s16, 11 }
  0x19   : > { %v3424_v11 = vld [vmem:[%s3415_s29] sm:$0xff]  ;;  %v3427_v12 = vld [vmem:[%s3415_s29 + $0x8] sm:$0xff]  ;;  %v3430_v13 = vld [vmem:[%s3415_s29 + $0x10] sm:$0xff]  ;;  %s4345_s25 = scalar_lea.hbm %s4399_s3, %s2701_s17  ;;  %s3249_s16 = scalar_lea.vmem %s4347_s19, 2048 }
  0x1a   : > { %v232_v14 = vshrl.u32 %v3424_v11, 16  ;;  %v235_v15 = vshll.u32 %v3424_v11, 16  ;;  %v241_v16 = vshll.u32 %v3427_v12, 16  ;;  %v184_v17 = vld [vmem:[%s3415_s29 + $0x50] sm:$0xff]  ;;  %v245_v19 = vshrl.u32 %v3427_v12, 16  ;;  %v3443_v22 = vld [vmem:[%s3415_s29 + $0x58] sm:$0xff]  ;;  %p3250_p11 = scmp.ne.s32.totalorder %s4347_s19, %s3249_s16  ;;  %p3257_p1 = scmp.lt.s32.totalorder %s3255_s4, %s3249_s16 }
  0x1b   : > { %2709 = vmatpush3.bf16.msra.mxu0 %v3087_v7  ;;  %3033 = vmatpush3.bf16.msra.mxu1 %v3087_v7  ;;  %v251_v20 = vshll.u32 %v3430_v13, 16  ;;  %v255_v21 = vshrl.u32 %v3430_v13, 16  ;;  %v320_v23 = vshrl.u32 %v184_v17, 16  ;;  %v3448_v27 = vld [vmem:[%s3415_s29 + $0x60] sm:$0xff]  ;;  %v323_v33 = vshll.u32 %v184_v17, 16  ;;  %v3510_v6 = vld [vmem:[%s3415_s29 + $0x18] sm:$0xff] }
  0x1c   : > { %2710 = vmatprep.subr.bf16.mxu0 %v3088_v8  ;;  %3026 = vmatprep.subr.bf16.mxu1 %v3088_v8  ;;  %v234_v24 = vrot.slane %v232_v14, 4  ;;  %v237_v25 = vrot.slane %v235_v15, 5  ;;  %v243_v26 = vrot.slane %v241_v16, 5  ;;  %v247_v29 = vrot.slane %v245_v19, 4  ;;  %v3513_v7 = vld [vmem:[%s3415_s29 + $0x20] sm:$0x11]  ;;  %p3251_p12 = pnand %p3250_p11, %p3374_p5  ;;  %p3258_p2 = por %p3257_p1, %p3256_p0 }
  0x1d   : > { %v253_v30 = vrot.slane %v251_v20, 5  ;;  %v322_v32 = vrot.slane %v320_v23, 4  ;;  %v329_v34 = vshll.u32 %v3443_v22, 16  ;;  %v257_v38 = vrot.slane %v255_v21, 4  ;;  %v3521_v17 = vld [vmem:[%s3415_s29 + $0x68] sm:$0xff] }
  0x1e   : > { %v238_v31 = vor.u32 %v237_v25, %v234_v24  ;;  %v248_v37 = vor.u32 %v247_v29, %v243_v26  ;;  %v333_v39 = vshrl.u32 %v3443_v22, 16  ;;  %v339_v40 = vshll.u32 %v3448_v27, 16  ;;  %p3252_p13 = pneg %p3251_p12 }
  0x1f   : > { %2711 = vmatpush3.bf16.msra.mxu0 %v3089_v9  ;;  %3034 = vmatpush3.bf16.msra.mxu1 %v3089_v9  ;;  %v325_v42 = vrot.slane %v323_v33, 5  ;;  %v331_v43 = vrot.slane %v329_v34, 5  ;;  %v343_v44 = vshrl.u32 %v3448_v27, 16  ;;  %v258_v54 = vor.u32 %v257_v38, %v253_v30 }
  0x20   : > { %2712 = vmatprep.subr.bf16.mxu0 %v3090_v10  ;;  %3027 = vmatprep.subr.bf16.mxu1 %v3090_v10  ;;  %v239_v41 = vrot.slane %v238_v31, 4  ;;  %v249_v46 = vrot.slane %v248_v37, 4  ;;  %v335_v47 = vrot.slane %v333_v39, 4  ;;  %v341_v50 = vrot.slane %v339_v40, 5  ;;  %v3101_v10 = vld [vmem:[%s4397_s1 + $0x148] sm:$0xff]   ;;  %p3259_p3 = pnand %p3258_p2, %p3252_p13 }
  0x21   : > { %v326_v49 = vor.u32 %v325_v42, %v322_v32  ;;  %v345_v51 = vrot.slane %v343_v44, 4  ;;  %v259_v1 = vrot.slane %v258_v54, 4  ;;  %v261_v14 = vshll.u32 %v3510_v6, 16  ;;  %v3103_v31 = vld [vmem:[%s4397_s1 + $0x108] sm:$0xff]  }
  0x22   : > { %v244_v48 = vsel %vm3463_vm2, %v239_v41, %v243_v26  ;;  %v254_v53 = vsel %vm3463_vm2, %v249_v46, %v253_v30  ;;  %v336_v55 = vor.u32 %v335_v47, %v331_v43  ;;  %v265_v15 = vshrl.u32 %v3510_v6, 16  ;;  %v3104_v41 = vld [vmem:[%s4397_s1 + $0x50] sm:$0xff]  }
  0x23   : > { %2713 = vmatpush3.bf16.msra.mxu0 %v3091_v18  ;;  %3035 = vmatpush3.bf16.msra.mxu1 %v3091_v18  ;;  %v2414_v56 = vcombine.high %v244_v48, %v254_v53  ;;  %v327_v57 = vrot.slane %v326_v49, 4  ;;  %v346_v58 = vor.u32 %v345_v51, %v341_v50  ;;  %v2413_v2 = vcombine.low %v244_v48, %v254_v53  ;;  %v3524_v18 = vld [vmem:[%s3415_s29 + $0x70] sm:$0x11] }
  0x24   : > { %2714 = vmatprep.subr.bf16.mxu0 %v3092_v28  ;;  %3028 = vmatprep.subr.bf16.mxu1 %v3092_v28  ;;  %v337_v60 = vrot.slane %v336_v55, 4  ;;  %v271_v23 = vshll.u32 %v3513_v7, 16  ;;  %v349_v24 = vshll.u32 %v3521_v17, 16  ;;  %v353_v25 = vshrl.u32 %v3521_v17, 16  ;;  %v3102_v28 = vld [vmem:[%s4397_s1 + $0x8] sm:$0xff]   ;;  %v3106_v51 = vld [vmem:[%s4397_s1 + $0x10] sm:$0xff]  }
  0x25   : > { %632 = vmatprep.mubr.bf16.mxu0 %v2414_v56  ;;  %v332_v62 = vsel %vm3463_vm2, %v327_v57, %v331_v43  ;;  %v347_v4 = vrot.slane %v346_v58, 4  ;;  %v359_v26 = vshll.u32 %v3524_v18, 16  ;;  %v263_v29 = vrot.slane %v261_v14, 5  ;;  %v3108_v57 = vld [vmem:[%s4397_s1 + $0x58] sm:$0xff]  }
  0x26   : > { %v342_v3 = vsel %vm3463_vm2, %v337_v60, %v341_v50  ;;  %v267_v30 = vrot.slane %v265_v15, 4  ;;  %v351_v32 = vrot.slane %v349_v24, 5  ;;  %v355_v33 = vrot.slane %v353_v25, 4 }
  0x27   : > { %2715 = vmatpush3.bf16.msra.mxu0 %v3093_v35  ;;  %3036 = vmatpush3.bf16.msra.mxu1 %v3093_v35  ;;  %v2421_v8 = vcombine.low %v332_v62, %v342_v3  ;;  %v2422_v9 = vcombine.high %v332_v62, %v342_v3  ;;  %v987_v35 = vrot.slane %v3427_v12, 5  ;;  %v273_v38 = vrot.slane %v271_v23, 5  ;;  %v3577_v62 = vld [vmem:[%s3415_s29 + $0x28] sm:$0xff]  ;;  %v3111_v23 = vld [vmem:[%s4397_s1 + $0x118] sm:$0xff]  }
  0x28   : > { %2716 = vmatprep.subr.bf16.mxu0 %v3094_v45  ;;  %3029 = vmatprep.subr.bf16.mxu1 %v3094_v45  ;;  %v268_v37 = vor.u32 %v267_v30, %v263_v29  ;;  %v356_v42 = vor.u32 %v355_v33, %v351_v32  ;;  %v361_v43 = vrot.slane %v359_v26, 5  ;;  %v3105_v45 = vld [vmem:[%s4397_s1 + $0x150] sm:$0xff]   ;;  %v264_v46 = vsel %vm3463_vm2, %v259_v1, %v263_v29  ;;  %v3608_v29 = vld [vmem:[%s3415_s29 + $0x88] sm:$0xff] }
  0x29   : > { %664 = vmatprep.mubr.bf16.mxu1 %v2422_v9  ;;  %v352_v48 = vsel %vm3463_vm2, %v347_v4, %v351_v32  ;;  %v990_v53 = vrot.slane %v3430_v13, 5  ;;  %v3571_v58 = vrot.slane %v987_v35, 4  ;;  %v993_v1 = vrot.slane %v3510_v6, 5  ;;  %v3595_v9 = vld [vmem:[%s3415_s29 + $0x78] sm:$0xff] }
  0x2a   : > { %v269_v47 = vrot.slane %v268_v37, 4  ;;  %v357_v49 = vrot.slane %v356_v42, 4  ;;  %v276_v3 = vshrl.u32 %v3577_v62, 16  ;;  %v279_v4 = vshll.u32 %v3577_v62, 16 }
  0x2b   : > { %2717 = vmatpush3.bf16.msra.mxu0 %v3095_v52  ;;  %3037 = vmatpush3.bf16.msra.mxu1 %v3095_v52  ;;  %v3107_v52 = vld [vmem:[%s4397_s1 + $0x110] sm:$0xff]   ;;  %v364_v30 = vshrl.u32 %v3595_v9, 16  ;;  %v2446_v36 = vcombine.high %v3424_v11, %v3427_v12 }
  0x2c   : > { %2766 = vmatprep.subr.bf16.mxu1 %v3096_v59  ;;  %2830 = vmatprep.subr.bf16.mxu0 %v3097_v61  ;;  %v274_v50 = vsel %vm3463_vm2, %v269_v47, %v273_v38  ;;  %v362_v55 = vsel %vm3463_vm2, %v357_v49, %v361_v43  ;;  %v3109_v61 = vld [vmem:[%s4397_s1 + $0x158] sm:$0xff]   ;;  %v278_v32 = vrot.slane %v276_v3, 4  ;;  %v281_v33 = vrot.slane %v279_v4, 5  ;;  %v3116_v4 = vld [vmem:[%s4397_s1 + $0x68] sm:$0xff]  }
  0x2d   : > { %v2416_v54 = vcombine.high %v264_v46, %v274_v50  ;;  %v2415_v56 = vcombine.low %v264_v46, %v274_v50  ;;  %v2424_v59 = vcombine.high %v352_v48, %v362_v55  ;;  %v2423_v60 = vcombine.low %v352_v48, %v362_v55 }
  0x2e   : > { %633 = vmatmul.mubr.bf16.vlgmr.msra.gmra.mrb[0].mxu0 %v2413_v2  ;;  %665 = vmatmul.mubr.bf16.vlgmr.msra.gmra.mrb[0].mxu1 %v2421_v8  ;;  %v3588_v2 = vld [vmem:[%s3415_s29 + $0x38] sm:$0xff]  ;;  %v366_v43 = vrot.slane %v364_v30, 4  ;;  %v282_v47 = vor.u32 %v281_v33, %v278_v32  ;;  %v4400_v50 = vshll.u32 %v3608_v29, 16 }
  0x2f   : > { %2767 = vmatpush3.bf16.msra.mxu1 %v3098_v63  ;;  %2831 = vmatpush3.bf16.msra.mxu0 %v3099_v0  ;;  %v3580_v63 = vld [vmem:[%s3415_s29 + $0x30] sm:$0xff]  ;;  %v3584_v0 = vrot.slane %v990_v53, 4  ;;  %v295_v26 = vshll.u32 %v3588_v2, 16 }
  0x30   : > { %2768 = vmatprep.subr.bf16.mxu1 %v3100_v5  ;;  %2832 = vmatprep.subr.bf16.mxu0 %v3101_v10  ;;  %v285_v5 = vshll.u32 %v3580_v63, 16  ;;  %v289_v8 = vshrl.u32 %v3580_v63, 16  ;;  %v3110_v10 = vld [vmem:[%s4397_s1 + $0x18] sm:$0xff]   ;;  %v283_v55 = vrot.slane %v282_v47, 4  ;;  %v3664_v47 = vld [vmem:[%s3415_s29 + $0x40] sm:$0xff] }
  0x31   : > { %640 = vmatprep.mubr.bf16.mxu0 %v2416_v54  ;;  %672 = vmatprep.mubr.bf16.mxu1 %v2424_v59  ;;  %v3621_v42 = vrot.slane %v295_v26, 5  ;;  %v3113_v54 = vld [vmem:[%s4397_s1 + $0x160] sm:$0xff]   ;;  %v3635_v59 = vrot.slane %v4400_v50, 5 }
  0x32   : > { %v287_v37 = vrot.slane %v285_v5, 5  ;;  %v291_v38 = vrot.slane %v289_v8, 4 }
  0x33   : > { %2769 = vmatpush3.bf16.msra.mxu1 %v3102_v28  ;;  %2833 = vmatpush3.bf16.msra.mxu0 %v3103_v31  ;;  %v3605_v28 = vld [vmem:[%s3415_s29 + $0x80] sm:$0xff]  ;;  %v367_v31 = vshll.u32 %v3595_v9, 16 }
  0x34   : > { %2770 = vmatprep.subr.bf16.mxu1 %v3104_v41  ;;  %2834 = vmatprep.subr.bf16.mxu0 %v3105_v45  ;;  %v3112_v41 = vld [vmem:[%s4397_s1 + $0x60] sm:$0xff]   ;;  %v4401_v46 = vshll.u32 %v3605_v28, 16  ;;  %v292_v48 = vor.u32 %v291_v38, %v287_v37  ;;  %v377_v49 = vshrl.u32 %v3605_v28, 16  ;;  %v299_v38 = vshrl.u32 %v3588_v2, 16 }
  0x35   : > { %v369_v45 = vrot.slane %v367_v31, 5 }
  0x36   : > { %641 = vmatmul.mubr.bf16.gmra.mrb[4].mxu0 %v2415_v56  ;;  %673 = vmatmul.mubr.bf16.gmra.mrb[4].mxu1 %v2423_v60  ;;  %v293_v56 = vrot.slane %v292_v48, 4  ;;  %v3114_v60 = vld [vmem:[%s4397_s1 + $0x20] sm:$0xff]   ;;  %v301_v48 = vrot.slane %v299_v38, 4 }
  0x37   : > { %2835 = vmatpush3.bf16.msra.mxu0 %v3107_v52  ;;  %2771 = vmatpush3.bf16.msra.mxu1 %v3106_v51  ;;  %v370_v52 = vor.u32 %v369_v45, %v366_v43  ;;  %v375_v51 = vrot.slane %v4401_v46, 5  ;;  %v3118_v45 = vld [vmem:[%s4397_s1 + $0x28] sm:$0xff]  }
  0x38   : > { %2836 = vmatprep.subr.bf16.mxu0 %v3109_v61  ;;  %2772 = vmatprep.subr.bf16.mxu1 %v3108_v57  ;;  %v379_v57 = vrot.slane %v377_v49, 4  ;;  %v3115_v61 = vld [vmem:[%s4397_s1 + $0x120] sm:$0xff]   ;;  %v298_v30 = vsel %vm3463_vm2, %v293_v56, %v3621_v42  ;;  %v309_v56 = vshrl.u32 %v3664_v47, 16 }
  0x39   : > { %v371_v3 = vrot.slane %v370_v52, 4  ;;  %v4402_v52 = vshrl.u32 %v3608_v29, 16 }
  0x3a   : > { %v380_v31 = vor.u32 %v379_v57, %v375_v51  ;;  %v3678_v57 = vld [vmem:[%s3415_s29 + $0x90] sm:$0xff] }
  0x3b   : > { %2837 = vmatpush3.bf16.msra.mxu0 %v3111_v23  ;;  %2773 = vmatpush3.bf16.msra.mxu1 %v3110_v10  ;;  %v288_v23 = vsel %vm3463_vm2, %v283_v55, %v287_v37  ;;  %v3117_v10 = vld [vmem:[%s4397_s1 + $0x168] sm:$0xff]   ;;  %v376_v43 = vsel %vm3463_vm2, %v371_v3, %v375_v51  ;;  %v305_v55 = vshll.u32 %v3664_v47, 16 }
  0x3c   : > { %2838 = vmatprep.subr.bf16.mxu0 %v3113_v54  ;;  %2774 = vmatprep.subr.bf16.mxu1 %v3112_v41  ;;  %v2418_v32 = vcombine.high %v288_v23, %v298_v30  ;;  %v2417_v33 = vcombine.low %v288_v23, %v298_v30  ;;  %v381_v37 = vrot.slane %v380_v31, 4  ;;  %v3119_v41 = vld [vmem:[%s4397_s1 + $0x128] sm:$0xff]   ;;  %v302_v23 = vor.u32 %v301_v48, %v3621_v42  ;;  %v3121_v31 = vld [vmem:[%s4397_s1 + $0x170] sm:$0xff]  }
  0x3d   : > { %v3673_v54 = vld [vmem:[%s3415_s29 + $0x48] sm:$0x11]  ;;  %v4403_v42 = vshll.u32 %v3678_v57, 16  ;;  %v397_v48 = vshrl.u32 %v3678_v57, 16 }
  0x3e   : > { %648 = vmatprep.mubr.bf16.mxu0 %v2418_v32  ;;  %v386_v51 = vsel %vm3463_vm2, %v381_v37, %v3635_v59  ;;  %v315_v30 = vshll.u32 %v3673_v54, 16  ;;  %v307_v32 = vrot.slane %v305_v55, 5 }
  0x3f   : > { %2839 = vmatpush3.bf16.msra.mxu0 %v3115_v61  ;;  %2775 = vmatpush3.bf16.msra.mxu1 %v3114_v60  ;;  %v3120_v60 = vld [vmem:[%s4397_s1 + $0x70] sm:$0xff]   ;;  %v2426_v61 = vcombine.high %v376_v43, %v386_v51  ;;  %v2425_v3 = vcombine.low %v376_v43, %v386_v51  ;;  %v303_v43 = vrot.slane %v302_v23, 4  ;;  %v395_v46 = vrot.slane %v4403_v42, 5 }
  0x40   : > { %649 = vmatmul.mubr.bf16.gmra.mrb[8].mxu0 %v2417_v33  ;;  %2776 = vmatprep.subr.bf16.mxu1 %v3116_v4  ;;  %v3686_v4 = vld [vmem:[%s3415_s29 + $0x98] sm:$0x11]  ;;  %v311_v33 = vrot.slane %v309_v56, 4  ;;  %v317_v37 = vrot.slane %v315_v30, 5  ;;  %v3123_v30 = vld [vmem:[%s4397_s1 + $0x130] sm:$0xff]  }
  0x41   : > { %2840 = vmatprep.subr.bf16.mxu0 %v3117_v10  ;;  %v389_v10 = vrot.slane %v4402_v52, 4  ;;  %680 = vmatprep.mubr.bf16.mxu1 %v2426_v61  ;;  %v403_v51 = vshll.u32 %v3686_v4, 16  ;;  %v3122_v52 = vld [vmem:[%s4397_s1 + $0x30] sm:$0xff]  }
  0x42   : > { %681 = vmatmul.mubr.bf16.gmra.mrb[8].mxu1 %v2425_v3 }
  0x43   : > { %2841 = vmatpush3.bf16.msra.mxu0 %v3119_v41  ;;  %2777 = vmatpush3.bf16.msra.mxu1 %v3118_v45  ;;  %v312_v41 = vor.u32 %v311_v33, %v307_v32  ;;  %v390_v50 = vor.u32 %v389_v10, %v3635_v59  ;;  %v399_v45 = vrot.slane %v397_v48, 4  ;;  %v405_v61 = vrot.slane %v403_v51, 5 }
  0x44   : > { %2778 = vmatprep.subr.bf16.mxu1 %v3120_v60  ;;  %2842 = vmatprep.subr.bf16.mxu0 %v3121_v31  ;;  %v308_v59 = vsel %vm3463_vm2, %v303_v43, %v307_v32  ;;  %v3124_v31 = vld [vmem:[%s4397_s1 + $0x78] sm:$0xff]   ;;  %v996_v32 = vrot.slane %v3513_v7, 5  ;;  %v995_v7 = vrot.slane %v993_v1, 4 }
  0x45   : > { %v313_v23 = vrot.slane %v312_v41, 4  ;;  %v391_v60 = vrot.slane %v390_v50, 4  ;;  %v400_v33 = vor.u32 %v399_v45, %v395_v46  ;;  %v3125_v50 = vld [vmem:[%s4397_s1 + $0x178] sm:$0xff]   ;;  %v3737_v45 = vld [vmem:[%s3415_s29] sm:$0xee] }
  0x47   : > { %2779 = vmatpush3.bf16.msra.mxu1 %v3122_v52  ;;  %v318_v10 = vsel %vm3463_vm2, %v313_v23, %v317_v37  ;;  %2843 = vmatpush3.bf16.msra.mxu0 %v3123_v30  ;;  %v396_v51 = vsel %vm3463_vm2, %v391_v60, %v395_v46  ;;  %v401_v41 = vrot.slane %v400_v33, 4  ;;  %v3126_v52 = vld [vmem:[%s4397_s1 + $0x38] sm:$0xff]   ;;  %v991_v23 = vsel %vm3710_vm5, %v3571_v58, %v990_v53  ;;  %v3130_v60 = vld [vmem:[%s4397_s1 + $0x1c0] sm:$0xff]  }
  0x48   : > { %2780 = vmatprep.subr.bf16.mxu1 %v3124_v31  ;;  %v2420_v43 = vcombine.high %v308_v59, %v318_v10  ;;  %v2419_v42 = vcombine.low %v308_v59, %v318_v10  ;;  %2844 = vmatprep.subr.bf16.mxu0 %v3125_v50  ;;  %v3127_v37 = vld [vmem:[%s4397_s1 + $0x138] sm:$0xff]   ;;  %v2477_v59 = vrot.slane %v3737_v45, 9  ;;  %v3132_v53 = vld [vmem:[%s4397_s1 + $0x240] sm:$0xff]   ;;  %v1000_v58 = vrot.slane %v3580_v63, 5 }
  0x49   : > { %v406_v46 = vsel %vm3463_vm2, %v401_v41, %v405_v61  ;;  %v994_v33 = vsel %vm3710_vm5, %v3584_v0, %v993_v1  ;;  %v997_v10 = vsel %vm3710_vm5, %v995_v7, %v996_v32  ;;  %v3133_v50 = vld [vmem:[%s4397_s1 + $0x200] sm:$0xff]   ;;  %v3138_v0 = vld [vmem:[%s4397_s1 + $0x248] sm:$0xff]   ;;  %v1003_v1 = vrot.slane %v3588_v2, 5 }
  0x4a   : > { %656 = vmatprep.mubr.bf16.mxu0 %v2420_v43  ;;  %v2428_v30 = vcombine.high %v396_v51, %v406_v46  ;;  %v2427_v31 = vcombine.low %v396_v51, %v406_v46  ;;  %v988_v61 = vsel %vm3710_vm5, %v2477_v59, %v987_v35  ;;  %v2516_v43 = vcombine.high %v994_v33, %v997_v10  ;;  %v3131_v41 = vld [vmem:[%s4397_s1 + $0x180] sm:$0xff]   ;;  %v3136_v7 = vld [vmem:[%s4397_s1 + $0x1c8] sm:$0xff]  }
  0x4b   : > { %2781 = vmatpush3.bf16.msra.mxu1 %v3126_v52  ;;  %657 = vmatmul.mubr.bf16.gmra.mrb[12].mxu0 %v2419_v42  ;;  %v2514_v42 = vcombine.high %v988_v61, %v991_v23  ;;  %v2513_v35 = vcombine.low %v988_v61, %v991_v23  ;;  %v1002_v51 = vrot.slane %v1000_v58, 4  ;;  %v2445_v32 = vcombine.low %v3424_v11, %v3427_v12  ;;  %v3782_v52 = vld [vmem:[%s3415_s29 + $0x28] sm:$0xee]  ;;  %v3166_v12 = vld [vmem:[%s4397_s1 + $0x1f0] sm:$0xff]  }
  0x4c   : > { %2845 = vmatpush3.bf16.msra.mxu0 %v3127_v37  ;;  %2894 = vmatprep.subr.bf16.mxu1 %v3130_v60  ;;  %v2448_v37 = vcombine.high %v3430_v13, %v3510_v6  ;;  %v2478_v46 = vrot.slane %v3782_v52, 9  ;;  %v3139_v59 = vld [vmem:[%s4397_s1 + $0x208] sm:$0xff]   ;;  %v1006_v11 = vrot.slane %v3664_v47, 5  ;;  %v1005_v61 = vrot.slane %v1003_v1, 4 }
  0x4d   : > { %688 = vmatprep.mubr.bf16.mxu1 %v2428_v30  ;;  %2958 = vmatprep.subr.bf16.mxu0 %v3132_v53  ;;  %v1004_v60 = vsel %vm3710_vm5, %v1002_v51, %v1003_v1  ;;  %v3144_v30 = vld [vmem:[%s4397_s1 + $0x250] sm:$0xff]   ;;  %v3150_v51 = vld [vmem:[%s4397_s1 + $0x258] sm:$0xff]  }
  0x4e   : > { %689 = vmatmul.mubr.bf16.gmra.mrb[12].mxu1 %v2427_v31  ;;  %1262 = vmatprep.mubr.bf16.mxu0 %v2514_v42  ;;  %v1001_v23 = vsel %vm3710_vm5, %v2478_v46, %v1000_v58  ;;  %v2515_v31 = vcombine.low %v994_v33, %v997_v10  ;;  %v3142_v58 = vld [vmem:[%s4397_s1 + $0x1d0] sm:$0xff]   ;;  %v1008_v42 = vrot.slane %v1006_v11, 4  ;;  %v1009_v33 = vrot.slane %v3673_v54, 5  ;;  %v3151_v1 = vld [vmem:[%s4397_s1 + $0x218] sm:$0xff]  }
  0x4f   : > { %905 = vmatprep.mubr.bf16.mxu1 %v2446_v36  ;;  %v3137_v36 = vld [vmem:[%s4397_s1 + $0x188] sm:$0xff]   ;;  %v2518_v53 = vcombine.high %v1001_v23, %v1004_v60  ;;  %v3813_v10 = vrot.slane %v241_v16, 6  ;;  %v3826_v54 = vrot.slane %v251_v20, 6  ;;  %v2450_v16 = vcombine.high %v3577_v62, %v3580_v63 }
  0x50   : > { %v1007_v20 = vsel %vm3710_vm5, %v1005_v61, %v1006_v11  ;;  %v1019_v11 = vrot.slane %v3521_v17, 5 }
  0x53   : > { %1263 = vmatmul.mubr.bf16.vlgmr.msra.gmra.mrb[16].mxu0 %v2513_v35  ;;  %v3145_v35 = vld [vmem:[%s4397_s1 + $0x210] sm:$0xff]  }
  0x54   : > { %2959 = vmatpush3.bf16.msra.mxu0 %v3133_v50  ;;  %1270 = vmatprep.mubr.bf16.mxu0 %v2516_v43  ;;  %v2447_v50 = vcombine.low %v3430_v13, %v3510_v6  ;;  %v3143_v43 = vld [vmem:[%s4397_s1 + $0x190] sm:$0xff]  }
  0x55   : > { %2960 = vmatprep.subr.bf16.mxu0 %v3138_v0  ;;  %v3148_v0 = vld [vmem:[%s4397_s1 + $0x1d8] sm:$0xff]  }
  0x56   : > { %906 = vmatmul.mubr.bf16.vlgmr.msra.gmra.mrb[16].mxu1 %v2445_v32  ;;  %v1016_v32 = vrot.slane %v3448_v27, 5  ;;  %v1343_v27 = vld [vmem:[%s3415_s29 + $0x20] sm:$0x33] }
  0x57   : > { %2895 = vmatpush3.bf16.msra.mxu1 %v3131_v41  ;;  %913 = vmatprep.mubr.bf16.mxu1 %v2448_v37  ;;  %v1013_v41 = vrot.slane %v3443_v22, 5  ;;  %v1010_v37 = vsel %vm3710_vm5, %v1008_v42, %v1009_v33  ;;  %v3162_v33 = vld [vmem:[%s4397_s1 + $0x268] sm:$0xff]  }
  0x58   : > { %2896 = vmatprep.subr.bf16.mxu1 %v3136_v7  ;;  %2961 = vmatpush3.bf16.msra.mxu0 %v3139_v59  ;;  %v3842_v7 = vld [vmem:[%s3415_s29 + $0x50] sm:$0xee]  ;;  %v3156_v59 = vld [vmem:[%s4397_s1 + $0x260] sm:$0xff]   ;;  %v1018_v42 = vrot.slane %v1016_v32, 4 }
  0x59   : > { %2962 = vmatprep.subr.bf16.mxu0 %v3144_v30  ;;  %v1015_v46 = vrot.slane %v1013_v41, 4  ;;  %v2517_v30 = vcombine.low %v1001_v23, %v1004_v60  ;;  %v2479_v61 = vrot.slane %v3842_v7, 9  ;;  %v3157_v23 = vld [vmem:[%s4397_s1 + $0x220] sm:$0xff]   ;;  %v1351_v60 = vshrl.u32 %v3737_v45, 16 }
  0x5b   : > { %1271 = vmatmul.mubr.bf16.gmra.mrb[20].mxu0 %v2515_v31  ;;  %2897 = vmatpush3.bf16.msra.mxu1 %v3137_v36  ;;  %v3149_v31 = vld [vmem:[%s4397_s1 + $0x198] sm:$0xff]   ;;  %v2520_v36 = vcombine.high %v1007_v20, %v1010_v37 }
  0x5c   : > { %1278 = vmatprep.mubr.bf16.mxu0 %v2518_v53  ;;  %2898 = vmatprep.subr.bf16.mxu1 %v3142_v58  ;;  %v3154_v53 = vld [vmem:[%s4397_s1 + $0x1e0] sm:$0xff]   ;;  %v2449_v58 = vcombine.low %v3577_v62, %v3580_v63  ;;  %v1021_v62 = vrot.slane %v1019_v11, 4 }
  0x5d   : > { %2963 = vmatpush3.bf16.msra.mxu0 %v3145_v35  ;;  %v1022_v35 = vrot.slane %v3524_v18, 5  ;;  %v3160_v18 = vld [vmem:[%s4397_s1 + $0x1e8] sm:$0xff]  }
  0x5e   : > { %914 = vmatmul.mubr.bf16.gmra.mrb[20].mxu1 %v2447_v50  ;;  %2964 = vmatprep.subr.bf16.mxu0 %v3150_v51  ;;  %v1354_v50 = vshll.u32 %v3737_v45, 16  ;;  %v3155_v51 = vld [vmem:[%s4397_s1 + $0x1a0] sm:$0xff]   ;;  %v3878_v45 = vsel %vm3710_vm5, %v2479_v61, %v1013_v41  ;;  %v1359_v41 = vrot.slane %v245_v19, 5 }
  0x5f   : > { %921 = vmatprep.mubr.bf16.mxu1 %v2450_v16  ;;  %2899 = vmatpush3.bf16.msra.mxu1 %v3143_v43  ;;  %v2452_v43 = vcombine.high %v3588_v2, %v3664_v47  ;;  %v1353_v16 = vrot.slane %v1351_v60, 5 }
  0x60   : > { %2900 = vmatprep.subr.bf16.mxu1 %v3148_v0  ;;  %v3882_v0 = vsel %vm3710_vm5, %v1015_v46, %v1016_v32  ;;  %v3161_v32 = vld [vmem:[%s4397_s1 + $0x1a8] sm:$0xff]   ;;  %v1361_v19 = vor.u32 %v3813_v10, %v1359_v41  ;;  %v3240_v10 = vld [vmem:[%s3415_s29 + $0x50] sm:$0xff]  ;;  %v3173_v41 = vld [vmem:[%s4397_s1 + $0x1b8] sm:$0xff]  }
  0x61   : > { %2965 = vmatpush3.bf16.msra.mxu0 %v3151_v1  ;;  %v3163_v1 = vld [vmem:[%s4397_s1 + $0x228] sm:$0xff]   ;;  %v2522_v61 = vcombine.high %v3878_v45, %v3882_v0 }
  0x62   : > { %2966 = vmatprep.subr.bf16.mxu0 %v3156_v59  ;;  %v1356_v59 = vrot.slane %v1354_v50, 6  ;;  %v1363_v60 = vrot.slane %v1361_v19, 4 }
  0x63   : > { %1279 = vmatmul.mubr.bf16.gmra.mrb[24].mxu0 %v2517_v30  ;;  %2901 = vmatpush3.bf16.msra.mxu1 %v3149_v31  ;;  %v3168_v30 = vld [vmem:[%s4397_s1 + $0x270] sm:$0xff]   ;;  %v2519_v31 = vcombine.low %v1007_v20, %v1010_v37  ;;  %v2451_v37 = vcombine.low %v3588_v2, %v3664_v47 }
  0x64   : > { %1286 = vmatprep.mubr.bf16.mxu0 %v2520_v36  ;;  %2902 = vmatprep.subr.bf16.mxu1 %v3154_v53  ;;  %v1357_v46 = vor.u32 %v1356_v59, %v1353_v16  ;;  %v1364_v36 = vrot.slane %v255_v21, 5  ;;  %v1026_v53 = vrot.slane %v3605_v28, 5  ;;  %v3169_v20 = vld [vmem:[%s4397_s1 + $0x230] sm:$0xff]   ;;  %v3175_v16 = vld [vmem:[%s4397_s1 + $0x238] sm:$0xff]  }
  0x65   : > { %2967 = vmatpush3.bf16.msra.mxu0 %v3157_v23  ;;  %v3174_v23 = vld [vmem:[%s4397_s1 + $0x278] sm:$0xff]  }
  0x66   : > { %922 = vmatmul.mubr.bf16.gmra.mrb[24].mxu1 %v2449_v58  ;;  %2968 = vmatprep.subr.bf16.mxu0 %v3162_v33  ;;  %v1358_v13 = vrot.slane %v1357_v46, 4  ;;  %v3908_v21 = vor.u32 %v3826_v54, %v1364_v36  ;;  %v2454_v58 = vcombine.high %v3240_v10, %v3443_v22  ;;  %v3167_v54 = vld [vmem:[%s4397_s1 + $0x1b0] sm:$0xff]   ;;  %v3172_v33 = vld [vmem:[%s4397_s1 + $0x1f8] sm:$0xff]  }
  0x67   : > { %929 = vmatprep.mubr.bf16.mxu1 %v2452_v43  ;;  %2903 = vmatpush3.bf16.msra.mxu1 %v3155_v51  ;;  %v3931_v43 = vsel %vm3710_vm5, %v1018_v42, %v1019_v11  ;;  %v3935_v51 = vsel %vm3710_vm5, %v1021_v62, %v1022_v35  ;;  %v1028_v42 = vrot.slane %v1026_v53, 4  ;;  %v1029_v35 = vrot.slane %v3608_v29, 5  ;;  %v3966_v46 = vld [vmem:[%s3415_s29 + $0x58] sm:$0xff] }
  0x68   : > { %2904 = vmatprep.subr.bf16.mxu1 %v3160_v18  ;;  %v3938_v18 = vld [vmem:[%s3415_s29 + $0x78] sm:$0xee]  ;;  %v3950_v11 = vsel %vm3923_vm8, %v1363_v60, %v3908_v21  ;;  %v2453_v36 = vcombine.low %v3240_v10, %v3966_v46 }
  0x69   : > { %2969 = vmatpush3.bf16.msra.mxu0 %v3163_v1  ;;  %v3945_v1 = vsel %vm3923_vm8, %v1358_v13, %v1361_v19  ;;  %v1387_v19 = vshll.u32 %v3782_v52, 16  ;;  %v1392_v13 = vrot.slane %v289_v8, 5  ;;  %v2523_v8 = vcombine.low %v3931_v43, %v3935_v51 }
  0x6a   : > { %2970 = vmatprep.subr.bf16.mxu0 %v3168_v30  ;;  %v2577_v62 = vcombine.low %v3945_v1, %v3950_v11  ;;  %v2578_v59 = vcombine.high %v3945_v1, %v3950_v11  ;;  %v2521_v30 = vcombine.low %v3878_v45, %v3882_v0  ;;  %v3976_v0 = vsel %vm3710_vm5, %v1028_v42, %v1029_v35  ;;  %v1790_v11 = vld [vmem:[%s3415_s29 + $0x50] sm:$0xcc] }
  0x6b   : > { %1287 = vmatmul.mubr.bf16.gmra.mrb[28].mxu0 %v2519_v31  ;;  %2905 = vmatpush3.bf16.msra.mxu1 %v3161_v32  ;;  %v2524_v31 = vcombine.high %v3931_v43, %v3935_v51  ;;  %v2480_v32 = vrot.slane %v3938_v18, 9  ;;  %v1389_v10 = vrot.slane %v1387_v19, 6  ;;  %v1403_v43 = vrot.slane %v305_v55, 6 }
  0x6c   : > { %1294 = vmatprep.mubr.bf16.mxu0 %v2522_v61  ;;  %2906 = vmatprep.subr.bf16.mxu1 %v3166_v12  ;;  %v3970_v61 = vld [vmem:[%s3415_s29 + $0x60] sm:$0xff]  ;;  %v1384_v12 = vshrl.u32 %v3782_v52, 16  ;;  %v1831_v1 = vrot.slane %v3966_v46, 6  ;;  %v1436_v46 = vrot.slane %v349_v24, 6 }
  0x6d   : > { %2971 = vmatpush3.bf16.msra.mxu0 %v3169_v20  ;;  %v2456_v45 = vcombine.high %v3970_v61, %v3521_v17  ;;  %v1032_v20 = vrot.slane %v3678_v57, 5  ;;  %v3989_v60 = vsel %vm3710_vm5, %v2480_v32, %v1026_v53  ;;  %v1402_v32 = vrot.slane %v309_v56, 5 }
  0x6e   : > { %930 = vmatmul.mubr.bf16.gmra.mrb[28].mxu1 %v2451_v37  ;;  %2972 = vmatprep.subr.bf16.mxu0 %v3174_v23  ;;  %v1393_v37 = vrot.slane %v285_v5, 6  ;;  %v1397_v23 = vrot.slane %v299_v38, 5  ;;  %v1386_v52 = vrot.slane %v1384_v12, 5  ;;  %v3996_v38 = vld [vmem:[%s3415_s29 + $0x48] sm:$0x33]  ;;  %v2526_v53 = vcombine.high %v3989_v60, %v3976_v0 }
  0x6f   : > { %937 = vmatprep.mubr.bf16.mxu1 %v2454_v58  ;;  %2907 = vmatpush3.bf16.msra.mxu1 %v3167_v54  ;;  %v1398_v58 = vrot.slane %v295_v26, 6  ;;  %v1034_v42 = vrot.slane %v1032_v20, 4  ;;  %v2455_v51 = vcombine.low %v3970_v61, %v3521_v17  ;;  %v1411_v12 = vshll.u32 %v3996_v38, 16 }
  0x70   : > { %2908 = vmatprep.subr.bf16.mxu1 %v3172_v33  ;;  %v1394_v54 = vor.u32 %v1393_v37, %v1392_v13  ;;  %v1031_v33 = vrot.slane %v1029_v35, 4  ;;  %v1390_v5 = vor.u32 %v1389_v10, %v1386_v52  ;;  %v2458_v35 = vcombine.high %v3595_v9, %v3605_v28  ;;  %v1788_v52 = vld [vmem:[%s3415_s29] sm:$0xcc]  ;;  %v3243_v10 = vld [vmem:[%s3415_s29 + $0x8] sm:$0xff] }
  0x71   : > { %2973 = vmatpush3.bf16.msra.mxu0 %v3175_v16  ;;  %v1399_v16 = vor.u32 %v1398_v58, %v1397_v23  ;;  %v1426_v23 = vrot.slane %v329_v34, 6  ;;  %v1805_v58 = vrot.slane %v3243_v10, 6  ;;  %v1375_v10 = vshrl.u32 %v1343_v27, 16 }
  0x72   : > { %v1391_v26 = vrot.slane %v1390_v5, 4  ;;  %v4016_v56 = vsel %vm3710_vm5, %v1031_v33, %v1032_v20  ;;  %v1413_v33 = vrot.slane %v1411_v12, 6  ;;  %v1417_v5 = vshrl.u32 %v3842_v7, 16 }
  0x73   : > { %1295 = vmatmul.mubr.bf16.gmra.mrb[32].mxu0 %v2521_v30  ;;  %2909 = vmatpush3.bf16.msra.mxu1 %v3173_v41  ;;  %v1035_v30 = vrot.slane %v3686_v4, 5  ;;  %v1396_v41 = vrot.slane %v1394_v54, 4  ;;  %v1370_v12 = vrot.slane %v261_v14, 6 }
  0x74   : > { %1302 = vmatprep.mubr.bf16.mxu0 %v2524_v31  ;;  %v1401_v31 = vrot.slane %v1399_v16, 4  ;;  %v4020_v55 = vsel %vm3923_vm8, %v1391_v26, %v1394_v54  ;;  %v1431_v54 = vrot.slane %v339_v40, 6  ;;  %v2525_v40 = vcombine.low %v3989_v60, %v3976_v0 }
  0x75   : > { %v4011_v4 = vsel %vm3923_vm8, %v1396_v41, %v1399_v16  ;;  %v4025_v19 = vsel %vm3710_vm5, %v1034_v42, %v1035_v30  ;;  %v1420_v16 = vshll.u32 %v3842_v7, 16  ;;  %v1430_v42 = vrot.slane %v343_v44, 5 }
  0x76   : > { %938 = vmatmul.mubr.bf16.gmra.mrb[32].mxu1 %v2453_v36  ;;  %v1408_v36 = vshrl.u32 %v3996_v38, 16  ;;  %v2582_v13 = vcombine.high %v4020_v55, %v4011_v4  ;;  %v2581_v37 = vcombine.low %v4020_v55, %v4011_v4  ;;  %v2528_v34 = vcombine.high %v4016_v56, %v4025_v19 }
  0x77   : > { %945 = vmatprep.mubr.bf16.mxu1 %v2456_v45  ;;  %v1404_v45 = vor.u32 %v1403_v43, %v1402_v32  ;;  %v2609_v30 = vrot.slane %v1788_v52, 10  ;;  %v1419_v26 = vrot.slane %v1417_v5, 5  ;;  %v3244_v32 = vld [vmem:[%s3415_s29 + $0x10] sm:$0xff]  ;;  %v4063_v44 = vor.u32 %v1431_v54, %v1430_v42 }
  0x78   : > { %v1410_v20 = vrot.slane %v1408_v36, 5  ;;  %v1808_v43 = vrot.slane %v3244_v32, 6  ;;  %v2457_v7 = vcombine.low %v3595_v9, %v3605_v28  ;;  %v2460_v0 = vcombine.high %v3608_v29, %v3678_v57 }
  0x79   : > { %v4037_v3 = vsel %vm3923_vm8, %v1401_v31, %v1404_v45  ;;  %v1807_v31 = vrot.slane %v1805_v58, 4  ;;  %v1806_v9 = vsel %vm4054_vm11, %v2609_v30, %v1805_v58  ;;  %v1378_v54 = vshll.u32 %v1343_v27, 16 }
  0x7a   : > { %v1414_v41 = vor.u32 %v1413_v33, %v1410_v20  ;;  %v2527_v6 = vcombine.low %v4016_v56, %v4025_v19  ;;  %v1810_v30 = vrot.slane %v1808_v43, 4  ;;  %v2459_v56 = vcombine.low %v3608_v29, %v3678_v57 }
  0x7b   : > { %1303 = vmatmul.mubr.bf16.gmra.mrb[36].mxu0 %v2523_v8  ;;  %v1406_v8 = vrot.slane %v1404_v45, 4  ;;  %v1369_v45 = vrot.slane %v265_v15, 5  ;;  %v1809_v52 = vsel %vm4054_vm11, %v1807_v31, %v1808_v43  ;;  %v1368_v19 = vrot.slane %v3908_v21, 4  ;;  %v1789_v43 = vld [vmem:[%s3415_s29 + $0x28] sm:$0xcc] }
  0x7c   : > { %1310 = vmatprep.mubr.bf16.mxu0 %v2526_v53  ;;  %v1425_v53 = vrot.slane %v333_v39, 5  ;;  %v2646_v14 = vcombine.high %v1806_v9, %v1809_v52  ;;  %v1434_v4 = vrot.slane %v4063_v44, 4 }
  0x7d   : > { %v4061_v39 = vsel %vm3923_vm8, %v1406_v8, %v1414_v41  ;;  %v3245_v8 = vld [vmem:[%s3415_s29 + $0x18] sm:$0xff]  ;;  %v1371_v58 = vor.u32 %v1370_v12, %v1369_v45  ;;  %v2610_v12 = vrot.slane %v1789_v43, 10 }
  0x7e   : > { %946 = vmatmul.mubr.bf16.gmra.mrb[36].mxu1 %v2455_v51  ;;  %v1422_v51 = vrot.slane %v1420_v16, 6  ;;  %v1427_v36 = vor.u32 %v1426_v23, %v1425_v53  ;;  %v2584_v60 = vcombine.high %v4037_v3, %v4061_v39  ;;  %v1811_v33 = vrot.slane %v3245_v8, 6 }
  0x7f   : > { %953 = vmatprep.mubr.bf16.mxu1 %v2458_v35  ;;  %v2583_v35 = vcombine.low %v4037_v3, %v4061_v39  ;;  %v1377_v16 = vrot.slane %v1375_v10, 5  ;;  %v1380_v53 = vrot.slane %v1378_v54, 6  ;;  %v1373_v31 = vrot.slane %v1371_v58, 4 }
  0x80   : > { %v1423_v20 = vor.u32 %v1422_v51, %v1419_v26  ;;  %v1429_v23 = vrot.slane %v1427_v36, 4  ;;  %v1813_v41 = vrot.slane %v1811_v33, 4  ;;  %v1814_v26 = vrot.slane %v1343_v27, 6 }
  0x81   : > { %v1381_v32 = vor.u32 %v1380_v53, %v1377_v16  ;;  %v1812_v51 = vsel %vm4054_vm11, %v1810_v30, %v1811_v33  ;;  %v2645_v27 = vcombine.low %v1806_v9, %v1809_v52  ;;  %v1372_v21 = vsel %vm3923_vm8, %v1368_v19, %v1371_v58  ;;  %v3246_v19 = vld [vmem:[%s3415_s29 + $0x68] sm:$0xff] }
  0x82   : > { %v1424_v5 = vrot.slane %v1423_v20, 4  ;;  %v4085_v15 = vsel %vm3923_vm8, %v1429_v23, %v4063_v44  ;;  %v1821_v23 = vrot.slane %v3588_v2, 6  ;;  %v1824_v9 = vrot.slane %v3664_v47, 6  ;;  %v3247_v44 = vld [vmem:[%s3415_s29 + $0x80] sm:$0xff] }
  0x83   : > { %1311 = vmatmul.mubr.bf16.gmra.mrb[40].mxu0 %v2525_v40  ;;  %v1827_v33 = vrot.slane %v3996_v38, 6  ;;  %v2611_v58 = vrot.slane %v1790_v11, 10  ;;  %v1833_v16 = vrot.slane %v1831_v1, 4  ;;  %v1834_v53 = vrot.slane %v3970_v61, 6 }
  0x84   : > { %1318 = vmatprep.mubr.bf16.mxu0 %v2528_v34  ;;  %v4091_v34 = vsel %vm3923_vm8, %v1424_v5, %v1427_v36  ;;  %v1815_v36 = vsel %vm4054_vm11, %v1813_v41, %v1814_v26  ;;  %v1823_v54 = vrot.slane %v1821_v23, 4  ;;  %v1826_v8 = vrot.slane %v1824_v9, 4 }
  0x85   : > { %v2586_v42 = vcombine.high %v4091_v34, %v4085_v15  ;;  %v2585_v40 = vcombine.low %v4091_v34, %v4085_v15  ;;  %v2648_v45 = vcombine.high %v1812_v51, %v1815_v36  ;;  %v2647_v52 = vcombine.low %v1812_v51, %v1815_v36 }
  0x86   : > { %954 = vmatmul.mubr.bf16.gmra.mrb[40].mxu1 %v2457_v7  ;;  %v1818_v7 = vrot.slane %v3580_v63, 6  ;;  %v1828_v47 = vsel %vm4054_vm11, %v1826_v8, %v1827_v33  ;;  %v1435_v30 = vrot.slane %v353_v25, 5  ;;  %v1450_v51 = vshrl.u32 %v3938_v18, 16  ;;  %v3248_v33 = vld [vmem:[%s3415_s29 + $0x88] sm:$0xff] }
  0x87   : > { %961 = vmatprep.mubr.bf16.mxu1 %v2460_v0  ;;  %v1382_v0 = vsel %vm3923_vm8, %v1373_v31, %v1381_v32  ;;  %v1837_v31 = vrot.slane %v3246_v19, 6  ;;  %v1453_v36 = vshll.u32 %v3938_v18, 16  ;;  %v4416_v3 = vshll.u32 %v3608_v29, 16 }
  0x88   : > { %v1820_v20 = vrot.slane %v1818_v7, 4  ;;  %v2580_v63 = vcombine.high %v1372_v21, %v1382_v0  ;;  %v1819_v10 = vsel %vm4054_vm11, %v2610_v12, %v1818_v7  ;;  %v2579_v5 = vcombine.low %v1372_v21, %v1382_v0 }
  0x89   : > { %v1437_v24 = vor.u32 %v1436_v46, %v1435_v30  ;;  %v1836_v7 = vrot.slane %v1834_v53, 4  ;;  %v1839_v43 = vrot.slane %v1837_v31, 4  ;;  %v4414_v21 = vshll.u32 %v3605_v28, 16 }
  0x8a   : > { %v1455_v12 = vrot.slane %v1453_v36, 6  ;;  %v1464_v39 = vrot.slane %v4416_v3, 6  ;;  %v1468_v11 = vrot.slane %v397_v48, 5  ;;  %v1850_v30 = vrot.slane %v3678_v57, 6 }
  0x8b   : > { %1319 = vmatmul.mubr.bf16.gmra.mrb[44].mxu0 %v2527_v6  ;;  %v1825_v6 = vsel %vm4054_vm11, %v1823_v54, %v1824_v9  ;;  %v1439_v55 = vrot.slane %v1437_v24, 4  ;;  %v1459_v0 = vrot.slane %v4414_v21, 6  ;;  %v1838_v18 = vsel %vm4054_vm11, %v1836_v7, %v1837_v31 }
  0x8c   : > { %2080 = vmatprep.mubr.bf16.mxu0 %v2646_v14  ;;  %v2652_v38 = vcombine.high %v1825_v6, %v1828_v47  ;;  %v1345_v14 = vld [vmem:[%s3415_s29 + $0x70] sm:$0x33]  ;;  %v2651_v17 = vcombine.low %v1825_v6, %v1828_v47  ;;  %v1438_v28 = vsel %vm3923_vm8, %v1434_v4, %v1437_v24  ;;  %v4415_v9 = vshrl.u32 %v3608_v29, 16  ;;  %v1346_v6 = vld [vmem:[%s3415_s29 + $0x98] sm:$0x33] }
  0x8d   : > { %v1441_v41 = vshrl.u32 %v1345_v14, 16  ;;  %v1444_v26 = vshll.u32 %v1345_v14, 16  ;;  %v1853_v24 = vrot.slane %v1346_v6, 6 }
  0x8e   : > { %962 = vmatmul.mubr.bf16.gmra.mrb[44].mxu1 %v2459_v56  ;;  %v1835_v56 = vsel %vm4054_vm11, %v1833_v16, %v1834_v53 }
  0x8f   : > { %1707 = vmatprep.mubr.bf16.mxu1 %v2578_v59  ;;  %v1822_v59 = vsel %vm4054_vm11, %v1820_v20, %v1821_v23  ;;  %v1443_v25 = vrot.slane %v1441_v41, 5  ;;  %v1446_v61 = vrot.slane %v1444_v26, 6  ;;  %v1844_v23 = vrot.slane %v3247_v44, 6 }
  0x90   : > { %v2650_v2 = vcombine.high %v1819_v10, %v1822_v59 }
  0x91   : > { %v1846_v8 = vrot.slane %v1844_v23, 4 }
  0x93   : > { %2081 = vmatmul.mubr.bf16.vlgmr.msra.gmra.mrb[48].mxu0 %v2645_v27  ;;  %v1840_v27 = vrot.slane %v1345_v14, 6  ;;  %v1474_v14 = vshrl.u32 %v1346_v6, 16 }
  0x94   : > { %2088 = vmatprep.mubr.bf16.mxu0 %v2648_v45  ;;  %v1452_v45 = vrot.slane %v1450_v51, 5 }
  0x95   : > { %v1841_v20 = vsel %vm4054_vm11, %v1839_v43, %v1840_v27 }
  0x96   : > { %1708 = vmatmul.mubr.bf16.vlgmr.msra.gmra.mrb[48].mxu1 %v2577_v62  ;;  %v2649_v62 = vcombine.low %v1819_v10, %v1822_v59  ;;  %v2655_v48 = vcombine.low %v1838_v18, %v1841_v20 }
  0x97   : > { %1715 = vmatprep.mubr.bf16.mxu1 %v2580_v63  ;;  %v1791_v63 = vld [vmem:[%s3415_s29 + $0x78] sm:$0xcc] }
  0x98   : > { %v2612_v54 = vrot.slane %v1791_v63, 10 }
  0x9a   : > { %v1845_v16 = vsel %vm4054_vm11, %v2612_v54, %v1844_v23 }
  0x9b   : > { %2089 = vmatmul.mubr.bf16.gmra.mrb[52].mxu0 %v2647_v52  ;;  %v1463_v52 = vrot.slane %v4415_v9, 5 }
  0x9c   : > { %2096 = vmatprep.mubr.bf16.mxu0 %v2650_v2  ;;  %v1456_v2 = vor.u32 %v1455_v12, %v1452_v45 }
  0x9e   : > { %1716 = vmatmul.mubr.bf16.gmra.mrb[52].mxu1 %v2579_v5  ;;  %v1847_v5 = vrot.slane %v3248_v33, 6  ;;  %v1457_v29 = vrot.slane %v1456_v2, 4 }
  0x9f   : > { %1723 = vmatprep.mubr.bf16.mxu1 %v2582_v13  ;;  %v1832_v13 = vsel %vm4054_vm11, %v2611_v58, %v1831_v1  ;;  %v1465_v1 = vor.u32 %v1464_v39, %v1463_v52  ;;  %v1477_v58 = vshll.u32 %v1346_v6, 16 }
  0xa0   : > { %v2654_v32 = vcombine.high %v1832_v13, %v1835_v56  ;;  %v1848_v53 = vsel %vm4054_vm11, %v1846_v8, %v1847_v5  ;;  %v1849_v31 = vrot.slane %v1847_v5, 4 }
  0xa1   : > { %v1479_v19 = vrot.slane %v1477_v58, 6  ;;  %v1467_v15 = vrot.slane %v1465_v1, 4  ;;  %v2657_v51 = vcombine.low %v1845_v16, %v1848_v53 }
  0xa3   : > { %2097 = vmatmul.mubr.bf16.gmra.mrb[56].mxu0 %v2649_v62  ;;  %v4417_v62 = vshll.u32 %v3678_v57, 16 }
  0xa4   : > { %2104 = vmatprep.mubr.bf16.mxu0 %v2652_v38 }
  0xa5   : > { %v1469_v38 = vrot.slane %v4417_v62, 6 }
  0xa6   : > { %1724 = vmatmul.mubr.bf16.gmra.mrb[56].mxu1 %v2581_v37  ;;  %v1447_v37 = vor.u32 %v1446_v61, %v1443_v25  ;;  %v1851_v61 = vsel %vm4054_vm11, %v1849_v31, %v1850_v30 }
  0xa7   : > { %1731 = vmatprep.mubr.bf16.mxu1 %v2584_v60  ;;  %v1458_v60 = vrot.slane %v377_v49, 5  ;;  %v2653_v49 = vcombine.low %v1832_v13, %v1835_v56  ;;  %v1470_v41 = vor.u32 %v1469_v38, %v1468_v11  ;;  %v2658_v13 = vcombine.high %v1845_v16, %v1848_v53 }
  0xa8   : > { %v1448_v10 = vsel %vm3923_vm8, %v1439_v55, %v1447_v37  ;;  %v1476_v56 = vrot.slane %v1474_v14, 5 }
  0xa9   : > { %v1460_v59 = vor.u32 %v1459_v0, %v1458_v60  ;;  %v2588_v47 = vcombine.high %v1438_v28, %v1448_v10  ;;  %v2587_v57 = vcombine.low %v1438_v28, %v1448_v10  ;;  %v1472_v34 = vrot.slane %v1470_v41, 4 }
  0xaa   : > { %v1471_v36 = vsel %vm3923_vm8, %v1467_v15, %v1470_v41 }
  0xab   : > { %2105 = vmatmul.mubr.bf16.gmra.mrb[60].mxu0 %v2651_v17  ;;  %v1461_v26 = vsel %vm3923_vm8, %v1457_v29, %v1460_v59  ;;  %v1852_v17 = vrot.slane %v1850_v30, 4 }
  0xac   : > { %2112 = vmatprep.mubr.bf16.mxu0 %v2654_v32 }
  0xad   : > { %v1854_v32 = vsel %vm4054_vm11, %v1852_v17, %v1853_v24 }
  0xae   : > { %1732 = vmatmul.mubr.bf16.gmra.mrb[60].mxu1 %v2583_v35  ;;  %v2656_v35 = vcombine.high %v1838_v18, %v1841_v20  ;;  %v2660_v43 = vcombine.high %v1851_v61, %v1854_v32  ;;  %v2659_v55 = vcombine.low %v1851_v61, %v1854_v32 }
  0xaf   : > { %1739 = vmatprep.mubr.bf16.mxu1 %v2586_v42  ;;  %v1462_v42 = vrot.slane %v1460_v59, 4 }
  0xb1   : > { %v1466_v46 = vsel %vm3923_vm8, %v1462_v42, %v1465_v1 }
  0xb2   : > { %v2590_v25 = vcombine.high %v1461_v26, %v1466_v46  ;;  %v2589_v27 = vcombine.low %v1461_v26, %v1466_v46 }
  0xb3   : > { %2113 = vmatmul.mubr.bf16.gmra.mrb[64].mxu0 %v2653_v49 }
  0xb4   : > { %2120 = vmatprep.mubr.bf16.mxu0 %v2656_v35 }
  0xb6   : > { %1740 = vmatmul.mubr.bf16.gmra.mrb[64].mxu1 %v2585_v40  ;;  %v1480_v40 = vor.u32 %v1479_v19, %v1476_v56 }
  0xb7   : > { %1747 = vmatprep.mubr.bf16.mxu1 %v2588_v47 }
  0xb8   : > { %v1481_v7 = vsel %vm3923_vm8, %v1472_v34, %v1480_v40 }
  0xb9   : > { %v2592_v4 = vcombine.high %v1471_v36, %v1481_v7  ;;  %v2591_v37 = vcombine.low %v1471_v36, %v1481_v7 }
  0xbb   : > { %2121 = vmatmul.mubr.bf16.gmra.mrb[68].mxu0 %v2655_v48 }
  0xbc   : > { %2128 = vmatprep.mubr.bf16.mxu0 %v2658_v13 }
  0xbe   : > { %1748 = vmatmul.mubr.bf16.gmra.mrb[68].mxu1 %v2587_v57 }
  0xbf   : > { %1755 = vmatprep.mubr.bf16.mxu1 %v2590_v25 }
  0xc3   : > { %2129 = vmatmul.mubr.bf16.gmra.mrb[72].mxu0 %v2657_v51 }
  0xc4   : > { %2136 = vmatprep.mubr.bf16.mxu0 %v2660_v43 }
  0xc6   : > { %1756 = vmatmul.mubr.bf16.gmra.mrb[72].mxu1 %v2589_v27 }
  0xc7   : > { %1763 = vmatprep.mubr.bf16.mxu1 %v2592_v4 }
  0xcb   : > { %2137 = vmatmul.mubr.bf16.gmra.mrb[76].mxu0 %v2659_v55 }
  0xce   : > { %1764 = vmatmul.mubr.bf16.gmra.mrb[76].mxu1 %v2591_v37 }
 0x101   : > { %v2718_v22 = vpop.f32.mrb[0].mxu0  ;;  %v2742_v60 = vpop.f32.mrb[0].mxu1 }
 0x102   : > { %v2719_v21 = vpop.f32.mrb[1].mxu0  ;;  %v2743_v0 = vpop.f32.mrb[1].mxu1 }
 0x103   : > { %v2720_v45 = vadd.f32 %v2719_v21, %v2718_v22  ;;  %v4202_v12 = vadd.f32 %v2743_v0, %v2742_v60  ;;  %v2721_v50 = vpop.f32.mrb[2].mxu0  ;;  %v2745_v18 = vpop.f32.mrb[2].mxu1 }
 0x104   : > { %v2722_v20 = vpop.f32.mrb[3].mxu0  ;;  %v2746_v44 = vpop.f32.mrb[3].mxu1 }
 0x105   : > { %v2723_v23 = vadd.f32 %v2722_v20, %v2721_v50  ;;  %v4204_v49 = vadd.f32 %v2746_v44, %v2745_v18 }
 0x109   : > { %v2724_v28 = vpop.f32.mrb[4].mxu0  ;;  %v2748_v63 = vpop.f32.mrb[4].mxu1 }
 0x10a   : > { %v2725_v10 = vpop.f32.mrb[5].mxu0  ;;  %v2749_v9 = vpop.f32.mrb[5].mxu1 }
 0x10b   : > { %v2726_v59 = vadd.f32 %v2725_v10, %v2724_v28  ;;  %v2727_v52 = vpop.f32.mrb[6].mxu0  ;;  %v4206_v3 = vadd.f32 %v2749_v9, %v2748_v63  ;;  %v2751_v39 = vpop.f32.mrb[6].mxu1 }
 0x10c   : > { %v2728_v35 = vpop.f32.mrb[7].mxu0  ;;  %v2752_v54 = vpop.f32.mrb[7].mxu1 }
 0x10d   : > { %v2729_v2 = vadd.f32 %v2728_v35, %v2727_v52  ;;  %v4208_v8 = vadd.f32 %v2752_v54, %v2751_v39 }
 0x113   : > { %v2730_v33 = vpop.f32.mrb[8].mxu0 }
 0x114   : > { %v2731_v5 = vpop.f32.mrb[9].mxu0 }
 0x115   : > { %v4210_v6 = vadd.f32 %v2731_v5, %v2730_v33  ;;  %v2733_v47 = vpop.f32.mrb[10].mxu0  ;;  %v2754_v1 = vpop.f32.mrb[8].mxu1 }
 0x116   : > { %v2734_v42 = vpop.f32.mrb[11].mxu0  ;;  %v2755_v62 = vpop.f32.mrb[9].mxu1 }
 0x117   : > { %v4212_v11 = vadd.f32 %v2734_v42, %v2733_v47  ;;  %v4214_v38 = vadd.f32 %v2755_v62, %v2754_v1  ;;  %v2757_v29 = vpop.f32.mrb[10].mxu1 }
 0x118   : > { %v2758_v14 = vpop.f32.mrb[11].mxu1 }
 0x119   : > { %v4216_v58 = vadd.f32 %v2758_v14, %v2757_v29 }
 0x11e   : > { %v2736_v16 = vpop.f32.mrb[12].mxu0 }
 0x11f   : > { %v2737_v53 = vpop.f32.mrb[13].mxu0 }
 0x120   : > { %v4218_v30 = vadd.f32 %v2737_v53, %v2736_v16  ;;  %v2739_v48 = vpop.f32.mrb[14].mxu0 }
 0x121   : > { %v2760_v46 = vpop.f32.mrb[12].mxu1  ;;  %v2740_v41 = vpop.f32.mrb[15].mxu0 }
 0x122   : > { %v2761_v26 = vpop.f32.mrb[13].mxu1  ;;  %v4220_v13 = vadd.f32 %v2740_v41, %v2739_v48 }
 0x123   : > { %v4222_v56 = vadd.f32 %v2761_v26, %v2760_v46  ;;  %v2763_v19 = vpop.f32.mrb[14].mxu1 }
 0x124   : > { %v2764_v31 = vpop.f32.mrb[15].mxu1 }
 0x125   : > { %v4224_v17 = vadd.f32 %v2764_v31, %v2763_v19 }
 0x126   : > { %v2846_v24 = vpop.f32.mrb[16].mxu0 }
 0x127   : > { %v2847_v57 = vpop.f32.mrb[17].mxu0 }
 0x128   : > { %v2848_v25 = vadd.f32 %v2847_v57, %v2846_v24  ;;  %v2849_v15 = vpop.f32.mrb[18].mxu0 }
 0x129   : > { %v2782_v34 = vpop.f32.mrb[16].mxu1  ;;  %v2850_v40 = vpop.f32.mrb[19].mxu0 }
 0x12a   : > { %v2783_v61 = vpop.f32.mrb[17].mxu1  ;;  %v2851_v32 = vadd.f32 %v2850_v40, %v2849_v15 }
 0x12b   : > { %v2784_v51 = vadd.f32 %v2783_v61, %v2782_v34  ;;  %v2785_v36 = vpop.f32.mrb[18].mxu1 }
 0x12c   : > { %v2786_v7 = vpop.f32.mrb[19].mxu1 }
 0x12d   : > { %v908_v43 = vadd.f32 %v2784_v51, %v2720_v45  ;;  %v2787_v27 = vadd.f32 %v2786_v7, %v2785_v36 }
 0x12e   : > { %v2852_v4 = vpop.f32.mrb[20].mxu0 }
 0x12f   : > { %v4226_v55 = vadd.f32 %v2848_v25, %v908_v43  ;;  %v911_v37 = vadd.f32 %v2787_v27, %v2723_v23  ;;  %v2853_v22 = vpop.f32.mrb[21].mxu0 }
 0x130   : > { %v2854_v60 = vadd.f32 %v2853_v22, %v2852_v4  ;;  %v2855_v21 = vpop.f32.mrb[22].mxu0 }
 0x131   : > { %v4228_v0 = vadd.f32 %v2851_v32, %v911_v37  ;;  %v2788_v50 = vpop.f32.mrb[20].mxu1  ;;  %v2856_v18 = vpop.f32.mrb[23].mxu0 }
 0x132   : > { %v2789_v20 = vpop.f32.mrb[21].mxu1  ;;  %v2857_v44 = vadd.f32 %v2856_v18, %v2855_v21 }
 0x133   : > { %v2790_v28 = vadd.f32 %v2789_v20, %v2788_v50  ;;  %v2791_v63 = vpop.f32.mrb[22].mxu1 }
 0x134   : > { %v2792_v10 = vpop.f32.mrb[23].mxu1 }
 0x135   : > { %v916_v9 = vadd.f32 %v2790_v28, %v2726_v59  ;;  %v2793_v52 = vadd.f32 %v2792_v10, %v2791_v63 }
 0x136   : > { %v2858_v45 = vpop.f32.mrb[24].mxu0 }
 0x137   : > { %v4230_v39 = vadd.f32 %v2854_v60, %v916_v9  ;;  %v919_v35 = vadd.f32 %v2793_v52, %v2729_v2  ;;  %v2859_v54 = vpop.f32.mrb[25].mxu0 }
 0x138   : > { %v2860_v23 = vadd.f32 %v2859_v54, %v2858_v45  ;;  %v2861_v33 = vpop.f32.mrb[26].mxu0 }
 0x139   : > { %v4232_v5 = vadd.f32 %v2857_v44, %v919_v35  ;;  %v2794_v47 = vpop.f32.mrb[24].mxu1  ;;  %v2862_v42 = vpop.f32.mrb[27].mxu0 }
 0x13a   : > { %v2795_v1 = vpop.f32.mrb[25].mxu1  ;;  %v2863_v62 = vadd.f32 %v2862_v42, %v2861_v33 }
 0x13b   : > { %v2796_v29 = vadd.f32 %v2795_v1, %v2794_v47  ;;  %v2797_v14 = vpop.f32.mrb[26].mxu1 }
 0x13c   : > { %v2798_v16 = vpop.f32.mrb[27].mxu1 }
 0x13d   : > { %v924_v53 = vadd.f32 %v2796_v29, %v4210_v6  ;;  %v2799_v59 = vadd.f32 %v2798_v16, %v2797_v14 }
 0x13e   : > { %v2864_v48 = vpop.f32.mrb[28].mxu0 }
 0x13f   : > { %v4235_v46 = vadd.f32 %v2860_v23, %v924_v53  ;;  %v927_v2 = vadd.f32 %v2799_v59, %v4212_v11  ;;  %v2865_v41 = vpop.f32.mrb[29].mxu0 }
 0x140   : > { %v2866_v26 = vadd.f32 %v2865_v41, %v2864_v48  ;;  %v2867_v19 = vpop.f32.mrb[30].mxu0 }
 0x141   : > { %v4238_v31 = vadd.f32 %v2863_v62, %v927_v2  ;;  %v2800_v24 = vpop.f32.mrb[28].mxu1  ;;  %v2868_v57 = vpop.f32.mrb[31].mxu0 }
 0x142   : > { %v2801_v25 = vpop.f32.mrb[29].mxu1  ;;  %v2869_v15 = vadd.f32 %v2868_v57, %v2867_v19 }
 0x143   : > { %v2802_v34 = vadd.f32 %v2801_v25, %v2800_v24  ;;  %v2803_v40 = vpop.f32.mrb[30].mxu1 }
 0x144   : > { %v2804_v61 = vpop.f32.mrb[31].mxu1 }
 0x145   : > { %v932_v6 = vadd.f32 %v2802_v34, %v4218_v30  ;;  %v2805_v32 = vadd.f32 %v2804_v61, %v2803_v40 }
 0x146   : > { %v2870_v51 = vpop.f32.mrb[32].mxu0 }
 0x147   : > { %v4241_v36 = vadd.f32 %v2866_v26, %v932_v6  ;;  %v935_v11 = vadd.f32 %v2805_v32, %v4220_v13  ;;  %v2871_v7 = vpop.f32.mrb[33].mxu0 }
 0x148   : > { %v2872_v43 = vadd.f32 %v2871_v7, %v2870_v51  ;;  %v2873_v27 = vpop.f32.mrb[34].mxu0 }
 0x149   : > { %v4244_v4 = vadd.f32 %v2869_v15, %v935_v11  ;;  %v2806_v37 = vpop.f32.mrb[32].mxu1  ;;  %v2874_v22 = vpop.f32.mrb[35].mxu0 }
 0x14a   : > { %v2807_v60 = vpop.f32.mrb[33].mxu1  ;;  %v2875_v21 = vadd.f32 %v2874_v22, %v2873_v27 }
 0x14b   : > { %v2808_v50 = vadd.f32 %v2807_v60, %v2806_v37  ;;  %v2809_v18 = vpop.f32.mrb[34].mxu1 }
 0x14c   : > { %v2810_v20 = vpop.f32.mrb[35].mxu1 }
 0x14d   : > { %v940_v30 = vadd.f32 %v2808_v50, %v4202_v12  ;;  %v2811_v44 = vadd.f32 %v2810_v20, %v2809_v18 }
 0x14e   : > { %v2876_v28 = vpop.f32.mrb[36].mxu0 }
 0x14f   : > { %v4247_v63 = vadd.f32 %v2872_v43, %v940_v30  ;;  %v943_v13 = vadd.f32 %v2811_v44, %v4204_v49  ;;  %v2877_v10 = vpop.f32.mrb[37].mxu0 }
 0x150   : > { %v2878_v9 = vadd.f32 %v2877_v10, %v2876_v28  ;;  %v2879_v52 = vpop.f32.mrb[38].mxu0 }
 0x151   : > { %v4250_v45 = vadd.f32 %v2875_v21, %v943_v13  ;;  %v2812_v35 = vpop.f32.mrb[36].mxu1  ;;  %v2880_v54 = vpop.f32.mrb[39].mxu0 }
 0x152   : > { %v2813_v23 = vpop.f32.mrb[37].mxu1  ;;  %v2881_v33 = vadd.f32 %v2880_v54, %v2879_v52 }
 0x153   : > { %v2814_v47 = vadd.f32 %v2813_v23, %v2812_v35  ;;  %v2815_v42 = vpop.f32.mrb[38].mxu1 }
 0x154   : > { %v2816_v1 = vpop.f32.mrb[39].mxu1 }
 0x155   : > { %v948_v12 = vadd.f32 %v2814_v47, %v4206_v3  ;;  %v2817_v62 = vadd.f32 %v2816_v1, %v2815_v42  ;;  %v4274_v47 = vld [vmem:[%s4398_s2] ss:$0 sm:$0xff] }
 0x156   : > { %v2882_v29 = vpop.f32.mrb[40].mxu0 }
 0x157   : > { %v4253_v14 = vadd.f32 %v2878_v9, %v948_v12  ;;  %v951_v49 = vadd.f32 %v2817_v62, %v4208_v8  ;;  %v2883_v16 = vpop.f32.mrb[41].mxu0 }
 0x158   : > { %v2884_v53 = vadd.f32 %v2883_v16, %v2882_v29  ;;  %v2885_v59 = vpop.f32.mrb[42].mxu0 }
 0x159   : > { %v4256_v48 = vadd.f32 %v2881_v33, %v951_v49  ;;  %v2818_v2 = vpop.f32.mrb[40].mxu1  ;;  %v2886_v41 = vpop.f32.mrb[43].mxu0 }
 0x15a   : > { %v2819_v26 = vpop.f32.mrb[41].mxu1  ;;  %v2887_v19 = vadd.f32 %v2886_v41, %v2885_v59 }
 0x15b   : > { %v2820_v24 = vadd.f32 %v2819_v26, %v2818_v2  ;;  %v2821_v57 = vpop.f32.mrb[42].mxu1 }
 0x15c   : > { %v2822_v25 = vpop.f32.mrb[43].mxu1 }
 0x15d   : > { %v956_v3 = vadd.f32 %v2820_v24, %v4214_v38  ;;  %v2823_v15 = vadd.f32 %v2822_v25, %v2821_v57 }
 0x15e   : > { %v2888_v34 = vpop.f32.mrb[44].mxu0 }
 0x15f   : > { %v4259_v40 = vadd.f32 %v2884_v53, %v956_v3  ;;  %v959_v8 = vadd.f32 %v2823_v15, %v4216_v58  ;;  %v2889_v61 = vpop.f32.mrb[45].mxu0 }
 0x160   : > { %v2890_v6 = vadd.f32 %v2889_v61, %v2888_v34  ;;  %v2891_v32 = vpop.f32.mrb[46].mxu0 }
 0x161   : > { %v4262_v51 = vadd.f32 %v2887_v19, %v959_v8  ;;  %v2824_v11 = vpop.f32.mrb[44].mxu1  ;;  %v2892_v7 = vpop.f32.mrb[47].mxu0 }
 0x162   : > { %v2825_v43 = vpop.f32.mrb[45].mxu1  ;;  %v2893_v27 = vadd.f32 %v2892_v7, %v2891_v32 }
 0x163   : > { %v2826_v37 = vadd.f32 %v2825_v43, %v2824_v11  ;;  %v2827_v22 = vpop.f32.mrb[46].mxu1 }
 0x164   : > { %v2828_v60 = vpop.f32.mrb[47].mxu1 }
 0x165   : > { %v964_v38 = vadd.f32 %v2826_v37, %v4222_v56  ;;  %v2829_v21 = vadd.f32 %v2828_v60, %v2827_v22 }
 0x166   : > { %v2974_v50 = vpop.f32.mrb[48].mxu0 }
 0x167   : > { %v4265_v18 = vadd.f32 %v2890_v6, %v964_v38  ;;  %v967_v58 = vadd.f32 %v2829_v21, %v4224_v17  ;;  %v2975_v20 = vpop.f32.mrb[49].mxu0 }
 0x168   : > { %v2976_v30 = vadd.f32 %v2975_v20, %v2974_v50  ;;  %v2977_v44 = vpop.f32.mrb[50].mxu0 }
 0x169   : > { %v4268_v28 = vadd.f32 %v2893_v27, %v967_v58  ;;  %v2910_v13 = vpop.f32.mrb[48].mxu1  ;;  %v2978_v10 = vpop.f32.mrb[51].mxu0 }
 0x16a   : > { %v2911_v9 = vpop.f32.mrb[49].mxu1  ;;  %v2979_v52 = vadd.f32 %v2978_v10, %v2977_v44 }
 0x16b   : > { %v2912_v35 = vadd.f32 %v2911_v9, %v2910_v13  ;;  %v2913_v54 = vpop.f32.mrb[50].mxu1 }
 0x16c   : > { %v2914_v23 = vpop.f32.mrb[51].mxu1 }
 0x16d   : > { %v1772_v56 = vadd.f32 %v2912_v35, %v4226_v55  ;;  %v2915_v33 = vadd.f32 %v2914_v23, %v2913_v54 }
 0x16e   : > { %v2980_v17 = vpop.f32.mrb[52].mxu0 }
 0x16f   : > { %v2145_v42 = vadd.f32 %v2976_v30, %v1772_v56  ;;  %v1773_v1 = vadd.f32 %v2915_v33, %v4228_v0  ;;  %v2981_v12 = vpop.f32.mrb[53].mxu0 }
 0x170   : > { %v2982_v62 = vadd.f32 %v2981_v12, %v2980_v17  ;;  %v2983_v29 = vpop.f32.mrb[54].mxu0 }
 0x171   : > { %v2168_v49 = vadd.f32 %v4274_v47, %v2145_v42  ;;  %v2146_v16 = vadd.f32 %v2979_v52, %v1773_v1  ;;  %v2916_v53 = vpop.f32.mrb[52].mxu1  ;;  %v2984_v59 = vpop.f32.mrb[55].mxu0 }
 0x172   : > { %v2917_v2 = vpop.f32.mrb[53].mxu1  ;;  %v2985_v55 = vadd.f32 %v2984_v59, %v2983_v29 }
 0x173   : > { %v2678_v41 = vmul.f32 -1.442695, %v2168_v49  ;;  %v2169_v26 = vadd.f32 %v4274_v47, %v2146_v16  ;;  %v2918_v19 = vadd.f32 %v2917_v2, %v2916_v53  ;;  %v2919_v24 = vpop.f32.mrb[54].mxu1 }
 0x174   : > { %v2920_v57 = vpop.f32.mrb[55].mxu1 }
 0x175   : > { %3176 = vpow2.f32 %v2678_v41  ;;  %v2679_v25 = vmul.f32 -1.442695, %v2169_v26  ;;  %v1774_v0 = vadd.f32 %v2918_v19, %v4230_v39  ;;  %v2921_v3 = vadd.f32 %v2920_v57, %v2919_v24 }
 0x176   : > { %v2986_v15 = vpop.f32.mrb[56].mxu0 }
 0x177   : > { %3178 = vpow2.f32 %v2679_v25  ;;  %v2147_v34 = vadd.f32 %v2982_v62, %v1774_v0  ;;  %v1775_v8 = vadd.f32 %v2921_v3, %v4232_v5  ;;  %v2987_v61 = vpop.f32.mrb[57].mxu0 }
 0x178   : > { %v2988_v6 = vadd.f32 %v2987_v61, %v2986_v15  ;;  %v2989_v32 = vpop.f32.mrb[58].mxu0 }
 0x179   : > { %v2170_v11 = vadd.f32 %v4274_v47, %v2147_v34  ;;  %v2148_v7 = vadd.f32 %v2985_v55, %v1775_v8  ;;  %v2922_v43 = vpop.f32.mrb[56].mxu1  ;;  %v2990_v27 = vpop.f32.mrb[59].mxu0 }
 0x17a   : > { %v2923_v37 = vpop.f32.mrb[57].mxu1  ;;  %v2991_v22 = vadd.f32 %v2990_v27, %v2989_v32 }
 0x17b   : > { %v2680_v60 = vmul.f32 -1.442695, %v2170_v11  ;;  %v2171_v38 = vadd.f32 %v4274_v47, %v2148_v7  ;;  %v2924_v39 = vadd.f32 %v2923_v37, %v2922_v43  ;;  %v2925_v21 = vpop.f32.mrb[58].mxu1 }
 0x17c   : > { %v2926_v50 = vpop.f32.mrb[59].mxu1 }
 0x17d   : > { %3180 = vpow2.f32 %v2680_v60  ;;  %v2681_v58 = vmul.f32 -1.442695, %v2171_v38  ;;  %v1776_v5 = vadd.f32 %v2924_v39, %v4235_v46  ;;  %v2927_v20 = vadd.f32 %v2926_v50, %v2925_v21 }
 0x17e   : > { %v2992_v30 = vpop.f32.mrb[60].mxu0 }
 0x17f   : > { %v3177_v44 = vpop.eup %3176  ;;  %3182 = vpow2.f32 %v2681_v58  ;;  %v2149_v13 = vadd.f32 %v2988_v6, %v1776_v5  ;;  %v1777_v10 = vadd.f32 %v2927_v20, %v4238_v31  ;;  %v2993_v9 = vpop.f32.mrb[61].mxu0 }
 0x180   : > { %v2232_v52 = vadd.f32 1.0, %v3177_v44  ;;  %v2994_v35 = vadd.f32 %v2993_v9, %v2992_v30  ;;  %v2995_v54 = vpop.f32.mrb[62].mxu0 }
 0x181   : > { %v3179_v23 = vpop.eup %3178  ;;  %v2172_v56 = vadd.f32 %v4274_v47, %v2149_v13  ;;  %v2150_v33 = vadd.f32 %v2991_v22, %v1777_v10  ;;  %v2928_v17 = vpop.f32.mrb[60].mxu1 }
 0x182   : > { %v2996_v42 = vpop.f32.mrb[63].mxu0  ;;  %3184 = vrcp.f32 %v2232_v52  ;;  %v2233_v46 = vadd.f32 1.0, %v3179_v23  ;;  %v2929_v1 = vpop.f32.mrb[61].mxu1 }
 0x183   : > { %v2997_v12 = vadd.f32 %v2996_v42, %v2995_v54  ;;  %v2682_v62 = vmul.f32 -1.442695, %v2172_v56  ;;  %v2173_v29 = vadd.f32 %v4274_v47, %v2150_v33  ;;  %v2930_v31 = vadd.f32 %v2929_v1, %v2928_v17  ;;  %v2931_v49 = vpop.f32.mrb[62].mxu1 }
 0x184   : > { %3186 = vrcp.f32 %v2233_v46  ;;  %v2932_v16 = vpop.f32.mrb[63].mxu1 }
 0x185   : > { %3188 = vpow2.f32 %v2682_v62  ;;  %v2683_v53 = vmul.f32 -1.442695, %v2173_v29  ;;  %v1778_v59 = vadd.f32 %v2930_v31, %v4241_v36  ;;  %v2933_v2 = vadd.f32 %v2932_v16, %v2931_v49 }
 0x186   : > { %v2998_v55 = vpop.f32.mrb[64].mxu0 }
 0x187   : > { %v3181_v41 = vpop.eup %3180  ;;  %3190 = vpow2.f32 %v2683_v53  ;;  %v2151_v26 = vadd.f32 %v2994_v35, %v1778_v59  ;;  %v1779_v19 = vadd.f32 %v2933_v2, %v4244_v4  ;;  %v2999_v24 = vpop.f32.mrb[65].mxu0 }
 0x188   : > { %v2234_v57 = vadd.f32 1.0, %v3181_v41  ;;  %v3000_v25 = vadd.f32 %v2999_v24, %v2998_v55  ;;  %v3001_v0 = vpop.f32.mrb[66].mxu0 }
 0x189   : > { %v3183_v3 = vpop.eup %3182  ;;  %v2174_v15 = vadd.f32 %v4274_v47, %v2151_v26  ;;  %v2152_v34 = vadd.f32 %v2997_v12, %v1779_v19  ;;  %v2934_v8 = vpop.f32.mrb[64].mxu1 }
 0x18a   : > { %v3002_v61 = vpop.f32.mrb[67].mxu0  ;;  %3192 = vrcp.f32 %v2234_v57  ;;  %v2235_v36 = vadd.f32 1.0, %v3183_v3  ;;  %v2935_v6 = vpop.f32.mrb[65].mxu1 }
 0x18b   : > { %v3003_v32 = vadd.f32 %v3002_v61, %v3001_v0  ;;  %v2684_v11 = vmul.f32 -1.442695, %v2174_v15  ;;  %v2175_v7 = vadd.f32 %v4274_v47, %v2152_v34  ;;  %v2936_v43 = vadd.f32 %v2935_v6, %v2934_v8  ;;  %v2937_v4 = vpop.f32.mrb[66].mxu1 }
 0x18c   : > { %v3185_v27 = vpop.eup %3184  ;;  %3194 = vrcp.f32 %v2235_v36  ;;  %v2938_v37 = vpop.f32.mrb[67].mxu1 }
 0x18d   : > { %2281 = vst.msk [vmem:[%s4294_s11] sm:$0xff] %vm2280_vm12, %v3185_v27  ;;  %3196 = vpow2.f32 %v2684_v11  ;;  %v2685_v22 = vmul.f32 -1.442695, %v2175_v7  ;;  %v1780_v60 = vadd.f32 %v2936_v43, %v4247_v63  ;;  %v2939_v38 = vadd.f32 %v2938_v37, %v2937_v4 }
 0x18e   : > { %v3187_v39 = vpop.eup %3186  ;;  %v3004_v21 = vpop.f32.mrb[68].mxu0 }
 0x18f   : > { %v3189_v50 = vpop.eup %3188  ;;  %2282 = vst.msk [vmem:[%s4294_s11 + $0x8] sm:$0xff] %vm2280_vm12, %v3187_v39  ;;  %3198 = vpow2.f32 %v2685_v22  ;;  %v2153_v58 = vadd.f32 %v3000_v25, %v1780_v60  ;;  %v1781_v5 = vadd.f32 %v2939_v38, %v4250_v45  ;;  %v3005_v20 = vpop.f32.mrb[69].mxu0 }
 0x190   : > { %v2236_v30 = vadd.f32 1.0, %v3189_v50  ;;  %v3006_v44 = vadd.f32 %v3005_v20, %v3004_v21  ;;  %v3007_v13 = vpop.f32.mrb[70].mxu0 }
 0x191   : > { %v3191_v10 = vpop.eup %3190  ;;  %v2176_v9 = vadd.f32 %v4274_v47, %v2153_v58  ;;  %v2154_v52 = vadd.f32 %v3003_v32, %v1781_v5  ;;  %v2940_v63 = vpop.f32.mrb[68].mxu1 }
 0x192   : > { %v3008_v35 = vpop.f32.mrb[71].mxu0  ;;  %3200 = vrcp.f32 %v2236_v30  ;;  %v2237_v54 = vadd.f32 1.0, %v3191_v10  ;;  %v2941_v23 = vpop.f32.mrb[69].mxu1 }
 0x193   : > { %v3009_v56 = vadd.f32 %v3008_v35, %v3007_v13  ;;  %v2686_v33 = vmul.f32 -1.442695, %v2176_v9  ;;  %v2177_v17 = vadd.f32 %v4274_v47, %v2154_v52  ;;  %v2942_v45 = vadd.f32 %v2941_v23, %v2940_v63  ;;  %v2943_v42 = vpop.f32.mrb[70].mxu1 }
 0x194   : > { %v3193_v46 = vpop.eup %3192  ;;  %3202 = vrcp.f32 %v2237_v54  ;;  %v2944_v1 = vpop.f32.mrb[71].mxu1 }
 0x195   : > { %2283 = vst.msk [vmem:[%s4294_s11 + $0x10] sm:$0xff] %vm2280_vm12, %v3193_v46  ;;  %3204 = vpow2.f32 %v2686_v33  ;;  %v2687_v12 = vmul.f32 -1.442695, %v2177_v17  ;;  %v1782_v62 = vadd.f32 %v2942_v45, %v4253_v14  ;;  %v2945_v29 = vadd.f32 %v2944_v1, %v2943_v42 }
 0x196   : > { %v3195_v31 = vpop.eup %3194  ;;  %v3010_v49 = vpop.f32.mrb[72].mxu0 }
 0x197   : > { %v3197_v16 = vpop.eup %3196  ;;  %2284 = vst.msk [vmem:[%s4294_s11 + $0x18] sm:$0xff] %vm2280_vm12, %v3195_v31  ;;  %3206 = vpow2.f32 %v2687_v12  ;;  %v2155_v53 = vadd.f32 %v3006_v44, %v1782_v62  ;;  %v1783_v59 = vadd.f32 %v2945_v29, %v4256_v48  ;;  %v3011_v2 = vpop.f32.mrb[73].mxu0 }
 0x198   : > { %v2238_v55 = vadd.f32 1.0, %v3197_v16  ;;  %v3012_v41 = vadd.f32 %v3011_v2, %v3010_v49  ;;  %v3013_v26 = vpop.f32.mrb[74].mxu0 }
 0x199   : > { %v3199_v19 = vpop.eup %3198  ;;  %v2178_v24 = vadd.f32 %v4274_v47, %v2155_v53  ;;  %v2156_v57 = vadd.f32 %v3009_v56, %v1783_v59  ;;  %v2946_v14 = vpop.f32.mrb[72].mxu1 }
 0x19a   : > { %v3014_v25 = vpop.f32.mrb[75].mxu0  ;;  %3208 = vrcp.f32 %v2238_v55  ;;  %v2239_v0 = vadd.f32 1.0, %v3199_v19  ;;  %v2947_v3 = vpop.f32.mrb[73].mxu1 }
 0x19b   : > { %v3015_v15 = vadd.f32 %v3014_v25, %v3013_v26  ;;  %v2688_v34 = vmul.f32 -1.442695, %v2178_v24  ;;  %v2179_v8 = vadd.f32 %v4274_v47, %v2156_v57  ;;  %v2948_v48 = vadd.f32 %v2947_v3, %v2946_v14  ;;  %v2949_v61 = vpop.f32.mrb[74].mxu1 }
 0x19c   : > { %v3201_v36 = vpop.eup %3200  ;;  %3210 = vrcp.f32 %v2239_v0  ;;  %v2950_v6 = vpop.f32.mrb[75].mxu1 }
 0x19d   : > { %2285 = vst.msk [vmem:[%s4294_s11 + $0x20] sm:$0xff] %vm2280_vm12, %v3201_v36  ;;  %3212 = vpow2.f32 %v2688_v34  ;;  %v2689_v32 = vmul.f32 -1.442695, %v2179_v8  ;;  %v1784_v11 = vadd.f32 %v2948_v48, %v4259_v40  ;;  %v2951_v7 = vadd.f32 %v2950_v6, %v2949_v61 }
 0x19e   : > { %v3203_v43 = vpop.eup %3202  ;;  %v3016_v4 = vpop.f32.mrb[76].mxu0 }
 0x19f   : > { %v3205_v27 = vpop.eup %3204  ;;  %2286 = vst.msk [vmem:[%s4294_s11 + $0x28] sm:$0xff] %vm2280_vm12, %v3203_v43  ;;  %3214 = vpow2.f32 %v2689_v32  ;;  %v2157_v37 = vadd.f32 %v3012_v41, %v1784_v11  ;;  %v1785_v22 = vadd.f32 %v2951_v7, %v4262_v51  ;;  %v3017_v60 = vpop.f32.mrb[77].mxu0 }
 0x1a0   : > { %v2240_v38 = vadd.f32 1.0, %v3205_v27  ;;  %v3018_v39 = vadd.f32 %v3017_v60, %v3016_v4  ;;  %v3019_v21 = vpop.f32.mrb[78].mxu0 }
 0x1a1   : > { %v3207_v50 = vpop.eup %3206  ;;  %v2180_v58 = vadd.f32 %v4274_v47, %v2157_v37  ;;  %v2158_v5 = vadd.f32 %v3015_v15, %v1785_v22  ;;  %v2952_v40 = vpop.f32.mrb[76].mxu1 }
 0x1a2   : > { %v3020_v20 = vpop.f32.mrb[79].mxu0  ;;  %3216 = vrcp.f32 %v2240_v38  ;;  %v2241_v30 = vadd.f32 1.0, %v3207_v50  ;;  %v2953_v44 = vpop.f32.mrb[77].mxu1 }
 0x1a3   : > { %v3021_v13 = vadd.f32 %v3020_v20, %v3019_v21  ;;  %v2690_v10 = vmul.f32 -1.442695, %v2180_v58  ;;  %v2181_v9 = vadd.f32 %v4274_v47, %v2158_v5  ;;  %v2954_v51 = vadd.f32 %v2953_v44, %v2952_v40  ;;  %v2955_v52 = vpop.f32.mrb[78].mxu1 }
 0x1a4   : > { %v3209_v63 = vpop.eup %3208  ;;  %3218 = vrcp.f32 %v2241_v30  ;;  %v2956_v35 = vpop.f32.mrb[79].mxu1 }
 0x1a5   : > { %2287 = vst.msk [vmem:[%s4294_s11 + $0x30] sm:$0xff] %vm2280_vm12, %v3209_v63  ;;  %3220 = vpow2.f32 %v2690_v10  ;;  %v2691_v54 = vmul.f32 -1.442695, %v2181_v9  ;;  %v1786_v23 = vadd.f32 %v2954_v51, %v4265_v18  ;;  %v2957_v56 = vadd.f32 %v2956_v35, %v2955_v52 }
 0x1a6   : > { %v3211_v33 = vpop.eup %3210 }
 0x1a7   : > { %v3213_v17 = vpop.eup %3212  ;;  %2288 = vst.msk [vmem:[%s4294_s11 + $0x38] sm:$0xff] %vm2280_vm12, %v3211_v33  ;;  %3222 = vpow2.f32 %v2691_v54  ;;  %v2159_v45 = vadd.f32 %v3018_v39, %v1786_v23  ;;  %v1787_v42 = vadd.f32 %v2957_v56, %v4268_v28 }
 0x1a8   : > { %v2242_v46 = vadd.f32 1.0, %v3213_v17 }
 0x1a9   : > { %v3215_v1 = vpop.eup %3214  ;;  %v2182_v12 = vadd.f32 %v4274_v47, %v2159_v45  ;;  %v2160_v62 = vadd.f32 %v3021_v13, %v1787_v42 }
 0x1aa   : > { %3224 = vrcp.f32 %v2242_v46  ;;  %v2243_v29 = vadd.f32 1.0, %v3215_v1 }
 0x1ab   : > { %v2692_v31 = vmul.f32 -1.442695, %v2182_v12  ;;  %v2183_v18 = vadd.f32 %v4274_v47, %v2160_v62 }
 0x1ac   : > { %v3217_v49 = vpop.eup %3216  ;;  %3226 = vrcp.f32 %v2243_v29 }
 0x1ad   : > { %2289 = vst.msk [vmem:[%s4294_s11 + $0x40] sm:$0xff] %vm2280_vm12, %v3217_v49  ;;  %3228 = vpow2.f32 %v2692_v31  ;;  %v2693_v16 = vmul.f32 -1.442695, %v2183_v18 }
 0x1ae   : > { %v3219_v28 = vpop.eup %3218 }
 0x1af   : > { %v3221_v53 = vpop.eup %3220  ;;  %2290 = vst.msk [vmem:[%s4294_s11 + $0x48] sm:$0xff] %vm2280_vm12, %v3219_v28  ;;  %3230 = vpow2.f32 %v2693_v16 }
 0x1b0   : > { %v2244_v59 = vadd.f32 1.0, %v3221_v53 }
 0x1b1   : > { %v3223_v2 = vpop.eup %3222 }
 0x1b2   : > { %3232 = vrcp.f32 %v2244_v59  ;;  %v2245_v55 = vadd.f32 1.0, %v3223_v2 }
 0x1b4   : > { %v3225_v47 = vpop.eup %3224  ;;  %3234 = vrcp.f32 %v2245_v55 }
 0x1b5   : > { %2291 = vst.msk [vmem:[%s4294_s11 + $0x50] sm:$0xff] %vm2280_vm12, %v3225_v47 }
 0x1b6   : > { %v3227_v41 = vpop.eup %3226 }
 0x1b7   : > { %v3229_v26 = vpop.eup %3228  ;;  %2292 = vst.msk [vmem:[%s4294_s11 + $0x58] sm:$0xff] %vm2280_vm12, %v3227_v41 }
 0x1b8   : > { %v2246_v19 = vadd.f32 1.0, %v3229_v26 }
 0x1b9   : > { %v3231_v24 = vpop.eup %3230 }
 0x1ba   : > { %3236 = vrcp.f32 %v2246_v19  ;;  %v2247_v57 = vadd.f32 1.0, %v3231_v24 }
 0x1bc   : > { %v3233_v14 = vpop.eup %3232  ;;  %3238 = vrcp.f32 %v2247_v57 }
 0x1bd   : > { %2293 = vst.msk [vmem:[%s4294_s11 + $0x60] sm:$0xff] %vm2280_vm12, %v3233_v14 }
 0x1be   : > { %v3235_v25 = vpop.eup %3234 }
 0x1bf   : > { %2294 = vst.msk [vmem:[%s4294_s11 + $0x68] sm:$0xff] %vm2280_vm12, %v3235_v25 }
 0x1c4   : > { %v3237_v0 = vpop.eup %3236 }
 0x1c5   : > { %2295 = vst.msk [vmem:[%s4294_s11 + $0x70] sm:$0xff] %vm2280_vm12, %v3237_v0 }
 0x1c6   : > { %v3239_v3 = vpop.eup %3238 }
 0x1c7   : > { %2296 = vst.msk [vmem:[%s4294_s11 + $0x78] sm:$0xff] %vm2280_vm12, %v3239_v3 }
 0x1c8   : > { %3262 = shalt.err (!%p3259_p3)
}
 0x1c9   : > { %s3263_s26 = scalar_lea.hbm %s4345_s25, 2048  ;;  %s3267_s7 = scalar_lea.hbm %s4399_s3, 8192 }
 0x1ca   : > { %p3264_p4 = scmp.ne.s32.totalorder %s4345_s25, %s3263_s26  ;;  %p3268_p9 = scmp.lt.u32.totalorder %s4345_s25, %s4399_s3 }
 0x1cb   : > { %p3269_p10 = scmp.lt.u32.totalorder %s3267_s7, %s3263_s26  ;;  %p3271_p12 = scmp.lt.u32.totalorder %s3263_s26, %s4345_s25 }
 0x1cc   : > { %p3265_p7 = pnand %p3264_p4, %p3374_p5 }
 0x1cd   : > { %p3270_p11 = por %p3269_p10, %p3268_p9 }
 0x1ce   : > { %p3266_p8 = pneg %p3265_p7 }
 0x1cf   : > { %p3272_p13 = por %p3271_p12, %p3270_p11 }
 0x1d1   : > { %p3273_p0 = pnand %p3272_p13, %p3266_p8 }
 0x1d3   : > { %3276 = shalt.err (!%p3273_p0)
}
 0x1d4   : > { %s3314_s9 = smov 128   ;;  %s3315_s10 = smov 8  }
 0x1d5   : > { %3039 = dma.vmem_to_hbm [thread:$0]  (%p3374_p5), %s4347_s19, 2048, %s4345_s25, %s4355_s27, %s3314_s9, %s3314_s9, %s3315_s10  }
 0x1d6 PF: > { %p3045_p1 = scmp.ge.s32.totalorder %s3311_s15, 2  ;;  %s2327_s11 = sand.u32 1, %s3299_s12  }
 0x1d7   : > { %s2328_s17 = scalar_lea.sflag [#allocation3], %s2327_s11 }
 0x1d8   : > { %p3042_p2 = pnand %p3045_p1, %p3378_p6 }
 0x1da   : > { %3294 = dma.done.wait (!%p3042_p2), %s2328_s17, 2048  }
 0x1db   : > { %3296 = vsyncadd (!%p3042_p2), %s2328_s17, 4294965248  ;;  %p13_p3 = scmp.ge.s32.totalorder %s3361_s18, 6   ;;  %s4418_s12 = smov %s3303_s13 }
 0x1dc   : > { %s4419_s13 = smov %s3307_s14  ;;  %s4420_s14 = smov %s3372_s21 }
 0x1dd   : > { %s4421_s15 = smov %s3361_s18  ;;  %15 = sbr.rel (!%p13_p3) target bundleno = 3 (0x3), region = 71 }
 0x1e4   :  { %2333 = vsyncpa [#allocation3], 1 }
 0x1e5   :  { %2335 = vsyncpa [#allocation3 + $0x1], 1 }

</bundles_post_ra>
